<compile_context>
chip_gen: v6e
topology: v6e:2x2x1
jax: 0.10.0
libtpu: 0.0.40
codegen_flags: <defaults>
</compile_context>

<pallas_src>
import functools

import jax
import jax.numpy as jnp
import numpy as np
from jax import lax
from jax.experimental import pallas as pl
from jax.experimental.pallas import tpu as pltpu

K = 3
LEAKY_SLOPE = 0.01     # nn.LeakyReLU default
BN_EPS = 1e-5          # nn.BatchNorm2d default
SHIFT_PAD = 128        # lane-aligned zero prefix for in-kernel shifted reads
LANE = 128


def _round_up(x, m):
    return (x + m - 1) // m * m


# --------------------------------------------------------------------------- #
# One-time parameter preparation (hoisted out of the per-call path).
# --------------------------------------------------------------------------- #
def prepare_gblock_params(w1, w2, gamma, beta, *, batch):
    """w1: (Cin, Coc, K, K), w2: (Coc, Coc, K, K) in PyTorch ConvTranspose2d layout.

    Builds per-tap block-diagonal weights so that with the batch folded onto the
    sublane axis, each conv tap is a single MXU dot:
        out[n*Co + o, :] += sum_c W_big[tap, n*Co+o, n*Ci+c] * x_shift[n*Ci+c, :]
    """
    Cin, Coc = int(w1.shape[0]), int(w1.shape[1])
    N = batch
    eye = jnp.eye(N, dtype=jnp.float32)

    def blockdiag(w, ci):
        # (ci, co, K, K) -> (K*K, co, ci), un-flipped scatter-form kernel.
        wt = jnp.transpose(w.astype(jnp.float32), (2, 3, 1, 0)).reshape(K * K, -1, ci)
        co = wt.shape[1]
        big = eye[None, :, None, :, None] * wt[:, None, :, None, :]   # (T,N,co,N,ci)
        return big.reshape(K * K, N * co, N * ci)

    return dict(
        w1_big=blockdiag(w1, Cin),                      # (9, N*Coc, N*Cin)
        w2_big=blockdiag(w2, Coc),                      # (9, N*Coc, N*Coc)
        gamma=gamma.astype(jnp.float32).reshape(Coc, 1),
        beta=beta.astype(jnp.float32).reshape(Coc, 1),
    )


# --------------------------------------------------------------------------- #
# Fused kernel.
# --------------------------------------------------------------------------- #
def _gblock_kernel(x_ref, w1_ref, w2_ref, g_ref, b_ref, mask_ref, out_ref, hbuf,
                   *, N, Coc, Wg, HWp, inv_cnt):
    f32 = jnp.float32
    dot = functools.partial(jnp.dot, preferred_element_type=f32,
                            precision=lax.Precision.HIGHEST)   # fp32 contract

    # ---- ConvTranspose2d #1: 9 shifted reads, one MXU dot per tap -----------
    acc = jnp.zeros((N * Coc, HWp), f32)
    for kh in range(K):
        for kw in range(K):
            s = kh * Wg + kw
            xs = x_ref[:, pl.ds(SHIFT_PAD - s, HWp)]            # (N*Cin, HWp)
            acc = acc + dot(w1_ref[kh * K + kw], xs)            # (N*Coc, HWp)

    # ---- BatchNorm2d (training-mode batch stats), single exact-f32 pass -----
    # Grid positions outside the valid conv1 output are exactly zero, so the
    # whole-row sums are the valid-region sums; divide by the valid count.
    s1 = jnp.zeros((Coc, 1), f32)
    s2 = jnp.zeros((Coc, 1), f32)
    for n in range(N):
        blk = acc[n * Coc:(n + 1) * Coc, :]
        s1 = s1 + jnp.sum(blk, axis=1, keepdims=True)
        s2 = s2 + jnp.sum(blk * blk, axis=1, keepdims=True)
    mean = s1 * inv_cnt
    var = s2 * inv_cnt - mean * mean                            # biased variance
    scale = g_ref[...] * lax.rsqrt(var + BN_EPS)                # (Coc, 1)
    shift = b_ref[...] - mean * scale

    # ---- BN affine + LeakyReLU + margin re-zero, staged behind a zero prefix
    hbuf[:, :SHIFT_PAD] = jnp.zeros((N * Coc, SHIFT_PAD), f32)
    mask = mask_ref[...]                                        # (1, HWp)
    for n in range(N):
        hb = acc[n * Coc:(n + 1) * Coc, :] * scale + shift
        hb = jnp.where(hb > 0, hb, LEAKY_SLOPE * hb)
        hbuf[n * Coc:(n + 1) * Coc, SHIFT_PAD:] = hb * mask     # aligned stores

    # ---- ConvTranspose2d #2: same shifted-read + per-tap MXU dot ------------
    acc2 = jnp.zeros((N * Coc, HWp), f32)
    for kh in range(K):
        for kw in range(K):
            s = kh * Wg + kw
            hs = hbuf[:, pl.ds(SHIFT_PAD - s, HWp)]             # (N*Coc, HWp)
            acc2 = acc2 + dot(w2_ref[kh * K + kw], hs)

    out_ref[...] = acc2                                         # lane-dense, unmasked


# --------------------------------------------------------------------------- #
# Per-call wrapper: pad + reshape only; jitted so glue fuses with the call.
# --------------------------------------------------------------------------- #
@jax.jit
def gblock_forward(x_nchw, params):
    """x_nchw: (N, Cin, H, W) -> (N, Coc, H+4, W+4)."""
    N, Cin, H, W = x_nchw.shape
    Coc = params["gamma"].shape[0]
    H1, W1 = H + K - 1, W + K - 1          # conv1 output spatial size
    Hg, Wg = H1 + K - 1, W1 + K - 1        # conv2 (= final) output spatial size
    HW = Hg * Wg
    HWp = _round_up(HW, LANE)              # lane-dense flattened grid length
    inv_cnt = 1.0 / float(N * H1 * W1)     # valid-element count for BN stats

    # Static guards for the flattened-shift trick: right/bottom zero margins of
    # each embedded grid must cover K-1 and the prefix must cover the max shift.
    assert Wg - W >= K - 1 and Hg - H >= K - 1
    assert Wg - W1 >= K - 1 and Hg - H1 >= K - 1
    assert SHIFT_PAD % LANE == 0 and SHIFT_PAD >= (K - 1) * (Wg + 1)

    # Embed x at the top-left of a zeroed Hg x Wg grid, flatten spatial onto the
    # lane axis (batch folded onto sublanes), add the 128-lane zero prefix and
    # lane padding to HWp.  No transposes anywhere.
    xg = jnp.pad(x_nchw.astype(jnp.float32),
                 ((0, 0), (0, 0), (0, Hg - H), (0, Wg - W)))
    xg = xg.reshape(N * Cin, HW)
    xg = jnp.pad(xg, ((0, 0), (SHIFT_PAD, HWp - HW)))           # (N*Cin, 128+HWp)

    # Validity mask of the conv1 output region (compile-time constant).
    m = ((np.arange(Hg) < H1)[:, None] & (np.arange(Wg) < W1)[None, :])
    m = np.pad(m.astype(np.float32).reshape(HW), (0, HWp - HW))
    mask = jnp.asarray(m.reshape(1, HWp))

    kernel = functools.partial(_gblock_kernel, N=N, Coc=Coc, Wg=Wg, HWp=HWp,
                               inv_cnt=inv_cnt)
    vmem = pl.BlockSpec(memory_space=pltpu.MemorySpace.VMEM)
    out_flat = pl.pallas_call(
        kernel,
        out_shape=jax.ShapeDtypeStruct((N * Coc, HWp), jnp.float32),
        in_specs=[vmem] * 6,
        out_specs=vmem,
        scratch_shapes=[pltpu.VMEM((N * Coc, SHIFT_PAD + HWp), jnp.float32)],
    )(xg, params["w1_big"], params["w2_big"], params["gamma"], params["beta"],
      mask)

    # Drop the lane padding, then a free reshape to NCHW.
    return out_flat[:, :HW].reshape(N, Coc, Hg, Wg)


# -------- pure-numpy reference (scatter-form transposed conv) ---------------- #
def _convT_ref(x, w):
    Nn, Ci, H, W = x.shape
    _, Co, Kh, Kw = w.shape
    y = np.zeros((Nn, Co, H + Kh - 1, W + Kw - 1), np.float32)
    for ci in range(Ci):
        for co in range(Co):
            for kh in range(Kh):
                for kw in range(Kw):
                    y[:, co, kh:kh + H, kw:kw + W] += x[:, ci] * w[ci, co, kh, kw]
    return y


def _gblock_ref(x, w1, w2, gamma, beta):
    h = _convT_ref(x, w1)
    mean = h.mean(axis=(0, 2, 3), keepdims=True)
    var = h.var(axis=(0, 2, 3), keepdims=True)       # biased, as PyTorch train-mode
    h = (h - mean) / np.sqrt(var + BN_EPS)
    h = h * gamma.reshape(1, -1, 1, 1) + beta.reshape(1, -1, 1, 1)
    h = np.where(h > 0, h, LEAKY_SLOPE * h)
    return _convT_ref(h, w2)


if __name__ == "__main__":
    key = jax.random.PRNGKey(0)
    k1, k2, k3, k4, k5 = jax.random.split(key, 5)

    N, ic, oc, H, W = 2, 4, 8, 16, 16
    x = jax.random.normal(k1, (N, ic, H, W), jnp.float32)
    w1 = 0.1 * jax.random.normal(k2, (ic, oc, K, K), jnp.float32)
    w2 = 0.1 * jax.random.normal(k3, (oc, oc, K, K), jnp.float32)
    gamma = 1.0 + 0.1 * jax.random.normal(k4, (oc,), jnp.float32)
    beta = 0.1 * jax.random.normal(k5, (oc,), jnp.float32)

    params = prepare_gblock_params(w1, w2, gamma, beta, batch=N)  # one-time glue
    out = jax.block_until_ready(gblock_forward(x, params))

    ref = _gblock_ref(np.asarray(x), np.asarray(w1), np.asarray(w2),
                      np.asarray(gamma), np.asarray(beta))
    np.testing.assert_allclose(np.asarray(out), ref, rtol=1e-3, atol=1e-3)
    print("KERNEL_OK")
</pallas_src>

<mosaic_0001>
module attributes {stable_mosaic.version = 11 : i64} {
  func.func @_gblock_kernel(%arg0: memref<8x640xf32, #tpu.memory_space<vmem>>, %arg1: memref<9x16x8xf32, #tpu.memory_space<vmem>>, %arg2: memref<9x16x16xf32, #tpu.memory_space<vmem>>, %arg3: memref<8x1xf32, #tpu.memory_space<vmem>>, %arg4: memref<8x1xf32, #tpu.memory_space<vmem>>, %arg5: memref<1x512xf32, #tpu.memory_space<vmem>>, %arg6: memref<16x512xf32, #tpu.memory_space<vmem>>, %arg7: memref<16x640xf32, #tpu.memory_space<vmem>>) attributes {dimension_semantics = [], scalar_prefetch = 0 : i64, scratch_operands = 1 : i64, tpu.core_type = #tpu.core_type<tc>} {
    %cst = arith.constant 0.000000e+00 : f32
    %0 = vector.broadcast %cst : f32 to vector<16x512xf32>
    %c0 = arith.constant 0 : index
    %c128 = arith.constant 128 : index
    %1 = vector.load %arg0[%c0, %c128] : memref<8x640xf32, #tpu.memory_space<vmem>>, vector<8x512xf32>
    %c0_0 = arith.constant 0 : index
    %c0_1 = arith.constant 0 : index
    %c0_2 = arith.constant 0 : index
    %2 = vector.load %arg1[%c0_0, %c0_1, %c0_2] : memref<9x16x8xf32, #tpu.memory_space<vmem>>, vector<1x16x8xf32>
    %3 = vector.shape_cast %2 : vector<1x16x8xf32> to vector<16x8xf32>
    %cst_3 = arith.constant dense<0.000000e+00> : vector<16x512xf32>
    %4 = tpu.matmul %3, %1, %cst_3 {dimension_numbers = #tpu.dot_dimension_numbers<[1], [0], [0], [1], [0, 0, 1, 1], [], []>, precision = #tpu.contract_precision<fp32>} : vector<16x8xf32>, vector<8x512xf32>, vector<16x512xf32> -> vector<16x512xf32>
    %5 = arith.addf %0, %4 : vector<16x512xf32>
    %c0_4 = arith.constant 0 : index
    %c127 = arith.constant 127 : index
    %6 = vector.load %arg0[%c0_4, %c127] : memref<8x640xf32, #tpu.memory_space<vmem>>, vector<8x512xf32>
    %c1 = arith.constant 1 : index
    %c0_5 = arith.constant 0 : index
    %c0_6 = arith.constant 0 : index
    %7 = vector.load %arg1[%c1, %c0_5, %c0_6] : memref<9x16x8xf32, #tpu.memory_space<vmem>>, vector<1x16x8xf32>
    %8 = vector.shape_cast %7 : vector<1x16x8xf32> to vector<16x8xf32>
    %cst_7 = arith.constant dense<0.000000e+00> : vector<16x512xf32>
    %9 = tpu.matmul %8, %6, %cst_7 {dimension_numbers = #tpu.dot_dimension_numbers<[1], [0], [0], [1], [0, 0, 1, 1], [], []>, precision = #tpu.contract_precision<fp32>} : vector<16x8xf32>, vector<8x512xf32>, vector<16x512xf32> -> vector<16x512xf32>
    %10 = arith.addf %5, %9 : vector<16x512xf32>
    %c0_8 = arith.constant 0 : index
    %c126 = arith.constant 126 : index
    %11 = vector.load %arg0[%c0_8, %c126] : memref<8x640xf32, #tpu.memory_space<vmem>>, vector<8x512xf32>
    %c2 = arith.constant 2 : index
    %c0_9 = arith.constant 0 : index
    %c0_10 = arith.constant 0 : index
    %12 = vector.load %arg1[%c2, %c0_9, %c0_10] : memref<9x16x8xf32, #tpu.memory_space<vmem>>, vector<1x16x8xf32>
    %13 = vector.shape_cast %12 : vector<1x16x8xf32> to vector<16x8xf32>
    %cst_11 = arith.constant dense<0.000000e+00> : vector<16x512xf32>
    %14 = tpu.matmul %13, %11, %cst_11 {dimension_numbers = #tpu.dot_dimension_numbers<[1], [0], [0], [1], [0, 0, 1, 1], [], []>, precision = #tpu.contract_precision<fp32>} : vector<16x8xf32>, vector<8x512xf32>, vector<16x512xf32> -> vector<16x512xf32>
    %15 = arith.addf %10, %14 : vector<16x512xf32>
    %c0_12 = arith.constant 0 : index
    %c108 = arith.constant 108 : index
    %16 = vector.load %arg0[%c0_12, %c108] : memref<8x640xf32, #tpu.memory_space<vmem>>, vector<8x512xf32>
    %c3 = arith.constant 3 : index
    %c0_13 = arith.constant 0 : index
    %c0_14 = arith.constant 0 : index
    %17 = vector.load %arg1[%c3, %c0_13, %c0_14] : memref<9x16x8xf32, #tpu.memory_space<vmem>>, vector<1x16x8xf32>
    %18 = vector.shape_cast %17 : vector<1x16x8xf32> to vector<16x8xf32>
    %cst_15 = arith.constant dense<0.000000e+00> : vector<16x512xf32>
    %19 = tpu.matmul %18, %16, %cst_15 {dimension_numbers = #tpu.dot_dimension_numbers<[1], [0], [0], [1], [0, 0, 1, 1], [], []>, precision = #tpu.contract_precision<fp32>} : vector<16x8xf32>, vector<8x512xf32>, vector<16x512xf32> -> vector<16x512xf32>
    %20 = arith.addf %15, %19 : vector<16x512xf32>
    %c0_16 = arith.constant 0 : index
    %c107 = arith.constant 107 : index
    %21 = vector.load %arg0[%c0_16, %c107] : memref<8x640xf32, #tpu.memory_space<vmem>>, vector<8x512xf32>
    %c4 = arith.constant 4 : index
    %c0_17 = arith.constant 0 : index
    %c0_18 = arith.constant 0 : index
    %22 = vector.load %arg1[%c4, %c0_17, %c0_18] : memref<9x16x8xf32, #tpu.memory_space<vmem>>, vector<1x16x8xf32>
    %23 = vector.shape_cast %22 : vector<1x16x8xf32> to vector<16x8xf32>
    %cst_19 = arith.constant dense<0.000000e+00> : vector<16x512xf32>
    %24 = tpu.matmul %23, %21, %cst_19 {dimension_numbers = #tpu.dot_dimension_numbers<[1], [0], [0], [1], [0, 0, 1, 1], [], []>, precision = #tpu.contract_precision<fp32>} : vector<16x8xf32>, vector<8x512xf32>, vector<16x512xf32> -> vector<16x512xf32>
    %25 = arith.addf %20, %24 : vector<16x512xf32>
    %c0_20 = arith.constant 0 : index
    %c106 = arith.constant 106 : index
    %26 = vector.load %arg0[%c0_20, %c106] : memref<8x640xf32, #tpu.memory_space<vmem>>, vector<8x512xf32>
    %c5 = arith.constant 5 : index
    %c0_21 = arith.constant 0 : index
    %c0_22 = arith.constant 0 : index
    %27 = vector.load %arg1[%c5, %c0_21, %c0_22] : memref<9x16x8xf32, #tpu.memory_space<vmem>>, vector<1x16x8xf32>
    %28 = vector.shape_cast %27 : vector<1x16x8xf32> to vector<16x8xf32>
    %cst_23 = arith.constant dense<0.000000e+00> : vector<16x512xf32>
    %29 = tpu.matmul %28, %26, %cst_23 {dimension_numbers = #tpu.dot_dimension_numbers<[1], [0], [0], [1], [0, 0, 1, 1], [], []>, precision = #tpu.contract_precision<fp32>} : vector<16x8xf32>, vector<8x512xf32>, vector<16x512xf32> -> vector<16x512xf32>
    %30 = arith.addf %25, %29 : vector<16x512xf32>
    %c0_24 = arith.constant 0 : index
    %c88 = arith.constant 88 : index
    %31 = vector.load %arg0[%c0_24, %c88] : memref<8x640xf32, #tpu.memory_space<vmem>>, vector<8x512xf32>
    %c6 = arith.constant 6 : index
    %c0_25 = arith.constant 0 : index
    %c0_26 = arith.constant 0 : index
    %32 = vector.load %arg1[%c6, %c0_25, %c0_26] : memref<9x16x8xf32, #tpu.memory_space<vmem>>, vector<1x16x8xf32>
    %33 = vector.shape_cast %32 : vector<1x16x8xf32> to vector<16x8xf32>
    %cst_27 = arith.constant dense<0.000000e+00> : vector<16x512xf32>
    %34 = tpu.matmul %33, %31, %cst_27 {dimension_numbers = #tpu.dot_dimension_numbers<[1], [0], [0], [1], [0, 0, 1, 1], [], []>, precision = #tpu.contract_precision<fp32>} : vector<16x8xf32>, vector<8x512xf32>, vector<16x512xf32> -> vector<16x512xf32>
    %35 = arith.addf %30, %34 : vector<16x512xf32>
    %c0_28 = arith.constant 0 : index
    %c87 = arith.constant 87 : index
    %36 = vector.load %arg0[%c0_28, %c87] : memref<8x640xf32, #tpu.memory_space<vmem>>, vector<8x512xf32>
    %c7 = arith.constant 7 : index
    %c0_29 = arith.constant 0 : index
    %c0_30 = arith.constant 0 : index
    %37 = vector.load %arg1[%c7, %c0_29, %c0_30] : memref<9x16x8xf32, #tpu.memory_space<vmem>>, vector<1x16x8xf32>
    %38 = vector.shape_cast %37 : vector<1x16x8xf32> to vector<16x8xf32>
    %cst_31 = arith.constant dense<0.000000e+00> : vector<16x512xf32>
    %39 = tpu.matmul %38, %36, %cst_31 {dimension_numbers = #tpu.dot_dimension_numbers<[1], [0], [0], [1], [0, 0, 1, 1], [], []>, precision = #tpu.contract_precision<fp32>} : vector<16x8xf32>, vector<8x512xf32>, vector<16x512xf32> -> vector<16x512xf32>
    %40 = arith.addf %35, %39 : vector<16x512xf32>
    %c0_32 = arith.constant 0 : index
    %c86 = arith.constant 86 : index
    %41 = vector.load %arg0[%c0_32, %c86] : memref<8x640xf32, #tpu.memory_space<vmem>>, vector<8x512xf32>
    %c8 = arith.constant 8 : index
    %c0_33 = arith.constant 0 : index
    %c0_34 = arith.constant 0 : index
    %42 = vector.load %arg1[%c8, %c0_33, %c0_34] : memref<9x16x8xf32, #tpu.memory_space<vmem>>, vector<1x16x8xf32>
    %43 = vector.shape_cast %42 : vector<1x16x8xf32> to vector<16x8xf32>
    %cst_35 = arith.constant dense<0.000000e+00> : vector<16x512xf32>
    %44 = tpu.matmul %43, %41, %cst_35 {dimension_numbers = #tpu.dot_dimension_numbers<[1], [0], [0], [1], [0, 0, 1, 1], [], []>, precision = #tpu.contract_precision<fp32>} : vector<16x8xf32>, vector<8x512xf32>, vector<16x512xf32> -> vector<16x512xf32>
    %45 = arith.addf %40, %44 : vector<16x512xf32>
    %cst_36 = arith.constant 0.000000e+00 : f32
    %46 = vector.broadcast %cst_36 : f32 to vector<8x1xf32>
    %cst_37 = arith.constant 0.000000e+00 : f32
    %47 = vector.broadcast %cst_37 : f32 to vector<8x1xf32>
    %48 = vector.extract_strided_slice %45 {offsets = [0, 0], sizes = [8, 512], strides = [1, 1]} : vector<16x512xf32> to vector<8x512xf32>
    %cst_38 = arith.constant dense<0.000000e+00> : vector<8xf32>
    %49 = vector.multi_reduction <add>, %48, %cst_38 [1] : vector<8x512xf32> to vector<8xf32>
    %50 = vector.shape_cast %49 : vector<8xf32> to vector<8x1xf32>
    %51 = arith.addf %46, %50 : vector<8x1xf32>
    %52 = arith.mulf %48, %48 : vector<8x512xf32>
    %cst_39 = arith.constant dense<0.000000e+00> : vector<8xf32>
    %53 = vector.multi_reduction <add>, %52, %cst_39 [1] : vector<8x512xf32> to vector<8xf32>
    %54 = vector.shape_cast %53 : vector<8xf32> to vector<8x1xf32>
    %55 = arith.addf %47, %54 : vector<8x1xf32>
    %56 = vector.extract_strided_slice %45 {offsets = [8, 0], sizes = [8, 512], strides = [1, 1]} : vector<16x512xf32> to vector<8x512xf32>
    %cst_40 = arith.constant dense<0.000000e+00> : vector<8xf32>
    %57 = vector.multi_reduction <add>, %56, %cst_40 [1] : vector<8x512xf32> to vector<8xf32>
    %58 = vector.shape_cast %57 : vector<8xf32> to vector<8x1xf32>
    %59 = arith.addf %51, %58 : vector<8x1xf32>
    %60 = arith.mulf %56, %56 : vector<8x512xf32>
    %cst_41 = arith.constant dense<0.000000e+00> : vector<8xf32>
    %61 = vector.multi_reduction <add>, %60, %cst_41 [1] : vector<8x512xf32> to vector<8xf32>
    %62 = vector.shape_cast %61 : vector<8xf32> to vector<8x1xf32>
    %63 = arith.addf %55, %62 : vector<8x1xf32>
    %cst_42 = arith.constant 0.00154320989 : f32
    %64 = vector.broadcast %cst_42 : f32 to vector<8x1xf32>
    %65 = arith.mulf %59, %64 : vector<8x1xf32>
    %cst_43 = arith.constant 0.00154320989 : f32
    %66 = vector.broadcast %cst_43 : f32 to vector<8x1xf32>
    %67 = arith.mulf %63, %66 : vector<8x1xf32>
    %68 = arith.mulf %65, %65 : vector<8x1xf32>
    %69 = arith.subf %67, %68 : vector<8x1xf32>
    %c0_44 = arith.constant 0 : index
    %c0_45 = arith.constant 0 : index
    %70 = vector.load %arg3[%c0_44, %c0_45] : memref<8x1xf32, #tpu.memory_space<vmem>>, vector<8x1xf32>
    %cst_46 = arith.constant 9.99999974E-6 : f32
    %71 = vector.broadcast %cst_46 : f32 to vector<8x1xf32>
    %72 = arith.addf %69, %71 : vector<8x1xf32>
    %73 = math.rsqrt %72 : vector<8x1xf32>
    %74 = arith.mulf %70, %73 : vector<8x1xf32>
    %c0_47 = arith.constant 0 : index
    %c0_48 = arith.constant 0 : index
    %75 = vector.load %arg4[%c0_47, %c0_48] : memref<8x1xf32, #tpu.memory_space<vmem>>, vector<8x1xf32>
    %76 = arith.mulf %65, %74 : vector<8x1xf32>
    %77 = arith.subf %75, %76 : vector<8x1xf32>
    %cst_49 = arith.constant 0.000000e+00 : f32
    %78 = vector.broadcast %cst_49 : f32 to vector<16x128xf32>
    %c0_50 = arith.constant 0 : index
    %c0_51 = arith.constant 0 : index
    %79 = vector.load %arg7[%c0_50, %c0_51] : memref<16x640xf32, #tpu.memory_space<vmem>>, vector<16x128xf32>
    tpu.vector_store %arg7[%c0_50, %c0_51], %78 {strides = array<i32>} : memref<16x640xf32, #tpu.memory_space<vmem>>, vector<16x128xf32>,
    %c0_52 = arith.constant 0 : index
    %c0_53 = arith.constant 0 : index
    %80 = vector.load %arg5[%c0_52, %c0_53] : memref<1x512xf32, #tpu.memory_space<vmem>>, vector<1x512xf32>
    %81 = vector.extract_strided_slice %45 {offsets = [0, 0], sizes = [8, 512], strides = [1, 1]} : vector<16x512xf32> to vector<8x512xf32>
    %82 = vector.broadcast %74 : vector<8x1xf32> to vector<8x512xf32>
    %83 = arith.mulf %81, %82 : vector<8x512xf32>
    %84 = vector.broadcast %77 : vector<8x1xf32> to vector<8x512xf32>
    %85 = arith.addf %83, %84 : vector<8x512xf32>
    %cst_54 = arith.constant 0.000000e+00 : f32
    %86 = vector.broadcast %cst_54 : f32 to vector<8x512xf32>
    %87 = arith.cmpf ogt, %85, %86 : vector<8x512xf32>
    %cst_55 = arith.constant 0.00999999977 : f32
    %88 = vector.broadcast %cst_55 : f32 to vector<8x512xf32>
    %89 = arith.mulf %88, %85 : vector<8x512xf32>
    %90 = arith.select %87, %85, %89 : vector<8x512xi1>, vector<8x512xf32>
    %91 = vector.broadcast %80 : vector<1x512xf32> to vector<8x512xf32>
    %92 = arith.mulf %90, %91 : vector<8x512xf32>
    %c0_56 = arith.constant 0 : index
    %c128_57 = arith.constant 128 : index
    %93 = vector.load %arg7[%c0_56, %c128_57] : memref<16x640xf32, #tpu.memory_space<vmem>>, vector<8x512xf32>
    tpu.vector_store %arg7[%c0_56, %c128_57], %92 {strides = array<i32>} : memref<16x640xf32, #tpu.memory_space<vmem>>, vector<8x512xf32>,
    %94 = vector.extract_strided_slice %45 {offsets = [8, 0], sizes = [8, 512], strides = [1, 1]} : vector<16x512xf32> to vector<8x512xf32>
    %95 = vector.broadcast %74 : vector<8x1xf32> to vector<8x512xf32>
    %96 = arith.mulf %94, %95 : vector<8x512xf32>
    %97 = vector.broadcast %77 : vector<8x1xf32> to vector<8x512xf32>
    %98 = arith.addf %96, %97 : vector<8x512xf32>
    %cst_58 = arith.constant 0.000000e+00 : f32
    %99 = vector.broadcast %cst_58 : f32 to vector<8x512xf32>
    %100 = arith.cmpf ogt, %98, %99 : vector<8x512xf32>
    %cst_59 = arith.constant 0.00999999977 : f32
    %101 = vector.broadcast %cst_59 : f32 to vector<8x512xf32>
    %102 = arith.mulf %101, %98 : vector<8x512xf32>
    %103 = arith.select %100, %98, %102 : vector<8x512xi1>, vector<8x512xf32>
    %104 = vector.broadcast %80 : vector<1x512xf32> to vector<8x512xf32>
    %105 = arith.mulf %103, %104 : vector<8x512xf32>
    %c8_60 = arith.constant 8 : index
    %c128_61 = arith.constant 128 : index
    %106 = vector.load %arg7[%c8_60, %c128_61] : memref<16x640xf32, #tpu.memory_space<vmem>>, vector<8x512xf32>
    tpu.vector_store %arg7[%c8_60, %c128_61], %105 {strides = array<i32>} : memref<16x640xf32, #tpu.memory_space<vmem>>, vector<8x512xf32>,
    %cst_62 = arith.constant 0.000000e+00 : f32
    %107 = vector.broadcast %cst_62 : f32 to vector<16x512xf32>
    %c0_63 = arith.constant 0 : index
    %c128_64 = arith.constant 128 : index
    %108 = vector.load %arg7[%c0_63, %c128_64] : memref<16x640xf32, #tpu.memory_space<vmem>>, vector<16x512xf32>
    %c0_65 = arith.constant 0 : index
    %c0_66 = arith.constant 0 : index
    %c0_67 = arith.constant 0 : index
    %109 = vector.load %arg2[%c0_65, %c0_66, %c0_67] : memref<9x16x16xf32, #tpu.memory_space<vmem>>, vector<1x16x16xf32>
    %110 = vector.shape_cast %109 : vector<1x16x16xf32> to vector<16x16xf32>
    %cst_68 = arith.constant dense<0.000000e+00> : vector<16x512xf32>
    %111 = tpu.matmul %110, %108, %cst_68 {dimension_numbers = #tpu.dot_dimension_numbers<[1], [0], [0], [1], [0, 0, 1, 1], [], []>, precision = #tpu.contract_precision<fp32>} : vector<16x16xf32>, vector<16x512xf32>, vector<16x512xf32> -> vector<16x512xf32>
    %112 = arith.addf %107, %111 : vector<16x512xf32>
    %c0_69 = arith.constant 0 : index
    %c127_70 = arith.constant 127 : index
    %113 = vector.load %arg7[%c0_69, %c127_70] : memref<16x640xf32, #tpu.memory_space<vmem>>, vector<16x512xf32>
    %c1_71 = arith.constant 1 : index
    %c0_72 = arith.constant 0 : index
    %c0_73 = arith.constant 0 : index
    %114 = vector.load %arg2[%c1_71, %c0_72, %c0_73] : memref<9x16x16xf32, #tpu.memory_space<vmem>>, vector<1x16x16xf32>
    %115 = vector.shape_cast %114 : vector<1x16x16xf32> to vector<16x16xf32>
    %cst_74 = arith.constant dense<0.000000e+00> : vector<16x512xf32>
    %116 = tpu.matmul %115, %113, %cst_74 {dimension_numbers = #tpu.dot_dimension_numbers<[1], [0], [0], [1], [0, 0, 1, 1], [], []>, precision = #tpu.contract_precision<fp32>} : vector<16x16xf32>, vector<16x512xf32>, vector<16x512xf32> -> vector<16x512xf32>
    %117 = arith.addf %112, %116 : vector<16x512xf32>
    %c0_75 = arith.constant 0 : index
    %c126_76 = arith.constant 126 : index
    %118 = vector.load %arg7[%c0_75, %c126_76] : memref<16x640xf32, #tpu.memory_space<vmem>>, vector<16x512xf32>
    %c2_77 = arith.constant 2 : index
    %c0_78 = arith.constant 0 : index
    %c0_79 = arith.constant 0 : index
    %119 = vector.load %arg2[%c2_77, %c0_78, %c0_79] : memref<9x16x16xf32, #tpu.memory_space<vmem>>, vector<1x16x16xf32>
    %120 = vector.shape_cast %119 : vector<1x16x16xf32> to vector<16x16xf32>
    %cst_80 = arith.constant dense<0.000000e+00> : vector<16x512xf32>
    %121 = tpu.matmul %120, %118, %cst_80 {dimension_numbers = #tpu.dot_dimension_numbers<[1], [0], [0], [1], [0, 0, 1, 1], [], []>, precision = #tpu.contract_precision<fp32>} : vector<16x16xf32>, vector<16x512xf32>, vector<16x512xf32> -> vector<16x512xf32>
    %122 = arith.addf %117, %121 : vector<16x512xf32>
    %c0_81 = arith.constant 0 : index
    %c108_82 = arith.constant 108 : index
    %123 = vector.load %arg7[%c0_81, %c108_82] : memref<16x640xf32, #tpu.memory_space<vmem>>, vector<16x512xf32>
    %c3_83 = arith.constant 3 : index
    %c0_84 = arith.constant 0 : index
    %c0_85 = arith.constant 0 : index
    %124 = vector.load %arg2[%c3_83, %c0_84, %c0_85] : memref<9x16x16xf32, #tpu.memory_space<vmem>>, vector<1x16x16xf32>
    %125 = vector.shape_cast %124 : vector<1x16x16xf32> to vector<16x16xf32>
    %cst_86 = arith.constant dense<0.000000e+00> : vector<16x512xf32>
    %126 = tpu.matmul %125, %123, %cst_86 {dimension_numbers = #tpu.dot_dimension_numbers<[1], [0], [0], [1], [0, 0, 1, 1], [], []>, precision = #tpu.contract_precision<fp32>} : vector<16x16xf32>, vector<16x512xf32>, vector<16x512xf32> -> vector<16x512xf32>
    %127 = arith.addf %122, %126 : vector<16x512xf32>
    %c0_87 = arith.constant 0 : index
    %c107_88 = arith.constant 107 : index
    %128 = vector.load %arg7[%c0_87, %c107_88] : memref<16x640xf32, #tpu.memory_space<vmem>>, vector<16x512xf32>
    %c4_89 = arith.constant 4 : index
    %c0_90 = arith.constant 0 : index
    %c0_91 = arith.constant 0 : index
    %129 = vector.load %arg2[%c4_89, %c0_90, %c0_91] : memref<9x16x16xf32, #tpu.memory_space<vmem>>, vector<1x16x16xf32>
    %130 = vector.shape_cast %129 : vector<1x16x16xf32> to vector<16x16xf32>
    %cst_92 = arith.constant dense<0.000000e+00> : vector<16x512xf32>
    %131 = tpu.matmul %130, %128, %cst_92 {dimension_numbers = #tpu.dot_dimension_numbers<[1], [0], [0], [1], [0, 0, 1, 1], [], []>, precision = #tpu.contract_precision<fp32>} : vector<16x16xf32>, vector<16x512xf32>, vector<16x512xf32> -> vector<16x512xf32>
    %132 = arith.addf %127, %131 : vector<16x512xf32>
    %c0_93 = arith.constant 0 : index
    %c106_94 = arith.constant 106 : index
    %133 = vector.load %arg7[%c0_93, %c106_94] : memref<16x640xf32, #tpu.memory_space<vmem>>, vector<16x512xf32>
    %c5_95 = arith.constant 5 : index
    %c0_96 = arith.constant 0 : index
    %c0_97 = arith.constant 0 : index
    %134 = vector.load %arg2[%c5_95, %c0_96, %c0_97] : memref<9x16x16xf32, #tpu.memory_space<vmem>>, vector<1x16x16xf32>
    %135 = vector.shape_cast %134 : vector<1x16x16xf32> to vector<16x16xf32>
    %cst_98 = arith.constant dense<0.000000e+00> : vector<16x512xf32>
    %136 = tpu.matmul %135, %133, %cst_98 {dimension_numbers = #tpu.dot_dimension_numbers<[1], [0], [0], [1], [0, 0, 1, 1], [], []>, precision = #tpu.contract_precision<fp32>} : vector<16x16xf32>, vector<16x512xf32>, vector<16x512xf32> -> vector<16x512xf32>
    %137 = arith.addf %132, %136 : vector<16x512xf32>
    %c0_99 = arith.constant 0 : index
    %c88_100 = arith.constant 88 : index
    %138 = vector.load %arg7[%c0_99, %c88_100] : memref<16x640xf32, #tpu.memory_space<vmem>>, vector<16x512xf32>
    %c6_101 = arith.constant 6 : index
    %c0_102 = arith.constant 0 : index
    %c0_103 = arith.constant 0 : index
    %139 = vector.load %arg2[%c6_101, %c0_102, %c0_103] : memref<9x16x16xf32, #tpu.memory_space<vmem>>, vector<1x16x16xf32>
    %140 = vector.shape_cast %139 : vector<1x16x16xf32> to vector<16x16xf32>
    %cst_104 = arith.constant dense<0.000000e+00> : vector<16x512xf32>
    %141 = tpu.matmul %140, %138, %cst_104 {dimension_numbers = #tpu.dot_dimension_numbers<[1], [0], [0], [1], [0, 0, 1, 1], [], []>, precision = #tpu.contract_precision<fp32>} : vector<16x16xf32>, vector<16x512xf32>, vector<16x512xf32> -> vector<16x512xf32>
    %142 = arith.addf %137, %141 : vector<16x512xf32>
    %c0_105 = arith.constant 0 : index
    %c87_106 = arith.constant 87 : index
    %143 = vector.load %arg7[%c0_105, %c87_106] : memref<16x640xf32, #tpu.memory_space<vmem>>, vector<16x512xf32>
    %c7_107 = arith.constant 7 : index
    %c0_108 = arith.constant 0 : index
    %c0_109 = arith.constant 0 : index
    %144 = vector.load %arg2[%c7_107, %c0_108, %c0_109] : memref<9x16x16xf32, #tpu.memory_space<vmem>>, vector<1x16x16xf32>
    %145 = vector.shape_cast %144 : vector<1x16x16xf32> to vector<16x16xf32>
    %cst_110 = arith.constant dense<0.000000e+00> : vector<16x512xf32>
    %146 = tpu.matmul %145, %143, %cst_110 {dimension_numbers = #tpu.dot_dimension_numbers<[1], [0], [0], [1], [0, 0, 1, 1], [], []>, precision = #tpu.contract_precision<fp32>} : vector<16x16xf32>, vector<16x512xf32>, vector<16x512xf32> -> vector<16x512xf32>
    %147 = arith.addf %142, %146 : vector<16x512xf32>
    %c0_111 = arith.constant 0 : index
    %c86_112 = arith.constant 86 : index
    %148 = vector.load %arg7[%c0_111, %c86_112] : memref<16x640xf32, #tpu.memory_space<vmem>>, vector<16x512xf32>
    %c8_113 = arith.constant 8 : index
    %c0_114 = arith.constant 0 : index
    %c0_115 = arith.constant 0 : index
    %149 = vector.load %arg2[%c8_113, %c0_114, %c0_115] : memref<9x16x16xf32, #tpu.memory_space<vmem>>, vector<1x16x16xf32>
    %150 = vector.shape_cast %149 : vector<1x16x16xf32> to vector<16x16xf32>
    %cst_116 = arith.constant dense<0.000000e+00> : vector<16x512xf32>
    %151 = tpu.matmul %150, %148, %cst_116 {dimension_numbers = #tpu.dot_dimension_numbers<[1], [0], [0], [1], [0, 0, 1, 1], [], []>, precision = #tpu.contract_precision<fp32>} : vector<16x16xf32>, vector<16x512xf32>, vector<16x512xf32> -> vector<16x512xf32>
    %152 = arith.addf %147, %151 : vector<16x512xf32>
    %c0_117 = arith.constant 0 : index
    %c0_118 = arith.constant 0 : index
    %153 = vector.load %arg6[%c0_117, %c0_118] : memref<16x512xf32, #tpu.memory_space<vmem>>, vector<16x512xf32>
    tpu.vector_store %arg6[%c0_117, %c0_118], %152 {strides = array<i32>} : memref<16x512xf32, #tpu.memory_space<vmem>>, vector<16x512xf32>,
    return
  }
}

</mosaic_0001>

<bundles_post_ra>
// kernel: gblock_forward.1
= control target key start
LH: loop header
LB: loop body
LE: loop exit
PB: predicated region body
PF: predicated region fallthrough
CT: control target
= control target key end

     0   :  { %v24336_v2 = vmov 0.0   ;;  %s19931_s25 = smov 1   ;;  %s19932_s8 = smov 2   ;;  %vm57_vm0 = vcmask 64512   ;;  %vm48_vm1 = vcmask 7168   ;;  %vm2139_vm2 = vcmask 15360   ;;  %s24329_s0 = inlined_call_operand.vmem [shape: f32[8,640], index: 0, kind: input, shape index: {}]   ;;  %s24330_s1 = inlined_call_operand.vmem [shape: f32[9,16,8], index: 1, kind: input, shape index: {}]   ;;  %s24331_s3 = inlined_call_operand.vmem [shape: f32[8,1], index: 3, kind: input, shape index: {}]   ;;  %s24332_s4 = inlined_call_operand.vmem [shape: f32[8,1], index: 4, kind: input, shape index: {}]   ;;  %s24333_s5 = inlined_call_operand.vmem [shape: f32[1,512], index: 5, kind: input, shape index: {}]   ;;  %s24334_s2 = inlined_call_operand.vmem [shape: f32[9,16,16], index: 2, kind: input, shape index: {}]   ;;  %s24335_s6 = inlined_call_operand.vmem [shape: f32[16,512], index: 6, kind: output, shape index: {}]  }
   0x1   :  { %v19978_v0 = vld [vmem:[%s24329_s0] sm:$0xff]  ;;  %v19983_v1 = vld [vmem:[%s24329_s0 + $0x8] sm:$0xff]  ;;  %130 = vmatprep.mubr.f32.mxu0 %v24336_v2  ;;  %227 = vmatprep.mubr.f32.mxu1 %v24336_v2  ;;  %v19994_v3 = vld [vmem:[%s24329_s0 + $0x18] sm:$0xff]  ;;  %s19934_s9 = smov 21   ;;  %s19935_s14 = smov 22   ;;  %vm3203_vm3 = vcmask 162816  }
   0x2   :  { %38 = vrot.lane.b32.xlu1 %v19978_v0, %s19931_s25  ;;  %40 = vrot.lane.b32.xlu0 %v19983_v1, %s19931_s25  ;;  %v19999_v4 = vld [vmem:[%s24329_s0 + $0x10] sm:$0xff]  ;;  %v20008_v5 = vld [vmem:[%s24329_s0 + $0x20] sm:$0xff]  ;;  %s19933_s0 = smov 20   ;;  %v20133_v56 = vand.u32 4294901760, %v19983_v1  ;;  %s19936_s19 = smov 40   ;;  %vm4267_vm4 = vcmask 171008  }
   0x3   :  { %v19884_v6 = vld [vmem:[%s24330_s1 + $0x10] sm:$0xff]  ;;  %v19885_v8 = vld [vmem:[%s24330_s1 + $0x18] sm:$0xff]  ;;  %v27_v48 = vld [vmem:[%s24330_s1] sm:$0xff]  ;;  %v20114_v50 = vand.u32 4294901760, %v19999_v4  ;;  %s19937_s24 = smov 41   ;;  %s19938_s30 = smov 42  }
   0x4   :  { %v59_v7 = vsel %vm57_vm0, %v19884_v6, 0  ;;  %v62_v10 = vsel %vm57_vm0, %v19885_v8, 0  ;;  %v1093_v51 = vsel %vm57_vm0, %v27_v48, 0  ;;  %v28_v52 = vld [vmem:[%s24330_s1 + $0x8] sm:$0xff]  ;;  %v1224_v60 = vsub.f32 %v19983_v1, %v20133_v56 }
   0x5   :  { %v20053_v9 = vand.u32 4294901760, %v59_v7  ;;  %v20063_v12 = vand.u32 4294901760, %v62_v10  ;;  %v1218_v53 = vsub.f32 %v19999_v4, %v20114_v50  ;;  %v20127_v54 = vand.u32 4294901760, %v1093_v51 }
   0x6   :  { %44 = vrot.lane.b32.xlu1 %v19994_v3, %s19931_s25  ;;  %42 = vrot.lane.b32.xlu0 %v19999_v4, %s19931_s25  ;;  %v1096_v55 = vsel %vm57_vm0, %v28_v52, 0  ;;  %v1225_v6 = vand.u32 4294901760, %v1224_v60  ;;  %vm5331_vm5 = vcmask 179200   ;;  %vm6395_vm6 = vcmask 326656  }
   0x7   :  { %v20061_v11 = vsub.f32 %v59_v7, %v20053_v9  ;;  %v20071_v14 = vsub.f32 %v62_v10, %v20063_v12  ;;  %v1219_v57 = vand.u32 4294901760, %v1218_v53  ;;  %v20142_v58 = vsub.f32 %v1093_v51, %v20127_v54 }
   0x8   :  { %v20144_v59 = vand.u32 4294901760, %v1096_v55  ;;  %vm7459_vm7 = vcmask 334848   ;;  %vm8523_vm8 = vcmask 343040  }
   0x9   :  { %v20068_v13 = vand.u32 4294901760, %v20061_v11  ;;  %v20077_v20 = vand.u32 4294901760, %v20071_v14  ;;  %v1220_v61 = vsub.f32 %v1218_v53, %v1219_v57  ;;  %v20156_v62 = vand.u32 4294901760, %v20142_v58 }
   0xa   :  { %46 = vrot.lane.b32.xlu0 %v20008_v5, %s19931_s25  ;;  %2131 = vrot.lane.b32.xlu1 %v19983_v1, %s19932_s8  ;;  %v20159_v63 = vsub.f32 %v1096_v55, %v20144_v59 }
   0xb   :  { %v134_v19 = vsub.f32 %v20061_v11, %v20068_v13  ;;  %v145_v26 = vsub.f32 %v20071_v14, %v20077_v20  ;;  %v1221_v7 = vand.u32 4294901760, %v1220_v61  ;;  %v1168_v8 = vsub.f32 %v20142_v58, %v20156_v62 }
   0xc   :  { %v20172_v10 = vand.u32 4294901760, %v20159_v63 }
   0xd   :  { %v135_v25 = vand.u32 4294901760, %v134_v19  ;;  %v146_v33 = vand.u32 4294901760, %v145_v26 }
   0xe   :  { %2133 = vrot.lane.b32.xlu0 %v19999_v4, %s19932_s8  ;;  %2129 = vrot.lane.b32.xlu1 %v19978_v0, %s19932_s8 }
  0x12   :  { %2135 = vrot.lane.b32.xlu0 %v19994_v3, %s19932_s8  ;;  %2137 = vrot.lane.b32.xlu1 %v20008_v5, %s19932_s8 }
  0x16   :  { %3195 = vrot.lane.b32.xlu0 %v19983_v1, %s19933_s0  ;;  %3197 = vrot.lane.b32.xlu1 %v19999_v4, %s19933_s0 }
  0x1a   :  { %3193 = vrot.lane.b32.xlu0 %v19978_v0, %s19933_s0  ;;  %3199 = vrot.lane.b32.xlu1 %v19994_v3, %s19933_s0 }
  0x1e   :  { %3201 = vrot.lane.b32.xlu0 %v20008_v5, %s19933_s0  ;;  %4259 = vrot.lane.b32.xlu1 %v19983_v1, %s19934_s9 }
  0x22   :  { %4261 = vrot.lane.b32.xlu0 %v19999_v4, %s19934_s9  ;;  %4257 = vrot.lane.b32.xlu1 %v19978_v0, %s19934_s9 }
  0x26   :  { %4263 = vrot.lane.b32.xlu0 %v19994_v3, %s19934_s9  ;;  %4265 = vrot.lane.b32.xlu1 %v20008_v5, %s19934_s9 }
  0x2a   :  { %5323 = vrot.lane.b32.xlu0 %v19983_v1, %s19935_s14  ;;  %5325 = vrot.lane.b32.xlu1 %v19999_v4, %s19935_s14 }
  0x2e   :  { %5321 = vrot.lane.b32.xlu0 %v19978_v0, %s19935_s14  ;;  %5327 = vrot.lane.b32.xlu1 %v19994_v3, %s19935_s14 }
  0x32   :  { %5329 = vrot.lane.b32.xlu0 %v20008_v5, %s19935_s14  ;;  %6387 = vrot.lane.b32.xlu1 %v19983_v1, %s19936_s19 }
  0x36   :  { %6389 = vrot.lane.b32.xlu0 %v19999_v4, %s19936_s19  ;;  %6385 = vrot.lane.b32.xlu1 %v19978_v0, %s19936_s19 }
  0x3a   :  { %6391 = vrot.lane.b32.xlu0 %v19994_v3, %s19936_s19  ;;  %6393 = vrot.lane.b32.xlu1 %v20008_v5, %s19936_s19 }
  0x3e   :  { %7451 = vrot.lane.b32.xlu0 %v19983_v1, %s19937_s24  ;;  %7453 = vrot.lane.b32.xlu1 %v19999_v4, %s19937_s24 }
  0x42   :  { %7449 = vrot.lane.b32.xlu0 %v19978_v0, %s19937_s24  ;;  %7455 = vrot.lane.b32.xlu1 %v19994_v3, %s19937_s24 }
  0x46   :  { %7457 = vrot.lane.b32.xlu0 %v20008_v5, %s19937_s24  ;;  %8515 = vrot.lane.b32.xlu1 %v19983_v1, %s19938_s30 }
  0x4a   :  { %8517 = vrot.lane.b32.xlu0 %v19999_v4, %s19938_s30  ;;  %8513 = vrot.lane.b32.xlu1 %v19978_v0, %s19938_s30 }
  0x4e   :  { %8519 = vrot.lane.b32.xlu0 %v19994_v3, %s19938_s30  ;;  %8521 = vrot.lane.b32.xlu1 %v20008_v5, %s19938_s30 }
  0x74   :  { %v39_v15 = vpop.permute.xlu1 %38  ;;  %v41_v16 = vpop.permute.xlu0 %40 }
  0x75   :  { %v49_v17 = vsel %vm48_vm1, %v39_v15, %v41_v16 }
  0x76   :  { %v96_v18 = vand.u32 4294901760, %v49_v17 }
  0x78   :  { %v190_v21 = vsub.f32 %v49_v17, %v96_v18  ;;  %v43_v22 = vpop.permute.xlu0 %42  ;;  %v45_v28 = vpop.permute.xlu1 %44 }
  0x79   :  { %v50_v23 = vsel %vm48_vm1, %v41_v16, %v43_v22  ;;  %v51_v38 = vsel %vm48_vm1, %v43_v22, %v45_v28  ;;  %v20187_v16 = vand.u32 4294901760, %v20008_v5 }
  0x7a   :  { %v94_v24 = vand.u32 4294901760, %v50_v23  ;;  %v191_v27 = vand.u32 4294901760, %v190_v21  ;;  %v20089_v41 = vand.u32 4294901760, %v51_v38 }
  0x7c   :  { %95 = vmatprep.subr.mxu0 %v94_v24  ;;  %v184_v29 = vsub.f32 %v50_v23, %v94_v24  ;;  %v47_v30 = vpop.permute.xlu0 %46  ;;  %v192_v35 = vsub.f32 %v190_v21, %v191_v27  ;;  %v704_v43 = vsub.f32 %v51_v38, %v20089_v41  ;;  %v2132_v23 = vpop.permute.xlu1 %2131 }
  0x7d   :  { %97 = vmatpush1.msra.mxu0 %v96_v18  ;;  %v52_v31 = vsel %vm48_vm1, %v45_v28, %v47_v30  ;;  %v19886_v28 = vld [vmem:[%s24330_s1 + $0x20] sm:$0xff] }
  0x7e   :  { %136 = vmatmul.mubr.f32.vlgmr.msra.gmra.mxu0 %v135_v25  ;;  %274 = vmatprep.subr.mxu0 %v184_v29  ;;  %v185_v32 = vand.u32 4294901760, %v184_v29  ;;  %v20083_v34 = vand.u32 4294901760, %v52_v31  ;;  %v193_v40 = vand.u32 4294901760, %v192_v35  ;;  %v705_v45 = vand.u32 4294901760, %v704_v43 }
  0x7f   :  { %277 = vmatpush1.msra.mxu0 %v190_v21  ;;  %141 = vmatprep.mubr.f32.mxu0 %v24336_v2 }
  0x80   :  { %445 = vmatprep.subr.mxu0 %v185_v32  ;;  %v186_v36 = vsub.f32 %v184_v29, %v185_v32  ;;  %v698_v37 = vsub.f32 %v52_v31, %v20083_v34  ;;  %v706_v47 = vsub.f32 %v704_v43, %v705_v45  ;;  %v2130_v30 = vpop.permute.xlu1 %2129  ;;  %v2149_v31 = vsel %vm57_vm0, %v19886_v28, 0 }
  0x81   :  { %v2140_v32 = vsel %vm2139_vm2, %v2130_v30, %v2132_v23  ;;  %v20250_v35 = vand.u32 4294901760, %v2149_v31 }
  0x82   :  { %147 = vmatmul.mubr.f32.gmra.mxu0 %v146_v33  ;;  %v187_v39 = vand.u32 4294901760, %v186_v36  ;;  %v699_v42 = vand.u32 4294901760, %v698_v37  ;;  %v707_v49 = vand.u32 4294901760, %v706_v47  ;;  %v20252_v36 = vand.u32 4294901760, %v2140_v32 }
  0x83   :  { %310 = vmatprep.mubr.f32.mxu0 %v24336_v2 }
  0x84   :  { %188 = vmatprep.subr.mxu1 %v187_v39  ;;  %v700_v44 = vsub.f32 %v698_v37, %v699_v42  ;;  %v20265_v39 = vsub.f32 %v2149_v31, %v20250_v35 }
  0x85   :  { %194 = vmatpush1.msra.mxu1 %v193_v40 }
  0x86   :  { %229 = vmatmul.mubr.f32.vlgmr.msra.gmra.mxu1 %v20053_v9  ;;  %313 = vmatmul.mubr.f32.vlgmr.msra.gmra.mxu0 %v20061_v11  ;;  %v701_v46 = vand.u32 4294901760, %v700_v44 }
  0x87   :  { %358 = vmatprep.subr.mxu1 %v94_v24  ;;  %449 = vmatpush1.msra.mxu0 %v191_v27 }
  0x88   :  { %360 = vmatpush1.msra.mxu1 %v96_v18  ;;  %234 = vmatprep.mubr.f32.mxu1 %v24336_v2 }
  0x89   :  { %528 = vmatprep.subr.mxu1 %v94_v24  ;;  %318 = vmatprep.mubr.f32.mxu0 %v24336_v2  ;;  %v20221_v24 = vpop.permute.xlu0 %2133 }
  0x8a   :  { %236 = vmatmul.mubr.f32.gmra.mxu1 %v20063_v12  ;;  %321 = vmatmul.mubr.f32.gmra.mxu0 %v20071_v14  ;;  %v2141_v26 = vsel %vm2139_vm2, %v2132_v23, %v20221_v24 }
  0x8b   :  { %393 = vmatprep.mubr.f32.mxu1 %v24336_v2  ;;  %482 = vmatprep.mubr.f32.mxu0 %v24336_v2  ;;  %v20234_v29 = vand.u32 4294901760, %v2141_v26 }
  0x8c   :  { %609 = vmatprep.subr.mxu0 %v20083_v34 }
  0x8d   :  { %v2136_v51 = vpop.permute.xlu0 %2135 }
  0x8e   :  { %397 = vmatmul.mubr.f32.vlgmr.msra.gmra.mxu1 %v20068_v13  ;;  %484 = vmatmul.mubr.f32.vlgmr.msra.gmra.mxu0 %v20053_v9  ;;  %v2142_v61 = vsel %vm2139_vm2, %v20221_v24, %v2136_v51 }
  0x8f   :  { %530 = vmatpush1.msra.mxu1 %v96_v18  ;;  %611 = vmatpush1.msra.mxu0 %v20089_v41  ;;  %v1732_v18 = vsub.f32 %v20008_v5, %v20187_v16 }
  0x90   :  { %788 = vmatprep.subr.mxu0 %v698_v37  ;;  %402 = vmatprep.mubr.f32.mxu1 %v24336_v2 }
  0x91   :  { %489 = vmatprep.mubr.f32.mxu0 %v24336_v2  ;;  %702 = vmatprep.subr.mxu1 %v701_v46  ;;  %v1733_v19 = vand.u32 4294901760, %v1732_v18 }
  0x92   :  { %406 = vmatmul.mubr.f32.gmra.mxu1 %v20077_v20  ;;  %491 = vmatmul.mubr.f32.gmra.mxu0 %v20063_v12 }
  0x93   :  { %563 = vmatprep.mubr.f32.mxu1 %v24336_v2  ;;  %644 = vmatprep.mubr.f32.mxu0 %v24336_v2 }
  0x96   :  { %565 = vmatmul.mubr.f32.vlgmr.msra.gmra.mxu1 %v20053_v9  ;;  %650 = vmatmul.mubr.f32.vlgmr.msra.gmra.mxu0 %v135_v25 }
  0x97   :  { %708 = vmatpush1.msra.mxu1 %v707_v49  ;;  %791 = vmatpush1.msra.mxu0 %v704_v43  ;;  %v20279_v43 = vand.u32 4294901760, %v20265_v39 }
  0x98   :  { %872 = vmatprep.subr.mxu1 %v20083_v34  ;;  %959 = vmatprep.subr.mxu0 %v699_v42 }
  0x99   :  { %570 = vmatprep.mubr.f32.mxu1 %v24336_v2  ;;  %655 = vmatprep.mubr.f32.mxu0 %v24336_v2  ;;  %v2224_v47 = vsub.f32 %v20265_v39, %v20279_v43 }
  0x9a   :  { %572 = vmatmul.mubr.f32.gmra.mxu1 %v20063_v12  ;;  %661 = vmatmul.mubr.f32.gmra.mxu0 %v146_v33  ;;  %v19887_v33 = vld [vmem:[%s24330_s1 + $0x28] sm:$0xff] }
  0x9b   :  { %741 = vmatprep.mubr.f32.mxu1 %v24336_v2  ;;  %824 = vmatprep.mubr.f32.mxu0 %v24336_v2  ;;  %v2152_v37 = vsel %vm57_vm0, %v19887_v33, 0  ;;  %v2225_v52 = vand.u32 4294901760, %v2224_v47 }
  0x9c   :  { %v20267_v40 = vand.u32 4294901760, %v2152_v37 }
  0x9e   :  { %743 = vmatmul.mubr.f32.vlgmr.msra.gmra.mxu1 %v20053_v9  ;;  %827 = vmatmul.mubr.f32.vlgmr.msra.gmra.mxu0 %v20061_v11  ;;  %v1226_v11 = vsub.f32 %v1224_v60, %v1225_v6  ;;  %v20282_v44 = vsub.f32 %v2152_v37, %v20267_v40 }
  0x9f   :  { %874 = vmatpush1.msra.mxu1 %v20089_v41  ;;  %963 = vmatpush1.msra.mxu0 %v705_v45 }
  0xa0   :  { %1042 = vmatprep.subr.mxu1 %v20083_v34  ;;  %748 = vmatprep.mubr.f32.mxu1 %v24336_v2  ;;  %v1227_v15 = vand.u32 4294901760, %v1226_v11  ;;  %v20246_v34 = vsub.f32 %v2141_v26, %v20234_v29  ;;  %v20295_v48 = vand.u32 4294901760, %v20282_v44 }
  0xa1   :  { %832 = vmatprep.mubr.f32.mxu0 %v24336_v2  ;;  %1129 = vmatprep.subr.mxu0 %v20114_v50 }
  0xa2   :  { %750 = vmatmul.mubr.f32.gmra.mxu1 %v20063_v12  ;;  %835 = vmatmul.mubr.f32.gmra.mxu0 %v20071_v14  ;;  %v1179_v14 = vsub.f32 %v20159_v63, %v20172_v10  ;;  %v2275_v38 = vand.u32 4294901760, %v20246_v34 }
  0xa3   :  { %907 = vmatprep.mubr.f32.mxu1 %v24336_v2  ;;  %996 = vmatprep.mubr.f32.mxu0 %v24336_v2 }
  0xa4   :  { %v20190_v17 = vand.u32 4294901760, %v1179_v14  ;;  %v2276_v42 = vsub.f32 %v20246_v34, %v2275_v38  ;;  %v19888_v14 = vld [vmem:[%s24330_s1 + $0x30] sm:$0xff] }
  0xa6   :  { %911 = vmatmul.mubr.f32.vlgmr.msra.gmra.mxu1 %v20068_v13  ;;  %998 = vmatmul.mubr.f32.vlgmr.msra.gmra.mxu0 %v20053_v9  ;;  %v1169_v13 = vand.u32 4294901760, %v1168_v8  ;;  %v2277_v46 = vand.u32 4294901760, %v2276_v42  ;;  %v3196_v8 = vpop.permute.xlu0 %3195 }
  0xa7   :  { %1044 = vmatpush1.msra.mxu1 %v20089_v41  ;;  %916 = vmatprep.mubr.f32.mxu1 %v24336_v2  ;;  %v2280_v41 = vsub.f32 %v2140_v32, %v20252_v36 }
  0xa8   :  { %1003 = vmatprep.mubr.f32.mxu0 %v24336_v2  ;;  %1131 = vmatpush1.msra.mxu0 %v20133_v56 }
  0xa9   :  { %1222 = vmatprep.subr.mxu1 %v1221_v7  ;;  %1308 = vmatprep.subr.mxu0 %v1218_v53  ;;  %v2281_v45 = vand.u32 4294901760, %v2280_v41  ;;  %v2235_v53 = vsub.f32 %v20282_v44, %v20295_v48 }
  0xaa   :  { %920 = vmatmul.mubr.f32.gmra.mxu1 %v20077_v20  ;;  %1005 = vmatmul.mubr.f32.gmra.mxu0 %v20063_v12  ;;  %v1734_v20 = vsub.f32 %v1732_v18, %v1733_v19 }
  0xab   :  { %1077 = vmatprep.mubr.f32.mxu1 %v24336_v2  ;;  %1164 = vmatprep.mubr.f32.mxu0 %v24336_v2  ;;  %v2282_v49 = vsub.f32 %v2280_v41, %v2281_v45 }
  0xac   :  { %v1735_v22 = vand.u32 4294901760, %v1734_v20 }
  0xae   :  { %1079 = vmatmul.mubr.f32.vlgmr.msra.gmra.mxu1 %v20053_v9  ;;  %1170 = vmatmul.mubr.f32.vlgmr.msra.gmra.mxu0 %v1169_v13  ;;  %v20202_v9 = vand.u32 4294901760, %v19994_v3 }
  0xaf   :  { %1084 = vmatprep.mubr.f32.mxu1 %v24336_v2  ;;  %1175 = vmatprep.mubr.f32.mxu0 %v24336_v2 }
  0xb0   :  { %1228 = vmatpush1.msra.mxu1 %v1227_v15  ;;  %1311 = vmatpush1.msra.mxu0 %v1224_v60 }
  0xb1   :  { %1392 = vmatprep.subr.mxu1 %v20114_v50  ;;  %1479 = vmatprep.subr.mxu0 %v1219_v57 }
  0xb2   :  { %1086 = vmatmul.mubr.f32.gmra.mxu1 %v20063_v12  ;;  %1181 = vmatmul.mubr.f32.gmra.mxu0 %v20190_v17  ;;  %v1738_v12 = vsub.f32 %v19994_v3, %v20202_v9 }
  0xb3   :  { %1261 = vmatprep.mubr.f32.mxu1 %v24336_v2  ;;  %1344 = vmatprep.mubr.f32.mxu0 %v24336_v2 }
  0xb4   :  { %v1739_v21 = vand.u32 4294901760, %v1738_v12 }
  0xb6   :  { %1263 = vmatmul.mubr.f32.vlgmr.msra.gmra.mxu1 %v20127_v54  ;;  %1347 = vmatmul.mubr.f32.vlgmr.msra.gmra.mxu0 %v20142_v58  ;;  %v1740_v25 = vsub.f32 %v1738_v12, %v1739_v21 }
  0xb7   :  { %1268 = vmatprep.mubr.f32.mxu1 %v24336_v2  ;;  %1352 = vmatprep.mubr.f32.mxu0 %v24336_v2 }
  0xb8   :  { %1394 = vmatpush1.msra.mxu1 %v20133_v56  ;;  %1483 = vmatpush1.msra.mxu0 %v1225_v6  ;;  %v1741_v27 = vand.u32 4294901760, %v1740_v25 }
  0xb9   :  { %1562 = vmatprep.subr.mxu1 %v20114_v50  ;;  %1643 = vmatprep.subr.mxu0 %v20187_v16  ;;  %v2138_v50 = vpop.permute.xlu1 %2137 }
  0xba   :  { %1270 = vmatmul.mubr.f32.gmra.mxu1 %v20144_v59  ;;  %1355 = vmatmul.mubr.f32.gmra.mxu0 %v20159_v63  ;;  %v2143_v55 = vsel %vm2139_vm2, %v2136_v51, %v2138_v50  ;;  %v19890_v50 = vld [vmem:[%s24330_s1 + $0x40] sm:$0xff] }
  0xbb   :  { %1427 = vmatprep.mubr.f32.mxu1 %v24336_v2  ;;  %1516 = vmatprep.mubr.f32.mxu0 %v24336_v2  ;;  %v20311_v57 = vand.u32 4294901760, %v2143_v55 }
  0xbd   :  { %v2788_v60 = vsub.f32 %v2143_v55, %v20311_v57  ;;  %v4277_v55 = vsel %vm57_vm0, %v19890_v50, 0 }
  0xbe   :  { %1431 = vmatmul.mubr.f32.vlgmr.msra.gmra.mxu1 %v20156_v62  ;;  %1518 = vmatmul.mubr.f32.vlgmr.msra.gmra.mxu0 %v20127_v54 }
  0xbf   :  { %1436 = vmatprep.mubr.f32.mxu1 %v24336_v2  ;;  %1523 = vmatprep.mubr.f32.mxu0 %v24336_v2 }
  0xc0   :  { %1564 = vmatpush1.msra.mxu1 %v20133_v56  ;;  %1645 = vmatpush1.msra.mxu0 %v20202_v9  ;;  %v2283_v56 = vand.u32 4294901760, %v2282_v49 }
  0xc1   :  { %1736 = vmatprep.subr.mxu1 %v1735_v22  ;;  %1822 = vmatprep.subr.mxu0 %v1732_v18  ;;  %v3213_v18 = vsel %vm57_vm0, %v19888_v14, 0 }
  0xc2   :  { %1440 = vmatmul.mubr.f32.gmra.mxu1 %v20172_v10  ;;  %1525 = vmatmul.mubr.f32.gmra.mxu0 %v20144_v59  ;;  %v20373_v20 = vand.u32 4294901760, %v3213_v18 }
  0xc3   :  { %1597 = vmatprep.mubr.f32.mxu1 %v24336_v2  ;;  %1678 = vmatprep.mubr.f32.mxu0 %v24336_v2 }
  0xc4   :  { %v20388_v24 = vsub.f32 %v3213_v18, %v20373_v20 }
  0xc6   :  { %1599 = vmatmul.mubr.f32.vlgmr.msra.gmra.mxu1 %v20127_v54  ;;  %1684 = vmatmul.mubr.f32.vlgmr.msra.gmra.mxu0 %v1169_v13  ;;  %v20402_v4 = vand.u32 4294901760, %v20388_v24 }
  0xc7   :  { %1604 = vmatprep.mubr.f32.mxu1 %v24336_v2  ;;  %1689 = vmatprep.mubr.f32.mxu0 %v24336_v2 }
  0xc8   :  { %1742 = vmatpush1.msra.mxu1 %v1741_v27  ;;  %1825 = vmatpush1.msra.mxu0 %v1738_v12  ;;  %v3288_v30 = vsub.f32 %v20388_v24, %v20402_v4 }
  0xc9   :  { %1906 = vmatprep.subr.mxu1 %v20187_v16  ;;  %1993 = vmatprep.subr.mxu0 %v1733_v19  ;;  %v19889_v19 = vld [vmem:[%s24330_s1 + $0x38] sm:$0xff] }
  0xca   :  { %1606 = vmatmul.mubr.f32.gmra.mxu1 %v20144_v59  ;;  %1695 = vmatmul.mubr.f32.gmra.mxu0 %v20190_v17  ;;  %v3194_v17 = vpop.permute.xlu0 %3193  ;;  %v3216_v22 = vsel %vm57_vm0, %v19889_v19, 0  ;;  %v3289_v33 = vand.u32 4294901760, %v3288_v30 }
  0xcb   :  { %1775 = vmatprep.mubr.f32.mxu1 %v24336_v2  ;;  %1858 = vmatprep.mubr.f32.mxu0 %v24336_v2  ;;  %v20390_v25 = vand.u32 4294901760, %v3216_v22 }
  0xcd   :  { %v20405_v27 = vsub.f32 %v3216_v22, %v20390_v25 }
  0xce   :  { %1777 = vmatmul.mubr.f32.vlgmr.msra.gmra.mxu1 %v20127_v54  ;;  %1861 = vmatmul.mubr.f32.vlgmr.msra.gmra.mxu0 %v20142_v58  ;;  %v20314_v58 = vand.u32 4294901760, %v2235_v53  ;;  %v3202_v0 = vpop.permute.xlu0 %3201 }
  0xcf   :  { %1782 = vmatprep.mubr.f32.mxu1 %v24336_v2  ;;  %1866 = vmatprep.mubr.f32.mxu0 %v24336_v2  ;;  %v20418_v31 = vand.u32 4294901760, %v20405_v27 }
  0xd0   :  { %1908 = vmatpush1.msra.mxu1 %v20202_v9  ;;  %1997 = vmatpush1.msra.mxu0 %v1739_v21 }
  0xd1   :  { %2185 = vmatprep.subr.mxu0 %v20234_v29  ;;  %2076 = vmatprep.subr.mxu1 %v20187_v16 }
  0xd2   :  { %1784 = vmatmul.mubr.f32.gmra.mxu1 %v20144_v59  ;;  %1869 = vmatmul.mubr.f32.gmra.mxu0 %v20159_v63  ;;  %v20467_v47 = vpop.permute.xlu0 %4261 }
  0xd3   :  { %1941 = vmatprep.mubr.f32.mxu1 %v24336_v2  ;;  %2030 = vmatprep.mubr.f32.mxu0 %v24336_v2 }
  0xd6   :  { %1945 = vmatmul.mubr.f32.vlgmr.msra.gmra.mxu1 %v20156_v62  ;;  %2032 = vmatmul.mubr.f32.vlgmr.msra.gmra.mxu0 %v20127_v54  ;;  %v2789_v62 = vand.u32 4294901760, %v2788_v60  ;;  %v4264_v18 = vpop.permute.xlu0 %4263 }
  0xd7   :  { %2187 = vmatpush1.msra.mxu0 %v20252_v36  ;;  %2078 = vmatpush1.msra.mxu1 %v20202_v9  ;;  %v3204_v9 = vsel %vm3203_vm3, %v3194_v17, %v3196_v8 }
  0xd8   :  { %2364 = vmatprep.subr.mxu0 %v20246_v34  ;;  %1950 = vmatprep.mubr.f32.mxu1 %v24336_v2  ;;  %v2790_v63 = vsub.f32 %v2788_v60, %v2789_v62  ;;  %v20375_v21 = vand.u32 4294901760, %v3204_v9  ;;  %v3299_v34 = vsub.f32 %v20405_v27, %v20418_v31 }
  0xd9   :  { %2037 = vmatprep.mubr.f32.mxu0 %v24336_v2  ;;  %2278 = vmatprep.subr.mxu1 %v2277_v46 }
  0xda   :  { %1954 = vmatmul.mubr.f32.gmra.mxu1 %v20172_v10  ;;  %2039 = vmatmul.mubr.f32.gmra.mxu0 %v20144_v59  ;;  %v2791_v7 = vand.u32 4294901760, %v2790_v63  ;;  %v20344_v10 = vpop.permute.xlu1 %3197  ;;  %v3344_v26 = vsub.f32 %v3204_v9, %v20375_v21 }
  0xdb   :  { %2111 = vmatprep.mubr.f32.mxu1 %v24336_v2  ;;  %2220 = vmatprep.mubr.f32.mxu0 %v24336_v2  ;;  %v3205_v13 = vsel %vm3203_vm3, %v3196_v8, %v20344_v10 }
  0xdc   :  { %v20357_v16 = vand.u32 4294901760, %v3205_v13  ;;  %v3345_v28 = vand.u32 4294901760, %v3344_v26 }
  0xde   :  { %2113 = vmatmul.mubr.f32.vlgmr.msra.gmra.mxu1 %v20127_v54  ;;  %2226 = vmatmul.mubr.f32.vlgmr.msra.gmra.mxu0 %v2225_v52  ;;  %v20326_v54 = vand.u32 4294901760, %v2142_v61  ;;  %v20369_v12 = vsub.f32 %v3205_v13, %v20357_v16  ;;  %v3346_v32 = vsub.f32 %v3344_v26, %v3345_v28  ;;  %v3200_v3 = vpop.permute.xlu1 %3199 }
  0xdf   :  { %2284 = vmatpush1.msra.mxu1 %v2283_v56  ;;  %2367 = vmatpush1.msra.mxu0 %v2280_v41  ;;  %v3206_v5 = vsel %vm3203_vm3, %v20344_v10, %v3200_v3 }
  0xe0   :  { %2448 = vmatprep.subr.mxu1 %v20234_v29  ;;  %2535 = vmatprep.subr.mxu0 %v2275_v38  ;;  %v3339_v23 = vand.u32 4294901760, %v20369_v12  ;;  %v3347_v37 = vand.u32 4294901760, %v3346_v32 }
  0xe1   :  { %2118 = vmatprep.mubr.f32.mxu1 %v24336_v2  ;;  %2231 = vmatprep.mubr.f32.mxu0 %v24336_v2 }
  0xe2   :  { %2120 = vmatmul.mubr.f32.gmra.mxu1 %v20144_v59  ;;  %2237 = vmatmul.mubr.f32.gmra.mxu0 %v20314_v58  ;;  %v2794_v59 = vsub.f32 %v2142_v61, %v20326_v54  ;;  %v3340_v1 = vsub.f32 %v20369_v12, %v3339_v23  ;;  %v4260_v46 = vpop.permute.xlu1 %4259 }
  0xe3   :  { %2317 = vmatprep.mubr.f32.mxu1 %v24336_v2  ;;  %2400 = vmatprep.mubr.f32.mxu0 %v24336_v2  ;;  %v4269_v49 = vsel %vm4267_vm4, %v4260_v46, %v20467_v47 }
  0xe4   :  { %v2795_v6 = vand.u32 4294901760, %v2794_v59 }
  0xe6   :  { %2319 = vmatmul.mubr.f32.vlgmr.msra.gmra.mxu1 %v20250_v35  ;;  %2403 = vmatmul.mubr.f32.vlgmr.msra.gmra.mxu0 %v20265_v39  ;;  %v2796_v11 = vsub.f32 %v2794_v59, %v2795_v6  ;;  %v4258_v53 = vpop.permute.xlu1 %4257 }
  0xe7   :  { %2450 = vmatpush1.msra.mxu1 %v20252_v36  ;;  %2539 = vmatpush1.msra.mxu0 %v2281_v45  ;;  %v4268_v56 = vsel %vm4267_vm4, %v4258_v53, %v4260_v46 }
  0xe8   :  { %2618 = vmatprep.subr.mxu1 %v20234_v29  ;;  %2324 = vmatprep.mubr.f32.mxu1 %v24336_v2  ;;  %v2797_v15 = vand.u32 4294901760, %v2796_v11  ;;  %v3341_v29 = vand.u32 4294901760, %v3340_v1  ;;  %v20496_v61 = vand.u32 4294901760, %v4268_v56  ;;  %v4270_v1 = vsel %vm4267_vm4, %v20467_v47, %v4264_v18 }
  0xe9   :  { %2408 = vmatprep.mubr.f32.mxu0 %v24336_v2  ;;  %2699 = vmatprep.subr.mxu0 %v20311_v57 }
  0xea   :  { %2326 = vmatmul.mubr.f32.gmra.mxu1 %v20267_v40  ;;  %2411 = vmatmul.mubr.f32.gmra.mxu0 %v20282_v44  ;;  %v4266_v17 = vpop.permute.xlu1 %4265 }
  0xeb   :  { %2483 = vmatprep.mubr.f32.mxu1 %v24336_v2  ;;  %2572 = vmatprep.mubr.f32.mxu0 %v24336_v2 }
  0xee   :  { %2487 = vmatmul.mubr.f32.vlgmr.msra.gmra.mxu1 %v20279_v43  ;;  %2574 = vmatmul.mubr.f32.vlgmr.msra.gmra.mxu0 %v20250_v35  ;;  %v20592_v50 = vpop.permute.xlu1 %5325 }
  0xef   :  { %2620 = vmatpush1.msra.mxu1 %v20252_v36  ;;  %2701 = vmatpush1.msra.mxu0 %v20326_v54  ;;  %v3207_v36 = vsel %vm3203_vm3, %v3200_v3, %v3202_v0 }
  0xf0   :  { %2878 = vmatprep.subr.mxu0 %v2788_v60  ;;  %2492 = vmatprep.mubr.f32.mxu1 %v24336_v2  ;;  %v20434_v38 = vand.u32 4294901760, %v3207_v36  ;;  %v20494_v60 = vand.u32 4294901760, %v4277_v55 }
  0xf1   :  { %2579 = vmatprep.mubr.f32.mxu0 %v24336_v2  ;;  %2792 = vmatprep.subr.mxu1 %v2791_v7 }
  0xf2   :  { %2496 = vmatmul.mubr.f32.gmra.mxu1 %v20295_v48  ;;  %2581 = vmatmul.mubr.f32.gmra.mxu0 %v20267_v40  ;;  %v3852_v41 = vsub.f32 %v3207_v36, %v20434_v38 }
  0xf3   :  { %2653 = vmatprep.mubr.f32.mxu1 %v24336_v2  ;;  %2734 = vmatprep.mubr.f32.mxu0 %v24336_v2 }
  0xf4   :  { %v3853_v42 = vand.u32 4294901760, %v3852_v41 }
  0xf6   :  { %2655 = vmatmul.mubr.f32.vlgmr.msra.gmra.mxu1 %v20250_v35  ;;  %2740 = vmatmul.mubr.f32.vlgmr.msra.gmra.mxu0 %v2225_v52  ;;  %v20480_v52 = vand.u32 4294901760, %v4269_v49 }
  0xf7   :  { %2798 = vmatpush1.msra.mxu1 %v2797_v15  ;;  %2881 = vmatpush1.msra.mxu0 %v2794_v59  ;;  %v20504_v59 = vsub.f32 %v4277_v55, %v20494_v60 }
  0xf8   :  { %2962 = vmatprep.subr.mxu1 %v20311_v57  ;;  %3049 = vmatprep.subr.mxu0 %v2789_v62 }
  0xf9   :  { %2660 = vmatprep.mubr.f32.mxu1 %v24336_v2  ;;  %2745 = vmatprep.mubr.f32.mxu0 %v24336_v2  ;;  %v20519_v8 = vand.u32 4294901760, %v20504_v59 }
  0xfa   :  { %2662 = vmatmul.mubr.f32.gmra.mxu1 %v20267_v40  ;;  %2751 = vmatmul.mubr.f32.gmra.mxu0 %v20314_v58  ;;  %v4402_v58 = vsub.f32 %v4269_v49, %v20480_v52  ;;  %v5324_v49 = vpop.permute.xlu0 %5323 }
  0xfb   :  { %2831 = vmatprep.mubr.f32.mxu1 %v24336_v2  ;;  %2914 = vmatprep.mubr.f32.mxu0 %v24336_v2  ;;  %v4352_v14 = vsub.f32 %v20504_v59, %v20519_v8 }
  0xfc   :  { %v4403_v62 = vand.u32 4294901760, %v4402_v58 }
  0xfd   :  { %v20541_v9 = vand.u32 4294901760, %v4352_v14 }
  0xfe   :  { %2833 = vmatmul.mubr.f32.vlgmr.msra.gmra.mxu1 %v20250_v35  ;;  %2917 = vmatmul.mubr.f32.vlgmr.msra.gmra.mxu0 %v20265_v39  ;;  %v20437_v39 = vand.u32 4294901760, %v3299_v34  ;;  %v4404_v7 = vsub.f32 %v4402_v58, %v4403_v62 }
  0xff   :  { %2964 = vmatpush1.msra.mxu1 %v20326_v54  ;;  %3053 = vmatpush1.msra.mxu0 %v2795_v6  ;;  %v20509_v6 = vsub.f32 %v4268_v56, %v20496_v61 }
 0x100   :  { %3132 = vmatprep.subr.mxu1 %v20311_v57  ;;  %2838 = vmatprep.mubr.f32.mxu1 %v24336_v2  ;;  %v19891_v57 = vld [vmem:[%s24330_s1 + $0x48] sm:$0xff]  ;;  %v4405_v13 = vand.u32 4294901760, %v4404_v7 }
 0x101   :  { %2922 = vmatprep.mubr.f32.mxu0 %v24336_v2  ;;  %3249 = vmatprep.subr.mxu0 %v20357_v16  ;;  %v4409_v11 = vand.u32 4294901760, %v20509_v6 }
 0x102   :  { %2840 = vmatmul.mubr.f32.gmra.mxu1 %v20267_v40  ;;  %2925 = vmatmul.mubr.f32.gmra.mxu0 %v20282_v44 }
 0x103   :  { %2997 = vmatprep.mubr.f32.mxu1 %v24336_v2  ;;  %3086 = vmatprep.mubr.f32.mxu0 %v24336_v2 }
 0x106   :  { %3001 = vmatmul.mubr.f32.vlgmr.msra.gmra.mxu1 %v20279_v43  ;;  %3088 = vmatmul.mubr.f32.vlgmr.msra.gmra.mxu0 %v20250_v35  ;;  %v3854_v43 = vsub.f32 %v3852_v41, %v3853_v42 }
 0x107   :  { %3134 = vmatpush1.msra.mxu1 %v20326_v54  ;;  %3251 = vmatpush1.msra.mxu0 %v20375_v21  ;;  %v4280_v54 = vsel %vm57_vm0, %v19891_v57, 0 }
 0x108   :  { %3428 = vmatprep.subr.mxu0 %v20369_v12  ;;  %3006 = vmatprep.mubr.f32.mxu1 %v24336_v2  ;;  %v3855_v45 = vand.u32 4294901760, %v3854_v43  ;;  %v20506_v63 = vand.u32 4294901760, %v4280_v54  ;;  %v4271_v12 = vsel %vm4267_vm4, %v4264_v18, %v4266_v17  ;;  %v5322_v18 = vpop.permute.xlu0 %5321 }
 0x109   :  { %3093 = vmatprep.mubr.f32.mxu0 %v24336_v2  ;;  %3342 = vmatprep.subr.mxu1 %v3341_v29  ;;  %v20548_v22 = vand.u32 4294901760, %v4271_v12 }
 0x10a   :  { %3010 = vmatmul.mubr.f32.gmra.mxu1 %v20295_v48  ;;  %3095 = vmatmul.mubr.f32.gmra.mxu0 %v20267_v40  ;;  %v20522_v10 = vsub.f32 %v4280_v54, %v20506_v63 }
 0x10b   :  { %3167 = vmatprep.mubr.f32.mxu1 %v24336_v2  ;;  %3284 = vmatprep.mubr.f32.mxu0 %v24336_v2 }
 0x10c   :  { %v20532_v15 = vand.u32 4294901760, %v20522_v10 }
 0x10e   :  { %3169 = vmatmul.mubr.f32.vlgmr.msra.gmra.mxu1 %v20250_v35  ;;  %3290 = vmatmul.mubr.f32.vlgmr.msra.gmra.mxu0 %v3289_v33  ;;  %v20449_v35 = vand.u32 4294901760, %v3206_v5  ;;  %v4363_v19 = vsub.f32 %v20522_v10, %v20532_v15 }
 0x10f   :  { %3348 = vmatpush1.msra.mxu1 %v3347_v37  ;;  %3431 = vmatpush1.msra.mxu0 %v3344_v26 }
 0x110   :  { %3512 = vmatprep.subr.mxu1 %v20357_v16  ;;  %3599 = vmatprep.subr.mxu0 %v3339_v23 }
 0x111   :  { %3174 = vmatprep.mubr.f32.mxu1 %v24336_v2  ;;  %3295 = vmatprep.mubr.f32.mxu0 %v24336_v2 }
 0x112   :  { %3176 = vmatmul.mubr.f32.gmra.mxu1 %v20267_v40  ;;  %3301 = vmatmul.mubr.f32.gmra.mxu0 %v20437_v39  ;;  %v3858_v40 = vsub.f32 %v3206_v5, %v20449_v35 }
 0x113   :  { %3381 = vmatprep.mubr.f32.mxu1 %v24336_v2  ;;  %3464 = vmatprep.mubr.f32.mxu0 %v24336_v2 }
 0x114   :  { %v3859_v44 = vand.u32 4294901760, %v3858_v40 }
 0x116   :  { %3383 = vmatmul.mubr.f32.vlgmr.msra.gmra.mxu1 %v20373_v20  ;;  %3467 = vmatmul.mubr.f32.vlgmr.msra.gmra.mxu0 %v20388_v24  ;;  %v3860_v48 = vsub.f32 %v3858_v40, %v3859_v44 }
 0x117   :  { %3514 = vmatpush1.msra.mxu1 %v20375_v21  ;;  %3603 = vmatpush1.msra.mxu0 %v3345_v28 }
 0x118   :  { %3682 = vmatprep.subr.mxu1 %v20357_v16  ;;  %3388 = vmatprep.mubr.f32.mxu1 %v24336_v2  ;;  %v3861_v51 = vand.u32 4294901760, %v3860_v48  ;;  %v4410_v16 = vsub.f32 %v20509_v6, %v4409_v11 }
 0x119   :  { %3472 = vmatprep.mubr.f32.mxu0 %v24336_v2  ;;  %3763 = vmatprep.subr.mxu0 %v20434_v38 }
 0x11a   :  { %3390 = vmatmul.mubr.f32.gmra.mxu1 %v20390_v25  ;;  %3475 = vmatmul.mubr.f32.gmra.mxu0 %v20405_v27 }
 0x11b   :  { %3547 = vmatprep.mubr.f32.mxu1 %v24336_v2  ;;  %3636 = vmatprep.mubr.f32.mxu0 %v24336_v2 }
 0x11e   :  { %3551 = vmatmul.mubr.f32.vlgmr.msra.gmra.mxu1 %v20402_v4  ;;  %3638 = vmatmul.mubr.f32.vlgmr.msra.gmra.mxu0 %v20373_v20 }
 0x11f   :  { %3684 = vmatpush1.msra.mxu1 %v20375_v21  ;;  %3765 = vmatpush1.msra.mxu0 %v20449_v35  ;;  %v4411_v21 = vand.u32 4294901760, %v4410_v16 }
 0x120   :  { %3942 = vmatprep.subr.mxu0 %v3852_v41  ;;  %3556 = vmatprep.mubr.f32.mxu1 %v24336_v2 }
 0x121   :  { %3643 = vmatprep.mubr.f32.mxu0 %v24336_v2  ;;  %3856 = vmatprep.subr.mxu1 %v3855_v45 }
 0x122   :  { %3560 = vmatmul.mubr.f32.gmra.mxu1 %v20418_v31  ;;  %3645 = vmatmul.mubr.f32.gmra.mxu0 %v20390_v25 }
 0x123   :  { %3717 = vmatprep.mubr.f32.mxu1 %v24336_v2  ;;  %3798 = vmatprep.mubr.f32.mxu0 %v24336_v2 }
 0x126   :  { %3719 = vmatmul.mubr.f32.vlgmr.msra.gmra.mxu1 %v20373_v20  ;;  %3804 = vmatmul.mubr.f32.vlgmr.msra.gmra.mxu0 %v3289_v33 }
 0x127   :  { %3862 = vmatpush1.msra.mxu1 %v3861_v51  ;;  %3945 = vmatpush1.msra.mxu0 %v3858_v40 }
 0x128   :  { %4026 = vmatprep.subr.mxu1 %v20434_v38  ;;  %4113 = vmatprep.subr.mxu0 %v3853_v42 }
 0x129   :  { %3724 = vmatprep.mubr.f32.mxu1 %v24336_v2  ;;  %3809 = vmatprep.mubr.f32.mxu0 %v24336_v2 }
 0x12a   :  { %3726 = vmatmul.mubr.f32.gmra.mxu1 %v20390_v25  ;;  %3815 = vmatmul.mubr.f32.gmra.mxu0 %v20437_v39 }
 0x12b   :  { %3895 = vmatprep.mubr.f32.mxu1 %v24336_v2  ;;  %3978 = vmatprep.mubr.f32.mxu0 %v24336_v2 }
 0x12e   :  { %3897 = vmatmul.mubr.f32.vlgmr.msra.gmra.mxu1 %v20373_v20  ;;  %3981 = vmatmul.mubr.f32.vlgmr.msra.gmra.mxu0 %v20388_v24  ;;  %v20552_v24 = vand.u32 4294901760, %v4363_v19 }
 0x12f   :  { %4028 = vmatpush1.msra.mxu1 %v20449_v35  ;;  %4117 = vmatpush1.msra.mxu0 %v3859_v44 }
 0x130   :  { %4196 = vmatprep.subr.mxu1 %v20434_v38  ;;  %3902 = vmatprep.mubr.f32.mxu1 %v24336_v2 }
 0x131   :  { %3986 = vmatprep.mubr.f32.mxu0 %v24336_v2  ;;  %4313 = vmatprep.subr.mxu0 %v20480_v52 }
 0x132   :  { %3904 = vmatmul.mubr.f32.gmra.mxu1 %v20390_v25  ;;  %3989 = vmatmul.mubr.f32.gmra.mxu0 %v20405_v27  ;;  %v20567_v27 = vand.u32 4294901760, %v4270_v1 }
 0x133   :  { %4061 = vmatprep.mubr.f32.mxu1 %v24336_v2  ;;  %4150 = vmatprep.mubr.f32.mxu0 %v24336_v2 }
 0x136   :  { %4065 = vmatmul.mubr.f32.vlgmr.msra.gmra.mxu1 %v20402_v4  ;;  %4152 = vmatmul.mubr.f32.vlgmr.msra.gmra.mxu0 %v20373_v20 }
 0x137   :  { %4198 = vmatpush1.msra.mxu1 %v20449_v35  ;;  %4315 = vmatpush1.msra.mxu0 %v20496_v61 }
 0x138   :  { %4492 = vmatprep.subr.mxu0 %v4402_v58  ;;  %4070 = vmatprep.mubr.f32.mxu1 %v24336_v2 }
 0x139   :  { %4157 = vmatprep.mubr.f32.mxu0 %v24336_v2  ;;  %4406 = vmatprep.subr.mxu1 %v4405_v13 }
 0x13a   :  { %4074 = vmatmul.mubr.f32.gmra.mxu1 %v20418_v31  ;;  %4159 = vmatmul.mubr.f32.gmra.mxu0 %v20390_v25 }
 0x13b   :  { %4231 = vmatprep.mubr.f32.mxu1 %v24336_v2  ;;  %4348 = vmatprep.mubr.f32.mxu0 %v24336_v2 }
 0x13e   :  { %v137_v23 = vpop.f32.mrf.mxu0  ;;  %4233 = vmatmul.mubr.f32.vlgmr.msra.gmra.mxu1 %v20373_v20  ;;  %4354 = vmatmul.mubr.f32.vlgmr.msra.gmra.mxu0 %v20541_v9  ;;  %v20561_v20 = vsub.f32 %v4271_v12, %v20548_v22 }
 0x13f   :  { %4412 = vmatpush1.msra.mxu1 %v4411_v21  ;;  %4495 = vmatpush1.msra.mxu0 %v20509_v6 }
 0x140   :  { %4576 = vmatprep.subr.mxu1 %v20480_v52  ;;  %4663 = vmatprep.subr.mxu0 %v4403_v62  ;;  %v139_v26 = vpop.f32.mrf.mxu0  ;;  %v4917_v29 = vand.u32 4294901760, %v20561_v20 }
 0x141   :  { %4238 = vmatprep.mubr.f32.mxu1 %v24336_v2  ;;  %4359 = vmatprep.mubr.f32.mxu0 %v24336_v2 }
 0x142   :  { %v148_v4 = vpop.f32.mrf.mxu0  ;;  %4240 = vmatmul.mubr.f32.gmra.mxu1 %v20390_v25  ;;  %4365 = vmatmul.mubr.f32.gmra.mxu0 %v20552_v24  ;;  %v20574_v25 = vsub.f32 %v4270_v1, %v20567_v27  ;;  %v4918_v36 = vsub.f32 %v20561_v20, %v4917_v29 }
 0x143   :  { %4445 = vmatprep.mubr.f32.mxu1 %v24336_v2  ;;  %4528 = vmatprep.mubr.f32.mxu0 %v24336_v2 }
 0x144   :  { %v150_v28 = vpop.f32.mrf.mxu0  ;;  %v4923_v42 = vand.u32 4294901760, %v20574_v25  ;;  %v4919_v44 = vand.u32 4294901760, %v4918_v36 }
 0x146   :  { %v230_v30 = vpop.f32.mrf.mxu1  ;;  %v314_v31 = vpop.f32.mrf.mxu0  ;;  %4447 = vmatmul.mubr.f32.vlgmr.msra.gmra.mxu1 %v20494_v60  ;;  %4531 = vmatmul.mubr.f32.vlgmr.msra.gmra.mxu0 %v20504_v59  ;;  %v4924_v56 = vsub.f32 %v20574_v25, %v4923_v42 }
 0x147   :  { %v231_v32 = vadd.f32 %v230_v30, %v137_v23  ;;  %4578 = vmatpush1.msra.mxu1 %v20496_v61  ;;  %4667 = vmatpush1.msra.mxu0 %v4409_v11  ;;  %v19892_v11 = vld [vmem:[%s24330_s1 + $0x50] sm:$0xff] }
 0x148   :  { %4746 = vmatprep.subr.mxu1 %v20480_v52  ;;  %v232_v0 = vpop.f32.mrf.mxu1  ;;  %v316_v3 = vpop.f32.mrf.mxu0  ;;  %4452 = vmatprep.mubr.f32.mxu1 %v24336_v2  ;;  %v4925_v16 = vand.u32 4294901760, %v4924_v56 }
 0x149   :  { %v315_v33 = vadd.f32 %v314_v31, %v231_v32  ;;  %v233_v34 = vadd.f32 %v232_v0, %v139_v26  ;;  %4536 = vmatprep.mubr.f32.mxu0 %v24336_v2  ;;  %4827 = vmatprep.subr.mxu0 %v20548_v22  ;;  %v5341_v26 = vsel %vm57_vm0, %v19892_v11, 0  ;;  %v5330_v11 = vpop.permute.xlu0 %5329 }
 0x14a   :  { %v237_v37 = vpop.f32.mrf.mxu1  ;;  %v322_v38 = vpop.f32.mrf.mxu0  ;;  %4454 = vmatmul.mubr.f32.gmra.mxu1 %v20506_v63  ;;  %4539 = vmatmul.mubr.f32.gmra.mxu0 %v20522_v10 }
 0x14b   :  { %v317_v39 = vadd.f32 %v316_v3, %v233_v34  ;;  %v238_v41 = vadd.f32 %v237_v37, %v148_v4  ;;  %4611 = vmatprep.mubr.f32.mxu1 %v24336_v2  ;;  %4700 = vmatprep.mubr.f32.mxu0 %v24336_v2 }
 0x14c   :  { %v239_v5 = vpop.f32.mrf.mxu1  ;;  %v324_v35 = vpop.f32.mrf.mxu0 }
 0x14d   :  { %v323_v40 = vadd.f32 %v322_v38, %v238_v41  ;;  %v240_v43 = vadd.f32 %v239_v5, %v150_v28  ;;  %v5332_v28 = vsel %vm5331_vm5, %v5322_v18, %v5324_v49 }
 0x14e   :  { %v398_v45 = vpop.f32.mrf.mxu1  ;;  %v485_v46 = vpop.f32.mrf.mxu0  ;;  %4615 = vmatmul.mubr.f32.vlgmr.msra.gmra.mxu1 %v20519_v8  ;;  %4702 = vmatmul.mubr.f32.vlgmr.msra.gmra.mxu0 %v20494_v60  ;;  %v20637_v3 = vand.u32 4294901760, %v5332_v28 }
 0x14f   :  { %v325_v47 = vadd.f32 %v324_v35, %v240_v43  ;;  %v399_v48 = vadd.f32 %v398_v45, %v315_v33  ;;  %4748 = vmatpush1.msra.mxu1 %v20496_v61  ;;  %4829 = vmatpush1.msra.mxu0 %v20567_v27  ;;  %v5333_v61 = vsel %vm5331_vm5, %v5324_v49, %v20592_v50 }
 0x150   :  { %v400_v51 = vpop.f32.mrf.mxu1  ;;  %v487_v52 = vpop.f32.mrf.mxu0  ;;  %5006 = vmatprep.subr.mxu0 %v20561_v20  ;;  %4620 = vmatprep.mubr.f32.mxu1 %v24336_v2  ;;  %v20609_v17 = vand.u32 4294901760, %v5333_v61  ;;  %v20653_v35 = vsub.f32 %v5332_v28, %v20637_v3 }
 0x151   :  { %v486_v53 = vadd.f32 %v485_v46, %v399_v48  ;;  %v401_v55 = vadd.f32 %v400_v51, %v317_v39  ;;  %4707 = vmatprep.mubr.f32.mxu0 %v24336_v2  ;;  %4920 = vmatprep.subr.mxu1 %v4919_v44 }
 0x152   :  { %v407_v57 = vpop.f32.mrf.mxu1  ;;  %v492_v58 = vpop.f32.mrf.mxu0  ;;  %4624 = vmatmul.mubr.f32.gmra.mxu1 %v20532_v15  ;;  %4709 = vmatmul.mubr.f32.gmra.mxu0 %v20506_v63  ;;  %v20629_v31 = vsub.f32 %v5333_v61, %v20609_v17 }
 0x153   :  { %v488_v54 = vadd.f32 %v487_v52, %v401_v55  ;;  %v408_v62 = vadd.f32 %v407_v57, %v323_v40  ;;  %4781 = vmatprep.mubr.f32.mxu1 %v24336_v2  ;;  %4862 = vmatprep.mubr.f32.mxu0 %v24336_v2 }
 0x154   :  { %v409_v6 = vpop.f32.mrf.mxu1  ;;  %v494_v7 = vpop.f32.mrf.mxu0  ;;  %v5467_v38 = vand.u32 4294901760, %v20629_v31 }
 0x155   :  { %v493_v13 = vadd.f32 %v492_v58, %v408_v62  ;;  %v410_v14 = vadd.f32 %v409_v6, %v325_v47 }
 0x156   :  { %v566_v19 = vpop.f32.mrf.mxu1  ;;  %v651_v12 = vpop.f32.mrf.mxu0  ;;  %4783 = vmatmul.mubr.f32.vlgmr.msra.gmra.mxu1 %v20494_v60  ;;  %4868 = vmatmul.mubr.f32.vlgmr.msra.gmra.mxu0 %v20541_v9  ;;  %v19893_v9 = vld [vmem:[%s24330_s1 + $0x58] sm:$0xff]  ;;  %v5468_v46 = vsub.f32 %v20629_v31, %v5467_v38 }
 0x157   :  { %v495_v21 = vadd.f32 %v494_v7, %v410_v14  ;;  %v20613_v23 = vadd.f32 %v566_v19, %v486_v53  ;;  %4926 = vmatpush1.msra.mxu1 %v4925_v16  ;;  %5009 = vmatpush1.msra.mxu0 %v20574_v25  ;;  %v5344_v33 = vsel %vm57_vm0, %v19893_v9, 0  ;;  %v5328_v14 = vpop.permute.xlu1 %5327 }
 0x158   :  { %5090 = vmatprep.subr.mxu1 %v20548_v22  ;;  %5177 = vmatprep.subr.mxu0 %v4917_v29  ;;  %v568_v1 = vpop.f32.mrf.mxu1  ;;  %v653_v4 = vpop.f32.mrf.mxu0  ;;  %v20633_v29 = vand.u32 4294901760, %v5341_v26  ;;  %v20650_v5 = vand.u32 4294901760, %v5344_v33  ;;  %v5469_v57 = vand.u32 4294901760, %v5468_v46 }
 0x159   :  { %v20624_v30 = vadd.f32 %v568_v1, %v488_v54  ;;  %4788 = vmatprep.mubr.f32.mxu1 %v24336_v2  ;;  %4873 = vmatprep.mubr.f32.mxu0 %v24336_v2 }
 0x15a   :  { %v573_v32 = vpop.f32.mrf.mxu1  ;;  %v662_v20 = vpop.f32.mrf.mxu0  ;;  %4790 = vmatmul.mubr.f32.gmra.mxu1 %v20506_v63  ;;  %4879 = vmatmul.mubr.f32.gmra.mxu0 %v20552_v24  ;;  %v20648_v41 = vsub.f32 %v5341_v26, %v20633_v29  ;;  %v20671_v25 = vsub.f32 %v5344_v33, %v20650_v5  ;;  %v5335_v26 = vsel %vm5331_vm5, %v5328_v14, %v5330_v11 }
 0x15b   :  { %v20635_v0 = vadd.f32 %v573_v32, %v493_v13  ;;  %4959 = vmatprep.mubr.f32.mxu1 %v24336_v2  ;;  %5042 = vmatprep.mubr.f32.mxu0 %v24336_v2  ;;  %v20700_v33 = vand.u32 4294901760, %v5335_v26 }
 0x15c   :  { %v575_v34 = vpop.f32.mrf.mxu1  ;;  %v664_v36 = vpop.f32.mrf.mxu0  ;;  %v20681_v54 = vand.u32 4294901760, %v20671_v25 }
 0x15d   :  { %v20642_v37 = vadd.f32 %v575_v34, %v495_v21 }
 0x15e   :  { %v744_v39 = vpop.f32.mrf.mxu1  ;;  %v828_v24 = vpop.f32.mrf.mxu0  ;;  %4961 = vmatmul.mubr.f32.vlgmr.msra.gmra.mxu1 %v20494_v60  ;;  %5045 = vmatmul.mubr.f32.vlgmr.msra.gmra.mxu0 %v20504_v59  ;;  %v5427_v21 = vsub.f32 %v20671_v25, %v20681_v54 }
 0x15f   :  { %v745_v40 = vadd.f32 %v744_v39, %v651_v12  ;;  %5092 = vmatpush1.msra.mxu1 %v20567_v27  ;;  %5181 = vmatpush1.msra.mxu0 %v4923_v42  ;;  %v5473_v42 = vand.u32 4294901760, %v20653_v35 }
 0x160   :  { %5260 = vmatprep.subr.mxu1 %v20548_v22  ;;  %v746_v43 = vpop.f32.mrf.mxu1  ;;  %v830_v44 = vpop.f32.mrf.mxu0  ;;  %4966 = vmatprep.mubr.f32.mxu1 %v24336_v2  ;;  %v20668_v22 = vand.u32 4294901760, %v20648_v41  ;;  %v20704_v39 = vand.u32 4294901760, %v5427_v21 }
 0x161   :  { %v829_v59 = vadd.f32 %v828_v24, %v745_v40  ;;  %v747_v45 = vadd.f32 %v746_v43, %v653_v4  ;;  %5050 = vmatprep.mubr.f32.mxu0 %v24336_v2  ;;  %5377 = vmatprep.subr.mxu0 %v20609_v17  ;;  %v5474_v62 = vsub.f32 %v20653_v35, %v5473_v42  ;;  %v6388_v21 = vpop.permute.xlu1 %6387 }
 0x162   :  { %v751_v47 = vpop.f32.mrf.mxu1  ;;  %v836_v48 = vpop.f32.mrf.mxu0  ;;  %4968 = vmatmul.mubr.f32.gmra.mxu1 %v20506_v63  ;;  %5053 = vmatmul.mubr.f32.gmra.mxu0 %v20522_v10  ;;  %v5416_v61 = vsub.f32 %v20648_v41, %v20668_v22 }
 0x163   :  { %v831_v49 = vadd.f32 %v830_v44, %v747_v45  ;;  %v752_v51 = vadd.f32 %v751_v47, %v662_v20  ;;  %5125 = vmatprep.mubr.f32.mxu1 %v24336_v2  ;;  %5214 = vmatprep.mubr.f32.mxu0 %v24336_v2  ;;  %v5475_v28 = vand.u32 4294901760, %v5474_v62  ;;  %v5334_v44 = vsel %vm5331_vm5, %v20592_v50, %v5328_v14 }
 0x164   :  { %v753_v52 = vpop.f32.mrf.mxu1  ;;  %v838_v53 = vpop.f32.mrf.mxu0 }
 0x165   :  { %v837_v55 = vadd.f32 %v836_v48, %v752_v51  ;;  %v754_v56 = vadd.f32 %v753_v52, %v664_v36 }
 0x166   :  { %v912_v10 = vpop.f32.mrf.mxu1  ;;  %v999_v58 = vpop.f32.mrf.mxu0  ;;  %5129 = vmatmul.mubr.f32.vlgmr.msra.gmra.mxu1 %v20519_v8  ;;  %5216 = vmatmul.mubr.f32.vlgmr.msra.gmra.mxu0 %v20494_v60 }
 0x167   :  { %v839_v6 = vadd.f32 %v838_v53, %v754_v56  ;;  %v913_v7 = vadd.f32 %v912_v10, %v829_v59  ;;  %5262 = vmatpush1.msra.mxu1 %v20567_v27  ;;  %5379 = vmatpush1.msra.mxu0 %v20637_v3  ;;  %v20693_v27 = vand.u32 4294901760, %v5416_v61 }
 0x168   :  { %5556 = vmatprep.subr.mxu0 %v20629_v31  ;;  %v914_v8 = vpop.f32.mrf.mxu1  ;;  %v1001_v13 = vpop.f32.mrf.mxu0  ;;  %5134 = vmatprep.mubr.f32.mxu1 %v24336_v2 }
 0x169   :  { %v1000_v16 = vadd.f32 %v999_v58, %v913_v7  ;;  %v915_v18 = vadd.f32 %v914_v8, %v831_v49  ;;  %5221 = vmatprep.mubr.f32.mxu0 %v24336_v2  ;;  %5470 = vmatprep.subr.mxu1 %v5469_v57 }
 0x16a   :  { %v921_v19 = vpop.f32.mrf.mxu1  ;;  %v1006_v12 = vpop.f32.mrf.mxu0  ;;  %5138 = vmatmul.mubr.f32.gmra.mxu1 %v20532_v15  ;;  %5223 = vmatmul.mubr.f32.gmra.mxu0 %v20506_v63 }
 0x16b   :  { %v1002_v1 = vadd.f32 %v1001_v13, %v915_v18  ;;  %v922_v4 = vadd.f32 %v921_v19, %v837_v55  ;;  %5295 = vmatprep.mubr.f32.mxu1 %v24336_v2  ;;  %5412 = vmatprep.mubr.f32.mxu0 %v24336_v2 }
 0x16c   :  { %v923_v9 = vpop.f32.mrf.mxu1  ;;  %v1008_v32 = vpop.f32.mrf.mxu0 }
 0x16d   :  { %v1007_v20 = vadd.f32 %v1006_v12, %v922_v4  ;;  %v924_v15 = vadd.f32 %v923_v9, %v839_v6 }
 0x16e   :  { %v1080_v34 = vpop.f32.mrf.mxu1  ;;  %v1171_v36 = vpop.f32.mrf.mxu0  ;;  %5297 = vmatmul.mubr.f32.vlgmr.msra.gmra.mxu1 %v20494_v60  ;;  %5418 = vmatmul.mubr.f32.vlgmr.msra.gmra.mxu0 %v20693_v27 }
 0x16f   :  { %v1009_v24 = vadd.f32 %v1008_v32, %v924_v15  ;;  %v20706_v40 = vadd.f32 %v1080_v34, %v1000_v16  ;;  %v1172_v43 = vadd.f32 %v1171_v36, %v20613_v23  ;;  %5476 = vmatpush1.msra.mxu1 %v5475_v28  ;;  %5559 = vmatpush1.msra.mxu0 %v20653_v35 }
 0x170   :  { %5640 = vmatprep.subr.mxu1 %v20609_v17  ;;  %5727 = vmatprep.subr.mxu0 %v5467_v38  ;;  %v1082_v60 = vpop.f32.mrf.mxu1  ;;  %v1173_v59 = vpop.f32.mrf.mxu0  ;;  %v20721_v23 = vsub.f32 %v5335_v26, %v20700_v33 }
 0x171   :  { %v20715_v45 = vadd.f32 %v1082_v60, %v1002_v1  ;;  %v1174_v46 = vadd.f32 %v1173_v59, %v20624_v30  ;;  %5302 = vmatprep.mubr.f32.mxu1 %v24336_v2  ;;  %5423 = vmatprep.mubr.f32.mxu0 %v24336_v2  ;;  %v20730_v30 = vand.u32 4294901760, %v5334_v44  ;;  %v20760_v26 = vpop.permute.xlu0 %6389 }
 0x172   :  { %v1087_v47 = vpop.f32.mrf.mxu1  ;;  %v1182_v50 = vpop.f32.mrf.mxu0  ;;  %5304 = vmatmul.mubr.f32.gmra.mxu1 %v20506_v63  ;;  %5429 = vmatmul.mubr.f32.gmra.mxu0 %v20704_v39  ;;  %v5981_v63 = vand.u32 4294901760, %v20721_v23  ;;  %v6397_v15 = vsel %vm6395_vm6, %v6388_v21, %v20760_v26 }
 0x173   :  { %v20725_v31 = vadd.f32 %v1087_v47, %v1007_v20  ;;  %v1183_v38 = vadd.f32 %v1182_v50, %v20635_v0  ;;  %5509 = vmatprep.mubr.f32.mxu1 %v24336_v2  ;;  %5592 = vmatprep.mubr.f32.mxu0 %v24336_v2  ;;  %v20742_v56 = vsub.f32 %v5334_v44, %v20730_v30  ;;  %v19894_v44 = vld [vmem:[%s24330_s1 + $0x60] sm:$0xff]  ;;  %v20777_v47 = vand.u32 4294901760, %v6397_v15  ;;  %v6386_v50 = vpop.permute.xlu1 %6385 }
 0x174   :  { %v1089_v48 = vpop.f32.mrf.mxu1  ;;  %v1184_v49 = vpop.f32.mrf.mxu0  ;;  %v5982_v35 = vsub.f32 %v20721_v23, %v5981_v63 }
 0x175   :  { %v20732_v51 = vadd.f32 %v1089_v48, %v1009_v24  ;;  %v1185_v52 = vadd.f32 %v1184_v49, %v20642_v37  ;;  %v5987_v11 = vand.u32 4294901760, %v20742_v56 }
 0x176   :  { %v1264_v53 = vpop.f32.mrf.mxu1  ;;  %v1348_v55 = vpop.f32.mrf.mxu0  ;;  %5511 = vmatmul.mubr.f32.vlgmr.msra.gmra.mxu1 %v20633_v29  ;;  %5595 = vmatmul.mubr.f32.vlgmr.msra.gmra.mxu0 %v20648_v41  ;;  %v5983_v14 = vand.u32 4294901760, %v5982_v35 }
 0x177   :  { %v1265_v0 = vadd.f32 %v1264_v53, %v1172_v43  ;;  %5642 = vmatpush1.msra.mxu1 %v20637_v3  ;;  %5731 = vmatpush1.msra.mxu0 %v5473_v42 }
 0x178   :  { %5810 = vmatprep.subr.mxu1 %v20609_v17  ;;  %v1266_v37 = vpop.f32.mrf.mxu1  ;;  %v1350_v57 = vpop.f32.mrf.mxu0  ;;  %5516 = vmatprep.mubr.f32.mxu1 %v24336_v2 }
 0x179   :  { %v1349_v10 = vadd.f32 %v1348_v55, %v1265_v0  ;;  %v1267_v58 = vadd.f32 %v1266_v37, %v1174_v46  ;;  %5600 = vmatprep.mubr.f32.mxu0 %v24336_v2  ;;  %5891 = vmatprep.subr.mxu0 %v20700_v33  ;;  %v6405_v55 = vsel %vm57_vm0, %v19894_v44, 0 }
 0x17a   :  { %v1271_v42 = vpop.f32.mrf.mxu1  ;;  %v1356_v61 = vpop.f32.mrf.mxu0  ;;  %5518 = vmatmul.mubr.f32.gmra.mxu1 %v20650_v5  ;;  %5603 = vmatmul.mubr.f32.gmra.mxu0 %v20671_v25  ;;  %v20803_v35 = vand.u32 4294901760, %v6405_v55 }
 0x17b   :  { %v1351_v17 = vadd.f32 %v1350_v57, %v1267_v58  ;;  %v1272_v62 = vadd.f32 %v1271_v42, %v1183_v38  ;;  %5675 = vmatprep.mubr.f32.mxu1 %v24336_v2  ;;  %5764 = vmatprep.mubr.f32.mxu0 %v24336_v2  ;;  %v6396_v57 = vsel %vm6395_vm6, %v6386_v50, %v6388_v21 }
 0x17c   :  { %v1273_v6 = vpop.f32.mrf.mxu1  ;;  %v1358_v7 = vpop.f32.mrf.mxu0  ;;  %v20799_v58 = vsub.f32 %v6397_v15, %v20777_v47 }
 0x17d   :  { %v1357_v8 = vadd.f32 %v1356_v61, %v1272_v62  ;;  %v1274_v13 = vadd.f32 %v1273_v6, %v1185_v52 }
 0x17e   :  { %v1432_v16 = vpop.f32.mrf.mxu1  ;;  %v1519_v18 = vpop.f32.mrf.mxu0  ;;  %5679 = vmatmul.mubr.f32.vlgmr.msra.gmra.mxu1 %v20668_v22  ;;  %5766 = vmatmul.mubr.f32.vlgmr.msra.gmra.mxu0 %v20633_v29 }
 0x17f   :  { %v1359_v19 = vadd.f32 %v1358_v7, %v1274_v13  ;;  %v1433_v12 = vadd.f32 %v1432_v16, %v1349_v10  ;;  %5812 = vmatpush1.msra.mxu1 %v20637_v3  ;;  %5893 = vmatpush1.msra.mxu0 %v20730_v30  ;;  %v5988_v3 = vsub.f32 %v20742_v56, %v5987_v11 }
 0x180   :  { %v1434_v1 = vpop.f32.mrf.mxu1  ;;  %v1521_v4 = vpop.f32.mrf.mxu0  ;;  %6070 = vmatprep.subr.mxu0 %v20721_v23  ;;  %5684 = vmatprep.mubr.f32.mxu1 %v24336_v2 }
 0x181   :  { %v1520_v28 = vadd.f32 %v1519_v18, %v1433_v12  ;;  %v1435_v9 = vadd.f32 %v1434_v1, %v1351_v17  ;;  %5771 = vmatprep.mubr.f32.mxu0 %v24336_v2  ;;  %5984 = vmatprep.subr.mxu1 %v5983_v14  ;;  %v5989_v46 = vand.u32 4294901760, %v5988_v3  ;;  %v20820_v14 = vsub.f32 %v6405_v55, %v20803_v35 }
 0x182   :  { %v1441_v32 = vpop.f32.mrf.mxu1  ;;  %v1526_v20 = vpop.f32.mrf.mxu0  ;;  %5688 = vmatmul.mubr.f32.gmra.mxu1 %v20681_v54  ;;  %5773 = vmatmul.mubr.f32.gmra.mxu0 %v20650_v5 }
 0x183   :  { %v1522_v34 = vadd.f32 %v1521_v4, %v1435_v9  ;;  %v1442_v36 = vadd.f32 %v1441_v32, %v1357_v8  ;;  %5845 = vmatprep.mubr.f32.mxu1 %v24336_v2  ;;  %5926 = vmatprep.mubr.f32.mxu0 %v24336_v2  ;;  %v6531_v8 = vand.u32 4294901760, %v20799_v58 }
 0x184   :  { %v1443_v24 = vpop.f32.mrf.mxu1  ;;  %v1528_v43 = vpop.f32.mrf.mxu0 }
 0x185   :  { %v1527_v60 = vadd.f32 %v1526_v20, %v1442_v36  ;;  %v1444_v59 = vadd.f32 %v1443_v24, %v1359_v19  ;;  %v6532_v1 = vsub.f32 %v20799_v58, %v6531_v8 }
 0x186   :  { %v1600_v38 = vpop.f32.mrf.mxu1  ;;  %v1685_v48 = vpop.f32.mrf.mxu0  ;;  %5847 = vmatmul.mubr.f32.vlgmr.msra.gmra.mxu1 %v20633_v29  ;;  %5932 = vmatmul.mubr.f32.vlgmr.msra.gmra.mxu0 %v20693_v27  ;;  %v19895_v27 = vld [vmem:[%s24330_s1 + $0x68] sm:$0xff] }
 0x187   :  { %v1529_v49 = vadd.f32 %v1528_v43, %v1444_v59  ;;  %v20781_v52 = vadd.f32 %v1600_v38, %v1520_v28  ;;  %v1686_v53 = vadd.f32 %v1685_v48, %v20706_v40  ;;  %5990 = vmatpush1.msra.mxu1 %v5989_v46  ;;  %6073 = vmatpush1.msra.mxu0 %v20742_v56  ;;  %v6408_v17 = vsel %vm57_vm0, %v19895_v27, 0  ;;  %v6392_v48 = vpop.permute.xlu0 %6391 }
 0x188   :  { %6154 = vmatprep.subr.mxu1 %v20700_v33  ;;  %6241 = vmatprep.subr.mxu0 %v5981_v63  ;;  %v1602_v0 = vpop.f32.mrf.mxu1  ;;  %v1687_v37 = vpop.f32.mrf.mxu0  ;;  %v20822_v16 = vand.u32 4294901760, %v6408_v17  ;;  %v20840_v56 = vand.u32 4294901760, %v20820_v14 }
 0x189   :  { %v20793_v10 = vadd.f32 %v1602_v0, %v1522_v34  ;;  %v1688_v40 = vadd.f32 %v1687_v37, %v20715_v45  ;;  %5852 = vmatprep.mubr.f32.mxu1 %v24336_v2  ;;  %5937 = vmatprep.mubr.f32.mxu0 %v24336_v2  ;;  %v20808_v45 = vand.u32 4294901760, %v6396_v57 }
 0x18a   :  { %v1607_v23 = vpop.f32.mrf.mxu1  ;;  %v1696_v63 = vpop.f32.mrf.mxu0  ;;  %5854 = vmatmul.mubr.f32.gmra.mxu1 %v20650_v5  ;;  %5943 = vmatmul.mubr.f32.gmra.mxu0 %v20704_v39  ;;  %v6480_v43 = vsub.f32 %v20820_v14, %v20840_v56 }
 0x18b   :  { %v20805_v42 = vadd.f32 %v1607_v23, %v1527_v60  ;;  %v1697_v61 = vadd.f32 %v1696_v63, %v20725_v31  ;;  %6023 = vmatprep.mubr.f32.mxu1 %v24336_v2  ;;  %6106 = vmatprep.mubr.f32.mxu0 %v24336_v2  ;;  %v20825_v18 = vsub.f32 %v6396_v57, %v20808_v45 }
 0x18c   :  { %v1609_v62 = vpop.f32.mrf.mxu1  ;;  %v1698_v6 = vpop.f32.mrf.mxu0  ;;  %v20865_v0 = vand.u32 4294901760, %v6480_v43 }
 0x18d   :  { %v20813_v7 = vadd.f32 %v1609_v62, %v1529_v49  ;;  %v1699_v39 = vadd.f32 %v1698_v6, %v20732_v51  ;;  %v6537_v28 = vand.u32 4294901760, %v20825_v18 }
 0x18e   :  { %v1778_v13 = vpop.f32.mrf.mxu1  ;;  %6025 = vmatmul.mubr.f32.vlgmr.msra.gmra.mxu1 %v20633_v29  ;;  %6109 = vmatmul.mubr.f32.vlgmr.msra.gmra.mxu0 %v20648_v41  ;;  %v1862_v31 = vpop.f32.mrf.mxu0 }
 0x18f   :  { %v1779_v19 = vadd.f32 %v1778_v13, %v1686_v53  ;;  %6156 = vmatpush1.msra.mxu1 %v20730_v30  ;;  %6245 = vmatpush1.msra.mxu0 %v5987_v11  ;;  %v20843_v11 = vsub.f32 %v6408_v17, %v20822_v16  ;;  %v6538_v60 = vsub.f32 %v20825_v18, %v6537_v28 }
 0x190   :  { %6324 = vmatprep.subr.mxu1 %v20700_v33  ;;  %v1780_v51 = vpop.f32.mrf.mxu1  ;;  %6030 = vmatprep.mubr.f32.mxu1 %v24336_v2  ;;  %v1864_v41 = vpop.f32.mrf.mxu0 }
 0x191   :  { %v1781_v12 = vadd.f32 %v1780_v51, %v1688_v40  ;;  %v1863_v21 = vadd.f32 %v1862_v31, %v1779_v19  ;;  %6114 = vmatprep.mubr.f32.mxu0 %v24336_v2  ;;  %6441 = vmatprep.subr.mxu0 %v20777_v47  ;;  %v20853_v44 = vand.u32 4294901760, %v20843_v11  ;;  %v6539_v23 = vand.u32 4294901760, %v6538_v60 }
 0x192   :  { %v1785_v4 = vpop.f32.mrf.mxu1  ;;  %6032 = vmatmul.mubr.f32.gmra.mxu1 %v20650_v5  ;;  %6117 = vmatmul.mubr.f32.gmra.mxu0 %v20671_v25  ;;  %v1870_v33 = vpop.f32.mrf.mxu0  ;;  %v6533_v25 = vand.u32 4294901760, %v6532_v1 }
 0x193   :  { %v1786_v9 = vadd.f32 %v1785_v4, %v1697_v61  ;;  %v1865_v3 = vadd.f32 %v1864_v41, %v1781_v12  ;;  %6189 = vmatprep.mubr.f32.mxu1 %v24336_v2  ;;  %6278 = vmatprep.mubr.f32.mxu0 %v24336_v2  ;;  %v6491_v37 = vsub.f32 %v20843_v11, %v20853_v44 }
 0x194   :  { %v1787_v32 = vpop.f32.mrf.mxu1  ;;  %v1872_v20 = vpop.f32.mrf.mxu0 }
 0x195   :  { %v1788_v15 = vadd.f32 %v1787_v32, %v1699_v39  ;;  %v1871_v34 = vadd.f32 %v1870_v33, %v1786_v9  ;;  %v20876_v13 = vand.u32 4294901760, %v6491_v37  ;;  %v7452_v37 = vpop.permute.xlu0 %7451 }
 0x196   :  { %v1946_v36 = vpop.f32.mrf.mxu1  ;;  %6193 = vmatmul.mubr.f32.vlgmr.msra.gmra.mxu1 %v20668_v22  ;;  %6280 = vmatmul.mubr.f32.vlgmr.msra.gmra.mxu0 %v20633_v29  ;;  %v2033_v24 = vpop.f32.mrf.mxu0 }
 0x197   :  { %v1873_v59 = vadd.f32 %v1872_v20, %v1788_v15  ;;  %v1947_v46 = vadd.f32 %v1946_v36, %v1863_v21  ;;  %6326 = vmatpush1.msra.mxu1 %v20730_v30  ;;  %6443 = vmatpush1.msra.mxu0 %v20808_v45  ;;  %v6394_v22 = vpop.permute.xlu1 %6393 }
 0x198   :  { %6620 = vmatprep.subr.mxu0 %v20799_v58  ;;  %v1948_v50 = vpop.f32.mrf.mxu1  ;;  %6198 = vmatprep.mubr.f32.mxu1 %v24336_v2  ;;  %v2035_v38 = vpop.f32.mrf.mxu0  ;;  %v6399_v57 = vsel %vm6395_vm6, %v6392_v48, %v6394_v22 }
 0x199   :  { %v1949_v49 = vadd.f32 %v1948_v50, %v1865_v3  ;;  %v2034_v53 = vadd.f32 %v2033_v24, %v1947_v46  ;;  %6285 = vmatprep.mubr.f32.mxu0 %v24336_v2  ;;  %6534 = vmatprep.subr.mxu1 %v6533_v25  ;;  %v20872_v62 = vand.u32 4294901760, %v6399_v57 }
 0x19a   :  { %v1955_v55 = vpop.f32.mrf.mxu1  ;;  %6202 = vmatmul.mubr.f32.gmra.mxu1 %v20681_v54  ;;  %6287 = vmatmul.mubr.f32.gmra.mxu0 %v20650_v5  ;;  %v2040_v30 = vpop.f32.mrf.mxu0 }
 0x19b   :  { %v1956_v27 = vadd.f32 %v1955_v55, %v1871_v34  ;;  %v2036_v40 = vadd.f32 %v2035_v38, %v1949_v49  ;;  %6359 = vmatprep.mubr.f32.mxu1 %v24336_v2  ;;  %6476 = vmatprep.mubr.f32.mxu0 %v24336_v2  ;;  %v20891_v21 = vsub.f32 %v6399_v57, %v20872_v62  ;;  %v20928_v57 = vpop.permute.xlu1 %7453 }
 0x19c   :  { %v1957_v63 = vpop.f32.mrf.mxu1  ;;  %v2042_v61 = vpop.f32.mrf.mxu0 }
 0x19d   :  { %v1958_v54 = vadd.f32 %v1957_v63, %v1873_v59  ;;  %v2041_v17 = vadd.f32 %v2040_v30, %v1956_v27  ;;  %v7045_v3 = vand.u32 4294901760, %v20891_v21 }
 0x19e   :  { %v2114_v6 = vpop.f32.mrf.mxu1  ;;  %6361 = vmatmul.mubr.f32.vlgmr.msra.gmra.mxu1 %v20633_v29  ;;  %6482 = vmatmul.mubr.f32.vlgmr.msra.gmra.mxu0 %v20865_v0  ;;  %v2227_v39 = vpop.f32.mrf.mxu0  ;;  %v6398_v29 = vsel %vm6395_vm6, %v20760_v26, %v6392_v48 }
 0x19f   :  { %v2043_v31 = vadd.f32 %v2042_v61, %v1958_v54  ;;  %v20878_v19 = vadd.f32 %v2114_v6, %v2034_v53  ;;  %6540 = vmatpush1.msra.mxu1 %v6539_v23  ;;  %6623 = vmatpush1.msra.mxu0 %v20825_v18  ;;  %v20899_v26 = vand.u32 4294901760, %v6398_v29  ;;  %v7046_v18 = vsub.f32 %v20891_v21, %v7045_v3 }
 0x1a0   :  { %6704 = vmatprep.subr.mxu1 %v20777_v47  ;;  %6791 = vmatprep.subr.mxu0 %v6531_v8  ;;  %v2116_v51 = vpop.f32.mrf.mxu1  ;;  %v2229_v41 = vpop.f32.mrf.mxu0 }
 0x1a1   :  { %v20886_v12 = vadd.f32 %v2116_v51, %v2036_v40  ;;  %6366 = vmatprep.mubr.f32.mxu1 %v24336_v2  ;;  %6487 = vmatprep.mubr.f32.mxu0 %v24336_v2  ;;  %v20910_v15 = vsub.f32 %v6398_v29, %v20899_v26  ;;  %v7047_v48 = vand.u32 4294901760, %v7046_v18 }
 0x1a2   :  { %v2121_v1 = vpop.f32.mrf.mxu1  ;;  %6368 = vmatmul.mubr.f32.gmra.mxu1 %v20650_v5  ;;  %6493 = vmatmul.mubr.f32.gmra.mxu0 %v20876_v13  ;;  %v2238_v58 = vpop.f32.mrf.mxu0 }
 0x1a3   :  { %v20895_v8 = vadd.f32 %v2121_v1, %v2041_v17  ;;  %6573 = vmatprep.mubr.f32.mxu1 %v24336_v2  ;;  %6656 = vmatprep.mubr.f32.mxu0 %v24336_v2  ;;  %v7051_v22 = vand.u32 4294901760, %v20910_v15  ;;  %v7461_v17 = vsel %vm7459_vm7, %v7452_v37, %v20928_v57 }
 0x1a4   :  { %v2123_v4 = vpop.f32.mrf.mxu1  ;;  %v2240_v33 = vpop.f32.mrf.mxu0 }
 0x1a5   :  { %v20901_v9 = vadd.f32 %v2123_v4, %v2043_v31  ;;  %v7052_v23 = vsub.f32 %v20910_v15, %v7051_v22  ;;  %v20945_v4 = vand.u32 4294901760, %v7461_v17 }
 0x1a6   :  { %v2320_v32 = vpop.f32.mrf.mxu1  ;;  %6575 = vmatmul.mubr.f32.vlgmr.msra.gmra.mxu1 %v20803_v35  ;;  %6659 = vmatmul.mubr.f32.vlgmr.msra.gmra.mxu0 %v20820_v14  ;;  %v2404_v5 = vpop.f32.mrf.mxu0 }
 0x1a7   :  { %v2321_v20 = vadd.f32 %v2320_v32, %v2227_v39  ;;  %6706 = vmatpush1.msra.mxu1 %v20808_v45  ;;  %6795 = vmatpush1.msra.mxu0 %v6537_v28 }
 0x1a8   :  { %6874 = vmatprep.subr.mxu1 %v20777_v47  ;;  %v2322_v34 = vpop.f32.mrf.mxu1  ;;  %6580 = vmatprep.mubr.f32.mxu1 %v24336_v2  ;;  %v2406_v25 = vpop.f32.mrf.mxu0 }
 0x1a9   :  { %v2323_v36 = vadd.f32 %v2322_v34, %v2229_v41  ;;  %v2405_v24 = vadd.f32 %v2404_v5, %v2321_v20  ;;  %6664 = vmatprep.mubr.f32.mxu0 %v24336_v2  ;;  %6955 = vmatprep.subr.mxu0 %v20872_v62  ;;  %v19896_v41 = vld [vmem:[%s24330_s1 + $0x70] sm:$0xff] }
 0x1aa   :  { %v2327_v28 = vpop.f32.mrf.mxu1  ;;  %6582 = vmatmul.mubr.f32.gmra.mxu1 %v20822_v16  ;;  %6667 = vmatmul.mubr.f32.gmra.mxu0 %v20843_v11  ;;  %v2412_v47 = vpop.f32.mrf.mxu0 }
 0x1ab   :  { %v2328_v43 = vadd.f32 %v2327_v28, %v2238_v58  ;;  %v2407_v60 = vadd.f32 %v2406_v25, %v2323_v36  ;;  %6739 = vmatprep.mubr.f32.mxu1 %v24336_v2  ;;  %6828 = vmatprep.mubr.f32.mxu0 %v24336_v2  ;;  %v7053_v58 = vand.u32 4294901760, %v7052_v23  ;;  %v7469_v25 = vsel %vm57_vm0, %v19896_v41, 0 }
 0x1ac   :  { %v2329_v59 = vpop.f32.mrf.mxu1  ;;  %v2414_v46 = vpop.f32.mrf.mxu0 }
 0x1ad   :  { %v2330_v50 = vadd.f32 %v2329_v59, %v2240_v33  ;;  %v2413_v38 = vadd.f32 %v2412_v47, %v2328_v43  ;;  %v7450_v33 = vpop.permute.xlu0 %7449  ;;  %v20964_v43 = vsub.f32 %v7461_v17, %v20945_v4 }
 0x1ae   :  { %v2488_v49 = vpop.f32.mrf.mxu1  ;;  %6743 = vmatmul.mubr.f32.vlgmr.msra.gmra.mxu1 %v20840_v56  ;;  %6830 = vmatmul.mubr.f32.vlgmr.msra.gmra.mxu0 %v20803_v35  ;;  %v2575_v53 = vpop.f32.mrf.mxu0  ;;  %v7460_v18 = vsel %vm7459_vm7, %v7450_v33, %v7452_v37 }
 0x1af   :  { %v2415_v55 = vadd.f32 %v2414_v46, %v2330_v50  ;;  %v2489_v30 = vadd.f32 %v2488_v49, %v2405_v24  ;;  %6876 = vmatpush1.msra.mxu1 %v20808_v45  ;;  %6957 = vmatpush1.msra.mxu0 %v20899_v26  ;;  %v20973_v46 = vand.u32 4294901760, %v7460_v18 }
 0x1b0   :  { %v2490_v27 = vpop.f32.mrf.mxu1  ;;  %7134 = vmatprep.subr.mxu0 %v20891_v21  ;;  %6748 = vmatprep.mubr.f32.mxu1 %v24336_v2  ;;  %v2577_v40 = vpop.f32.mrf.mxu0 }
 0x1b1   :  { %v2491_v63 = vadd.f32 %v2490_v27, %v2407_v60  ;;  %v2576_v61 = vadd.f32 %v2575_v53, %v2489_v30  ;;  %6835 = vmatprep.mubr.f32.mxu0 %v24336_v2  ;;  %7048 = vmatprep.subr.mxu1 %v7047_v48  ;;  %v20968_v60 = vand.u32 4294901760, %v7469_v25  ;;  %v7595_v53 = vand.u32 4294901760, %v20964_v43 }
 0x1b2   :  { %v2497_v45 = vpop.f32.mrf.mxu1  ;;  %6752 = vmatmul.mubr.f32.gmra.mxu1 %v20853_v44  ;;  %6837 = vmatmul.mubr.f32.gmra.mxu0 %v20822_v16  ;;  %v2582_v54 = vpop.f32.mrf.mxu0 }
 0x1b3   :  { %v2498_v6 = vadd.f32 %v2497_v45, %v2413_v38  ;;  %v2578_v39 = vadd.f32 %v2577_v40, %v2491_v63  ;;  %6909 = vmatprep.mubr.f32.mxu1 %v24336_v2  ;;  %6990 = vmatprep.mubr.f32.mxu0 %v24336_v2  ;;  %v20985_v30 = vsub.f32 %v7469_v25, %v20968_v60 }
 0x1b4   :  { %v2499_v31 = vpop.f32.mrf.mxu1  ;;  %v2584_v51 = vpop.f32.mrf.mxu0 }
 0x1b5   :  { %v2500_v29 = vadd.f32 %v2499_v31, %v2415_v55  ;;  %v2583_v1 = vadd.f32 %v2582_v54, %v2498_v6 }
 0x1b6   :  { %v2656_v32 = vpop.f32.mrf.mxu1  ;;  %6911 = vmatmul.mubr.f32.vlgmr.msra.gmra.mxu1 %v20803_v35  ;;  %6996 = vmatmul.mubr.f32.vlgmr.msra.gmra.mxu0 %v20865_v0  ;;  %v2741_v5 = vpop.f32.mrf.mxu0  ;;  %v19897_v0 = vld [vmem:[%s24330_s1 + $0x78] sm:$0xff] }
 0x1b7   :  { %v2585_v20 = vadd.f32 %v2584_v51, %v2500_v29  ;;  %v2657_v34 = vadd.f32 %v2656_v32, %v2576_v61  ;;  %7054 = vmatpush1.msra.mxu1 %v7053_v58  ;;  %7137 = vmatpush1.msra.mxu0 %v20910_v15  ;;  %v7472_v50 = vsel %vm57_vm0, %v19897_v0, 0  ;;  %v21008_v15 = vand.u32 4294901760, %v20985_v30 }
 0x1b8   :  { %7218 = vmatprep.subr.mxu1 %v20872_v62  ;;  %7305 = vmatprep.subr.mxu0 %v7045_v3  ;;  %v2658_v36 = vpop.f32.mrf.mxu1  ;;  %v2743_v24 = vpop.f32.mrf.mxu0  ;;  %v20987_v37 = vand.u32 4294901760, %v7472_v50 }
 0x1b9   :  { %v20959_v28 = vadd.f32 %v2657_v34, %v20781_v52  ;;  %v2659_v47 = vadd.f32 %v2658_v36, %v2578_v39  ;;  %6916 = vmatprep.mubr.f32.mxu1 %v24336_v2  ;;  %7001 = vmatprep.mubr.f32.mxu0 %v24336_v2  ;;  %v7544_v58 = vsub.f32 %v20985_v30, %v21008_v15  ;;  %v7456_v36 = vpop.permute.xlu1 %7455 }
 0x1ba   :  { %v2663_v21 = vpop.f32.mrf.mxu1  ;;  %6918 = vmatmul.mubr.f32.gmra.mxu1 %v20822_v16  ;;  %7007 = vmatmul.mubr.f32.gmra.mxu0 %v20876_v13  ;;  %v2752_v3 = vpop.f32.mrf.mxu0 }
 0x1bb   :  { %v20971_v59 = vadd.f32 %v2659_v47, %v20793_v10  ;;  %v2664_v52 = vadd.f32 %v2663_v21, %v2583_v1  ;;  %7087 = vmatprep.mubr.f32.mxu1 %v24336_v2  ;;  %7170 = vmatprep.mubr.f32.mxu0 %v24336_v2  ;;  %v21033_v47 = vand.u32 4294901760, %v7544_v58 }
 0x1bc   :  { %v2665_v38 = vpop.f32.mrf.mxu1  ;;  %v2754_v48 = vpop.f32.mrf.mxu0 }
 0x1bd   :  { %v20979_v49 = vadd.f32 %v2664_v52, %v20805_v42  ;;  %v2666_v13 = vadd.f32 %v2665_v38, %v2585_v20  ;;  %v20993_v42 = vsub.f32 %v7460_v18, %v20973_v46 }
 0x1be   :  { %v2834_v55 = vpop.f32.mrf.mxu1  ;;  %7089 = vmatmul.mubr.f32.vlgmr.msra.gmra.mxu1 %v20803_v35  ;;  %7173 = vmatmul.mubr.f32.vlgmr.msra.gmra.mxu0 %v20820_v14  ;;  %v2918_v10 = vpop.f32.mrf.mxu0 }
 0x1bf   :  { %v20990_v27 = vadd.f32 %v2666_v13, %v20813_v7  ;;  %v2835_v40 = vadd.f32 %v2834_v55, %v2741_v5  ;;  %7220 = vmatpush1.msra.mxu1 %v20899_v26  ;;  %7309 = vmatpush1.msra.mxu0 %v7051_v22  ;;  %v7596_v7 = vsub.f32 %v20964_v43, %v7595_v53  ;;  %v7601_v54 = vand.u32 4294901760, %v20993_v42 }
 0x1c0   :  { %7388 = vmatprep.subr.mxu1 %v20872_v62  ;;  %v2836_v14 = vpop.f32.mrf.mxu1  ;;  %7094 = vmatprep.mubr.f32.mxu1 %v24336_v2  ;;  %v2920_v23 = vpop.f32.mrf.mxu0  ;;  %v21011_v22 = vsub.f32 %v7472_v50, %v20987_v37 }
 0x1c1   :  { %v2837_v63 = vadd.f32 %v2836_v14, %v2743_v24  ;;  %v2919_v61 = vadd.f32 %v2918_v10, %v2835_v40  ;;  %7178 = vmatprep.mubr.f32.mxu0 %v24336_v2  ;;  %7505 = vmatprep.subr.mxu0 %v20945_v4  ;;  %v7602_v32 = vsub.f32 %v20993_v42, %v7601_v54 }
 0x1c2   :  { %v2841_v45 = vpop.f32.mrf.mxu1  ;;  %7096 = vmatmul.mubr.f32.gmra.mxu1 %v20822_v16  ;;  %7181 = vmatmul.mubr.f32.gmra.mxu0 %v20843_v11  ;;  %v2926_v62 = vpop.f32.mrf.mxu0  ;;  %v7597_v11 = vand.u32 4294901760, %v7596_v7  ;;  %v21021_v33 = vand.u32 4294901760, %v21011_v22  ;;  %v7462_v7 = vsel %vm7459_vm7, %v20928_v57, %v7456_v36 }
 0x1c3   :  { %v2842_v17 = vadd.f32 %v2841_v45, %v2752_v3  ;;  %v2921_v6 = vadd.f32 %v2920_v23, %v2837_v63  ;;  %7253 = vmatprep.mubr.f32.mxu1 %v24336_v2  ;;  %7342 = vmatprep.mubr.f32.mxu0 %v24336_v2  ;;  %v7603_v38 = vand.u32 4294901760, %v7602_v32 }
 0x1c4   :  { %v2843_v39 = vpop.f32.mrf.mxu1  ;;  %v2928_v31 = vpop.f32.mrf.mxu0  ;;  %v7555_v21 = vsub.f32 %v21011_v22, %v21021_v33 }
 0x1c5   :  { %v2844_v51 = vadd.f32 %v2843_v39, %v2754_v48  ;;  %v2927_v41 = vadd.f32 %v2926_v62, %v2842_v17 }
 0x1c6   :  { %v3002_v29 = vpop.f32.mrf.mxu1  ;;  %7257 = vmatmul.mubr.f32.vlgmr.msra.gmra.mxu1 %v20840_v56  ;;  %7344 = vmatmul.mubr.f32.vlgmr.msra.gmra.mxu0 %v20803_v35  ;;  %v3089_v1 = vpop.f32.mrf.mxu0  ;;  %v21044_v23 = vand.u32 4294901760, %v7555_v21 }
 0x1c7   :  { %v2929_v5 = vadd.f32 %v2928_v31, %v2844_v51  ;;  %v3003_v20 = vadd.f32 %v3002_v29, %v2919_v61  ;;  %7390 = vmatpush1.msra.mxu1 %v20899_v26  ;;  %7507 = vmatpush1.msra.mxu0 %v20973_v46  ;;  %v7458_v56 = vpop.permute.xlu0 %7457 }
 0x1c8   :  { %7684 = vmatprep.subr.mxu0 %v20964_v43  ;;  %v3004_v34 = vpop.f32.mrf.mxu1  ;;  %7262 = vmatprep.mubr.f32.mxu1 %v24336_v2  ;;  %v3091_v25 = vpop.f32.mrf.mxu0  ;;  %v7463_v3 = vsel %vm7459_vm7, %v7456_v36, %v7458_v56 }
 0x1c9   :  { %v3005_v24 = vadd.f32 %v3004_v34, %v2921_v6  ;;  %v3090_v18 = vadd.f32 %v3089_v1, %v3003_v20  ;;  %7349 = vmatprep.mubr.f32.mxu0 %v24336_v2  ;;  %7598 = vmatprep.subr.mxu1 %v7597_v11  ;;  %v21040_v10 = vand.u32 4294901760, %v7463_v3 }
 0x1ca   :  { %v3011_v0 = vpop.f32.mrf.mxu1  ;;  %7266 = vmatmul.mubr.f32.gmra.mxu1 %v20853_v44  ;;  %7351 = vmatmul.mubr.f32.gmra.mxu0 %v20822_v16  ;;  %v3096_v26 = vpop.f32.mrf.mxu0 }
 0x1cb   :  { %v3012_v52 = vadd.f32 %v3011_v0, %v2927_v41  ;;  %v3092_v50 = vadd.f32 %v3091_v25, %v3005_v24  ;;  %7423 = vmatprep.mubr.f32.mxu1 %v24336_v2  ;;  %7540 = vmatprep.mubr.f32.mxu0 %v24336_v2  ;;  %v21058_v6 = vsub.f32 %v7463_v3, %v21040_v10 }
 0x1cc   :  { %v3013_v48 = vpop.f32.mrf.mxu1  ;;  %v3098_v13 = vpop.f32.mrf.mxu0 }
 0x1cd   :  { %v3014_v44 = vadd.f32 %v3013_v48, %v2929_v5  ;;  %v3097_v55 = vadd.f32 %v3096_v26, %v3012_v52  ;;  %v21100_v48 = vpop.permute.xlu0 %8517 }
 0x1ce   :  { %v3170_v40 = vpop.f32.mrf.mxu1  ;;  %7425 = vmatmul.mubr.f32.vlgmr.msra.gmra.mxu1 %v20803_v35  ;;  %7546 = vmatmul.mubr.f32.vlgmr.msra.gmra.mxu0 %v21033_v47  ;;  %v3291_v14 = vpop.f32.mrf.mxu0 }
 0x1cf   :  { %v3099_v63 = vadd.f32 %v3098_v13, %v3014_v44  ;;  %v3171_v61 = vadd.f32 %v3170_v40, %v3090_v18  ;;  %7604 = vmatpush1.msra.mxu1 %v7603_v38  ;;  %7687 = vmatpush1.msra.mxu0 %v20993_v42  ;;  %v8516_v38 = vpop.permute.xlu1 %8515 }
 0x1d0   :  { %7768 = vmatprep.subr.mxu1 %v20945_v4  ;;  %7855 = vmatprep.subr.mxu0 %v7595_v53  ;;  %v3172_v45 = vpop.f32.mrf.mxu1  ;;  %v3293_v35 = vpop.f32.mrf.mxu0 }
 0x1d1   :  { %v21053_v62 = vadd.f32 %v3171_v61, %v20878_v19  ;;  %v3173_v17 = vadd.f32 %v3172_v45, %v3092_v50  ;;  %7430 = vmatprep.mubr.f32.mxu1 %v24336_v2  ;;  %7551 = vmatprep.mubr.f32.mxu0 %v24336_v2  ;;  %v21067_v19 = vand.u32 4294901760, %v7462_v7  ;;  %v8525_v61 = vsel %vm8523_vm8, %v8516_v38, %v21100_v48 }
 0x1d2   :  { %v3177_v39 = vpop.f32.mrf.mxu1  ;;  %7432 = vmatmul.mubr.f32.gmra.mxu1 %v20822_v16  ;;  %7557 = vmatmul.mubr.f32.gmra.mxu0 %v21044_v23  ;;  %v3302_v57 = vpop.f32.mrf.mxu0  ;;  %v8109_v16 = vand.u32 4294901760, %v21058_v6 }
 0x1d3   :  { %v21063_v43 = vadd.f32 %v3173_v17, %v20886_v12  ;;  %v3178_v53 = vadd.f32 %v3177_v39, %v3097_v55  ;;  %7637 = vmatprep.mubr.f32.mxu1 %v24336_v2  ;;  %7720 = vmatprep.mubr.f32.mxu0 %v24336_v2  ;;  %v19898_v39 = vld [vmem:[%s24330_s1 + $0x80] sm:$0xff] }
 0x1d4   :  { %v3179_v31 = vpop.f32.mrf.mxu1  ;;  %v3304_v51 = vpop.f32.mrf.mxu0 }
 0x1d5   :  { %v21070_v41 = vadd.f32 %v3178_v53, %v20895_v8  ;;  %v3180_v11 = vadd.f32 %v3179_v31, %v3099_v63  ;;  %v21082_v8 = vsub.f32 %v7462_v7, %v21067_v19 }
 0x1d6   :  { %v3384_v29 = vpop.f32.mrf.mxu1  ;;  %7639 = vmatmul.mubr.f32.vlgmr.msra.gmra.mxu1 %v20968_v60  ;;  %7723 = vmatmul.mubr.f32.vlgmr.msra.gmra.mxu0 %v20985_v30  ;;  %v3468_v12 = vpop.f32.mrf.mxu0 }
 0x1d7   :  { %v21076_v1 = vadd.f32 %v3180_v11, %v20901_v9  ;;  %v3385_v58 = vadd.f32 %v3384_v29, %v3291_v14  ;;  %7770 = vmatpush1.msra.mxu1 %v20973_v46  ;;  %7859 = vmatpush1.msra.mxu0 %v7601_v54  ;;  %v8110_v9 = vsub.f32 %v21058_v6, %v8109_v16  ;;  %v8115_v24 = vand.u32 4294901760, %v21082_v8  ;;  %v8514_v11 = vpop.permute.xlu1 %8513 }
 0x1d8   :  { %7938 = vmatprep.subr.mxu1 %v20945_v4  ;;  %v3386_v32 = vpop.f32.mrf.mxu1  ;;  %7644 = vmatprep.mubr.f32.mxu1 %v24336_v2  ;;  %v3470_v5 = vpop.f32.mrf.mxu0 }
 0x1d9   :  { %v3387_v20 = vadd.f32 %v3386_v32, %v3293_v35  ;;  %v3469_v56 = vadd.f32 %v3468_v12, %v3385_v58  ;;  %7728 = vmatprep.mubr.f32.mxu0 %v24336_v2  ;;  %8019 = vmatprep.subr.mxu0 %v21040_v10  ;;  %v8111_v26 = vand.u32 4294901760, %v8110_v9  ;;  %v8524_v9 = vsel %vm8523_vm8, %v8514_v11, %v8516_v38 }
 0x1da   :  { %v3391_v42 = vpop.f32.mrf.mxu1  ;;  %7646 = vmatmul.mubr.f32.gmra.mxu1 %v20987_v37  ;;  %7731 = vmatmul.mubr.f32.gmra.mxu0 %v21011_v22  ;;  %v3476_v4 = vpop.f32.mrf.mxu0 }
 0x1db   :  { %v3392_v54 = vadd.f32 %v3391_v42, %v3302_v57  ;;  %v3471_v34 = vadd.f32 %v3470_v5, %v3387_v20  ;;  %7803 = vmatprep.mubr.f32.mxu1 %v24336_v2  ;;  %7892 = vmatprep.mubr.f32.mxu0 %v24336_v2  ;;  %v8533_v5 = vsel %vm57_vm0, %v19898_v39, 0 }
 0x1dc   :  { %v3393_v25 = vpop.f32.mrf.mxu1  ;;  %v3478_v36 = vpop.f32.mrf.mxu0 }
 0x1dd   :  { %v3394_v18 = vadd.f32 %v3393_v25, %v3304_v51  ;;  %v3477_v0 = vadd.f32 %v3476_v4, %v3392_v54  ;;  %v21117_v51 = vand.u32 4294901760, %v8525_v61 }
 0x1de   :  { %v3552_v21 = vpop.f32.mrf.mxu1  ;;  %7807 = vmatmul.mubr.f32.vlgmr.msra.gmra.mxu1 %v21008_v15  ;;  %7894 = vmatmul.mubr.f32.vlgmr.msra.gmra.mxu0 %v20968_v60  ;;  %v3639_v3 = vpop.f32.mrf.mxu0 }
 0x1df   :  { %v3479_v52 = vadd.f32 %v3478_v36, %v3394_v18  ;;  %v3553_v50 = vadd.f32 %v3552_v21, %v3469_v56  ;;  %7940 = vmatpush1.msra.mxu1 %v20973_v46  ;;  %8021 = vmatpush1.msra.mxu0 %v21067_v19  ;;  %v8116_v46 = vsub.f32 %v21082_v8, %v8115_v24  ;;  %v21145_v36 = vand.u32 4294901760, %v8524_v9 }
 0x1e0   :  { %v3554_v13 = vpop.f32.mrf.mxu1  ;;  %8198 = vmatprep.subr.mxu0 %v21058_v6  ;;  %7812 = vmatprep.mubr.f32.mxu1 %v24336_v2  ;;  %v3641_v44 = vpop.f32.mrf.mxu0  ;;  %v21136_v54 = vsub.f32 %v8525_v61, %v21117_v51 }
 0x1e1   :  { %v3555_v55 = vadd.f32 %v3554_v13, %v3471_v34  ;;  %v3640_v40 = vadd.f32 %v3639_v3, %v3553_v50  ;;  %7899 = vmatprep.mubr.f32.mxu0 %v24336_v2  ;;  %8112 = vmatprep.subr.mxu1 %v8111_v26  ;;  %v8117_v31 = vand.u32 4294901760, %v8116_v46  ;;  %v21140_v34 = vand.u32 4294901760, %v8533_v5 }
 0x1e2   :  { %v3561_v14 = vpop.f32.mrf.mxu1  ;;  %7816 = vmatmul.mubr.f32.gmra.mxu1 %v21021_v33  ;;  %7901 = vmatmul.mubr.f32.gmra.mxu0 %v20987_v37  ;;  %v3646_v63 = vpop.f32.mrf.mxu0  ;;  %v8659_v3 = vand.u32 4294901760, %v21136_v54 }
 0x1e3   :  { %v3562_v7 = vadd.f32 %v3561_v14, %v3477_v0  ;;  %v3642_v45 = vadd.f32 %v3641_v44, %v3555_v55  ;;  %7973 = vmatprep.mubr.f32.mxu1 %v24336_v2  ;;  %8054 = vmatprep.mubr.f32.mxu0 %v24336_v2  ;;  %v21157_v50 = vsub.f32 %v8533_v5, %v21140_v34 }
 0x1e4   :  { %v3563_v35 = vpop.f32.mrf.mxu1  ;;  %v3648_v17 = vpop.f32.mrf.mxu0 }
 0x1e5   :  { %v3564_v57 = vadd.f32 %v3563_v35, %v3479_v52  ;;  %v3647_v53 = vadd.f32 %v3646_v63, %v3562_v7 }
 0x1e6   :  { %v3720_v29 = vpop.f32.mrf.mxu1  ;;  %7975 = vmatmul.mubr.f32.vlgmr.msra.gmra.mxu1 %v20968_v60  ;;  %8060 = vmatmul.mubr.f32.vlgmr.msra.gmra.mxu0 %v21033_v47  ;;  %v3805_v12 = vpop.f32.mrf.mxu0  ;;  %v19899_v47 = vld [vmem:[%s24330_s1 + $0x88] sm:$0xff] }
 0x1e7   :  { %v3649_v58 = vadd.f32 %v3648_v17, %v3564_v57  ;;  %v3721_v32 = vadd.f32 %v3720_v29, %v3640_v40  ;;  %8118 = vmatpush1.msra.mxu1 %v8117_v31  ;;  %8201 = vmatpush1.msra.mxu0 %v21082_v8  ;;  %v8536_v18 = vsel %vm57_vm0, %v19899_v47, 0  ;;  %v21180_v8 = vand.u32 4294901760, %v21157_v50 }
 0x1e8   :  { %8282 = vmatprep.subr.mxu1 %v21040_v10  ;;  %8369 = vmatprep.subr.mxu0 %v8109_v16  ;;  %v3722_v20 = vpop.f32.mrf.mxu1  ;;  %v3807_v56 = vpop.f32.mrf.mxu0  ;;  %v21159_v38 = vand.u32 4294901760, %v8536_v18 }
 0x1e9   :  { %v21131_v42 = vadd.f32 %v3721_v32, %v20959_v28  ;;  %v3723_v4 = vadd.f32 %v3722_v20, %v3642_v45  ;;  %7980 = vmatprep.mubr.f32.mxu1 %v24336_v2  ;;  %8065 = vmatprep.mubr.f32.mxu0 %v24336_v2  ;;  %v8608_v31 = vsub.f32 %v21157_v50, %v21180_v8  ;;  %v8520_v20 = vpop.permute.xlu0 %8519 }
 0x1ea   :  { %v3727_v6 = vpop.f32.mrf.mxu1  ;;  %7982 = vmatmul.mubr.f32.gmra.mxu1 %v20987_v37  ;;  %8071 = vmatmul.mubr.f32.gmra.mxu0 %v21044_v23  ;;  %v3816_v16 = vpop.f32.mrf.mxu0 }
 0x1eb   :  { %v21143_v25 = vadd.f32 %v3723_v4, %v20971_v59  ;;  %v3728_v28 = vadd.f32 %v3727_v6, %v3647_v53  ;;  %8151 = vmatprep.mubr.f32.mxu1 %v24336_v2  ;;  %8234 = vmatprep.mubr.f32.mxu0 %v24336_v2  ;;  %v21205_v4 = vand.u32 4294901760, %v8608_v31 }
 0x1ec   :  { %v3729_v0 = vpop.f32.mrf.mxu1  ;;  %v3818_v26 = vpop.f32.mrf.mxu0 }
 0x1ed   :  { %v21151_v21 = vadd.f32 %v3728_v28, %v20979_v49  ;;  %v3730_v23 = vadd.f32 %v3729_v0, %v3649_v58  ;;  %v21165_v49 = vsub.f32 %v8524_v9, %v21145_v36 }
 0x1ee   :  { %v3898_v52 = vpop.f32.mrf.mxu1  ;;  %8153 = vmatmul.mubr.f32.vlgmr.msra.gmra.mxu1 %v20968_v60  ;;  %8237 = vmatmul.mubr.f32.vlgmr.msra.gmra.mxu0 %v20985_v30  ;;  %v3982_v59 = vpop.f32.mrf.mxu0 }
 0x1ef   :  { %v21162_v13 = vadd.f32 %v3730_v23, %v20990_v27  ;;  %v3899_v44 = vadd.f32 %v3898_v52, %v3805_v12  ;;  %8284 = vmatpush1.msra.mxu1 %v21067_v19  ;;  %8373 = vmatpush1.msra.mxu0 %v8115_v24  ;;  %v8660_v27 = vsub.f32 %v21136_v54, %v8659_v3  ;;  %v8665_v63 = vand.u32 4294901760, %v21165_v49 }
 0x1f0   :  { %8452 = vmatprep.subr.mxu1 %v21040_v10  ;;  %v3900_v30 = vpop.f32.mrf.mxu1  ;;  %8158 = vmatprep.mubr.f32.mxu1 %v24336_v2  ;;  %v3984_v55 = vpop.f32.mrf.mxu0  ;;  %v21183_v24 = vsub.f32 %v8536_v18, %v21159_v38 }
 0x1f1   :  { %v3901_v40 = vadd.f32 %v3900_v30, %v3807_v56  ;;  %v3983_v46 = vadd.f32 %v3982_v59, %v3899_v44  ;;  %8242 = vmatprep.mubr.f32.mxu0 %v24336_v2  ;;  %8569 = vmatprep.subr.mxu0 %v21117_v51  ;;  %v8666_v29 = vsub.f32 %v21165_v49, %v8665_v63 }
 0x1f2   :  { %v3905_v14 = vpop.f32.mrf.mxu1  ;;  %8160 = vmatmul.mubr.f32.gmra.mxu1 %v20987_v37  ;;  %8245 = vmatmul.mubr.f32.gmra.mxu0 %v21011_v22  ;;  %v3990_v10 = vpop.f32.mrf.mxu0  ;;  %v8661_v22 = vand.u32 4294901760, %v8660_v27  ;;  %v21193_v11 = vand.u32 4294901760, %v21183_v24  ;;  %v8526_v27 = vsel %vm8523_vm8, %v21100_v48, %v8520_v20 }
 0x1f3   :  { %v3906_v61 = vadd.f32 %v3905_v14, %v3816_v16  ;;  %v3985_v7 = vadd.f32 %v3984_v55, %v3901_v40  ;;  %8317 = vmatprep.mubr.f32.mxu1 %v24336_v2  ;;  %8406 = vmatprep.mubr.f32.mxu0 %v24336_v2  ;;  %v8667_v0 = vand.u32 4294901760, %v8666_v29 }
 0x1f4   :  { %v3907_v45 = vpop.f32.mrf.mxu1  ;;  %v3992_v35 = vpop.f32.mrf.mxu0  ;;  %v8619_v6 = vsub.f32 %v21183_v24, %v21193_v11 }
 0x1f5   :  { %v3908_v17 = vadd.f32 %v3907_v45, %v3818_v26  ;;  %v3991_v39 = vadd.f32 %v3990_v10, %v3906_v61 }
 0x1f6   :  { %v4066_v57 = vpop.f32.mrf.mxu1  ;;  %8321 = vmatmul.mubr.f32.vlgmr.msra.gmra.mxu1 %v21008_v15  ;;  %8408 = vmatmul.mubr.f32.vlgmr.msra.gmra.mxu0 %v20968_v60  ;;  %v4153_v53 = vpop.f32.mrf.mxu0  ;;  %v21216_v55 = vand.u32 4294901760, %v8619_v6 }
 0x1f7   :  { %v3993_v12 = vadd.f32 %v3992_v35, %v3908_v17  ;;  %v4067_v58 = vadd.f32 %v4066_v57, %v3983_v46  ;;  %8454 = vmatpush1.msra.mxu1 %v21067_v19  ;;  %8571 = vmatpush1.msra.mxu0 %v21145_v36  ;;  %v8522_v15 = vpop.permute.xlu1 %8521 }
 0x1f8   :  { %8748 = vmatprep.subr.mxu0 %v21136_v54  ;;  %v4068_v32 = vpop.f32.mrf.mxu1  ;;  %8326 = vmatprep.mubr.f32.mxu1 %v24336_v2  ;;  %v4155_v5 = vpop.f32.mrf.mxu0  ;;  %v8527_v16 = vsel %vm8523_vm8, %v8520_v20, %v8522_v15 }
 0x1f9   :  { %v4069_v56 = vadd.f32 %v4068_v32, %v3985_v7  ;;  %v4154_v9 = vadd.f32 %v4153_v53, %v4067_v58  ;;  %8413 = vmatprep.mubr.f32.mxu0 %v24336_v2  ;;  %8662 = vmatprep.subr.mxu1 %v8661_v22  ;;  %v21212_v59 = vand.u32 4294901760, %v8527_v16 }
 0x1fa   :  { %v4075_v47 = vpop.f32.mrf.mxu1  ;;  %8330 = vmatmul.mubr.f32.gmra.mxu1 %v21021_v33  ;;  %8415 = vmatmul.mubr.f32.gmra.mxu0 %v20987_v37  ;;  %v4160_v19 = vpop.f32.mrf.mxu0 }
 0x1fb   :  { %v4076_v28 = vadd.f32 %v4075_v47, %v3991_v39  ;;  %v4156_v18 = vadd.f32 %v4155_v5, %v4069_v56  ;;  %8487 = vmatprep.mubr.f32.mxu1 %v24336_v2  ;;  %8604 = vmatprep.mubr.f32.mxu0 %v24336_v2  ;;  %v21230_v7 = vsub.f32 %v8527_v16, %v21212_v59 }
 0x1fc   :  { %v4077_v26 = vpop.f32.mrf.mxu1  ;;  %v4162_v23 = vpop.f32.mrf.mxu0 }
 0x1fd   :  { %v4078_v33 = vadd.f32 %v4077_v26, %v3993_v12  ;;  %v4161_v52 = vadd.f32 %v4160_v19, %v4076_v28 }
 0x1fe   :  { %v4234_v44 = vpop.f32.mrf.mxu1  ;;  %8489 = vmatmul.mubr.f32.vlgmr.msra.gmra.mxu1 %v20968_v60  ;;  %8610 = vmatmul.mubr.f32.vlgmr.msra.gmra.mxu0 %v21205_v4  ;;  %v4355_v30 = vpop.f32.mrf.mxu0 }
 0x1ff   :  { %v4163_v40 = vadd.f32 %v4162_v23, %v4078_v33  ;;  %v4235_v46 = vadd.f32 %v4234_v44, %v4154_v9  ;;  %8668 = vmatpush1.msra.mxu1 %v8667_v0  ;;  %8751 = vmatpush1.msra.mxu0 %v21165_v49 }
 0x200   :  { %8832 = vmatprep.subr.mxu1 %v21117_v51  ;;  %8919 = vmatprep.subr.mxu0 %v8659_v3  ;;  %v4236_v14 = vpop.f32.mrf.mxu1  ;;  %v4357_v60 = vpop.f32.mrf.mxu0 }
 0x201   :  { %v21225_v10 = vadd.f32 %v4235_v46, %v21053_v62  ;;  %v4237_v61 = vadd.f32 %v4236_v14, %v4156_v18  ;;  %8494 = vmatprep.mubr.f32.mxu1 %v24336_v2  ;;  %8615 = vmatprep.mubr.f32.mxu0 %v24336_v2  ;;  %v21239_v62 = vand.u32 4294901760, %v8526_v27 }
 0x202   :  { %v4241_v45 = vpop.f32.mrf.mxu1  ;;  %8496 = vmatmul.mubr.f32.gmra.mxu1 %v20987_v37  ;;  %8621 = vmatmul.mubr.f32.gmra.mxu0 %v21216_v55  ;;  %v4366_v48 = vpop.f32.mrf.mxu0  ;;  %v9173_v37 = vand.u32 4294901760, %v21230_v7 }
 0x203   :  { %v21235_v54 = vadd.f32 %v4237_v61, %v21063_v43  ;;  %v4242_v3 = vadd.f32 %v4241_v45, %v4161_v52  ;;  %8701 = vmatprep.mubr.f32.mxu1 %v24336_v2  ;;  %8784 = vmatprep.mubr.f32.mxu0 %v24336_v2 }
 0x204   :  { %v4243_v35 = vpop.f32.mrf.mxu1  ;;  %v4368_v17 = vpop.f32.mrf.mxu0 }
 0x205   :  { %24357 = vst [vmem:[#allocation3_spill] sm:$0xff] %v21235_v54  ;;  %v21242_v39 = vadd.f32 %v4242_v3, %v21070_v41  ;;  %v4244_v22 = vadd.f32 %v4243_v35, %v4163_v40  ;;  %v21254_v41 = vsub.f32 %v8526_v27, %v21239_v62 }
 0x206   :  { %v4448_v57 = vpop.f32.mrf.mxu1  ;;  %8703 = vmatmul.mubr.f32.vlgmr.msra.gmra.mxu1 %v21140_v34  ;;  %8787 = vmatmul.mubr.f32.vlgmr.msra.gmra.mxu0 %v21157_v50  ;;  %v4532_v43 = vpop.f32.mrf.mxu0 }
 0x207   :  { %v21248_v53 = vadd.f32 %v4244_v22, %v21076_v1  ;;  %v4449_v31 = vadd.f32 %v4448_v57, %v4355_v30  ;;  %8834 = vmatpush1.msra.mxu1 %v21145_v36  ;;  %8923 = vmatpush1.msra.mxu0 %v8665_v63  ;;  %v9174_v1 = vsub.f32 %v21230_v7, %v9173_v37  ;;  %v9179_v56 = vand.u32 4294901760, %v21254_v41 }
 0x208   :  { %9002 = vmatprep.subr.mxu1 %v21117_v51  ;;  %v4450_v29 = vpop.f32.mrf.mxu1  ;;  %8708 = vmatprep.mubr.f32.mxu1 %v24336_v2  ;;  %v4534_v12 = vpop.f32.mrf.mxu0 }
 0x209   :  { %24358 = vst [vmem:[#allocation4_spill] sm:$0xff] %v21248_v53  ;;  %v4451_v58 = vadd.f32 %v4450_v29, %v4357_v60  ;;  %v4533_v15 = vadd.f32 %v4532_v43, %v4449_v31  ;;  %8792 = vmatprep.mubr.f32.mxu0 %v24336_v2  ;;  %9083 = vmatprep.subr.mxu0 %v21212_v59  ;;  %v9175_v19 = vand.u32 4294901760, %v9174_v1 }
 0x20a   :  { %v4455_v49 = vpop.f32.mrf.mxu1  ;;  %8710 = vmatmul.mubr.f32.gmra.mxu1 %v21159_v38  ;;  %8795 = vmatmul.mubr.f32.gmra.mxu0 %v21183_v24  ;;  %v4540_v51 = vpop.f32.mrf.mxu0  ;;  %v9180_v23 = vsub.f32 %v21254_v41, %v9179_v56 }
 0x20b   :  { %v4456_v63 = vadd.f32 %v4455_v49, %v4366_v48  ;;  %v4535_v32 = vadd.f32 %v4534_v12, %v4451_v58  ;;  %8867 = vmatprep.mubr.f32.mxu1 %v24336_v2  ;;  %8956 = vmatprep.mubr.f32.mxu0 %v24336_v2 }
 0x20c   :  { %v4457_v5 = vpop.f32.mrf.mxu1  ;;  %v4542_v20 = vpop.f32.mrf.mxu0  ;;  %v9181_v60 = vand.u32 4294901760, %v9180_v23 }
 0x20d   :  { %v4458_v9 = vadd.f32 %v4457_v5, %v4368_v17  ;;  %v4541_v47 = vadd.f32 %v4540_v51, %v4456_v63 }
 0x20e   :  { %v4616_v6 = vpop.f32.mrf.mxu1  ;;  %8871 = vmatmul.mubr.f32.vlgmr.msra.gmra.mxu1 %v21180_v8  ;;  %8958 = vmatmul.mubr.f32.vlgmr.msra.gmra.mxu0 %v21140_v34  ;;  %v4703_v16 = vpop.f32.mrf.mxu0 }
 0x20f   :  { %v4543_v28 = vadd.f32 %v4542_v20, %v4458_v9  ;;  %v4617_v18 = vadd.f32 %v4616_v6, %v4533_v15  ;;  %9004 = vmatpush1.msra.mxu1 %v21145_v36  ;;  %9085 = vmatpush1.msra.mxu0 %v21239_v62 }
 0x210   :  { %v4618_v0 = vpop.f32.mrf.mxu1  ;;  %9262 = vmatprep.subr.mxu0 %v21230_v7  ;;  %8876 = vmatprep.mubr.f32.mxu1 %v24336_v2  ;;  %v4705_v26 = vpop.f32.mrf.mxu0 }
 0x211   :  { %v4619_v33 = vadd.f32 %v4618_v0, %v4535_v32  ;;  %v4704_v52 = vadd.f32 %v4703_v16, %v4617_v18  ;;  %8963 = vmatprep.mubr.f32.mxu0 %v24336_v2  ;;  %9176 = vmatprep.subr.mxu1 %v9175_v19 }
 0x212   :  { %v4625_v44 = vpop.f32.mrf.mxu1  ;;  %8880 = vmatmul.mubr.f32.gmra.mxu1 %v21193_v11  ;;  %8965 = vmatmul.mubr.f32.gmra.mxu0 %v21159_v38  ;;  %v4710_v36 = vpop.f32.mrf.mxu0 }
 0x213   :  { %v4626_v30 = vadd.f32 %v4625_v44, %v4541_v47  ;;  %9037 = vmatprep.mubr.f32.mxu1 %v24336_v2  ;;  %9118 = vmatprep.mubr.f32.mxu0 %v24336_v2  ;;  %v4706_v48 = vadd.f32 %v4705_v26, %v4619_v33 }
 0x214   :  { %v4627_v40 = vpop.f32.mrf.mxu1  ;;  %v4712_v46 = vpop.f32.mrf.mxu0 }
 0x215   :  { %v4628_v27 = vadd.f32 %v4627_v40, %v4543_v28  ;;  %v4711_v14 = vadd.f32 %v4710_v36, %v4626_v30 }
 0x216   :  { %v4784_v61 = vpop.f32.mrf.mxu1  ;;  %9039 = vmatmul.mubr.f32.vlgmr.msra.gmra.mxu1 %v21140_v34  ;;  %9124 = vmatmul.mubr.f32.vlgmr.msra.gmra.mxu0 %v21205_v4  ;;  %v4869_v45 = vpop.f32.mrf.mxu0 }
 0x217   :  { %v4785_v3 = vadd.f32 %v4784_v61, %v4704_v52  ;;  %9182 = vmatpush1.msra.mxu1 %v9181_v60  ;;  %9265 = vmatpush1.msra.mxu0 %v21254_v41  ;;  %v4713_v31 = vadd.f32 %v4712_v46, %v4628_v27 }
 0x218   :  { %9346 = vmatprep.subr.mxu1 %v21212_v59  ;;  %9433 = vmatprep.subr.mxu0 %v9173_v37  ;;  %v4786_v35 = vpop.f32.mrf.mxu1  ;;  %v21288_v17 = vpop.f32.mrf.mxu0 }
 0x219   :  { %v21291_v22 = vadd.f32 %v4785_v3, %v21131_v42  ;;  %v4787_v57 = vadd.f32 %v4786_v35, %v4706_v48  ;;  %9044 = vmatprep.mubr.f32.mxu1 %v24336_v2  ;;  %9129 = vmatprep.mubr.f32.mxu0 %v24336_v2 }
 0x21a   :  { %v4791_v4 = vpop.f32.mrf.mxu1  ;;  %9046 = vmatmul.mubr.f32.gmra.mxu1 %v21159_v38  ;;  %9135 = vmatmul.mubr.f32.gmra.mxu0 %v21216_v55  ;;  %v4880_v43 = vpop.f32.mrf.mxu0 }
 0x21b   :  { %v21298_v7 = vadd.f32 %v4787_v57, %v21143_v25  ;;  %v4792_v37 = vadd.f32 %v4791_v4, %v4711_v14  ;;  %9215 = vmatprep.mubr.f32.mxu1 %v24336_v2  ;;  %9298 = vmatprep.mubr.f32.mxu0 %v24336_v2 }
 0x21c   :  { %v4793_v42 = vpop.f32.mrf.mxu1  ;;  %v21302_v29 = vpop.f32.mrf.mxu0 }
 0x21d   :  { %24359 = vst [vmem:[#allocation5_spill] sm:$0xff] %v21298_v7  ;;  %v21305_v12 = vadd.f32 %v4792_v37, %v21151_v21  ;;  %v4794_v58 = vadd.f32 %v4793_v42, %v4713_v31 }
 0x21e   :  { %v4962_v15 = vpop.f32.mrf.mxu1  ;;  %9217 = vmatmul.mubr.f32.vlgmr.msra.gmra.mxu1 %v21140_v34  ;;  %9301 = vmatmul.mubr.f32.vlgmr.msra.gmra.mxu0 %v21157_v50  ;;  %v5046_v55 = vpop.f32.mrf.mxu0 }
 0x21f   :  { %v21310_v25 = vadd.f32 %v4794_v58, %v21162_v13  ;;  %v4963_v1 = vadd.f32 %v4962_v15, %v4869_v45  ;;  %9348 = vmatpush1.msra.mxu1 %v21239_v62  ;;  %9437 = vmatpush1.msra.mxu0 %v9179_v56 }
 0x220   :  { %9516 = vmatprep.subr.mxu1 %v21212_v59  ;;  %v21316_v21 = vpop.f32.mrf.mxu1  ;;  %9222 = vmatprep.mubr.f32.mxu1 %v24336_v2  ;;  %v21319_v49 = vpop.f32.mrf.mxu0 }
 0x221   :  { %24360 = vst [vmem:[#allocation6_spill] sm:$0xff] %v21310_v25  ;;  %v5047_v51 = vadd.f32 %v5046_v55, %v4963_v1  ;;  %9306 = vmatprep.mubr.f32.mxu0 %v24336_v2 }
 0x222   :  { %v4969_v50 = vpop.f32.mrf.mxu1  ;;  %9224 = vmatmul.mubr.f32.gmra.mxu1 %v21159_v38  ;;  %v5054_v13 = vpop.f32.mrf.mxu0  ;;  %9309 = vmatmul.mubr.f32.gmra.mxu0 %v21183_v24 }
 0x223   :  { %v4970_v63 = vadd.f32 %v4969_v50, %v4880_v43  ;;  %9381 = vmatprep.mubr.f32.mxu1 %v24336_v2  ;;  %9470 = vmatprep.mubr.f32.mxu0 %v24336_v2 }
 0x224   :  { %v21326_v59 = vpop.f32.mrf.mxu1  ;;  %v21328_v41 = vpop.f32.mrf.mxu0 }
 0x225   :  { %v5055_v32 = vadd.f32 %v5054_v13, %v4970_v63 }
 0x226   :  { %v5130_v5 = vpop.f32.mrf.mxu1  ;;  %9385 = vmatmul.mubr.f32.vlgmr.msra.gmra.mxu1 %v21180_v8  ;;  %v5217_v20 = vpop.f32.mrf.mxu0  ;;  %9472 = vmatmul.mubr.f32.vlgmr.msra.gmra.mxu0 %v21140_v34 }
 0x227   :  { %v5131_v56 = vadd.f32 %v5130_v5, %v5047_v51  ;;  %9518 = vmatpush1.msra.mxu1 %v21239_v62  ;;  %9390 = vmatprep.mubr.f32.mxu1 %v24336_v2 }
 0x228   :  { %v21334_v24 = vpop.f32.mrf.mxu1  ;;  %v21336_v9 = vpop.f32.mrf.mxu0  ;;  %9477 = vmatprep.mubr.f32.mxu0 %v24336_v2 }
 0x229   :  { %v5218_v47 = vadd.f32 %v5217_v20, %v5131_v56 }
 0x22a   :  { %v5139_v19 = vpop.f32.mrf.mxu1  ;;  %9394 = vmatmul.mubr.f32.gmra.mxu1 %v21193_v11  ;;  %v5224_v6 = vpop.f32.mrf.mxu0  ;;  %9479 = vmatmul.mubr.f32.gmra.mxu0 %v21159_v38 }
 0x22b   :  { %v5140_v8 = vadd.f32 %v5139_v19, %v5055_v32  ;;  %9551 = vmatprep.mubr.f32.mxu1 %v24336_v2  ;;  %9843 = vmatprep.mubr.f32.mxu0 %v24336_v2 }
 0x22c   :  { %v21343_v62 = vpop.f32.mrf.mxu1  ;;  %v21345_v16 = vpop.f32.mrf.mxu0 }
 0x22d   :  { %v5225_v28 = vadd.f32 %v5224_v6, %v5140_v8 }
 0x22e   :  { %v5298_v18 = vpop.f32.mrf.mxu1  ;;  %9553 = vmatmul.mubr.f32.vlgmr.msra.gmra.mxu1 %v21140_v34  ;;  %v5419_v0 = vpop.f32.mrf.mxu0 }
 0x22f   :  { %v5299_v26 = vadd.f32 %v5298_v18, %v5218_v47  ;;  %9558 = vmatprep.mubr.f32.mxu1 %v24336_v2 }
 0x230   :  { %v21349_v11 = vpop.f32.mrf.mxu1  ;;  %v21351_v23 = vpop.f32.mrf.mxu0 }
 0x231   :  { %v21354_v33 = vadd.f32 %v5299_v26, %v21225_v10 }
 0x232   :  { %v5305_v52 = vpop.f32.mrf.mxu1  ;;  %9560 = vmatmul.mubr.f32.gmra.mxu1 %v21159_v38  ;;  %v5430_v44 = vpop.f32.mrf.mxu0 }
 0x233   :  { %v5306_v36 = vadd.f32 %v5305_v52, %v5225_v28  ;;  %9950 = vmatprep.mubr.f32.mxu1 %v24336_v2 }
 0x234   :  { %v21358_v30 = vpop.f32.mrf.mxu1  ;;  %v21360_v34 = vpop.f32.mrf.mxu0 }
 0x235   :  { %24361 = vst [vmem:[#allocation7_spill] sm:$0xff] %v21358_v30  ;;  %v21363_v40 = vadd.f32 %v5306_v36, %v21242_v39 }
 0x236   :  { %v5512_v46 = vpop.f32.mrf.mxu1  ;;  %v5596_v27 = vpop.f32.mrf.mxu0 }
 0x237   :  { %v5513_v14 = vadd.f32 %v5512_v46, %v5419_v0 }
 0x238   :  { %v21365_v60 = vpop.f32.mrf.mxu1  ;;  %v21367_v10 = vpop.f32.mrf.mxu0 }
 0x239   :  { %v5597_v61 = vadd.f32 %v5596_v27, %v5513_v14 }
 0x23a   :  { %v5519_v38 = vpop.f32.mrf.mxu1  ;;  %v5604_v45 = vpop.f32.mrf.mxu0 }
 0x23b   :  { %v5520_v48 = vadd.f32 %v5519_v38, %v5430_v44 }
 0x23c   :  { %v21369_v3 = vpop.f32.mrf.mxu1  ;;  %v21371_v35 = vpop.f32.mrf.mxu0 }
 0x23d   :  { %v5605_v57 = vadd.f32 %v5604_v45, %v5520_v48 }
 0x23e   :  { %v5680_v4 = vpop.f32.mrf.mxu1  ;;  %v5767_v43 = vpop.f32.mrf.mxu0 }
 0x23f   :  { %v5681_v39 = vadd.f32 %v5680_v4, %v5597_v61 }
 0x240   :  { %v21373_v31 = vpop.f32.mrf.mxu1  ;;  %v21375_v37 = vpop.f32.mrf.mxu0 }
 0x241   :  { %v5768_v42 = vadd.f32 %v5767_v43, %v5681_v39 }
 0x242   :  { %v5689_v58 = vpop.f32.mrf.mxu1  ;;  %v5774_v15 = vpop.f32.mrf.mxu0 }
 0x243   :  { %v5690_v55 = vadd.f32 %v5689_v58, %v5605_v57 }
 0x244   :  { %v21377_v1 = vpop.f32.mrf.mxu1  ;;  %v21379_v51 = vpop.f32.mrf.mxu0 }
 0x245   :  { %v5775_v50 = vadd.f32 %v5774_v15, %v5690_v55 }
 0x246   :  { %v5848_v13 = vpop.f32.mrf.mxu1  ;;  %v5933_v63 = vpop.f32.mrf.mxu0 }
 0x247   :  { %v5849_v32 = vadd.f32 %v5848_v13, %v5768_v42 }
 0x248   :  { %v21381_v5 = vpop.f32.mrf.mxu1  ;;  %v21383_v20 = vpop.f32.mrf.mxu0 }
 0x249   :  { %24362 = vst [vmem:[#allocation8_spill] sm:$0xff] %v21381_v5  ;;  %v21386_v56 = vadd.f32 %v5849_v32, %v21291_v22 }
 0x24a   :  { %v5855_v47 = vpop.f32.mrf.mxu1  ;;  %v5944_v19 = vpop.f32.mrf.mxu0 }
 0x24b   :  { %v5856_v6 = vadd.f32 %v5855_v47, %v5775_v50 }
 0x24c   :  { %v21388_v8 = vpop.f32.mrf.mxu1  ;;  %v21390_v28 = vpop.f32.mrf.mxu0 }
 0x24d   :  { %24363 = vst [vmem:[#allocation9_spill] sm:$0xff] %v21388_v8  ;;  %v21393_v18 = vadd.f32 %v5856_v6, %v21305_v12 }
 0x24e   :  { %v6026_v0 = vpop.f32.mrf.mxu1  ;;  %v6110_v26 = vpop.f32.mrf.mxu0 }
 0x24f   :  { %v6027_v52 = vadd.f32 %v6026_v0, %v5933_v63 }
 0x250   :  { %v21395_v44 = vpop.f32.mrf.mxu1  ;;  %v21397_v36 = vpop.f32.mrf.mxu0 }
 0x251   :  { %v6111_v46 = vadd.f32 %v6110_v26, %v6027_v52 }
 0x252   :  { %v6033_v22 = vpop.f32.mrf.mxu1  ;;  %v6118_v27 = vpop.f32.mrf.mxu0 }
 0x253   :  { %v6034_v14 = vadd.f32 %v6033_v22, %v5944_v19 }
 0x254   :  { %v21399_v61 = vpop.f32.mrf.mxu1  ;;  %v21401_v38 = vpop.f32.mrf.mxu0 }
 0x255   :  { %v6119_v45 = vadd.f32 %v6118_v27, %v6034_v14 }
 0x256   :  { %v6194_v48 = vpop.f32.mrf.mxu1  ;;  %v6281_v57 = vpop.f32.mrf.mxu0 }
 0x257   :  { %v6195_v12 = vadd.f32 %v6194_v48, %v6111_v46 }
 0x258   :  { %v21403_v4 = vpop.f32.mrf.mxu1  ;;  %v21405_v43 = vpop.f32.mrf.mxu0 }
 0x259   :  { %24364 = vst [vmem:[#allocation10_spill] sm:$0xff] %v21405_v43  ;;  %v6282_v39 = vadd.f32 %v6281_v57, %v6195_v12 }
 0x25a   :  { %v6203_v42 = vpop.f32.mrf.mxu1  ;;  %v6288_v58 = vpop.f32.mrf.mxu0 }
 0x25b   :  { %v6204_v15 = vadd.f32 %v6203_v42, %v6119_v45 }
 0x25c   :  { %v21407_v55 = vpop.f32.mrf.mxu1  ;;  %v21409_v50 = vpop.f32.mrf.mxu0 }
 0x25d   :  { %24365 = vst [vmem:[#allocation11_spill] sm:$0xff] %v21409_v50  ;;  %v6289_v13 = vadd.f32 %v6288_v58, %v6204_v15 }
 0x25e   :  { %v6362_v63 = vpop.f32.mrf.mxu1  ;;  %v6483_v32 = vpop.f32.mrf.mxu0 }
 0x25f   :  { %v6363_v47 = vadd.f32 %v6362_v63, %v6282_v39 }
 0x260   :  { %v21411_v19 = vpop.f32.mrf.mxu1  ;;  %v21413_v6 = vpop.f32.mrf.mxu0 }
 0x261   :  { %24366 = vst [vmem:[#allocation12_spill] sm:$0xff] %v21411_v19  ;;  %v21416_v0 = vadd.f32 %v6363_v47, %v21354_v33 }
 0x262   :  { %v6369_v26 = vpop.f32.mrf.mxu1  ;;  %v6494_v52 = vpop.f32.mrf.mxu0 }
 0x263   :  { %v6370_v46 = vadd.f32 %v6369_v26, %v6289_v13 }
 0x264   :  { %v21418_v22 = vpop.f32.mrf.mxu1  ;;  %v21420_v27 = vpop.f32.mrf.mxu0 }
 0x265   :  { %24367 = vst [vmem:[#allocation13_spill] sm:$0xff] %v21418_v22  ;;  %v21423_v14 = vadd.f32 %v6370_v46, %v21363_v40 }
 0x266   :  { %v6576_v45 = vpop.f32.mrf.mxu1  ;;  %v6660_v48 = vpop.f32.mrf.mxu0 }
 0x267   :  { %v6577_v57 = vadd.f32 %v6576_v45, %v6483_v32 }
 0x268   :  { %v21425_v12 = vpop.f32.mrf.mxu1  ;;  %v21427_v39 = vpop.f32.mrf.mxu0 }
 0x269   :  { %v6661_v42 = vadd.f32 %v6660_v48, %v6577_v57 }
 0x26a   :  { %v6583_v33 = vpop.f32.mrf.mxu1  ;;  %v6668_v58 = vpop.f32.mrf.mxu0 }
 0x26b   :  { %v6584_v15 = vadd.f32 %v6583_v33, %v6494_v52 }
 0x26c   :  { %v21429_v63 = vpop.f32.mrf.mxu1  ;;  %v21431_v13 = vpop.f32.mrf.mxu0 }
 0x26d   :  { %v6669_v47 = vadd.f32 %v6668_v58, %v6584_v15 }
 0x26e   :  { %v6744_v26 = vpop.f32.mrf.mxu1  ;;  %v6831_v2 = vpop.f32.mrf.mxu0 }
 0x26f   :  { %v6745_v40 = vadd.f32 %v6744_v26, %v6661_v42 }
 0x270   :  { %v21433_v46 = vpop.f32.mrf.mxu1  ;;  %v21435_v25 = vpop.f32.mrf.mxu0 }
 0x271   :  { %24368 = vst [vmem:[#allocation14_spill] sm:$0xff] %v21435_v25  ;;  %v6832_v32 = vadd.f32 %v6831_v2, %v6745_v40 }
 0x272   :  { %v6753_v45 = vpop.f32.mrf.mxu1  ;;  %v6838_v7 = vpop.f32.mrf.mxu0 }
 0x273   :  { %v6754_v53 = vadd.f32 %v6753_v45, %v6669_v47 }
 0x274   :  { %v21437_v48 = vpop.f32.mrf.mxu1  ;;  %v21439_v57 = vpop.f32.mrf.mxu0 }
 0x275   :  { %24369 = vst [vmem:[#allocation15_spill] sm:$0xff] %v21439_v57  ;;  %v6839_v52 = vadd.f32 %v6838_v7, %v6754_v53 }
 0x276   :  { %v6912_v33 = vpop.f32.mrf.mxu1  ;;  %v6997_v22 = vpop.f32.mrf.mxu0 }
 0x277   :  { %v6913_v54 = vadd.f32 %v6912_v33, %v6832_v32 }
 0x278   :  { %v21441_v58 = vpop.f32.mrf.mxu1  ;;  %v21443_v15 = vpop.f32.mrf.mxu0 }
 0x279   :  { %24370 = vst [vmem:[#allocation16_spill] sm:$0xff] %v21441_v58  ;;  %v21446_v42 = vadd.f32 %v6913_v54, %v21386_v56 }
 0x27a   :  { %v6919_v26 = vpop.f32.mrf.mxu1  ;;  %v7008_v2 = vpop.f32.mrf.mxu0 }
 0x27b   :  { %v6920_v40 = vadd.f32 %v6919_v26, %v6839_v52 }
 0x27c   :  { %v21448_v19 = vpop.f32.mrf.mxu1  ;;  %v21450_v47 = vpop.f32.mrf.mxu0 }
 0x27d   :  { %24371 = vst [vmem:[#allocation17_spill] sm:$0xff] %v21448_v19  ;;  %24372 = vst [vmem:[#allocation18_spill] sm:$0xff] %v21450_v47  ;;  %v21453_v45 = vadd.f32 %v6920_v40, %v21393_v18 }
 0x27e   :  { %v7090_v53 = vpop.f32.mrf.mxu1  ;;  %v7174_v7 = vpop.f32.mrf.mxu0 }
 0x27f   :  { %v7091_v32 = vadd.f32 %v7090_v53, %v6997_v22 }
 0x280   :  { %v21455_v33 = vpop.f32.mrf.mxu1  ;;  %v21457_v58 = vpop.f32.mrf.mxu0 }
 0x281   :  { %24373 = vst [vmem:[#allocation19_spill] sm:$0xff] %v21457_v58  ;;  %v7175_v57 = vadd.f32 %v7174_v7, %v7091_v32 }
 0x282   :  { %v7097_v54 = vpop.f32.mrf.mxu1  ;;  %v7182_v56 = vpop.f32.mrf.mxu0 }
 0x283   :  { %v7098_v25 = vadd.f32 %v7097_v54, %v7008_v2 }
 0x284   :  { %v21459_v50 = vpop.f32.mrf.mxu1  ;;  %v21461_v52 = vpop.f32.mrf.mxu0 }
 0x285   :  { %24374 = vst [vmem:[#allocation20_spill] sm:$0xff] %v21459_v50  ;;  %24375 = vst [vmem:[#allocation21_spill] sm:$0xff] %v21461_v52  ;;  %v7183_v26 = vadd.f32 %v7182_v56, %v7098_v25 }
 0x286   :  { %v7258_v19 = vpop.f32.mrf.mxu1  ;;  %v7345_v8 = vpop.f32.mrf.mxu0 }
 0x287   :  { %v7259_v18 = vadd.f32 %v7258_v19, %v7175_v57 }
 0x288   :  { %v21463_v40 = vpop.f32.mrf.mxu1  ;;  %v21465_v5 = vpop.f32.mrf.mxu0 }
 0x289   :  { %24376 = vst [vmem:[#allocation22_spill] sm:$0xff] %v21463_v40  ;;  %24377 = vst [vmem:[#allocation23_spill] sm:$0xff] %v21465_v5  ;;  %v7346_v22 = vadd.f32 %v7345_v8, %v7259_v18 }
 0x28a   :  { %v7267_v53 = vpop.f32.mrf.mxu1  ;;  %v7352_v47 = vpop.f32.mrf.mxu0 }
 0x28b   :  { %v7268_v58 = vadd.f32 %v7267_v53, %v7183_v26 }
 0x28c   :  { %v21467_v7 = vpop.f32.mrf.mxu1  ;;  %v21469_v32 = vpop.f32.mrf.mxu0 }
 0x28d   :  { %24378 = vst [vmem:[#allocation24_spill] sm:$0xff] %v21467_v7  ;;  %24379 = vst [vmem:[#allocation25_spill] sm:$0xff] %v21469_v32  ;;  %v7353_v2 = vadd.f32 %v7352_v47, %v7268_v58 }
 0x28e   :  { %v7426_v54 = vpop.f32.mrf.mxu1  ;;  %v7547_v50 = vpop.f32.mrf.mxu0 }
 0x28f   :  { %v7427_v52 = vadd.f32 %v7426_v54, %v7346_v22 }
 0x290   :  { %v21471_v25 = vpop.f32.mrf.mxu1  ;;  %v21473_v56 = vpop.f32.mrf.mxu0 }
 0x291   :  { %24380 = vst [vmem:[#allocation26_spill] sm:$0xff] %v21471_v25  ;;  %v21476_v19 = vadd.f32 %v7427_v52, %v21416_v0 }
 0x292   :  { %v7433_v57 = vpop.f32.mrf.mxu1  ;;  %v7558_v8 = vpop.f32.mrf.mxu0 }
 0x293   :  { %24381 = vst [vmem:[#allocation27_spill] sm:$0xff] %v21476_v19  ;;  %v7434_v18 = vadd.f32 %v7433_v57, %v7353_v2 }
 0x294   :  { %v21478_v5 = vpop.f32.mrf.mxu1  ;;  %v21480_v26 = vpop.f32.mrf.mxu0 }
 0x295   :  { %24382 = vst [vmem:[#allocation28_spill] sm:$0xff] %v21478_v5  ;;  %v21483_v53 = vadd.f32 %v7434_v18, %v21423_v14 }
 0x296   :  { %v7640_v58 = vpop.f32.mrf.mxu1  ;;  %v7724_v47 = vpop.f32.mrf.mxu0 }
 0x297   :  { %24383 = vst [vmem:[#allocation29_spill] sm:$0xff] %v21483_v53  ;;  %v7641_v22 = vadd.f32 %v7640_v58, %v7547_v50 }
 0x298   :  { %v21485_v54 = vpop.f32.mrf.mxu1  ;;  %v21487_v25 = vpop.f32.mrf.mxu0 }
 0x299   :  { %24384 = vst [vmem:[#allocation30_spill] sm:$0xff] %v21487_v25  ;;  %v7725_v32 = vadd.f32 %v7724_v47, %v7641_v22 }
 0x29a   :  { %v7647_v0 = vpop.f32.mrf.mxu1  ;;  %v7732_v52 = vpop.f32.mrf.mxu0 }
 0x29b   :  { %v7648_v19 = vadd.f32 %v7647_v0, %v7558_v8 }
 0x29c   :  { %v21489_v7 = vpop.f32.mrf.mxu1  ;;  %v21491_v2 = vpop.f32.mrf.mxu0 }
 0x29d   :  { %v7733_v57 = vadd.f32 %v7732_v52, %v7648_v19 }
 0x29e   :  { %v7808_v5 = vpop.f32.mrf.mxu1  ;;  %v7895_v40 = vpop.f32.mrf.mxu0 }
 0x29f   :  { %v7809_v14 = vadd.f32 %v7808_v5, %v7725_v32 }
 0x2a0   :  { %v21493_v18 = vpop.f32.mrf.mxu1  ;;  %v21495_v53 = vpop.f32.mrf.mxu0 }
 0x2a1   :  { %24385 = vst [vmem:[#allocation31_spill] sm:$0xff] %v21495_v53  ;;  %v7896_v50 = vadd.f32 %v7895_v40, %v7809_v14 }
 0x2a2   :  { %v7817_v58 = vpop.f32.mrf.mxu1  ;;  %v7902_v43 = vpop.f32.mrf.mxu0 }
 0x2a3   :  { %v7818_v25 = vadd.f32 %v7817_v58, %v7733_v57 }
 0x2a4   :  { %v21497_v47 = vpop.f32.mrf.mxu1  ;;  %v21499_v22 = vpop.f32.mrf.mxu0 }
 0x2a5   :  { %v7903_v8 = vadd.f32 %v7902_v43, %v7818_v25 }
 0x2a6   :  { %v7976_v0 = vpop.f32.mrf.mxu1  ;;  %v21501_v30 = vpop.f32.mrf.mxu0 }
 0x2a7   :  { %v7977_v19 = vadd.f32 %v7976_v0, %v7896_v50 }
 0x2a8   :  { %v21503_v52 = vpop.f32.mrf.mxu1  ;;  %v21505_v5 = vpop.f32.mrf.mxu0 }
 0x2a9   :  { %24386 = vst [vmem:[#allocation32_spill] sm:$0xff] %v21503_v52  ;;  %v21508_v32 = vadd.f32 %v7977_v19, %v21446_v42 }
 0x2aa   :  { %v7983_v40 = vpop.f32.mrf.mxu1  ;;  %v21510_v14 = vpop.f32.mrf.mxu0 }
 0x2ab   :  { %24387 = vst [vmem:[#allocation33_spill] sm:$0xff] %v21508_v32  ;;  %24388 = vst [vmem:[#allocation34_spill] sm:$0xff] %v21510_v14  ;;  %v7984_v57 = vadd.f32 %v7983_v40, %v7903_v8  ;;  %v5515_v14 = vadd.f32 %v21365_v60, %v21351_v23  ;;  %v6586_v60 = vadd.f32 %v21429_v63, %v21420_v27 }
 0x2ac   :  { %v21512_v58 = vpop.f32.mrf.mxu1  ;;  %v21514_v53 = vpop.f32.mrf.mxu0 }
 0x2ad   :  { %24389 = vst [vmem:[#allocation35_spill] sm:$0xff] %v21512_v58  ;;  %24390 = vst [vmem:[#allocation36_spill] sm:$0xff] %v21514_v53  ;;  %v21517_v43 = vadd.f32 %v7984_v57, %v21453_v45 }
 0x2ae   :  { %v21519_v25 = vpop.f32.mrf.mxu1  ;;  %v21521_v50 = vpop.f32.mrf.mxu0 }
 0x2af   :  { %24391 = vst [vmem:[#allocation37_spill] sm:$0xff] %v21517_v43  ;;  %24392 = vst [vmem:[#allocation38_spill] sm:$0xff] %v21521_v50 }
 0x2b0   :  { %v21523_v0 = vpop.f32.mrf.mxu1  ;;  %v21525_v52 = vpop.f32.mrf.mxu0 }
 0x2b1   :  { %24393 = vst [vmem:[#allocation39_spill] sm:$0xff] %v21523_v0  ;;  %24394 = vst [vmem:[#allocation40_spill] sm:$0xff] %v21525_v52 }
 0x2b2   :  { %v21527_v42 = vpop.f32.mrf.mxu1  ;;  %v21529_v19 = vpop.f32.mrf.mxu0 }
 0x2b3   :  { %24395 = vst [vmem:[#allocation41_spill] sm:$0xff] %v21527_v42  ;;  %24396 = vst [vmem:[#allocation42_spill] sm:$0xff] %v21529_v19 }
 0x2b4   :  { %v21531_v8 = vpop.f32.mrf.mxu1  ;;  %v21533_v40 = vpop.f32.mrf.mxu0 }
 0x2b5   :  { %24397 = vst [vmem:[#allocation43_spill] sm:$0xff] %v21531_v8  ;;  %24398 = vst [vmem:[#allocation44_spill] sm:$0xff] %v21533_v40 }
 0x2b6   :  { %v21535_v32 = vpop.f32.mrf.mxu1  ;;  %v21537_v45 = vpop.f32.mrf.mxu0 }
 0x2b7   :  { %24399 = vst [vmem:[#allocation45_spill] sm:$0xff] %v21535_v32  ;;  %24400 = vst [vmem:[#allocation46_spill] sm:$0xff] %v21537_v45 }
 0x2b8   :  { %v21539_v57 = vpop.f32.mrf.mxu1  ;;  %v21541_v43 = vpop.f32.mrf.mxu0 }
 0x2b9   :  { %24401 = vst [vmem:[#allocation47_spill] sm:$0xff] %v21539_v57  ;;  %24402 = vst [vmem:[#allocation48_spill] sm:$0xff] %v21541_v43 }
 0x2ba   :  { %v21543_v53 = vpop.f32.mrf.mxu1  ;;  %v21545_v50 = vpop.f32.mrf.mxu0 }
 0x2bb   :  { %24403 = vst [vmem:[#allocation49_spill] sm:$0xff] %v21543_v53  ;;  %24404 = vst [vmem:[#allocation50_spill] sm:$0xff] %v21545_v50 }
 0x2bc   :  { %v21547_v52 = vpop.f32.mrf.mxu1  ;;  %v21549_v58 = vpop.f32.mrf.mxu0 }
 0x2bd   :  { %24405 = vst [vmem:[#allocation51_spill] sm:$0xff] %v21547_v52  ;;  %24406 = vst [vmem:[#allocation52_spill] sm:$0xff] %v21549_v58 }
 0x2be   :  { %v21551_v19 = vpop.f32.mrf.mxu1  ;;  %v21553_v8 = vpop.f32.mrf.mxu0 }
 0x2bf   :  { %24407 = vst [vmem:[#allocation53_spill] sm:$0xff] %v21551_v19 }
 0x2c0   :  { %v21555_v40 = vpop.f32.mrf.mxu1  ;;  %v21557_v32 = vpop.f32.mrf.mxu0 }
 0x2c1   :  { %24408 = vst [vmem:[#allocation54_spill] sm:$0xff] %v21555_v40  ;;  %v4965_v40 = vadd.f32 %v21316_v21, %v21288_v17  ;;  %v6029_v17 = vadd.f32 %v21395_v44, %v21383_v20  ;;  %v5599_v20 = vadd.f32 %v21367_v10, %v5515_v14 }
 0x2c2   :  { %v21559_v45 = vpop.f32.mrf.mxu1  ;;  %v21561_v57 = vpop.f32.mrf.mxu0 }
 0x2c3   :  { %24409 = vst [vmem:[#allocation55_spill] sm:$0xff] %v21559_v45  ;;  %24410 = vst [vmem:[#allocation56_spill] sm:$0xff] %v21561_v57  ;;  %v5049_v21 = vadd.f32 %v21319_v49, %v4965_v40 }
 0x2c4   :  { %v21563_v43 = vpop.f32.mrf.mxu1  ;;  %v21565_v53 = vpop.f32.mrf.mxu0 }
 0x2c5   :  { %24411 = vst [vmem:[#allocation57_spill] sm:$0xff] %v21563_v43  ;;  %v4972_v43 = vadd.f32 %v21326_v59, %v21302_v29  ;;  %v6579_v29 = vadd.f32 %v21425_v12, %v21413_v6  ;;  %v6113_v6 = vadd.f32 %v21397_v36, %v6029_v17  ;;  %v5683_v12 = vadd.f32 %v21373_v31, %v5599_v20  ;;  %v24415_v17 = vld [vmem:[#allocation10_spill] sm:$0xff] }
 0x2c6   :  { %v21567_v50 = vpop.f32.mrf.mxu1  ;;  %v21569_v52 = vpop.f32.mrf.mxu0 }
 0x2c7   :  { %24412 = vst [vmem:[#allocation58_spill] sm:$0xff] %v21569_v52  ;;  %v5522_v52 = vadd.f32 %v21369_v3, %v21360_v34  ;;  %v5057_v34 = vadd.f32 %v21328_v41, %v4972_v43  ;;  %v5133_v3 = vadd.f32 %v21334_v24, %v5049_v21  ;;  %v6663_v24 = vadd.f32 %v21427_v39, %v6579_v29 }
 0x2c8   :  { %v21571_v58 = vpop.f32.mrf.mxu1  ;;  %v21573_v19 = vpop.f32.mrf.mxu0  ;;  %v7093_v43 = vadd.f32 %v21455_v33, %v21443_v15  ;;  %v24416_v15 = vld [vmem:[#allocation18_spill] sm:$0xff]  ;;  %v24417_v33 = vld [vmem:[#allocation20_spill] sm:$0xff] }
 0x2c9   :  { %v5607_v49 = vadd.f32 %v21371_v35, %v5522_v52  ;;  %v6197_v35 = vadd.f32 %v21403_v4, %v6113_v6  ;;  %v6671_v52 = vadd.f32 %v21431_v13, %v6586_v60  ;;  %v6747_v31 = vadd.f32 %v21433_v46, %v6663_v24 }
 0x2ca   :  { %v21577_v42 = vpop.f32.mrf.mxu1  ;;  %v21579_v45 = vpop.f32.mrf.mxu0  ;;  %v7643_v4 = vadd.f32 %v21485_v54, %v21473_v56  ;;  %v7650_v46 = vadd.f32 %v21489_v7, %v21480_v26  ;;  %v7100_v29 = vadd.f32 %v24417_v33, %v24416_v15  ;;  %v24418_v56 = vld [vmem:[#allocation8_spill] sm:$0xff]  ;;  %v24430_v15 = vld [vmem:[#allocation21_spill] sm:$0xff]  ;;  %v24431_v33 = vld [vmem:[#allocation22_spill] sm:$0xff] }
 0x2cb   :  { %24413 = vst [vmem:[#allocation59_spill] sm:$0xff] %v21579_v45  ;;  %v6036_v45 = vadd.f32 %v21399_v61, %v21390_v28  ;;  %v5142_v61 = vadd.f32 %v21343_v62, %v5057_v34  ;;  %v5692_v41 = vadd.f32 %v21377_v1, %v5607_v49  ;;  %v5220_v62 = vadd.f32 %v21336_v9, %v5133_v3  ;;  %v24422_v26 = vld [vmem:[#allocation12_spill] sm:$0xff] }
 0x2cc   :  { %v21587_v57 = vpop.f32.mrf.mxu1  ;;  %v21589_v0 = vpop.f32.mrf.mxu0  ;;  %v6756_v39 = vadd.f32 %v21437_v48, %v6671_v52  ;;  %v6284_v21 = vadd.f32 %v24415_v17, %v6197_v35  ;;  %v24426_v35 = vld [vmem:[#allocation3_spill] sm:$0xff]  ;;  %v24429_v17 = vld [vmem:[#allocation17_spill] sm:$0xff] }
 0x2cd   :  { %v6121_v27 = vadd.f32 %v21401_v38, %v6036_v45  ;;  %v5227_v38 = vadd.f32 %v21345_v16, %v5142_v61  ;;  %v5301_v9 = vadd.f32 %v21349_v11, %v5220_v62  ;;  %v5777_v13 = vadd.f32 %v21379_v51, %v5692_v41  ;;  %v24414_v45 = vld [vmem:[#allocation7_spill] sm:$0xff]  ;;  %v24419_v11 = vld [vmem:[#allocation9_spill] sm:$0xff]  ;;  %v24421_v51 = vld [vmem:[#allocation14_spill] sm:$0xff] }
 0x2ce   :  { %v21598_v59 = vpop.f32.mrf.mxu1  ;;  %v21600_v23 = vpop.f32.mrf.mxu0  ;;  %v6834_v3 = vadd.f32 %v24421_v51, %v6747_v31  ;;  %v6365_v49 = vadd.f32 %v24422_v26, %v6284_v21  ;;  %v24423_v61 = vld [vmem:[#allocation15_spill] sm:$0xff]  ;;  %v24427_v62 = vld [vmem:[#allocation13_spill] sm:$0xff]  ;;  %v7735_v31 = vadd.f32 %v21491_v2, %v7650_v46  ;;  %v8707_v2 = vadd.f32 %v21571_v58, %v21557_v32 }
 0x2cf   :  { %v6206_v36 = vadd.f32 %v21407_v55, %v6121_v27  ;;  %v5770_v55 = vadd.f32 %v21375_v37, %v5683_v12  ;;  %v5308_v48 = vadd.f32 %v24414_v45, %v5227_v38  ;;  %v5858_v34 = vadd.f32 %v24419_v11, %v5777_v13  ;;  %v24420_v37 = vld [vmem:[#allocation11_spill] sm:$0xff]  ;;  %v24425_v27 = vld [vmem:[#allocation30_spill] sm:$0xff]  ;;  %v24433_v11 = vld [vmem:[#allocation5_spill] sm:$0xff] }
 0x2d0   :  { %v21608_v44 = vpop.f32.mrf.mxu1  ;;  %v21610_v28 = vpop.f32.mrf.mxu0  ;;  %v6841_v6 = vadd.f32 %v24423_v61, %v6756_v39  ;;  %v24424_v12 = vld [vmem:[#allocation19_spill] sm:$0xff]  ;;  %v7727_v24 = vadd.f32 %v24425_v27, %v7643_v4  ;;  %v5313_v52 = vadd.f32 %v5301_v9, %v24426_v35  ;;  %v7185_v39 = vadd.f32 %v24430_v15, %v7100_v29  ;;  %v24435_v29 = vld [vmem:[#allocation24_spill] sm:$0xff] }
 0x2d1   :  { %v5851_v54 = vadd.f32 %v24418_v56, %v5770_v55  ;;  %v6291_v60 = vadd.f32 %v24420_v37, %v6206_v36  ;;  %v7177_v41 = vadd.f32 %v24424_v12, %v7093_v43  ;;  %v24428_v55 = vld [vmem:[#allocation16_spill] sm:$0xff] }
 0x2d2   :  { %v21618_v63 = vpop.f32.mrf.mxu1  ;;  %v21620_v10 = vpop.f32.mrf.mxu0  ;;  %v6915_v36 = vadd.f32 %v24428_v55, %v6834_v3  ;;  %v6922_v21 = vadd.f32 %v24429_v17, %v6841_v6  ;;  %v7811_v4 = vadd.f32 %v21493_v18, %v7727_v24  ;;  %v24432_v56 = vld [vmem:[#allocation4_spill] sm:$0xff]  ;;  %v24434_v3 = vld [vmem:[#allocation6_spill] sm:$0xff]  ;;  %v21680_v61 = vadd.f32 %v6365_v49, %v5313_v52  ;;  %v24437_v24 = vld [vmem:[#allocation31_spill] sm:$0xff] }
 0x2d3   :  { %v6372_v38 = vadd.f32 %v24427_v62, %v6291_v60  ;;  %v7261_v43 = vadd.f32 %v24431_v33, %v7177_v41  ;;  %v5317_v9 = vadd.f32 %v5308_v48, %v24432_v56  ;;  %v6375_v37 = vadd.f32 %v5851_v54, %v24433_v11  ;;  %v24436_v41 = vld [vmem:[#allocation23_spill] sm:$0xff]  ;;  %v24440_v55 = vld [vmem:[#allocation25_spill] sm:$0xff] }
 0x2d4   :  { %v21627_v14 = vpop.f32.mrf.mxu1  ;;  %v21629_v1 = vpop.f32.mrf.mxu0  ;;  %v7820_v60 = vadd.f32 %v21497_v47, %v7735_v31  ;;  %v6379_v26 = vadd.f32 %v5858_v34, %v24434_v3  ;;  %v7270_v6 = vadd.f32 %v24435_v29, %v7185_v39  ;;  %v8705_v48 = vadd.f32 %v21567_v50, %v21553_v8  ;;  %v24438_v52 = vld [vmem:[#allocation39_spill] sm:$0xff]  ;;  %v24441_v31 = vld [vmem:[#allocation26_spill] sm:$0xff] }
 0x2d5   :  { %v21683_v12 = vadd.f32 %v6372_v38, %v5317_v9  ;;  %v7439_v18 = vadd.f32 %v6915_v36, %v6375_v37  ;;  %v8714_v47 = vadd.f32 %v21587_v57, %v21565_v53  ;;  %v7348_v27 = vadd.f32 %v24436_v41, %v7261_v43  ;;  %v24439_v38 = vld [vmem:[#allocation56_spill] sm:$0xff]  ;;  %v24443_v39 = vld [vmem:[#allocation34_spill] sm:$0xff]  ;;  %v24450_v3 = vld [vmem:[#allocation43_spill] sm:$0xff] }
 0x2d6   :  { %v21642_v40 = vpop.f32.mrf.mxu1  ;;  %v9125_v16 = vpop.f32.mrf.mxu0  ;;  %v7443_v58 = vadd.f32 %v6922_v21, %v6379_v26  ;;  %v7898_v34 = vadd.f32 %v24437_v24, %v7811_v4  ;;  %v8155_v49 = vadd.f32 %v21519_v25, %v21501_v30  ;;  %v7905_v35 = vadd.f32 %v21499_v22, %v7820_v60  ;;  %v24442_v21 = vld [vmem:[#allocation32_spill] sm:$0xff]  ;;  %v24444_v30 = vld [vmem:[#allocation41_spill] sm:$0xff]  ;;  %v24445_v22 = vld [vmem:[#allocation35_spill] sm:$0xff] }
 0x2d7   :  { %v8157_v62 = vadd.f32 %v24438_v52, %v21505_v5  ;;  %v8712_v50 = vadd.f32 %v21577_v42, %v24439_v38  ;;  %v8791_v53 = vadd.f32 %v21573_v19, %v8707_v2  ;;  %v7355_v36 = vadd.f32 %v24440_v55, %v7270_v6  ;;  %v24446_v43 = vld [vmem:[#allocation58_spill] sm:$0xff]  ;;  %v24447_v9 = vld [vmem:[#allocation28_spill] sm:$0xff]  ;;  %v24454_v38 = vld [vmem:[#allocation45_spill] sm:$0xff] }
 0x2d8   :  { %v21652_v20 = vpop.f32.mrf.mxu1  ;;  %v21654_v7 = vpop.f32.mrf.mxu0  ;;  %v7429_v17 = vadd.f32 %v24441_v31, %v7348_v27  ;;  %v7979_v15 = vadd.f32 %v24442_v21, %v7898_v34  ;;  %v8162_v25 = vadd.f32 %v24444_v30, %v24443_v39  ;;  %v7986_v33 = vadd.f32 %v24445_v22, %v7905_v35  ;;  %v24448_v37 = vld [vmem:[#allocation38_spill] sm:$0xff]  ;;  %v24449_v2 = vld [vmem:[#allocation36_spill] sm:$0xff]  ;;  %v24452_v27 = vld [vmem:[#allocation59_spill] sm:$0xff] }
 0x2d9   :  { %v8789_v5 = vadd.f32 %v24446_v43, %v8705_v48  ;;  %v8799_v4 = vadd.f32 %v21589_v0, %v8714_v47  ;;  %v8875_v42 = vadd.f32 %v21608_v44, %v8791_v53  ;;  %v7436_v11 = vadd.f32 %v24447_v9, %v7355_v36  ;;  %v24451_v6 = vld [vmem:[#allocation40_spill] sm:$0xff]  ;;  %v24453_v35 = vld [vmem:[#allocation42_spill] sm:$0xff]  ;;  %v24455_v36 = vld [vmem:[#allocation47_spill] sm:$0xff] }
 0x2da   :  { %v21664_v13 = vpop.f32.mrf.mxu1  ;;  %v21666_v45 = vpop.f32.mrf.mxu0  ;;  %v8239_v60 = vadd.f32 %v24448_v37, %v8155_v49  ;;  %v8164_v26 = vadd.f32 %v24450_v3, %v24449_v2  ;;  %v8241_v41 = vadd.f32 %v24451_v6, %v8157_v62  ;;  %v8797_v24 = vadd.f32 %v24452_v27, %v8712_v50  ;;  %v24456_v31 = vld [vmem:[#allocation44_spill] sm:$0xff]  ;;  %v24457_v21 = vld [vmem:[#allocation49_spill] sm:$0xff]  ;;  %v24458_v22 = vld [vmem:[#allocation46_spill] sm:$0xff] }
 0x2db   :  { %v8873_v48 = vadd.f32 %v21598_v59, %v8789_v5  ;;  %v8884_v0 = vadd.f32 %v21627_v14, %v8799_v4  ;;  %v8503_v34 = vadd.f32 %v7979_v15, %v7439_v18  ;;  %v8247_v52 = vadd.f32 %v24453_v35, %v8162_v25  ;;  %v24464_v27 = vld [vmem:[#allocation52_spill] sm:$0xff]  ;;  %v24466_v35 = vld [vmem:[#allocation33_spill] sm:$0xff] }
 0x2dc   :  { %v21677_v46 = vpop.f32.mrf.mxu1  ;;  %v9138_v51 = vpop.f32.mrf.mxu0  ;;  %v8323_v53 = vadd.f32 %v24454_v38, %v8239_v60  ;;  %v8507_v55 = vadd.f32 %v7986_v33, %v7443_v58  ;;  %v8962_v62 = vadd.f32 %v21610_v28, %v8875_v42  ;;  %v8249_v14 = vadd.f32 %v24456_v31, %v8164_v26  ;;  %v24459_v33 = vld [vmem:[#allocation51_spill] sm:$0xff]  ;;  %v24460_v42 = vld [vmem:[#allocation48_spill] sm:$0xff]  ;;  %v24463_v26 = vld [vmem:[#allocation54_spill] sm:$0xff] }
 0x2dd   :  { %v8332_v39 = vadd.f32 %v24457_v21, %v8247_v52  ;;  %v8960_v30 = vadd.f32 %v21600_v23, %v8873_v48 }
 0x2de   :  { %v9218_v54 = vpop.f32.mrf.mxu1  ;;  %v9302_v32 = vpop.f32.mrf.mxu0  ;;  %v9043_v58 = vadd.f32 %v21652_v20, %v8962_v62  ;;  %v8410_v28 = vadd.f32 %v24458_v22, %v8323_v53  ;;  %v8334_v43 = vadd.f32 %v24459_v33, %v8249_v14  ;;  %v7445_v53 = vadd.f32 %v7436_v11, %v21683_v12  ;;  %v24469_v62 = vld [vmem:[#allocation37_spill] sm:$0xff] }
 0x2df   :  { %v9219_v29 = vadd.f32 %v9218_v54, %v9125_v16  ;;  %v8325_v16 = vadd.f32 %v24455_v36, %v8241_v41  ;;  %v8882_v54 = vadd.f32 %v21618_v63, %v8797_v24  ;;  %v24470_v11 = vld [vmem:[#allocation29_spill] sm:$0xff] }
 0x2e0   :  { %v9220_v8 = vpop.f32.mrf.mxu1  ;;  %v9304_v57 = vpop.f32.mrf.mxu0 }
 0x2e1   :  { %v9221_v49 = vadd.f32 %v9220_v8, %v21654_v7  ;;  %v9303_v18 = vadd.f32 %v9302_v32, %v9219_v29  ;;  %v8969_v7 = vadd.f32 %v21629_v1, %v8884_v0  ;;  %v8412_v9 = vadd.f32 %v24460_v42, %v8325_v16  ;;  %v24465_v0 = vld [vmem:[#allocation55_spill] sm:$0xff]  ;;  %v24468_v16 = vld [vmem:[#allocation57_spill] sm:$0xff] }
 0x2e2   :  { %v9225_v19 = vpop.f32.mrf.mxu1  ;;  %v9310_v56 = vpop.f32.mrf.mxu0  ;;  %v8967_v32 = vadd.f32 %v21620_v10, %v8882_v54 }
 0x2e3   :  { %v9226_v15 = vadd.f32 %v9225_v19, %v21666_v45  ;;  %v9305_v5 = vadd.f32 %v9304_v57, %v9221_v49  ;;  %v9041_v45 = vadd.f32 %v21642_v40, %v8960_v30  ;;  %v9050_v23 = vadd.f32 %v21677_v46, %v8969_v7  ;;  %v24461_v19 = vld [vmem:[#allocation50_spill] sm:$0xff] }
 0x2e4   :  { %v9227_v47 = vpop.f32.mrf.mxu1  ;;  %v9312_v44 = vpop.f32.mrf.mxu0  ;;  %v8417_v20 = vadd.f32 %v24461_v19, %v8332_v39  ;;  %v8493_v29 = vadd.f32 %v24463_v26, %v8412_v9  ;;  %v21737_v57 = vadd.f32 %v9043_v58, %v8503_v34  ;;  %v9048_v6 = vadd.f32 %v21664_v13, %v8967_v32  ;;  %v24467_v13 = vld [vmem:[#allocation27_spill] sm:$0xff] }
 0x2e5   :  { %v9228_v8 = vadd.f32 %v9227_v47, %v9138_v51  ;;  %v24462_v51 = vld [vmem:[#allocation53_spill] sm:$0xff]  ;;  %v9311_v60 = vadd.f32 %v9310_v56, %v9226_v15  ;;  %v7441_v40 = vadd.f32 %v7429_v17, %v21680_v61  ;;  %v8419_v46 = vadd.f32 %v24464_v27, %v8334_v43 }
 0x2e6   :  { %v9386_v50 = vpop.f32.mrf.mxu1  ;;  %v9473_v59 = vpop.f32.mrf.mxu0  ;;  %v8491_v37 = vadd.f32 %v24462_v51, %v8410_v28  ;;  %v8498_v47 = vadd.f32 %v24465_v0, %v8417_v20  ;;  %v21744_v56 = vadd.f32 %v9041_v45, %v24466_v35  ;;  %v21746_v52 = vadd.f32 %v9050_v23, %v8507_v55  ;;  %v9610_v35 = vld [vmem:[%s24331_s3] sm:$0xff] }
 0x2e7   :  { %v9387_v4 = vadd.f32 %v9386_v50, %v9303_v18  ;;  %v9313_v41 = vadd.f32 %v9312_v44, %v9228_v8  ;;  %v8505_v17 = vadd.f32 %v8493_v29, %v7441_v40  ;;  %v8500_v54 = vadd.f32 %v24468_v16, %v8419_v46 }
 0x2e8   :  { %v9388_v25 = vpop.f32.mrf.mxu1  ;;  %v9475_v63 = vpop.f32.mrf.mxu0  ;;  %v8504_v44 = vadd.f32 %v8491_v37, %v24467_v13  ;;  %v21752_v50 = vadd.f32 %v9048_v6, %v24469_v62  ;;  %v9581_v55 = vmul.f32 %v21737_v57, %v21737_v57  ;;  %v9574_v12 = vadd.f32 %v21737_v57, %v21744_v56  ;;  %v9619_v62 = vld [vmem:[%s24333_s5] sm:$0xf] }
 0x2e9   :  { %v9389_v2 = vadd.f32 %v9388_v25, %v9305_v5  ;;  %v9474_v24 = vadd.f32 %v9473_v59, %v9387_v4  ;;  %v8508_v39 = vadd.f32 %v8498_v47, %v24470_v11  ;;  %v9580_v18 = vmul.f32 %v21744_v56, %v21744_v56 }
 0x2ea   :  { %v9395_v1 = vpop.f32.mrf.mxu1  ;;  %v9480_v3 = vpop.f32.mrf.mxu0  ;;  %v9597_v7 = vmul.f32 %v21746_v52, %v21746_v52  ;;  %v8509_v22 = vadd.f32 %v8500_v54, %v7445_v53  ;;  %v9596_v28 = vmul.f32 %v21752_v50, %v21752_v50  ;;  %v9590_v43 = vadd.f32 %v21746_v52, %v21752_v50  ;;  %v9614_v53 = vld [vmem:[%s24332_s4] sm:$0xff] }
 0x2eb   :  { %v9396_v48 = vadd.f32 %v9395_v1, %v9311_v60  ;;  %v9476_v49 = vadd.f32 %v9475_v63, %v9389_v2  ;;  %v9584_v5 = vadd.f32 %v9581_v55, %v9580_v18  ;;  %v19939_v26 = vmov 0  }
 0x2ec   :  { %v9397_v10 = vpop.f32.mrf.mxu1  ;;  %v9482_v36 = vpop.f32.mrf.mxu0  ;;  %v9600_v20 = vadd.f32 %v9597_v7, %v9596_v28  ;;  %19926 = vset.pattern.permute.xlu1 %v19939_v26  ;;  %19927 = vset.pattern.permute.xlu0 %v19939_v26 }
 0x2ed   :  { %v9398_v38 = vadd.f32 %v9397_v10, %v9313_v41  ;;  %v9481_v31 = vadd.f32 %v9480_v3, %v9396_v48 }
 0x2ee   :  { %v9554_v34 = vpop.f32.mrf.mxu1 }
 0x2ef   :  { %v9555_v61 = vadd.f32 %v9554_v34, %v9474_v24  ;;  %v9483_v15 = vadd.f32 %v9482_v36, %v9398_v38  ;;  %v9651_v36 = vlaneseq }
 0x2f0   :  { %v9556_v59 = vpop.f32.mrf.mxu1 }
 0x2f1   :  { %v21756_v14 = vadd.f32 %v9555_v61, %v8504_v44  ;;  %v9557_v21 = vadd.f32 %v9556_v59, %v9476_v49  ;;  %v24471_v49 = vmov 0.0   ;;  %v21795_v61 = vshrl.u32 %v9651_v36, 7 }
 0x2f2   :  { %v9561_v30 = vpop.f32.mrf.mxu1 }
 0x2f3   :  { %v21765_v58 = vadd.f32 %v9557_v21, %v8505_v17  ;;  %v9562_v8 = vadd.f32 %v9561_v30, %v9481_v31  ;;  %v9575_v25 = vadd.f32 %v9574_v12, %v21756_v14  ;;  %v9582_v63 = vmul.f32 %v21756_v14, %v21756_v14 }
 0x2f4   :  { %v9563_v33 = vpop.f32.mrf.mxu1  ;;  %v9661_v54 = vsub.s32 2, %v21795_v61  ;;  %v9653_v12 = vsub.s32 0, %v21795_v61 }
 0x2f5   :  { %v21774_v4 = vadd.f32 %v9562_v8, %v8508_v39  ;;  %v9564_v42 = vadd.f32 %v9563_v33, %v9483_v15  ;;  %v9576_v9 = vadd.f32 %v9575_v25, %v21765_v58  ;;  %v9583_v32 = vmul.f32 %v21765_v58, %v21765_v58 }
 0x2f6   :  { %v9585_v45 = vadd.f32 %v9584_v5, %v9582_v63  ;;  %v9662_v11 = vrot.slane %v9619_v62, %v9661_v54  ;;  %v9654_v8 = vrot.slane %v9619_v62, %v9653_v12  ;;  %v9657_v25 = vsub.s32 1, %v21795_v61 }
 0x2f7   :  { %v21779_v23 = vadd.f32 %v9564_v42, %v8509_v22  ;;  %9577 = vadd.xlane.f32.xlu0 %v9576_v9  ;;  %v9591_v1 = vadd.f32 %v9590_v43, %v21774_v4  ;;  %v9598_v19 = vmul.f32 %v21774_v4, %v21774_v4 }
 0x2f8   :  { %v9586_v37 = vadd.f32 %v9585_v45, %v9583_v32  ;;  %v9658_v43 = vrot.slane %v9619_v62, %v9657_v25 }
 0x2f9   :  { %v9592_v51 = vadd.f32 %v9591_v1, %v21779_v23  ;;  %v9599_v60 = vmul.f32 %v21779_v23, %v21779_v23  ;;  %v9601_v2 = vadd.f32 %v9600_v20, %v9598_v19 }
 0x2fb   :  { %9593 = vadd.xlane.f32.xlu1 %v9592_v51  ;;  %9587 = vadd.xlane.f32.xlu0 %v9586_v37  ;;  %v9602_v3 = vadd.f32 %v9601_v2, %v9599_v60 }
 0x2ff   :  { %9603 = vadd.xlane.f32.xlu0 %v9602_v3 }
 0x380   :  { %v9578_v29 = vpop.xlane.xlu0 %9577 }
 0x384   :  { %v9594_v6 = vpop.xlane.xlu1 %9593  ;;  %v9588_v41 = vpop.xlane.xlu0 %9587 }
 0x385   :  { %v9595_v10 = vadd.f32 %v9594_v6, %v9578_v29  ;;  %v9665_v29 = vsub.s32 3, %v21795_v61 }
 0x387   :  { %v9606_v40 = vmul.f32 0.0015432099, %v9595_v10 }
 0x388   :  { %v9604_v27 = vpop.xlane.xlu0 %9603 }
 0x389   :  { %v9605_v46 = vadd.f32 %v9604_v27, %v9588_v41  ;;  %v9608_v24 = vmul.f32 %v9606_v40, %v9606_v40 }
 0x38b   :  { %v9607_v48 = vmul.f32 0.0015432099, %v9605_v46 }
 0x38d   :  { %v9609_v0 = vsub.f32 %v9607_v48, %v9608_v24  ;;  %v19900_v48 = vld [vmem:[%s24334_s2 + $0x10] sm:$0xff] }
 0x38f   :  { %v9611_v47 = vadd.f32 1e-05, %v9609_v0 }
 0x391   :  { %19928 = vrsqrt.f32 %v9611_v47  ;;  %v19901_v47 = vld [vmem:[%s24334_s2 + $0x18] sm:$0xff] }
 0x39e   :  { %v19929_v38 = vpop.eup %19928 }
 0x39f   :  { %v9613_v34 = vmul.f32 %v19929_v38, %v9610_v35 }
 0x3a1   :  { %9622 = vperm.xlu1 %19926, %v9613_v34   ;;  %v9615_v13 = vmul.f32 %v9613_v34, %v9606_v40 }
 0x3a3   :  { %v9616_v44 = vsub.f32 %v9614_v53, %v9615_v13 }
 0x3a5   :  { %9631 = vperm.xlu0 %19927, %v9616_v44   ;;  %9742 = vrot.lane.b32.xlu1 %v24471_v49, %s19931_s25 }
 0x41c   :  { %v9623_v17 = vpop.permute.xlu1 %9622 }
 0x41d   :  { %v9627_v16 = vmul.f32 %v9623_v17, %v21756_v14  ;;  %v9679_v55 = vmul.f32 %v9623_v17, %v21752_v50  ;;  %v9680_v21 = vmul.f32 %v9623_v17, %v21746_v52  ;;  %v9625_v14 = vmul.f32 %v9623_v17, %v21744_v56 }
 0x41e   :  { %v9626_v30 = vmul.f32 %v9623_v17, %v21737_v57  ;;  %v9681_v33 = vmul.f32 %v9623_v17, %v21774_v4  ;;  %v9682_v60 = vmul.f32 %v9623_v17, %v21779_v23  ;;  %v9628_v26 = vmul.f32 %v9623_v17, %v21765_v58 }
 0x41f   :  { %v9666_v23 = vrot.slane %v9619_v62, %v9665_v29 }
 0x420   :  { %v9632_v59 = vpop.permute.xlu0 %9631  ;;  %v9743_v24 = vpop.permute.xlu1 %9742 }
 0x421   :  { %v9636_v31 = vadd.f32 %v9632_v59, %v9627_v16  ;;  %v9683_v39 = vadd.f32 %v9679_v55, %v9632_v59  ;;  %v9684_v15 = vadd.f32 %v9680_v21, %v9632_v59  ;;  %v9634_v50 = vadd.f32 %v9632_v59, %v9625_v14 }
 0x422   :  { %v9635_v52 = vadd.f32 %v9632_v59, %v9626_v30  ;;  %v9685_v9 = vadd.f32 %v9681_v33, %v9632_v59  ;;  %v9686_v3 = vadd.f32 %v9682_v60, %v9632_v59  ;;  %v9637_v6 = vadd.f32 %v9632_v59, %v9628_v26 }
 0x423   :  { %vm9640_vm9 = vcmp.gt.f32.partialorder %v9636_v31, 0.0  ;;  %v9644_v18 = vmul.f32 0.01, %v9636_v31  ;;  %vm9687_vm10 = vcmp.gt.f32.partialorder %v9683_v39, 0.0  ;;  %v9691_v22 = vmul.f32 0.01, %v9683_v39 }
 0x424   :  { %v9692_v28 = vmul.f32 0.01, %v9684_v15  ;;  %vm9688_vm11 = vcmp.gt.f32.partialorder %v9684_v15, 0.0  ;;  %v9642_v5 = vmul.f32 0.01, %v9634_v50  ;;  %vm9638_vm12 = vcmp.gt.f32.partialorder %v9634_v50, 0.0 }
 0x425   :  { %v9648_v7 = vsel %vm9640_vm9, %v9636_v31, %v9644_v18  ;;  %v9695_v56 = vsel %vm9687_vm10, %v9683_v39, %v9691_v22  ;;  %v9643_v42 = vmul.f32 0.01, %v9635_v52  ;;  %vm9639_vm13 = vcmp.gt.f32.partialorder %v9635_v52, 0.0 }
 0x426   :  { %v21808_v63 = vmul.f32 %v9662_v11, %v9648_v7  ;;  %v21813_v57 = vmul.f32 %v9695_v56, %v9654_v8  ;;  %v9696_v32 = vsel %vm9688_vm11, %v9684_v15, %v9692_v28  ;;  %v9646_v1 = vsel %vm9638_vm12, %v9634_v50, %v9642_v5 }
 0x427   :  { %v21819_v45 = vmul.f32 %v9696_v32, %v9658_v43  ;;  %v9647_v4 = vsel %vm9639_vm13, %v9635_v52, %v9643_v42  ;;  %v9693_v19 = vmul.f32 0.01, %v9685_v9  ;;  %vm9689_vm14 = vcmp.gt.f32.partialorder %v9685_v9, 0.0 }
 0x428   :  { %9738 = vrot.lane.b32.xlu0 %v21808_v63, %s19931_s25  ;;  %9744 = vrot.lane.b32.xlu1 %v21813_v57, %s19931_s25  ;;  %v21825_v20 = vmul.f32 %v9654_v8, %v9646_v1  ;;  %v21827_v51 = vmul.f32 %v9658_v43, %v9647_v4  ;;  %v9694_v41 = vmul.f32 0.01, %v9686_v3  ;;  %vm9690_vm15 = vcmp.gt.f32.partialorder %v9686_v3, 0.0 }
 0x429   :  { %v9697_v37 = vsel %vm9689_vm14, %v9685_v9, %v9693_v19  ;;  %v9645_v10 = vmul.f32 0.01, %v9637_v6  ;;  %vm9641_vm0 = vcmp.gt.f32.partialorder %v9637_v6, 0.0  ;;  %vm9768_vm9 = vcmask 130048  }
 0x42a   :  { %v21834_v2 = vmul.f32 %v9697_v37, %v9662_v11  ;;  %v9698_v40 = vsel %vm9690_vm15, %v9686_v3, %v9694_v41  ;;  %v9770_v0 = vsel %vm9768_vm9, %v19900_v48, 0  ;;  %v9773_v13 = vsel %vm9768_vm9, %v19901_v47, 0 }
 0x42b   :  { %v21850_v58 = vmul.f32 %v9698_v40, %v9666_v23  ;;  %v9649_v27 = vsel %vm9641_vm0, %v9637_v6, %v9645_v10  ;;  %v21954_v34 = vand.u32 4294901760, %v9770_v0  ;;  %v21973_v16 = vand.u32 4294901760, %v9773_v13 }
 0x42c   :  { %11954 = vrot.lane.b32.xlu0 %v24471_v49, %s19932_s8  ;;  %9746 = vrot.lane.b32.xlu1 %v21819_v45, %s19931_s25  ;;  %v21856_v46 = vmul.f32 %v9666_v23, %v9649_v27 }
 0x42d   :  { %v21971_v17 = vsub.f32 %v9770_v0, %v21954_v34  ;;  %v21989_v21 = vsub.f32 %v9773_v13, %v21973_v16 }
 0x42f   :  { %v21986_v31 = vand.u32 4294901760, %v21971_v17  ;;  %v22002_v30 = vand.u32 4294901760, %v21989_v21 }
 0x430   :  { %11956 = vrot.lane.b32.xlu0 %v21813_v57, %s19932_s8  ;;  %9734 = vrot.lane.b32.xlu1 %v21825_v20, %s19931_s25 }
 0x431   :  { %v9847_v14 = vsub.f32 %v21971_v17, %v21986_v31  ;;  %v9858_v33 = vsub.f32 %v21989_v21, %v22002_v30 }
 0x433   :  { %v22013_v28 = vand.u32 4294901760, %v9847_v14  ;;  %v22026_v32 = vand.u32 4294901760, %v9858_v33 }
 0x434   :  { %11948 = vrot.lane.b32.xlu0 %v21827_v51, %s19932_s8  ;;  %9736 = vrot.lane.b32.xlu1 %v21827_v51, %s19931_s25 }
 0x438   :  { %11960 = vrot.lane.b32.xlu0 %v21834_v2, %s19932_s8  ;;  %9732 = vrot.lane.b32.xlu1 %v24471_v49, %s19931_s25 }
 0x43c   :  { %11950 = vrot.lane.b32.xlu0 %v21808_v63, %s19932_s8  ;;  %9748 = vrot.lane.b32.xlu1 %v21834_v2, %s19931_s25 }
 0x440   :  { %13087 = vrot.lane.b32.xlu0 %v24471_v49, %s19933_s0  ;;  %9750 = vrot.lane.b32.xlu1 %v21850_v58, %s19931_s25 }
 0x444   :  { %13089 = vrot.lane.b32.xlu0 %v21813_v57, %s19933_s0  ;;  %9740 = vrot.lane.b32.xlu1 %v21856_v46, %s19931_s25 }
 0x448   :  { %13081 = vrot.lane.b32.xlu0 %v21827_v51, %s19933_s0  ;;  %11958 = vrot.lane.b32.xlu1 %v21819_v45, %s19932_s8 }
 0x44c   :  { %13093 = vrot.lane.b32.xlu0 %v21834_v2, %s19933_s0  ;;  %11946 = vrot.lane.b32.xlu1 %v21825_v20, %s19932_s8 }
 0x450   :  { %13083 = vrot.lane.b32.xlu0 %v21808_v63, %s19933_s0  ;;  %11944 = vrot.lane.b32.xlu1 %v24471_v49, %s19932_s8 }
 0x454   :  { %14220 = vrot.lane.b32.xlu0 %v24471_v49, %s19934_s9  ;;  %11962 = vrot.lane.b32.xlu1 %v21850_v58, %s19932_s8 }
 0x458   :  { %14222 = vrot.lane.b32.xlu0 %v21813_v57, %s19934_s9  ;;  %11952 = vrot.lane.b32.xlu1 %v21856_v46, %s19932_s8 }
 0x45c   :  { %14214 = vrot.lane.b32.xlu0 %v21827_v51, %s19934_s9  ;;  %13091 = vrot.lane.b32.xlu1 %v21819_v45, %s19933_s0 }
 0x460   :  { %14226 = vrot.lane.b32.xlu0 %v21834_v2, %s19934_s9  ;;  %13079 = vrot.lane.b32.xlu1 %v21825_v20, %s19933_s0 }
 0x464   :  { %14216 = vrot.lane.b32.xlu0 %v21808_v63, %s19934_s9  ;;  %13077 = vrot.lane.b32.xlu1 %v24471_v49, %s19933_s0 }
 0x468   :  { %15353 = vrot.lane.b32.xlu0 %v24471_v49, %s19935_s14  ;;  %13095 = vrot.lane.b32.xlu1 %v21850_v58, %s19933_s0 }
 0x46c   :  { %15355 = vrot.lane.b32.xlu0 %v21813_v57, %s19935_s14  ;;  %13085 = vrot.lane.b32.xlu1 %v21856_v46, %s19933_s0 }
 0x470   :  { %15347 = vrot.lane.b32.xlu0 %v21827_v51, %s19935_s14  ;;  %14224 = vrot.lane.b32.xlu1 %v21819_v45, %s19934_s9 }
 0x474   :  { %15359 = vrot.lane.b32.xlu0 %v21834_v2, %s19935_s14  ;;  %14212 = vrot.lane.b32.xlu1 %v21825_v20, %s19934_s9 }
 0x478   :  { %15349 = vrot.lane.b32.xlu0 %v21808_v63, %s19935_s14  ;;  %14210 = vrot.lane.b32.xlu1 %v24471_v49, %s19934_s9 }
 0x47c   :  { %16486 = vrot.lane.b32.xlu0 %v24471_v49, %s19936_s19  ;;  %14228 = vrot.lane.b32.xlu1 %v21850_v58, %s19934_s9 }
 0x480   :  { %16488 = vrot.lane.b32.xlu0 %v21813_v57, %s19936_s19  ;;  %14218 = vrot.lane.b32.xlu1 %v21856_v46, %s19934_s9 }
 0x484   :  { %16480 = vrot.lane.b32.xlu0 %v21827_v51, %s19936_s19  ;;  %15357 = vrot.lane.b32.xlu1 %v21819_v45, %s19935_s14 }
 0x488   :  { %16492 = vrot.lane.b32.xlu0 %v21834_v2, %s19936_s19  ;;  %15345 = vrot.lane.b32.xlu1 %v21825_v20, %s19935_s14 }
 0x48c   :  { %16482 = vrot.lane.b32.xlu0 %v21808_v63, %s19936_s19  ;;  %15343 = vrot.lane.b32.xlu1 %v24471_v49, %s19935_s14 }
 0x490   :  { %17619 = vrot.lane.b32.xlu0 %v24471_v49, %s19937_s24  ;;  %15361 = vrot.lane.b32.xlu1 %v21850_v58, %s19935_s14 }
 0x494   :  { %17621 = vrot.lane.b32.xlu0 %v21813_v57, %s19937_s24  ;;  %15351 = vrot.lane.b32.xlu1 %v21856_v46, %s19935_s14 }
 0x498   :  { %17613 = vrot.lane.b32.xlu0 %v21827_v51, %s19937_s24  ;;  %16490 = vrot.lane.b32.xlu1 %v21819_v45, %s19936_s19 }
 0x49a   :  { %v9745_v35 = vpop.permute.xlu1 %9744  ;;  %v9739_v6 = vpop.permute.xlu0 %9738 }
 0x49b   :  { %v9756_v38 = vsel %vm48_vm1, %v9743_v24, %v9745_v35 }
 0x49c   :  { %17625 = vrot.lane.b32.xlu0 %v21834_v2, %s19937_s24  ;;  %v21956_v53 = vand.u32 4294901760, %v9756_v38  ;;  %16478 = vrot.lane.b32.xlu1 %v21825_v20, %s19936_s19 }
 0x49e   :  { %v21964_v44 = vsub.f32 %v9756_v38, %v21956_v53  ;;  %v21966_v36 = vpop.permute.xlu1 %9746 }
 0x49f   :  { %v9757_v61 = vsel %vm48_vm1, %v9745_v35, %v21966_v36 }
 0x4a0   :  { %17615 = vrot.lane.b32.xlu0 %v21808_v63, %s19937_s24  ;;  %v21975_v54 = vand.u32 4294901760, %v9757_v61  ;;  %16476 = vrot.lane.b32.xlu1 %v24471_v49, %s19936_s19  ;;  %v9902_v62 = vand.u32 4294901760, %v21964_v44 }
 0x4a2   :  { %v9895_v59 = vsub.f32 %v9757_v61, %v21975_v54  ;;  %9804 = vmatprep.subr.mxu0 %v21975_v54  ;;  %v9735_v55 = vpop.permute.xlu1 %9734  ;;  %v9903_v11 = vsub.f32 %v21964_v44, %v9902_v62 }
 0x4a3   :  { %9806 = vmatpush1.msra.mxu0 %v21956_v53 }
 0x4a4   :  { %18752 = vrot.lane.b32.xlu0 %v24471_v49, %s19938_s30  ;;  %16494 = vrot.lane.b32.xlu1 %v21850_v58, %s19936_s19  ;;  %v9896_v12 = vand.u32 4294901760, %v9895_v59  ;;  %v9904_v25 = vand.u32 4294901760, %v9903_v11 }
 0x4a6   :  { %v9737_v39 = vpop.permute.xlu1 %9736  ;;  %v9897_v18 = vsub.f32 %v9895_v59, %v9896_v12 }
 0x4a7   :  { %v9753_v15 = vsel %vm48_vm1, %v9735_v55, %v9737_v39  ;;  %v9754_v40 = vsel %vm48_vm1, %v9737_v39, %v9739_v6  ;;  %v9715_v39 = vld [vmem:[%s24334_s2] sm:$0xff] }
 0x4a8   :  { %18754 = vrot.lane.b32.xlu0 %v21813_v57, %s19938_s30  ;;  %v22004_v7 = vand.u32 4294901760, %v9753_v15  ;;  %16484 = vrot.lane.b32.xlu1 %v21856_v46, %s19936_s19  ;;  %v9898_v8 = vand.u32 4294901760, %v9897_v18  ;;  %v22064_v48 = vand.u32 4294901760, %v9754_v40  ;;  %v22115_v18 = vand.u32 4294901760, %v21819_v45 }
 0x4aa   :  { %v9907_v50 = vsub.f32 %v9753_v15, %v22004_v7  ;;  %9808 = vmatprep.subr.mxu0 %v22004_v7  ;;  %9899 = vmatprep.subr.mxu1 %v9898_v8  ;;  %v9733_v52 = vpop.permute.xlu1 %9732  ;;  %v10453_v38 = vsub.f32 %v9754_v40, %v22064_v48  ;;  %v10856_v15 = vsel %vm9768_vm9, %v9715_v39, 0  ;;  %v22130_v8 = vsub.f32 %v21819_v45, %v22115_v18 }
 0x4ab   :  { %v9752_v22 = vsel %vm48_vm1, %v9733_v52, %v9735_v55  ;;  %9905 = vmatpush1.msra.mxu1 %v9904_v25  ;;  %v22121_v14 = vand.u32 4294901760, %v10856_v15  ;;  %v22149_v52 = vand.u32 4294901760, %v21825_v20 }
 0x4ac   :  { %18746 = vrot.lane.b32.xlu0 %v21827_v51, %s19938_s30  ;;  %v22017_v56 = vand.u32 4294901760, %v9752_v22  ;;  %17623 = vrot.lane.b32.xlu1 %v21819_v45, %s19937_s24  ;;  %v9908_v43 = vand.u32 4294901760, %v9907_v50  ;;  %v10454_v61 = vand.u32 4294901760, %v10453_v38 }
 0x4ae   :  { %v9913_v5 = vsub.f32 %v9752_v22, %v22017_v56  ;;  %9810 = vmatpush1.msra.mxu0 %v22017_v56  ;;  %v9749_v42 = vpop.permute.xlu1 %9748  ;;  %v9909_v9 = vsub.f32 %v9907_v50, %v9908_v43  ;;  %v10982_v22 = vand.u32 4294901760, %v22130_v8 }
 0x4af   :  { %9849 = vmatmul.mubr.f32.vlgmr.msra.gmra.mxu0 %v22013_v28  ;;  %9995 = vmatprep.subr.mxu0 %v9895_v59  ;;  %v9758_v41 = vsel %vm48_vm1, %v21966_v36, %v9749_v42  ;;  %v10455_v59 = vsub.f32 %v10453_v38, %v10454_v61 }
 0x4b0   :  { %18758 = vrot.lane.b32.xlu0 %v21834_v2, %s19938_s30  ;;  %v9914_v1 = vand.u32 4294901760, %v9913_v5  ;;  %17611 = vrot.lane.b32.xlu1 %v21825_v20, %s19937_s24  ;;  %v9910_v4 = vand.u32 4294901760, %v9909_v9  ;;  %v22057_v27 = vand.u32 4294901760, %v9758_v41 }
 0x4b1   :  { %9998 = vmatpush1.msra.mxu0 %v21964_v44  ;;  %9854 = vmatprep.mubr.f32.mxu0 %v24471_v49  ;;  %v10456_v11 = vand.u32 4294901760, %v10455_v59  ;;  %v19902_v59 = vld [vmem:[%s24334_s2 + $0x20] sm:$0xff] }
 0x4b2   :  { %10001 = vmatprep.subr.mxu0 %v9907_v50  ;;  %v9915_v19 = vsub.f32 %v9913_v5, %v9914_v1  ;;  %9911 = vmatprep.subr.mxu1 %v9910_v4  ;;  %v9751_v37 = vpop.permute.xlu1 %9750  ;;  %v10441_v47 = vsub.f32 %v9758_v41, %v22057_v27  ;;  %v22141_v50 = vand.u32 4294901760, %v21827_v51  ;;  %v22224_v41 = vand.u32 4294901760, %v21856_v46 }
 0x4b3   :  { %10004 = vmatpush1.msra.mxu0 %v9913_v5  ;;  %v9759_v60 = vsel %vm48_vm1, %v9749_v42, %v9751_v37  ;;  %v10983_v5 = vsub.f32 %v22130_v8, %v10982_v22 }
 0x4b4   :  { %9860 = vmatmul.mubr.f32.gmra.mxu0 %v22026_v32  ;;  %10172 = vmatprep.subr.mxu0 %v9896_v12  ;;  %v9916_v3 = vand.u32 4294901760, %v9915_v19  ;;  %v22038_v26 = vand.u32 4294901760, %v9759_v60  ;;  %v10442_v44 = vand.u32 4294901760, %v10441_v47  ;;  %v22242_v40 = vsub.f32 %v21856_v46, %v22224_v41 }
 0x4b5   :  { %18748 = vrot.lane.b32.xlu0 %v21808_v63, %s19938_s30  ;;  %17609 = vrot.lane.b32.xlu1 %v24471_v49, %s19937_s24 }
 0x4b6   :  { %10037 = vmatprep.mubr.f32.mxu0 %v24471_v49  ;;  %9917 = vmatpush1.msra.mxu1 %v9916_v3  ;;  %v9741_v29 = vpop.permute.xlu1 %9740  ;;  %v22049_v23 = vsub.f32 %v9759_v60, %v22038_v26 }
 0x4b7   :  { %9952 = vmatmul.mubr.f32.vlgmr.msra.gmra.mxu1 %v21954_v34  ;;  %10083 = vmatprep.subr.mxu1 %v21975_v54  ;;  %v9755_v10 = vsel %vm48_vm1, %v9739_v6, %v9741_v29 }
 0x4b8   :  { %10040 = vmatmul.mubr.f32.vlgmr.msra.gmra.mxu0 %v21971_v17  ;;  %10085 = vmatpush1.msra.mxu1 %v21956_v53  ;;  %v22060_v24 = vand.u32 4294901760, %v9755_v10  ;;  %v10436_v0 = vand.u32 4294901760, %v22049_v23 }
 0x4b9   :  { %10176 = vmatpush1.msra.mxu0 %v9902_v62  ;;  %17627 = vrot.lane.b32.xlu1 %v21850_v58, %s19937_s24 }
 0x4ba   :  { %10180 = vmatprep.subr.mxu0 %v9908_v43  ;;  %10087 = vmatprep.subr.mxu1 %v22004_v7  ;;  %v10447_v35 = vsub.f32 %v9755_v10, %v22060_v24  ;;  %v10437_v13 = vsub.f32 %v22049_v23, %v10436_v0  ;;  %v10993_v43 = vsub.f32 %v21827_v51, %v22141_v50 }
 0x4bb   :  { %10184 = vmatpush1.msra.mxu0 %v9914_v1  ;;  %9957 = vmatprep.mubr.f32.mxu1 %v24471_v49 }
 0x4bc   :  { %10045 = vmatprep.mubr.f32.mxu0 %v24471_v49  ;;  %10089 = vmatpush1.msra.mxu1 %v22017_v56  ;;  %v10448_v36 = vand.u32 4294901760, %v10447_v35 }
 0x4bd   :  { %10344 = vmatprep.subr.mxu0 %v22038_v26  ;;  %9959 = vmatmul.mubr.f32.gmra.mxu1 %v21973_v16 }
 0x4be   :  { %10048 = vmatmul.mubr.f32.gmra.mxu0 %v21989_v21  ;;  %10261 = vmatprep.subr.mxu1 %v21975_v54  ;;  %v10438_v54 = vand.u32 4294901760, %v10437_v13  ;;  %v10449_v62 = vsub.f32 %v10447_v35, %v10448_v36 }
 0x4bf   :  { %17617 = vrot.lane.b32.xlu1 %v21856_v46, %s19937_s24  ;;  %10122 = vmatprep.mubr.f32.mxu1 %v24471_v49 }
 0x4c0   :  { %10217 = vmatprep.mubr.f32.mxu0 %v24471_v49  ;;  %v10450_v12 = vand.u32 4294901760, %v10449_v62 }
 0x4c1   :  { %10126 = vmatmul.mubr.f32.vlgmr.msra.gmra.mxu1 %v21986_v31 }
 0x4c2   :  { %10219 = vmatmul.mubr.f32.vlgmr.msra.gmra.mxu0 %v21954_v34  ;;  %10263 = vmatpush1.msra.mxu1 %v21956_v53  ;;  %v10443_v53 = vsub.f32 %v10441_v47, %v10442_v44 }
 0x4c3   :  { %10346 = vmatpush1.msra.mxu0 %v22057_v27  ;;  %18756 = vrot.lane.b32.xlu1 %v21819_v45, %s19938_s30  ;;  %v22144_v45 = vsub.f32 %v10856_v15, %v22121_v14 }
 0x4c4   :  { %10265 = vmatprep.subr.mxu1 %v22004_v7  ;;  %10348 = vmatprep.subr.mxu0 %v22060_v24  ;;  %v10444_v55 = vand.u32 4294901760, %v10443_v53  ;;  %v9716_v7 = vld [vmem:[%s24334_s2 + $0x8] sm:$0xff] }
 0x4c5   :  { %10267 = vmatpush1.msra.mxu1 %v22017_v56  ;;  %10350 = vmatpush1.msra.mxu0 %v22064_v48  ;;  %v10859_v25 = vsel %vm9768_vm9, %v9716_v7, 0  ;;  %v22161_v56 = vand.u32 4294901760, %v22144_v45  ;;  %v19903_v7 = vld [vmem:[%s24334_s2 + $0x28] sm:$0xff] }
 0x4c6   :  { %10131 = vmatprep.mubr.f32.mxu1 %v24471_v49  ;;  %10224 = vmatprep.mubr.f32.mxu0 %v24471_v49 }
 0x4c7   :  { %10439 = vmatprep.subr.mxu1 %v10438_v54  ;;  %10535 = vmatprep.subr.mxu0 %v22049_v23  ;;  %v10933_v51 = vsub.f32 %v22144_v45, %v22161_v56 }
 0x4c8   :  { %10135 = vmatmul.mubr.f32.gmra.mxu1 %v22002_v30  ;;  %10226 = vmatmul.mubr.f32.gmra.mxu0 %v21973_v16 }
 0x4c9   :  { %18744 = vrot.lane.b32.xlu1 %v21825_v20, %s19938_s30  ;;  %10300 = vmatprep.mubr.f32.mxu1 %v24471_v49  ;;  %v22189_v4 = vand.u32 4294901760, %v10933_v51 }
 0x4ca   :  { %10383 = vmatprep.mubr.f32.mxu0 %v24471_v49 }
 0x4cc   :  { %10302 = vmatmul.mubr.f32.vlgmr.msra.gmra.mxu1 %v21954_v34  ;;  %10389 = vmatmul.mubr.f32.vlgmr.msra.gmra.mxu0 %v22013_v28  ;;  %v22154_v28 = vand.u32 4294901760, %v10859_v25 }
 0x4cd   :  { %10445 = vmatpush1.msra.mxu1 %v10444_v55  ;;  %10538 = vmatpush1.msra.mxu0 %v10441_v47 }
 0x4ce   :  { %18742 = vrot.lane.b32.xlu1 %v24471_v49, %s19938_s30  ;;  %10451 = vmatprep.subr.mxu1 %v10450_v12  ;;  %v22171_v42 = vsub.f32 %v10859_v25, %v22154_v28  ;;  %v11981_v12 = vsel %vm9768_vm9, %v19902_v59, 0 }
 0x4cf   :  { %10541 = vmatprep.subr.mxu0 %v10447_v35  ;;  %10457 = vmatpush1.msra.mxu1 %v10456_v11  ;;  %v11955_v35 = vpop.permute.xlu0 %11954  ;;  %v22297_v15 = vand.u32 4294901760, %v11981_v12 }
 0x4d0   :  { %10544 = vmatpush1.msra.mxu0 %v10453_v38  ;;  %10307 = vmatprep.mubr.f32.mxu1 %v24471_v49  ;;  %v22267_v38 = vpop.permute.xlu1 %11958 }
 0x4d1   :  { %10394 = vmatprep.mubr.f32.mxu0 %v24471_v49  ;;  %10623 = vmatprep.subr.mxu1 %v22038_v26 }
 0x4d2   :  { %10712 = vmatprep.subr.mxu0 %v10436_v0  ;;  %10309 = vmatmul.mubr.f32.gmra.mxu1 %v21973_v16 }
 0x4d3   :  { %10400 = vmatmul.mubr.f32.gmra.mxu0 %v22026_v32  ;;  %18760 = vrot.lane.b32.xlu1 %v21850_v58, %s19938_s30  ;;  %v22184_v32 = vand.u32 4294901760, %v22171_v42  ;;  %v11957_v54 = vpop.permute.xlu0 %11956 }
 0x4d4   :  { %10490 = vmatprep.mubr.f32.mxu1 %v24471_v49  ;;  %10577 = vmatprep.mubr.f32.mxu0 %v24471_v49  ;;  %v11947_v53 = vpop.permute.xlu1 %11946  ;;  %v11969_v62 = vsel %vm2139_vm2, %v11957_v54, %v22267_v38  ;;  %v11968_v39 = vsel %vm2139_vm2, %v11955_v35, %v11957_v54 }
 0x4d5   :  { %v10944_v60 = vsub.f32 %v22171_v42, %v22184_v32  ;;  %v22287_v55 = vand.u32 4294901760, %v11969_v62 }
 0x4d6   :  { %10492 = vmatmul.mubr.f32.vlgmr.msra.gmra.mxu1 %v21954_v34 }
 0x4d7   :  { %10580 = vmatmul.mubr.f32.vlgmr.msra.gmra.mxu0 %v21971_v17  ;;  %10625 = vmatpush1.msra.mxu1 %v22057_v27  ;;  %v22135_v17 = vand.u32 4294901760, %v21813_v57  ;;  %v22197_v29 = vand.u32 4294901760, %v10944_v60 }
 0x4d8   :  { %10716 = vmatpush1.msra.mxu0 %v10442_v44  ;;  %18750 = vrot.lane.b32.xlu1 %v21856_v46, %s19938_s30  ;;  %v11534_v46 = vand.u32 4294901760, %v22242_v40  ;;  %v11945_v11 = vpop.permute.xlu1 %11944 }
 0x4d9   :  { %10627 = vmatprep.subr.mxu1 %v22060_v24  ;;  %10720 = vmatprep.subr.mxu0 %v10448_v36  ;;  %v10987_v33 = vsub.f32 %v21813_v57, %v22135_v17  ;;  %v11964_v25 = vsel %vm2139_vm2, %v11945_v11, %v11947_v53 }
 0x4da   :  { %10629 = vmatpush1.msra.mxu1 %v22064_v48  ;;  %10724 = vmatpush1.msra.mxu0 %v10454_v61  ;;  %v11535_v47 = vsub.f32 %v22242_v40, %v11534_v46 }
 0x4db   :  { %10497 = vmatprep.mubr.f32.mxu1 %v24471_v49  ;;  %10585 = vmatprep.mubr.f32.mxu0 %v24471_v49  ;;  %v10988_v57 = vand.u32 4294901760, %v10987_v33 }
 0x4dc   :  { %10801 = vmatprep.subr.mxu1 %v22038_v26  ;;  %10890 = vmatprep.subr.mxu0 %v22115_v18  ;;  %v11536_v36 = vand.u32 4294901760, %v11535_v47 }
 0x4dd   :  { %10499 = vmatmul.mubr.f32.gmra.mxu1 %v21973_v16  ;;  %10588 = vmatmul.mubr.f32.gmra.mxu0 %v21989_v21  ;;  %v10999_v21 = vsub.f32 %v21825_v20, %v22149_v52  ;;  %v10994_v20 = vand.u32 4294901760, %v10993_v43  ;;  %v10989_v1 = vsub.f32 %v10987_v33, %v10988_v57 }
 0x4de   :  { %10662 = vmatprep.mubr.f32.mxu1 %v24471_v49  ;;  %10757 = vmatprep.mubr.f32.mxu0 %v24471_v49 }
 0x4df   :  { %v11000_v9 = vand.u32 4294901760, %v10999_v21  ;;  %v10995_v19 = vsub.f32 %v10993_v43, %v10994_v20  ;;  %v10990_v3 = vand.u32 4294901760, %v10989_v1 }
 0x4e1   :  { %10666 = vmatmul.mubr.f32.vlgmr.msra.gmra.mxu1 %v21986_v31  ;;  %10759 = vmatmul.mubr.f32.vlgmr.msra.gmra.mxu0 %v21954_v34  ;;  %v10984_v31 = vand.u32 4294901760, %v10983_v5  ;;  %v11001_v37 = vsub.f32 %v10999_v21, %v11000_v9  ;;  %v10996_v26 = vand.u32 4294901760, %v10995_v19 }
 0x4e2   :  { %10803 = vmatpush1.msra.mxu1 %v22057_v27  ;;  %10892 = vmatpush1.msra.mxu0 %v22135_v17 }
 0x4e3   :  { %10805 = vmatprep.subr.mxu1 %v22060_v24  ;;  %10894 = vmatprep.subr.mxu0 %v22141_v50 }
 0x4e4   :  { %10807 = vmatpush1.msra.mxu1 %v22064_v48  ;;  %10896 = vmatpush1.msra.mxu0 %v22149_v52 }
 0x4e5   :  { %10671 = vmatprep.mubr.f32.mxu1 %v24471_v49  ;;  %10764 = vmatprep.mubr.f32.mxu0 %v24471_v49 }
 0x4e6   :  { %10985 = vmatprep.subr.mxu1 %v10984_v31  ;;  %11081 = vmatprep.subr.mxu0 %v22130_v8  ;;  %v22303_v8 = vsub.f32 %v11969_v62, %v22287_v55 }
 0x4e7   :  { %10675 = vmatmul.mubr.f32.gmra.mxu1 %v22002_v30  ;;  %10766 = vmatmul.mubr.f32.gmra.mxu0 %v21973_v16  ;;  %v11002_v30 = vand.u32 4294901760, %v11001_v37 }
 0x4e8   :  { %10840 = vmatprep.mubr.f32.mxu1 %v24471_v49  ;;  %10929 = vmatprep.mubr.f32.mxu0 %v24471_v49 }
 0x4eb   :  { %10842 = vmatmul.mubr.f32.vlgmr.msra.gmra.mxu1 %v21954_v34  ;;  %10935 = vmatmul.mubr.f32.vlgmr.msra.gmra.mxu0 %v22189_v4  ;;  %v22207_v34 = vand.u32 4294901760, %v21850_v58 }
 0x4ec   :  { %10991 = vmatpush1.msra.mxu1 %v10990_v3  ;;  %11084 = vmatpush1.msra.mxu0 %v10987_v33  ;;  %v22321_v33 = vand.u32 4294901760, %v11964_v25 }
 0x4ed   :  { %10997 = vmatprep.subr.mxu1 %v10996_v26  ;;  %11087 = vmatprep.subr.mxu0 %v10993_v43  ;;  %v22214_v6 = vsub.f32 %v21850_v58, %v22207_v34  ;;  %v22229_v58 = vand.u32 4294901760, %v21808_v63  ;;  %v12107_v43 = vand.u32 4294901760, %v22303_v8 }
 0x4ee   :  { %11003 = vmatpush1.msra.mxu1 %v11002_v30  ;;  %11090 = vmatpush1.msra.mxu0 %v10999_v21 }
 0x4ef   :  { %10847 = vmatprep.mubr.f32.mxu1 %v24471_v49  ;;  %10940 = vmatprep.mubr.f32.mxu0 %v24471_v49  ;;  %v11522_v23 = vand.u32 4294901760, %v22214_v6  ;;  %v22247_v24 = vsub.f32 %v21808_v63, %v22229_v58 }
 0x4f0   :  { %11169 = vmatprep.subr.mxu1 %v22115_v18  ;;  %11258 = vmatprep.subr.mxu0 %v10982_v22  ;;  %v22319_v22 = vsub.f32 %v11981_v12, %v22297_v15 }
 0x4f1   :  { %10849 = vmatmul.mubr.f32.gmra.mxu1 %v21973_v16  ;;  %10946 = vmatmul.mubr.f32.gmra.mxu0 %v22197_v29  ;;  %v22219_v16 = vand.u32 4294901760, %v21834_v2  ;;  %v11523_v27 = vsub.f32 %v22214_v6, %v11522_v23  ;;  %v11540_v48 = vand.u32 4294901760, %v22247_v24 }
 0x4f2   :  { %11036 = vmatprep.mubr.f32.mxu1 %v24471_v49  ;;  %11123 = vmatprep.mubr.f32.mxu0 %v24471_v49  ;;  %v22339_v51 = vand.u32 4294901760, %v22319_v22 }
 0x4f3   :  { %v22238_v10 = vsub.f32 %v21834_v2, %v22219_v16  ;;  %v11524_v63 = vand.u32 4294901760, %v11523_v27  ;;  %v11541_v13 = vsub.f32 %v22247_v24, %v11540_v48 }
 0x4f4   :  { %v12058_v1 = vsub.f32 %v22319_v22, %v22339_v51 }
 0x4f5   :  { %11038 = vmatmul.mubr.f32.vlgmr.msra.gmra.mxu1 %v22121_v14  ;;  %11126 = vmatmul.mubr.f32.vlgmr.msra.gmra.mxu0 %v22144_v45  ;;  %v11528_v2 = vand.u32 4294901760, %v22238_v10  ;;  %v11542_v61 = vand.u32 4294901760, %v11541_v13 }
 0x4f6   :  { %11171 = vmatpush1.msra.mxu1 %v22135_v17  ;;  %11262 = vmatpush1.msra.mxu0 %v10988_v57  ;;  %v22370_v3 = vand.u32 4294901760, %v12058_v1 }
 0x4f7   :  { %11173 = vmatprep.subr.mxu1 %v22141_v50  ;;  %11266 = vmatprep.subr.mxu0 %v10994_v20  ;;  %v11529_v0 = vsub.f32 %v22238_v10, %v11528_v2  ;;  %v22342_v20 = vsub.f32 %v11964_v25, %v22321_v33  ;;  %v19904_v25 = vld [vmem:[%s24334_s2 + $0x30] sm:$0xff] }
 0x4f8   :  { %11175 = vmatpush1.msra.mxu1 %v22149_v52  ;;  %11270 = vmatpush1.msra.mxu0 %v11000_v9 }
 0x4f9   :  { %11043 = vmatprep.mubr.f32.mxu1 %v24471_v49  ;;  %11131 = vmatprep.mubr.f32.mxu0 %v24471_v49  ;;  %v11530_v44 = vand.u32 4294901760, %v11529_v0 }
 0x4fa   :  { %11347 = vmatprep.subr.mxu1 %v22115_v18  ;;  %11430 = vmatprep.subr.mxu0 %v22207_v34  ;;  %v22293_v18 = vpop.permute.xlu0 %11948 }
 0x4fb   :  { %11045 = vmatmul.mubr.f32.gmra.mxu1 %v22154_v28  ;;  %11134 = vmatmul.mubr.f32.gmra.mxu0 %v22171_v42 }
 0x4fc   :  { %11208 = vmatprep.mubr.f32.mxu1 %v24471_v49  ;;  %11303 = vmatprep.mubr.f32.mxu0 %v24471_v49 }
 0x4ff   :  { %11212 = vmatmul.mubr.f32.vlgmr.msra.gmra.mxu1 %v22161_v56  ;;  %11305 = vmatmul.mubr.f32.vlgmr.msra.gmra.mxu0 %v22121_v14 }
 0x500   :  { %11349 = vmatpush1.msra.mxu1 %v22135_v17  ;;  %11432 = vmatpush1.msra.mxu0 %v22219_v16  ;;  %v11965_v17 = vsel %vm2139_vm2, %v11947_v53, %v22293_v18 }
 0x501   :  { %11351 = vmatprep.subr.mxu1 %v22141_v50  ;;  %11434 = vmatprep.subr.mxu0 %v22224_v41  ;;  %v22310_v50 = vand.u32 4294901760, %v11968_v39 }
 0x502   :  { %11353 = vmatpush1.msra.mxu1 %v22149_v52  ;;  %11436 = vmatpush1.msra.mxu0 %v22229_v58  ;;  %v22314_v52 = vand.u32 4294901760, %v11965_v17 }
 0x503   :  { %11217 = vmatprep.mubr.f32.mxu1 %v24471_v49  ;;  %11310 = vmatprep.mubr.f32.mxu0 %v24471_v49  ;;  %v22331_v21 = vsub.f32 %v11968_v39, %v22310_v50 }
 0x504   :  { %11525 = vmatprep.subr.mxu1 %v11524_v63  ;;  %11621 = vmatprep.subr.mxu0 %v22214_v6  ;;  %v22336_v57 = vsub.f32 %v11965_v17, %v22314_v52  ;;  %v11963_v6 = vpop.permute.xlu1 %11962 }
 0x505   :  { %11221 = vmatmul.mubr.f32.gmra.mxu1 %v22184_v32  ;;  %11312 = vmatmul.mubr.f32.gmra.mxu0 %v22154_v28  ;;  %v12113_v9 = vand.u32 4294901760, %v22331_v21 }
 0x506   :  { %11386 = vmatprep.mubr.f32.mxu1 %v24471_v49  ;;  %11469 = vmatprep.mubr.f32.mxu0 %v24471_v49 }
 0x507   :  { %v12114_v60 = vsub.f32 %v22331_v21, %v12113_v9 }
 0x509   :  { %11388 = vmatmul.mubr.f32.vlgmr.msra.gmra.mxu1 %v22121_v14  ;;  %11475 = vmatmul.mubr.f32.vlgmr.msra.gmra.mxu0 %v22189_v4  ;;  %v12125_v4 = vand.u32 4294901760, %v22342_v20 }
 0x50a   :  { %11531 = vmatpush1.msra.mxu1 %v11530_v44  ;;  %11624 = vmatpush1.msra.mxu0 %v22238_v10  ;;  %v11953_v10 = vpop.permute.xlu1 %11952 }
 0x50b   :  { %11537 = vmatprep.subr.mxu1 %v11536_v36  ;;  %11627 = vmatprep.subr.mxu0 %v22242_v40  ;;  %v12126_v30 = vsub.f32 %v22342_v20, %v12125_v4 }
 0x50c   :  { %11543 = vmatpush1.msra.mxu1 %v11542_v61  ;;  %11630 = vmatpush1.msra.mxu0 %v22247_v24 }
 0x50d   :  { %11393 = vmatprep.mubr.f32.mxu1 %v24471_v49  ;;  %11480 = vmatprep.mubr.f32.mxu0 %v24471_v49 }
 0x50e   :  { %11709 = vmatprep.subr.mxu1 %v22207_v34  ;;  %11798 = vmatprep.subr.mxu0 %v11522_v23  ;;  %v22452_v12 = vpop.permute.xlu1 %13091 }
 0x50f   :  { %11395 = vmatmul.mubr.f32.gmra.mxu1 %v22154_v28  ;;  %11486 = vmatmul.mubr.f32.gmra.mxu0 %v22197_v29 }
 0x510   :  { %11576 = vmatprep.mubr.f32.mxu1 %v24471_v49  ;;  %11663 = vmatprep.mubr.f32.mxu0 %v24471_v49 }
 0x513   :  { %11578 = vmatmul.mubr.f32.vlgmr.msra.gmra.mxu1 %v22121_v14  ;;  %11666 = vmatmul.mubr.f32.vlgmr.msra.gmra.mxu0 %v22144_v45  ;;  %v11984_v45 = vsel %vm9768_vm9, %v19903_v7, 0 }
 0x514   :  { %11711 = vmatpush1.msra.mxu1 %v22219_v16  ;;  %11802 = vmatpush1.msra.mxu0 %v11528_v2  ;;  %v22328_v5 = vand.u32 4294901760, %v11984_v45 }
 0x515   :  { %11713 = vmatprep.subr.mxu1 %v22224_v41  ;;  %11806 = vmatprep.subr.mxu0 %v11534_v46 }
 0x516   :  { %11715 = vmatpush1.msra.mxu1 %v22229_v58  ;;  %11810 = vmatpush1.msra.mxu0 %v11540_v48  ;;  %v22348_v31 = vsub.f32 %v11984_v45, %v22328_v5  ;;  %v13114_v45 = vsel %vm9768_vm9, %v19904_v25, 0 }
 0x517   :  { %11583 = vmatprep.mubr.f32.mxu1 %v24471_v49  ;;  %11671 = vmatprep.mubr.f32.mxu0 %v24471_v49 }
 0x518   :  { %11887 = vmatprep.subr.mxu1 %v22207_v34  ;;  %12015 = vmatprep.subr.mxu0 %v22287_v55  ;;  %v22364_v37 = vand.u32 4294901760, %v22348_v31  ;;  %v12115_v34 = vand.u32 4294901760, %v12114_v60 }
 0x519   :  { %11585 = vmatmul.mubr.f32.gmra.mxu1 %v22154_v28  ;;  %11674 = vmatmul.mubr.f32.gmra.mxu0 %v22171_v42  ;;  %v12108_v42 = vsub.f32 %v22303_v8, %v12107_v43 }
 0x51a   :  { %11748 = vmatprep.mubr.f32.mxu1 %v24471_v49  ;;  %11843 = vmatprep.mubr.f32.mxu0 %v24471_v49  ;;  %v12069_v29 = vsub.f32 %v22348_v31, %v22364_v37 }
 0x51b   :  { %v12109_v19 = vand.u32 4294901760, %v12108_v42 }
 0x51d   :  { %11752 = vmatmul.mubr.f32.vlgmr.msra.gmra.mxu1 %v22161_v56  ;;  %11845 = vmatmul.mubr.f32.vlgmr.msra.gmra.mxu0 %v22121_v14  ;;  %v12119_v56 = vand.u32 4294901760, %v22336_v57 }
 0x51e   :  { %11889 = vmatpush1.msra.mxu1 %v22219_v16  ;;  %12017 = vmatpush1.msra.mxu0 %v22310_v50  ;;  %v12127_v16 = vand.u32 4294901760, %v12126_v30 }
 0x51f   :  { %11891 = vmatprep.subr.mxu1 %v22224_v41  ;;  %12019 = vmatprep.subr.mxu0 %v22314_v52  ;;  %v12120_v26 = vsub.f32 %v22336_v57, %v12119_v56  ;;  %v22382_v41 = vand.u32 4294901760, %v12069_v29 }
 0x520   :  { %11893 = vmatpush1.msra.mxu1 %v22229_v58  ;;  %12021 = vmatpush1.msra.mxu0 %v22321_v33  ;;  %v11961_v58 = vpop.permute.xlu0 %11960 }
 0x521   :  { %11757 = vmatprep.mubr.f32.mxu1 %v24471_v49  ;;  %11850 = vmatprep.mubr.f32.mxu0 %v24471_v49  ;;  %v11971_v23 = vsel %vm2139_vm2, %v11961_v58, %v11963_v6  ;;  %v11970_v27 = vsel %vm2139_vm2, %v22267_v38, %v11961_v58 }
 0x522   :  { %12110 = vmatprep.subr.mxu1 %v12109_v19  ;;  %12206 = vmatprep.subr.mxu0 %v22303_v8  ;;  %v22407_v46 = vand.u32 4294901760, %v11970_v27  ;;  %v13080_v8 = vpop.permute.xlu1 %13079 }
 0x523   :  { %11761 = vmatmul.mubr.f32.gmra.mxu1 %v22184_v32  ;;  %11852 = vmatmul.mubr.f32.gmra.mxu0 %v22154_v28  ;;  %v12121_v32 = vand.u32 4294901760, %v12120_v26 }
 0x524   :  { %11926 = vmatprep.mubr.f32.mxu1 %v24471_v49  ;;  %12054 = vmatprep.mubr.f32.mxu0 %v24471_v49  ;;  %v11951_v40 = vpop.permute.xlu0 %11950  ;;  %v22422_v47 = vsub.f32 %v11970_v27, %v22407_v46 }
 0x525   :  { %v11966_v2 = vsel %vm2139_vm2, %v22293_v18, %v11951_v40 }
 0x526   :  { %v22414_v48 = vand.u32 4294901760, %v11966_v2  ;;  %v12653_v44 = vand.u32 4294901760, %v22422_v47 }
 0x527   :  { %11928 = vmatmul.mubr.f32.vlgmr.msra.gmra.mxu1 %v22121_v14  ;;  %12060 = vmatmul.mubr.f32.vlgmr.msra.gmra.mxu0 %v22370_v3  ;;  %v22391_v14 = vand.u32 4294901760, %v11971_v23 }
 0x528   :  { %12116 = vmatpush1.msra.mxu1 %v12115_v34  ;;  %12209 = vmatpush1.msra.mxu0 %v22331_v21  ;;  %v22430_v38 = vsub.f32 %v11966_v2, %v22414_v48  ;;  %v12654_v53 = vsub.f32 %v22422_v47, %v12653_v44  ;;  %v22481_v21 = vand.u32 4294901760, %v13114_v45 }
 0x529   :  { %12122 = vmatprep.subr.mxu1 %v12121_v32  ;;  %12212 = vmatprep.subr.mxu0 %v22336_v57  ;;  %v22400_v24 = vsub.f32 %v11971_v23, %v22391_v14  ;;  %v19905_v57 = vld [vmem:[%s24334_s2 + $0x38] sm:$0xff] }
 0x52a   :  { %12128 = vmatpush1.msra.mxu1 %v12127_v16  ;;  %12215 = vmatpush1.msra.mxu0 %v22342_v20  ;;  %v12665_v61 = vand.u32 4294901760, %v22430_v38  ;;  %v12655_v11 = vand.u32 4294901760, %v12654_v53  ;;  %v13117_v1 = vsel %vm9768_vm9, %v19905_v57, 0 }
 0x52b   :  { %11933 = vmatprep.mubr.f32.mxu1 %v24471_v49  ;;  %12065 = vmatprep.mubr.f32.mxu0 %v24471_v49  ;;  %v12647_v0 = vand.u32 4294901760, %v22400_v24 }
 0x52c   :  { %12294 = vmatprep.subr.mxu1 %v22287_v55  ;;  %12383 = vmatprep.subr.mxu0 %v12107_v43  ;;  %v12666_v59 = vsub.f32 %v22430_v38, %v12665_v61 }
 0x52d   :  { %11935 = vmatmul.mubr.f32.gmra.mxu1 %v22154_v28  ;;  %12071 = vmatmul.mubr.f32.gmra.mxu0 %v22382_v41  ;;  %v11967_v28 = vsel %vm2139_vm2, %v11951_v40, %v11953_v10  ;;  %v12648_v13 = vsub.f32 %v22400_v24, %v12647_v0 }
 0x52e   :  { %12161 = vmatprep.mubr.f32.mxu1 %v24471_v49  ;;  %12248 = vmatprep.mubr.f32.mxu0 %v24471_v49  ;;  %v22410_v63 = vand.u32 4294901760, %v11967_v28  ;;  %v12667_v18 = vand.u32 4294901760, %v12666_v59 }
 0x52f   :  { %v12649_v54 = vand.u32 4294901760, %v12648_v13 }
 0x530   :  { %v22427_v35 = vsub.f32 %v11967_v28, %v22410_v63 }
 0x531   :  { %12163 = vmatmul.mubr.f32.vlgmr.msra.gmra.mxu1 %v22297_v15  ;;  %12251 = vmatmul.mubr.f32.vlgmr.msra.gmra.mxu0 %v22319_v22 }
 0x532   :  { %12296 = vmatpush1.msra.mxu1 %v22310_v50  ;;  %12387 = vmatpush1.msra.mxu0 %v12113_v9  ;;  %v12659_v36 = vand.u32 4294901760, %v22427_v35 }
 0x533   :  { %12298 = vmatprep.subr.mxu1 %v22314_v52  ;;  %12391 = vmatprep.subr.mxu0 %v12119_v56 }
 0x534   :  { %12300 = vmatpush1.msra.mxu1 %v22321_v33  ;;  %12395 = vmatpush1.msra.mxu0 %v12125_v4  ;;  %v12660_v62 = vsub.f32 %v22427_v35, %v12659_v36  ;;  %v22503_v4 = vsub.f32 %v13114_v45, %v22481_v21 }
 0x535   :  { %12168 = vmatprep.mubr.f32.mxu1 %v24471_v49  ;;  %12256 = vmatprep.mubr.f32.mxu0 %v24471_v49 }
 0x536   :  { %12472 = vmatprep.subr.mxu1 %v22287_v55  ;;  %12555 = vmatprep.subr.mxu0 %v22391_v14  ;;  %v13088_v55 = vpop.permute.xlu0 %13087  ;;  %v12661_v39 = vand.u32 4294901760, %v12660_v62  ;;  %v22523_v29 = vand.u32 4294901760, %v22503_v4 }
 0x537   :  { %12170 = vmatmul.mubr.f32.gmra.mxu1 %v22328_v5  ;;  %12259 = vmatmul.mubr.f32.gmra.mxu0 %v22348_v31 }
 0x538   :  { %12333 = vmatprep.mubr.f32.mxu1 %v24471_v49  ;;  %12428 = vmatprep.mubr.f32.mxu0 %v24471_v49  ;;  %v13191_v16 = vsub.f32 %v22503_v4, %v22523_v29 }
 0x53a   :  { %v13090_v7 = vpop.permute.xlu0 %13089  ;;  %v22554_v10 = vand.u32 4294901760, %v13191_v16 }
 0x53b   :  { %12337 = vmatmul.mubr.f32.vlgmr.msra.gmra.mxu1 %v22339_v51  ;;  %12430 = vmatmul.mubr.f32.vlgmr.msra.gmra.mxu0 %v22297_v15  ;;  %v13102_v17 = vsel %vm3203_vm3, %v13090_v7, %v22452_v12 }
 0x53c   :  { %12474 = vmatpush1.msra.mxu1 %v22310_v50  ;;  %12557 = vmatpush1.msra.mxu0 %v22407_v46  ;;  %v22471_v50 = vand.u32 4294901760, %v13102_v17 }
 0x53d   :  { %12476 = vmatprep.subr.mxu1 %v22314_v52  ;;  %12559 = vmatprep.subr.mxu0 %v22410_v63  ;;  %v13078_v52 = vpop.permute.xlu1 %13077 }
 0x53e   :  { %12478 = vmatpush1.msra.mxu1 %v22321_v33  ;;  %12561 = vmatpush1.msra.mxu0 %v22414_v48  ;;  %v13101_v33 = vsel %vm3203_vm3, %v13088_v55, %v13090_v7  ;;  %v22477_v43 = vpop.permute.xlu0 %13081  ;;  %v22487_v20 = vsub.f32 %v13102_v17, %v22471_v50  ;;  %v13097_v9 = vsel %vm3203_vm3, %v13078_v52, %v13080_v8 }
 0x53f   :  { %12342 = vmatprep.mubr.f32.mxu1 %v24471_v49  ;;  %12435 = vmatprep.mubr.f32.mxu0 %v24471_v49  ;;  %v13098_v42 = vsel %vm3203_vm3, %v13080_v8, %v22477_v43  ;;  %v22505_v19 = vand.u32 4294901760, %v13097_v9 }
 0x540   :  { %12650 = vmatprep.subr.mxu1 %v12649_v54  ;;  %12746 = vmatprep.subr.mxu0 %v22400_v24  ;;  %v22498_v56 = vand.u32 4294901760, %v13098_v42  ;;  %v13240_v60 = vand.u32 4294901760, %v22487_v20 }
 0x541   :  { %12346 = vmatmul.mubr.f32.gmra.mxu1 %v22364_v37  ;;  %12437 = vmatmul.mubr.f32.gmra.mxu0 %v22328_v5  ;;  %v22526_v34 = vsub.f32 %v13097_v9, %v22505_v19  ;;  %v13096_v2 = vpop.permute.xlu1 %13095 }
 0x542   :  { %12511 = vmatprep.mubr.f32.mxu1 %v24471_v49  ;;  %12594 = vmatprep.mubr.f32.mxu0 %v24471_v49  ;;  %v22520_v30 = vsub.f32 %v13098_v42, %v22498_v56 }
 0x545   :  { %12513 = vmatmul.mubr.f32.vlgmr.msra.gmra.mxu1 %v22297_v15  ;;  %12600 = vmatmul.mubr.f32.vlgmr.msra.gmra.mxu0 %v22370_v3  ;;  %v22512_v3 = vand.u32 4294901760, %v13117_v1 }
 0x546   :  { %12656 = vmatpush1.msra.mxu1 %v12655_v11  ;;  %12749 = vmatpush1.msra.mxu0 %v22422_v47  ;;  %v13086_v47 = vpop.permute.xlu1 %13085 }
 0x547   :  { %12662 = vmatprep.subr.mxu1 %v12661_v39  ;;  %12752 = vmatprep.subr.mxu0 %v22427_v35  ;;  %v22532_v32 = vsub.f32 %v13117_v1, %v22512_v3 }
 0x548   :  { %12668 = vmatpush1.msra.mxu1 %v12667_v18  ;;  %12755 = vmatpush1.msra.mxu0 %v22430_v38 }
 0x549   :  { %12518 = vmatprep.mubr.f32.mxu1 %v24471_v49  ;;  %12605 = vmatprep.mubr.f32.mxu0 %v24471_v49  ;;  %v22548_v23 = vand.u32 4294901760, %v22532_v32 }
 0x54a   :  { %12834 = vmatprep.subr.mxu1 %v22391_v14  ;;  %12923 = vmatprep.subr.mxu0 %v12647_v0 }
 0x54b   :  { %12520 = vmatmul.mubr.f32.gmra.mxu1 %v22328_v5  ;;  %12611 = vmatmul.mubr.f32.gmra.mxu0 %v22382_v41  ;;  %v13258_v41 = vand.u32 4294901760, %v22526_v34  ;;  %v13202_v24 = vsub.f32 %v22532_v32, %v22548_v23 }
 0x54c   :  { %12701 = vmatprep.mubr.f32.mxu1 %v24471_v49  ;;  %12788 = vmatprep.mubr.f32.mxu0 %v24471_v49 }
 0x54d   :  { %v13259_v27 = vsub.f32 %v22526_v34, %v13258_v41 }
 0x54f   :  { %12703 = vmatmul.mubr.f32.vlgmr.msra.gmra.mxu1 %v22297_v15  ;;  %12791 = vmatmul.mubr.f32.vlgmr.msra.gmra.mxu0 %v22319_v22  ;;  %v22494_v22 = vand.u32 4294901760, %v13101_v33 }
 0x550   :  { %12836 = vmatpush1.msra.mxu1 %v22407_v46  ;;  %12927 = vmatpush1.msra.mxu0 %v12653_v44 }
 0x551   :  { %12838 = vmatprep.subr.mxu1 %v22410_v63  ;;  %12931 = vmatprep.subr.mxu0 %v12659_v36  ;;  %v22515_v26 = vsub.f32 %v13101_v33, %v22494_v22 }
 0x552   :  { %12840 = vmatpush1.msra.mxu1 %v22414_v48  ;;  %12935 = vmatpush1.msra.mxu0 %v12665_v61 }
 0x553   :  { %12708 = vmatprep.mubr.f32.mxu1 %v24471_v49  ;;  %12796 = vmatprep.mubr.f32.mxu0 %v24471_v49  ;;  %v13246_v6 = vand.u32 4294901760, %v22515_v26 }
 0x554   :  { %13012 = vmatprep.subr.mxu1 %v22391_v14  ;;  %13148 = vmatprep.subr.mxu0 %v22471_v50 }
 0x555   :  { %12710 = vmatmul.mubr.f32.gmra.mxu1 %v22328_v5  ;;  %12799 = vmatmul.mubr.f32.gmra.mxu0 %v22348_v31  ;;  %v13241_v31 = vsub.f32 %v22487_v20, %v13240_v60  ;;  %v13247_v14 = vsub.f32 %v22515_v26, %v13246_v6 }
 0x556   :  { %12873 = vmatprep.mubr.f32.mxu1 %v24471_v49  ;;  %12968 = vmatprep.mubr.f32.mxu0 %v24471_v49 }
 0x557   :  { %v13242_v58 = vand.u32 4294901760, %v13241_v31  ;;  %v13248_v28 = vand.u32 4294901760, %v13247_v14 }
 0x559   :  { %12877 = vmatmul.mubr.f32.vlgmr.msra.gmra.mxu1 %v22339_v51  ;;  %12970 = vmatmul.mubr.f32.vlgmr.msra.gmra.mxu0 %v22297_v15  ;;  %v13252_v51 = vand.u32 4294901760, %v22520_v30 }
 0x55a   :  { %13014 = vmatpush1.msra.mxu1 %v22407_v46  ;;  %13150 = vmatpush1.msra.mxu0 %v22494_v22  ;;  %v13260_v46 = vand.u32 4294901760, %v13259_v27 }
 0x55b   :  { %13016 = vmatprep.subr.mxu1 %v22410_v63  ;;  %13152 = vmatprep.subr.mxu0 %v22498_v56  ;;  %v13253_v40 = vsub.f32 %v22520_v30, %v13252_v51  ;;  %v22566_v63 = vand.u32 4294901760, %v13202_v24 }
 0x55c   :  { %13018 = vmatpush1.msra.mxu1 %v22414_v48  ;;  %13154 = vmatpush1.msra.mxu0 %v22505_v19  ;;  %v13094_v48 = vpop.permute.xlu0 %13093 }
 0x55d   :  { %12882 = vmatprep.mubr.f32.mxu1 %v24471_v49  ;;  %12975 = vmatprep.mubr.f32.mxu0 %v24471_v49  ;;  %v13104_v0 = vsel %vm3203_vm3, %v13094_v48, %v13096_v2  ;;  %v13103_v38 = vsel %vm3203_vm3, %v22452_v12, %v13094_v48  ;;  %v19906_v2 = vld [vmem:[%s24334_s2 + $0x40] sm:$0xff] }
 0x55e   :  { %13243 = vmatprep.subr.mxu1 %v13242_v58  ;;  %13339 = vmatprep.subr.mxu0 %v22487_v20  ;;  %v22591_v61 = vand.u32 4294901760, %v13103_v38  ;;  %v14247_v48 = vsel %vm9768_vm9, %v19906_v2, 0 }
 0x55f   :  { %12886 = vmatmul.mubr.f32.gmra.mxu1 %v22364_v37  ;;  %12977 = vmatmul.mubr.f32.gmra.mxu0 %v22328_v5  ;;  %v13254_v37 = vand.u32 4294901760, %v13253_v40 }
 0x560   :  { %13051 = vmatprep.mubr.f32.mxu1 %v24471_v49  ;;  %13187 = vmatprep.mubr.f32.mxu0 %v24471_v49  ;;  %v13084_v35 = vpop.permute.xlu0 %13083  ;;  %v22608_v12 = vsub.f32 %v13103_v38, %v22591_v61 }
 0x561   :  { %v13099_v44 = vsel %vm3203_vm3, %v22477_v43, %v13084_v35 }
 0x562   :  { %v22600_v62 = vand.u32 4294901760, %v13099_v44  ;;  %v13786_v25 = vand.u32 4294901760, %v22608_v12 }
 0x563   :  { %13053 = vmatmul.mubr.f32.vlgmr.msra.gmra.mxu1 %v22297_v15  ;;  %13193 = vmatmul.mubr.f32.vlgmr.msra.gmra.mxu0 %v22554_v10  ;;  %v22575_v15 = vand.u32 4294901760, %v13104_v0 }
 0x564   :  { %13249 = vmatpush1.msra.mxu1 %v13248_v28  ;;  %13342 = vmatpush1.msra.mxu0 %v22515_v26  ;;  %v22618_v18 = vsub.f32 %v13099_v44, %v22600_v62  ;;  %v14221_v42 = vpop.permute.xlu0 %14220  ;;  %v13787_v9 = vsub.f32 %v22608_v12, %v13786_v25 }
 0x565   :  { %13255 = vmatprep.subr.mxu1 %v13254_v37  ;;  %13345 = vmatprep.subr.mxu0 %v22520_v30  ;;  %v22584_v13 = vsub.f32 %v13104_v0, %v22575_v15 }
 0x566   :  { %13261 = vmatpush1.msra.mxu1 %v13260_v46  ;;  %13348 = vmatpush1.msra.mxu0 %v22526_v34  ;;  %v13798_v33 = vand.u32 4294901760, %v22618_v18  ;;  %v13788_v34 = vand.u32 4294901760, %v13787_v9 }
 0x567   :  { %13058 = vmatprep.mubr.f32.mxu1 %v24471_v49  ;;  %13198 = vmatprep.mubr.f32.mxu0 %v24471_v49  ;;  %v13780_v59 = vand.u32 4294901760, %v22584_v13 }
 0x568   :  { %13427 = vmatprep.subr.mxu1 %v22471_v50  ;;  %13516 = vmatprep.subr.mxu0 %v13240_v60  ;;  %v14223_v40 = vpop.permute.xlu0 %14222 }
 0x569   :  { %13060 = vmatmul.mubr.f32.gmra.mxu1 %v22328_v5  ;;  %13204 = vmatmul.mubr.f32.gmra.mxu0 %v22566_v63  ;;  %v13100_v5 = vsel %vm3203_vm3, %v13084_v35, %v13086_v47  ;;  %v13781_v7 = vsub.f32 %v22584_v13, %v13780_v59  ;;  %v14234_v44 = vsel %vm4267_vm4, %v14221_v42, %v14223_v40 }
 0x56a   :  { %13294 = vmatprep.mubr.f32.mxu1 %v24471_v49  ;;  %13381 = vmatprep.mubr.f32.mxu0 %v24471_v49  ;;  %v22594_v54 = vand.u32 4294901760, %v13100_v5 }
 0x56b   :  { %v13782_v43 = vand.u32 4294901760, %v13781_v7 }
 0x56c   :  { %v22613_v11 = vsub.f32 %v13100_v5, %v22594_v54 }
 0x56d   :  { %13296 = vmatmul.mubr.f32.vlgmr.msra.gmra.mxu1 %v22481_v21  ;;  %13384 = vmatmul.mubr.f32.vlgmr.msra.gmra.mxu0 %v22503_v4 }
 0x56e   :  { %13429 = vmatpush1.msra.mxu1 %v22494_v22  ;;  %13520 = vmatpush1.msra.mxu0 %v13246_v6  ;;  %v13792_v45 = vand.u32 4294901760, %v22613_v11 }
 0x56f   :  { %13431 = vmatprep.subr.mxu1 %v22498_v56  ;;  %13524 = vmatprep.subr.mxu0 %v13252_v51  ;;  %v9850_v36 = vpop.f32.mrf.mxu0 }
 0x570   :  { %13433 = vmatpush1.msra.mxu1 %v22505_v19  ;;  %13528 = vmatpush1.msra.mxu0 %v13258_v41  ;;  %v13793_v1 = vsub.f32 %v22613_v11, %v13792_v45 }
 0x571   :  { %13301 = vmatprep.mubr.f32.mxu1 %v24471_v49  ;;  %13389 = vmatprep.mubr.f32.mxu0 %v24471_v49  ;;  %v22598_v53 = vpop.f32.mrf.mxu0 }
 0x572   :  { %13605 = vmatprep.subr.mxu1 %v22471_v50  ;;  %13688 = vmatprep.subr.mxu0 %v22575_v15  ;;  %v13794_v16 = vand.u32 4294901760, %v13793_v1 }
 0x573   :  { %13303 = vmatmul.mubr.f32.gmra.mxu1 %v22512_v3  ;;  %13392 = vmatmul.mubr.f32.gmra.mxu0 %v22532_v32 }
 0x574   :  { %v9861_v55 = vpop.f32.mrf.mxu0  ;;  %13466 = vmatprep.mubr.f32.mxu1 %v24471_v49  ;;  %13561 = vmatprep.mubr.f32.mxu0 %v24471_v49 }
 0x576   :  { %v22615_v39 = vpop.f32.mrf.mxu0 }
 0x577   :  { %13470 = vmatmul.mubr.f32.vlgmr.msra.gmra.mxu1 %v22523_v29  ;;  %13563 = vmatmul.mubr.f32.vlgmr.msra.gmra.mxu0 %v22481_v21  ;;  %v9953_v8 = vpop.f32.mrf.mxu1 }
 0x578   :  { %v10041_v17 = vpop.f32.mrf.mxu0  ;;  %13607 = vmatpush1.msra.mxu1 %v22494_v22  ;;  %13690 = vmatpush1.msra.mxu0 %v22591_v61  ;;  %v9954_v50 = vadd.f32 %v9953_v8, %v9850_v36  ;;  %v22644_v22 = vpop.permute.xlu1 %14224 }
 0x579   :  { %13609 = vmatprep.subr.mxu1 %v22498_v56  ;;  %13692 = vmatprep.subr.mxu0 %v22594_v54  ;;  %v22631_v52 = vpop.f32.mrf.mxu1  ;;  %v14235_v37 = vsel %vm4267_vm4, %v14223_v40, %v22644_v22  ;;  %v22691_v36 = vpop.permute.xlu0 %14214 }
 0x57a   :  { %13611 = vmatpush1.msra.mxu1 %v22505_v19  ;;  %13694 = vmatpush1.msra.mxu0 %v22600_v62  ;;  %v10042_v57 = vadd.f32 %v10041_v17, %v9954_v50  ;;  %v22636_v20 = vpop.f32.mrf.mxu0  ;;  %v13799_v19 = vsub.f32 %v22618_v18, %v13798_v33  ;;  %v22681_v46 = vand.u32 4294901760, %v14235_v37 }
 0x57b   :  { %13475 = vmatprep.mubr.f32.mxu1 %v24471_v49  ;;  %13568 = vmatprep.mubr.f32.mxu0 %v24471_v49 }
 0x57c   :  { %13783 = vmatprep.subr.mxu1 %v13782_v43  ;;  %13879 = vmatprep.subr.mxu0 %v22584_v13  ;;  %v13800_v41 = vand.u32 4294901760, %v13799_v19  ;;  %v14213_v27 = vpop.permute.xlu1 %14212  ;;  %v22701_v7 = vsub.f32 %v14235_v37, %v22681_v46 }
 0x57d   :  { %13479 = vmatmul.mubr.f32.gmra.mxu1 %v22548_v23  ;;  %13570 = vmatmul.mubr.f32.gmra.mxu0 %v22512_v3  ;;  %v9960_v56 = vpop.f32.mrf.mxu1  ;;  %v14231_v8 = vsel %vm4267_vm4, %v14213_v27, %v22691_v36 }
 0x57e   :  { %13644 = vmatprep.mubr.f32.mxu1 %v24471_v49  ;;  %13727 = vmatprep.mubr.f32.mxu0 %v24471_v49  ;;  %v9961_v60 = vadd.f32 %v9960_v56, %v9861_v55  ;;  %v10049_v26 = vpop.f32.mrf.mxu0  ;;  %v22722_v42 = vand.u32 4294901760, %v14231_v8 }
 0x57f   :  { %v22656_v30 = vpop.f32.mrf.mxu1 }
 0x580   :  { %v10050_v31 = vadd.f32 %v10049_v26, %v9961_v60  ;;  %v22658_v6 = vpop.f32.mrf.mxu0  ;;  %v14211_v35 = vpop.permute.xlu1 %14210 }
 0x581   :  { %13646 = vmatmul.mubr.f32.vlgmr.msra.gmra.mxu1 %v22481_v21  ;;  %13733 = vmatmul.mubr.f32.vlgmr.msra.gmra.mxu0 %v22554_v10  ;;  %v10127_v51 = vpop.f32.mrf.mxu1  ;;  %v14230_v50 = vsel %vm4267_vm4, %v14211_v35, %v14213_v27 }
 0x582   :  { %13789 = vmatpush1.msra.mxu1 %v13788_v34  ;;  %13882 = vmatpush1.msra.mxu0 %v22608_v12  ;;  %v10128_v58 = vadd.f32 %v10127_v51, %v10042_v57  ;;  %v10220_v14 = vpop.f32.mrf.mxu0  ;;  %v22714_v57 = vand.u32 4294901760, %v14234_v44  ;;  %v22731_v9 = vand.u32 4294901760, %v14230_v50 }
 0x583   :  { %13795 = vmatprep.subr.mxu1 %v13794_v16  ;;  %13885 = vmatprep.subr.mxu0 %v22613_v11  ;;  %v22665_v28 = vpop.f32.mrf.mxu1 }
 0x584   :  { %13801 = vmatpush1.msra.mxu1 %v13800_v41  ;;  %13888 = vmatpush1.msra.mxu0 %v22618_v18  ;;  %v10221_v24 = vadd.f32 %v10220_v14, %v10128_v58  ;;  %v22667_v10 = vpop.f32.mrf.mxu0  ;;  %v14373_v18 = vand.u32 4294901760, %v22701_v7  ;;  %v22741_v1 = vsub.f32 %v14234_v44, %v22714_v57 }
 0x585   :  { %13651 = vmatprep.mubr.f32.mxu1 %v24471_v49  ;;  %13738 = vmatprep.mubr.f32.mxu0 %v24471_v49 }
 0x586   :  { %13967 = vmatprep.subr.mxu1 %v22575_v15  ;;  %14056 = vmatprep.subr.mxu0 %v13780_v59  ;;  %v19907_v59 = vld [vmem:[%s24334_s2 + $0x48] sm:$0xff]  ;;  %v14374_v34 = vsub.f32 %v22701_v7, %v14373_v18  ;;  %v14379_v41 = vand.u32 4294901760, %v22741_v1 }
 0x587   :  { %13653 = vmatmul.mubr.f32.gmra.mxu1 %v22512_v3  ;;  %13744 = vmatmul.mubr.f32.gmra.mxu0 %v22566_v63  ;;  %v22695_v63 = vand.u32 4294901760, %v14247_v48  ;;  %v14250_v12 = vsel %vm9768_vm9, %v19907_v59, 0 }
 0x588   :  { %13834 = vmatprep.mubr.f32.mxu1 %v24471_v49  ;;  %13921 = vmatprep.mubr.f32.mxu0 %v24471_v49  ;;  %v10136_v0 = vpop.f32.mrf.mxu1  ;;  %v10227_v47 = vpop.f32.mrf.mxu0 }
 0x589   :  { %v10137_v38 = vadd.f32 %v10136_v0, %v10050_v31  ;;  %v22727_v11 = vsub.f32 %v14247_v48, %v22695_v63  ;;  %v14380_v0 = vsub.f32 %v22741_v1, %v14379_v41 }
 0x58a   :  { %v22686_v5 = vpop.f32.mrf.mxu1  ;;  %v22688_v13 = vpop.f32.mrf.mxu0 }
 0x58b   :  { %13836 = vmatmul.mubr.f32.vlgmr.msra.gmra.mxu1 %v22481_v21  ;;  %13924 = vmatmul.mubr.f32.vlgmr.msra.gmra.mxu0 %v22503_v4  ;;  %v10228_v55 = vadd.f32 %v10227_v47, %v10137_v38  ;;  %v22749_v19 = vand.u32 4294901760, %v22727_v11  ;;  %v14381_v59 = vand.u32 4294901760, %v14380_v0 }
 0x58c   :  { %13969 = vmatpush1.msra.mxu1 %v22591_v61  ;;  %14060 = vmatpush1.msra.mxu0 %v13786_v25  ;;  %v10303_v17 = vpop.f32.mrf.mxu1  ;;  %v10390_v4 = vpop.f32.mrf.mxu0 }
 0x58d   :  { %13971 = vmatprep.subr.mxu1 %v22594_v54  ;;  %14064 = vmatprep.subr.mxu0 %v13792_v45  ;;  %v22712_v43 = vadd.f32 %v10303_v17, %v10221_v24 }
 0x58e   :  { %13973 = vmatpush1.msra.mxu1 %v22600_v62  ;;  %14068 = vmatpush1.msra.mxu0 %v13798_v33  ;;  %v22720_v25 = vpop.f32.mrf.mxu1  ;;  %v22729_v45 = vpop.f32.mrf.mxu0  ;;  %v22738_v33 = vand.u32 4294901760, %v14250_v12 }
 0x58f   :  { %13841 = vmatprep.mubr.f32.mxu1 %v24471_v49  ;;  %13929 = vmatprep.mubr.f32.mxu0 %v24471_v49  ;;  %24472 = vst [vmem:[#allocation7_spill] sm:$0xff] %v22729_v45 }
 0x590   :  { %14145 = vmatprep.subr.mxu1 %v22575_v15  ;;  %14281 = vmatprep.subr.mxu0 %v22681_v46  ;;  %v22746_v15 = vsub.f32 %v14231_v8, %v22722_v42  ;;  %v22764_v16 = vsub.f32 %v14250_v12, %v22738_v33 }
 0x591   :  { %13843 = vmatmul.mubr.f32.gmra.mxu1 %v22512_v3  ;;  %13932 = vmatmul.mubr.f32.gmra.mxu0 %v22532_v32  ;;  %v22754_v32 = vsub.f32 %v14230_v50, %v22731_v9  ;;  %v14229_v50 = vpop.permute.xlu1 %14228 }
 0x592   :  { %14006 = vmatprep.mubr.f32.mxu1 %v24471_v49  ;;  %14101 = vmatprep.mubr.f32.mxu0 %v24471_v49  ;;  %v10310_v56 = vpop.f32.mrf.mxu1  ;;  %v14385_v14 = vand.u32 4294901760, %v22746_v15 }
 0x593   :  { %v22751_v60 = vadd.f32 %v10310_v56, %v10228_v55  ;;  %v10401_v26 = vpop.f32.mrf.mxu0  ;;  %v14391_v24 = vand.u32 4294901760, %v22754_v32 }
 0x594   :  { %v22759_v31 = vpop.f32.mrf.mxu1  ;;  %v14386_v47 = vsub.f32 %v22746_v15, %v14385_v14 }
 0x595   :  { %14010 = vmatmul.mubr.f32.vlgmr.msra.gmra.mxu1 %v22523_v29  ;;  %14103 = vmatmul.mubr.f32.vlgmr.msra.gmra.mxu0 %v22481_v21  ;;  %v22766_v51 = vpop.f32.mrf.mxu0  ;;  %v14324_v29 = vsub.f32 %v22727_v11, %v22749_v19  ;;  %v14392_v35 = vsub.f32 %v22754_v32, %v14391_v24 }
 0x596   :  { %24473 = vst [vmem:[#allocation10_spill] sm:$0xff] %v22766_v51  ;;  %14147 = vmatpush1.msra.mxu1 %v22591_v61  ;;  %14283 = vmatpush1.msra.mxu0 %v22714_v57  ;;  %v10493_v58 = vpop.f32.mrf.mxu1  ;;  %v14375_v61 = vand.u32 4294901760, %v14374_v34  ;;  %v14387_v8 = vand.u32 4294901760, %v14386_v47  ;;  %v14219_v47 = vpop.permute.xlu1 %14218 }
 0x597   :  { %14149 = vmatprep.subr.mxu1 %v22594_v54  ;;  %14285 = vmatprep.subr.mxu0 %v22722_v42  ;;  %v10494_v40 = vadd.f32 %v10493_v58, %v10390_v4  ;;  %v10581_v27 = vpop.f32.mrf.mxu0  ;;  %v22782_v54 = vand.u32 4294901760, %v22764_v16  ;;  %v14393_v12 = vand.u32 4294901760, %v14392_v35  ;;  %v14227_v58 = vpop.permute.xlu0 %14226 }
 0x598   :  { %14151 = vmatpush1.msra.mxu1 %v22600_v62  ;;  %14287 = vmatpush1.msra.mxu0 %v22731_v9  ;;  %v22784_v2 = vpop.f32.mrf.mxu1  ;;  %v22794_v62 = vand.u32 4294901760, %v14324_v29 }
 0x599   :  { %14015 = vmatprep.mubr.f32.mxu1 %v24471_v49  ;;  %14108 = vmatprep.mubr.f32.mxu0 %v24471_v49  ;;  %v10582_v37 = vadd.f32 %v10581_v27, %v10494_v40  ;;  %24474 = vst [vmem:[#allocation18_spill] sm:$0xff] %v22784_v2  ;;  %v22786_v48 = vpop.f32.mrf.mxu0  ;;  %v14335_v38 = vsub.f32 %v22764_v16, %v22782_v54 }
 0x59a   :  { %24475 = vst [vmem:[#allocation20_spill] sm:$0xff] %v22786_v48  ;;  %14376 = vmatprep.subr.mxu1 %v14375_v61  ;;  %14472 = vmatprep.subr.mxu0 %v22701_v7  ;;  %v14237_v40 = vsel %vm4267_vm4, %v14227_v58, %v14229_v50  ;;  %v14236_v7 = vsel %vm4267_vm4, %v22644_v22, %v14227_v58 }
 0x59b   :  { %14019 = vmatmul.mubr.f32.gmra.mxu1 %v22548_v23  ;;  %14110 = vmatmul.mubr.f32.gmra.mxu0 %v22512_v3  ;;  %v22814_v34 = vand.u32 4294901760, %v14335_v38 }
 0x59c   :  { %14184 = vmatprep.mubr.f32.mxu1 %v24471_v49  ;;  %14320 = vmatprep.mubr.f32.mxu0 %v24471_v49 }
 0x59d   :  { %v10500_v23 = vpop.f32.mrf.mxu1  ;;  %v10589_v44 = vpop.f32.mrf.mxu0 }
 0x59e   :  { %v10501_v55 = vadd.f32 %v10500_v23, %v10401_v26  ;;  %v14217_v23 = vpop.permute.xlu0 %14216 }
 0x59f   :  { %14186 = vmatmul.mubr.f32.vlgmr.msra.gmra.mxu1 %v22481_v21  ;;  %14326 = vmatmul.mubr.f32.vlgmr.msra.gmra.mxu0 %v22794_v62  ;;  %v22808_v17 = vpop.f32.mrf.mxu1  ;;  %v22810_v4 = vpop.f32.mrf.mxu0  ;;  %v14232_v22 = vsel %vm4267_vm4, %v22691_v36, %v14217_v23 }
 0x5a0   :  { %24476 = vst [vmem:[#allocation8_spill] sm:$0xff] %v22808_v17  ;;  %24477 = vst [vmem:[#allocation9_spill] sm:$0xff] %v22810_v4  ;;  %14382 = vmatpush1.msra.mxu1 %v14381_v59  ;;  %14475 = vmatpush1.msra.mxu0 %v22741_v1  ;;  %v10590_v56 = vadd.f32 %v10589_v44, %v10501_v55  ;;  %v14233_v55 = vsel %vm4267_vm4, %v14217_v23, %v14219_v47 }
 0x5a1   :  { %14388 = vmatprep.subr.mxu1 %v14387_v8  ;;  %14478 = vmatprep.subr.mxu0 %v22746_v15  ;;  %v10667_v26 = vpop.f32.mrf.mxu1  ;;  %v10760_v21 = vpop.f32.mrf.mxu0 }
 0x5a2   :  { %14394 = vmatpush1.msra.mxu1 %v14393_v12  ;;  %14481 = vmatpush1.msra.mxu0 %v22754_v32  ;;  %v10668_v29 = vadd.f32 %v10667_v26, %v10582_v37  ;;  %v22829_v37 = vand.u32 4294901760, %v14237_v40  ;;  %v22861_v26 = vand.u32 4294901760, %v14233_v55 }
 0x5a3   :  { %14191 = vmatprep.mubr.f32.mxu1 %v24471_v49  ;;  %14331 = vmatprep.mubr.f32.mxu0 %v24471_v49  ;;  %v22820_v27 = vpop.f32.mrf.mxu1  ;;  %v22822_v61 = vpop.f32.mrf.mxu0 }
 0x5a4   :  { %24478 = vst [vmem:[#allocation11_spill] sm:$0xff] %v22820_v27  ;;  %24479 = vst [vmem:[#allocation14_spill] sm:$0xff] %v22822_v61  ;;  %14560 = vmatprep.subr.mxu1 %v22681_v46  ;;  %14649 = vmatprep.subr.mxu0 %v14373_v18  ;;  %v10761_v0 = vadd.f32 %v10760_v21, %v10668_v29  ;;  %v22842_v59 = vsub.f32 %v14237_v40, %v22829_v37 }
 0x5a5   :  { %14193 = vmatmul.mubr.f32.gmra.mxu1 %v22512_v3  ;;  %14337 = vmatmul.mubr.f32.gmra.mxu0 %v22814_v34 }
 0x5a6   :  { %14427 = vmatprep.mubr.f32.mxu1 %v24471_v49  ;;  %14514 = vmatprep.mubr.f32.mxu0 %v24471_v49  ;;  %v24341_v32 = vand.u32 4294901760, %v22842_v59 }
 0x5a7   :  { %v10676_v35 = vpop.f32.mrf.mxu1  ;;  %v10767_v38 = vpop.f32.mrf.mxu0 }
 0x5a8   :  { %v10677_v44 = vadd.f32 %v10676_v35, %v10590_v56  ;;  %v22853_v56 = vand.u32 4294901760, %v14236_v7  ;;  %v14914_v29 = vsub.f32 %v22842_v59, %v24341_v32 }
 0x5a9   :  { %14429 = vmatmul.mubr.f32.vlgmr.msra.gmra.mxu1 %v22695_v63  ;;  %14517 = vmatmul.mubr.f32.vlgmr.msra.gmra.mxu0 %v22727_v11  ;;  %v22837_v3 = vpop.f32.mrf.mxu1  ;;  %v22839_v18 = vpop.f32.mrf.mxu0 }
 0x5aa   :  { %24480 = vst [vmem:[#allocation12_spill] sm:$0xff] %v22837_v3  ;;  %24481 = vst [vmem:[#allocation15_spill] sm:$0xff] %v22839_v18  ;;  %14562 = vmatpush1.msra.mxu1 %v22714_v57  ;;  %14653 = vmatpush1.msra.mxu0 %v14379_v41  ;;  %v10768_v8 = vadd.f32 %v10767_v38, %v10677_v44 }
 0x5ab   :  { %14564 = vmatprep.subr.mxu1 %v22722_v42  ;;  %14657 = vmatprep.subr.mxu0 %v14385_v14  ;;  %v10843_v50 = vpop.f32.mrf.mxu1  ;;  %v10936_v12 = vpop.f32.mrf.mxu0  ;;  %v22869_v14 = vand.u32 4294901760, %v14232_v22 }
 0x5ac   :  { %14566 = vmatpush1.msra.mxu1 %v22731_v9  ;;  %14661 = vmatpush1.msra.mxu0 %v14391_v24  ;;  %v22858_v1 = vadd.f32 %v10843_v50, %v10761_v0  ;;  %v10937_v41 = vadd.f32 %v10936_v12, %v22712_v43  ;;  %v22877_v43 = vsub.f32 %v14236_v7, %v22853_v56 }
 0x5ad   :  { %14434 = vmatprep.mubr.f32.mxu1 %v24471_v49  ;;  %14522 = vmatprep.mubr.f32.mxu0 %v24471_v49  ;;  %v22865_v36 = vpop.f32.mrf.mxu1  ;;  %v22867_v15 = vpop.f32.mrf.mxu0  ;;  %v22882_v24 = vsub.f32 %v14233_v55, %v22861_v26  ;;  %v22885_v58 = vsub.f32 %v14232_v22, %v22869_v14  ;;  %v14915_v55 = vand.u32 4294901760, %v14914_v29 }
 0x5ae   :  { %24482 = vst [vmem:[#allocation19_spill] sm:$0xff] %v22865_v36  ;;  %14738 = vmatprep.subr.mxu1 %v22681_v46  ;;  %14821 = vmatprep.subr.mxu0 %v22829_v37  ;;  %v24340_v38 = vand.u32 4294901760, %v22877_v43 }
 0x5af   :  { %14436 = vmatmul.mubr.f32.gmra.mxu1 %v22738_v33  ;;  %14525 = vmatmul.mubr.f32.gmra.mxu0 %v22764_v16  ;;  %v24339_v7 = vand.u32 4294901760, %v22885_v58  ;;  %v24495_v27 = vand.u32 4294901760, %v22885_v58 }
 0x5b0   :  { %14599 = vmatprep.mubr.f32.mxu1 %v24471_v49  ;;  %14694 = vmatprep.mubr.f32.mxu0 %v24471_v49  ;;  %v14920_v22 = vsub.f32 %v22877_v43, %v24340_v38 }
 0x5b1   :  { %v10850_v21 = vpop.f32.mrf.mxu1  ;;  %v10947_v46 = vpop.f32.mrf.mxu0  ;;  %v14932_v12 = vsub.f32 %v22885_v58, %v24339_v7 }
 0x5b2   :  { %v22890_v40 = vadd.f32 %v10850_v21, %v10768_v8  ;;  %v10948_v0 = vadd.f32 %v10947_v46, %v22751_v60  ;;  %v24338_v60 = vand.u32 4294901760, %v22882_v24  ;;  %v22926_v21 = vpop.permute.xlu1 %15357 }
 0x5b3   :  { %14603 = vmatmul.mubr.f32.vlgmr.msra.gmra.mxu1 %v22749_v19  ;;  %14696 = vmatmul.mubr.f32.vlgmr.msra.gmra.mxu0 %v22695_v63  ;;  %v22895_v47 = vpop.f32.mrf.mxu1  ;;  %v22897_v35 = vpop.f32.mrf.mxu0  ;;  %v14933_v7 = vand.u32 4294901760, %v14932_v12  ;;  %v19908_v12 = vld [vmem:[%s24334_s2 + $0x50] sm:$0xff] }
 0x5b4   :  { %24483 = vst [vmem:[#allocation30_spill] sm:$0xff] %v22895_v47  ;;  %24484 = vst [vmem:[#allocation3_spill] sm:$0xff] %v22897_v35  ;;  %14740 = vmatpush1.msra.mxu1 %v22714_v57  ;;  %14823 = vmatpush1.msra.mxu0 %v22853_v56  ;;  %v14926_v50 = vsub.f32 %v22882_v24, %v24338_v60 }
 0x5b5   :  { %14742 = vmatprep.subr.mxu1 %v22722_v42  ;;  %14825 = vmatprep.subr.mxu0 %v22861_v26  ;;  %v11039_v23 = vpop.f32.mrf.mxu1  ;;  %v11127_v44 = vpop.f32.mrf.mxu0 }
 0x5b6   :  { %14744 = vmatpush1.msra.mxu1 %v22731_v9  ;;  %14827 = vmatpush1.msra.mxu0 %v22869_v14  ;;  %v11040_v8 = vadd.f32 %v11039_v23, %v10937_v41  ;;  %v15354_v41 = vpop.permute.xlu0 %15353  ;;  %v14921_v23 = vand.u32 4294901760, %v14920_v22 }
 0x5b7   :  { %14608 = vmatprep.mubr.f32.mxu1 %v24471_v49  ;;  %14701 = vmatprep.mubr.f32.mxu0 %v24471_v49  ;;  %v22910_v57 = vpop.f32.mrf.mxu1  ;;  %v22912_v42 = vpop.f32.mrf.mxu0 }
 0x5b8   :  { %24485 = vst [vmem:[#allocation13_spill] sm:$0xff] %v22912_v42  ;;  %14916 = vmatprep.subr.mxu1 %v14915_v55  ;;  %15012 = vmatprep.subr.mxu0 %v22842_v59  ;;  %v11128_v9 = vadd.f32 %v11127_v44, %v11040_v8  ;;  %v14927_v55 = vand.u32 4294901760, %v14926_v50 }
 0x5b9   :  { %14612 = vmatmul.mubr.f32.gmra.mxu1 %v22782_v54  ;;  %14703 = vmatmul.mubr.f32.gmra.mxu0 %v22738_v33 }
 0x5ba   :  { %14777 = vmatprep.mubr.f32.mxu1 %v24471_v49  ;;  %14860 = vmatprep.mubr.f32.mxu0 %v24471_v49 }
 0x5bb   :  { %v11046_v46 = vpop.f32.mrf.mxu1  ;;  %v11135_v29 = vpop.f32.mrf.mxu0 }
 0x5bc   :  { %v11047_v44 = vadd.f32 %v11046_v46, %v10948_v0  ;;  %v15356_v0 = vpop.permute.xlu0 %15355  ;;  %v15346_v46 = vpop.permute.xlu1 %15345 }
 0x5bd   :  { %14779 = vmatmul.mubr.f32.vlgmr.msra.gmra.mxu1 %v22695_v63  ;;  %14866 = vmatmul.mubr.f32.vlgmr.msra.gmra.mxu0 %v22794_v62  ;;  %v22932_v8 = vpop.f32.mrf.mxu1  ;;  %v22934_v60 = vpop.f32.mrf.mxu0  ;;  %v15368_v50 = vsel %vm5331_vm5, %v15356_v0, %v22926_v21 }
 0x5be   :  { %24486 = vst [vmem:[#allocation16_spill] sm:$0xff] %v22932_v8  ;;  %24487 = vst [vmem:[#allocation17_spill] sm:$0xff] %v22934_v60  ;;  %14922 = vmatpush1.msra.mxu1 %v14921_v23  ;;  %15015 = vmatpush1.msra.mxu0 %v22877_v43  ;;  %v11136_v38 = vadd.f32 %v11135_v29, %v11047_v44  ;;  %v15380_v44 = vsel %vm9768_vm9, %v19908_v12, 0 }
 0x5bf   :  { %14928 = vmatprep.subr.mxu1 %v14927_v55  ;;  %15018 = vmatprep.subr.mxu0 %v22882_v24  ;;  %v11213_v32 = vpop.f32.mrf.mxu1  ;;  %v11306_v22 = vpop.f32.mrf.mxu0 }
 0x5c0   :  { %14934 = vmatpush1.msra.mxu1 %v14933_v7  ;;  %15021 = vmatpush1.msra.mxu0 %v22885_v58  ;;  %v11214_v62 = vadd.f32 %v11213_v32, %v11128_v9  ;;  %v24490_v7 = vand.u32 4294901760, %v22842_v59  ;;  %v22955_v9 = vand.u32 4294901760, %v15368_v50  ;;  %v22960_v18 = vpop.permute.xlu0 %15347  ;;  %v15344_v36 = vpop.permute.xlu1 %15343 }
 0x5c1   :  { %14784 = vmatprep.mubr.f32.mxu1 %v24471_v49  ;;  %14871 = vmatprep.mubr.f32.mxu0 %v24471_v49  ;;  %v22946_v29 = vpop.f32.mrf.mxu1  ;;  %v22948_v23 = vpop.f32.mrf.mxu0 }
 0x5c2   :  { %24488 = vst [vmem:[#allocation21_spill] sm:$0xff] %v22946_v29  ;;  %24489 = vst [vmem:[#allocation22_spill] sm:$0xff] %v22948_v23  ;;  %15100 = vmatprep.subr.mxu1 %v22829_v37  ;;  %15189 = vmatprep.subr.mxu0 %v24490_v7  ;;  %v11307_v32 = vadd.f32 %v11306_v22, %v11214_v62  ;;  %v15367_v22 = vsel %vm5331_vm5, %v15354_v41, %v15356_v0  ;;  %v19909_v62 = vld [vmem:[%s24334_s2 + $0x58] sm:$0xff] }
 0x5c3   :  { %14786 = vmatmul.mubr.f32.gmra.mxu1 %v22738_v33  ;;  %14877 = vmatmul.mubr.f32.gmra.mxu0 %v22814_v34  ;;  %v22965_v34 = vand.u32 4294901760, %v15380_v44  ;;  %v22975_v3 = vsub.f32 %v15368_v50, %v22955_v9  ;;  %v15363_v0 = vsel %vm5331_vm5, %v15344_v36, %v15346_v46  ;;  %v22986_v50 = vand.u32 4294901760, %v15367_v22 }
 0x5c4   :  { %14967 = vmatprep.mubr.f32.mxu1 %v24471_v49  ;;  %15054 = vmatprep.mubr.f32.mxu0 %v24471_v49 }
 0x5c5   :  { %v11222_v55 = vpop.f32.mrf.mxu1  ;;  %v11313_v47 = vpop.f32.mrf.mxu0 }
 0x5c6   :  { %v11223_v59 = vadd.f32 %v11222_v55, %v11136_v38  ;;  %v15364_v38 = vsel %vm5331_vm5, %v15346_v46, %v22960_v18  ;;  %v24494_v55 = vand.u32 4294901760, %v22882_v24  ;;  %v23000_v24 = vsub.f32 %v15380_v44, %v22965_v34 }
 0x5c7   :  { %14969 = vmatmul.mubr.f32.vlgmr.msra.gmra.mxu1 %v22695_v63  ;;  %15057 = vmatmul.mubr.f32.vlgmr.msra.gmra.mxu0 %v22727_v11  ;;  %v22970_v7 = vpop.f32.mrf.mxu1  ;;  %v22972_v12 = vpop.f32.mrf.mxu0  ;;  %v24493_v11 = vand.u32 4294901760, %v22877_v43  ;;  %v15383_v43 = vsel %vm9768_vm9, %v19909_v62, 0 }
 0x5c8   :  { %24491 = vst [vmem:[#allocation4_spill] sm:$0xff] %v22970_v7  ;;  %24492 = vst [vmem:[#allocation5_spill] sm:$0xff] %v22972_v12  ;;  %15102 = vmatpush1.msra.mxu1 %v22853_v56  ;;  %v11314_v41 = vadd.f32 %v11313_v47, %v11223_v59  ;;  %v22995_v47 = vand.u32 4294901760, %v15364_v38  ;;  %14974 = vmatprep.mubr.f32.mxu1 %v24471_v49 }
 0x5c9   :  { %15193 = vmatpush1.msra.mxu0 %v24493_v11  ;;  %15104 = vmatprep.subr.mxu1 %v22861_v26  ;;  %v11389_v61 = vpop.f32.mrf.mxu1  ;;  %v11476_v4 = vpop.f32.mrf.mxu0 }
 0x5ca   :  { %15197 = vmatprep.subr.mxu0 %v24494_v55  ;;  %15106 = vmatpush1.msra.mxu1 %v22869_v14  ;;  %v22992_v11 = vadd.f32 %v11389_v61, %v11307_v32  ;;  %v11477_v36 = vadd.f32 %v11476_v4, %v22858_v1  ;;  %v24342_v4 = vand.u32 4294901760, %v22975_v3  ;;  %v23013_v61 = vand.u32 4294901760, %v15383_v43 }
 0x5cb   :  { %15201 = vmatpush1.msra.mxu0 %v24495_v27  ;;  %15062 = vmatprep.mubr.f32.mxu0 %v24471_v49  ;;  %v23002_v46 = vpop.f32.mrf.mxu1  ;;  %v23004_v59 = vpop.f32.mrf.mxu0  ;;  %v23006_v27 = vand.u32 4294901760, %v15363_v0  ;;  %v23016_v1 = vsub.f32 %v15367_v22, %v22986_v50  ;;  %v23021_v58 = vsub.f32 %v15364_v38, %v22995_v47 }
 0x5cc   :  { %24496 = vst [vmem:[#allocation6_spill] sm:$0xff] %v23002_v46  ;;  %24497 = vst [vmem:[#allocation24_spill] sm:$0xff] %v23004_v59  ;;  %15278 = vmatprep.subr.mxu1 %v22829_v37  ;;  %15414 = vmatprep.subr.mxu0 %v22955_v9  ;;  %v23024_v37 = vand.u32 4294901760, %v23000_v24  ;;  %v23038_v38 = vsub.f32 %v15383_v43, %v23013_v61 }
 0x5cd   :  { %14976 = vmatmul.mubr.f32.gmra.mxu1 %v22738_v33  ;;  %15065 = vmatmul.mubr.f32.gmra.mxu0 %v22764_v16  ;;  %v23027_v62 = vsub.f32 %v15363_v0, %v23006_v27  ;;  %v15507_v16 = vsub.f32 %v22975_v3, %v24342_v4  ;;  %v24343_v0 = vand.u32 4294901760, %v23016_v1 }
 0x5ce   :  { %15139 = vmatprep.mubr.f32.mxu1 %v24471_v49  ;;  %15234 = vmatprep.mubr.f32.mxu0 %v24471_v49 }
 0x5cf   :  { %v11396_v32 = vpop.f32.mrf.mxu1  ;;  %v11487_v44 = vpop.f32.mrf.mxu0 }
 0x5d0   :  { %v23032_v22 = vadd.f32 %v11396_v32, %v11314_v41  ;;  %v11488_v55 = vadd.f32 %v11487_v44, %v22890_v40  ;;  %v15513_v32 = vsub.f32 %v23016_v1, %v24343_v0 }
 0x5d1   :  { %15143 = vmatmul.mubr.f32.vlgmr.msra.gmra.mxu1 %v22749_v19  ;;  %15236 = vmatmul.mubr.f32.vlgmr.msra.gmra.mxu0 %v22695_v63  ;;  %v23040_v59 = vpop.f32.mrf.mxu1  ;;  %v23042_v17 = vpop.f32.mrf.mxu0  ;;  %v15457_v19 = vsub.f32 %v23000_v24, %v23024_v37 }
 0x5d2   :  { %24498 = vst [vmem:[#allocation23_spill] sm:$0xff] %v23040_v59  ;;  %24499 = vst [vmem:[#allocation31_spill] sm:$0xff] %v23042_v17  ;;  %15280 = vmatpush1.msra.mxu1 %v22853_v56  ;;  %15416 = vmatpush1.msra.mxu0 %v22986_v50  ;;  %v15508_v56 = vand.u32 4294901760, %v15507_v16  ;;  %v24502_v16 = vand.u32 4294901760, %v23021_v58 }
 0x5d3   :  { %15282 = vmatprep.subr.mxu1 %v22861_v26  ;;  %15418 = vmatprep.subr.mxu0 %v22995_v47  ;;  %v11579_v41 = vpop.f32.mrf.mxu1  ;;  %v11667_v43 = vpop.f32.mrf.mxu0  ;;  %v23058_v26 = vand.u32 4294901760, %v23038_v38 }
 0x5d4   :  { %15284 = vmatpush1.msra.mxu1 %v22869_v14  ;;  %15420 = vmatpush1.msra.mxu0 %v23006_v27  ;;  %v11580_v44 = vadd.f32 %v11579_v41, %v11477_v36  ;;  %v23070_v36 = vand.u32 4294901760, %v15457_v19  ;;  %v15519_v41 = vsub.f32 %v23021_v58, %v24502_v16 }
 0x5d5   :  { %15148 = vmatprep.mubr.f32.mxu1 %v24471_v49  ;;  %15241 = vmatprep.mubr.f32.mxu0 %v24471_v49  ;;  %v23060_v4 = vpop.f32.mrf.mxu1  ;;  %v23062_v40 = vpop.f32.mrf.mxu0 }
 0x5d6   :  { %24500 = vst [vmem:[#allocation39_spill] sm:$0xff] %v23060_v4  ;;  %24501 = vst [vmem:[#allocation56_spill] sm:$0xff] %v23062_v40  ;;  %15509 = vmatprep.subr.mxu1 %v15508_v56  ;;  %15605 = vmatprep.subr.mxu0 %v22975_v3  ;;  %v11668_v14 = vadd.f32 %v11667_v43, %v11580_v44  ;;  %v24503_v40 = vand.u32 4294901760, %v23027_v62  ;;  %v15468_v43 = vsub.f32 %v23038_v38, %v23058_v26 }
 0x5d7   :  { %15152 = vmatmul.mubr.f32.gmra.mxu1 %v22782_v54  ;;  %15243 = vmatmul.mubr.f32.gmra.mxu0 %v22738_v33  ;;  %v15514_v44 = vand.u32 4294901760, %v15513_v32  ;;  %v15520_v16 = vand.u32 4294901760, %v15519_v41 }
 0x5d8   :  { %v15525_v17 = vsub.f32 %v23027_v62, %v24503_v40  ;;  %15317 = vmatprep.mubr.f32.mxu1 %v24471_v49  ;;  %15453 = vmatprep.mubr.f32.mxu0 %v24471_v49  ;;  %v15362_v40 = vpop.permute.xlu1 %15361  ;;  %v23090_v32 = vand.u32 4294901760, %v15468_v43  ;;  %v24508_v43 = vand.u32 4294901760, %v22975_v3 }
 0x5d9   :  { %v11586_v54 = vpop.f32.mrf.mxu1  ;;  %v11675_v56 = vpop.f32.mrf.mxu0 }
 0x5da   :  { %v11587_v19 = vadd.f32 %v11586_v54, %v11488_v55  ;;  %v15526_v51 = vand.u32 4294901760, %v15525_v17  ;;  %v15360_v54 = vpop.permute.xlu0 %15359 }
 0x5db   :  { %15319 = vmatmul.mubr.f32.vlgmr.msra.gmra.mxu1 %v22695_v63  ;;  %15459 = vmatmul.mubr.f32.vlgmr.msra.gmra.mxu0 %v23070_v36  ;;  %v23084_v0 = vpop.f32.mrf.mxu1  ;;  %v23086_v4 = vpop.f32.mrf.mxu0  ;;  %v15369_v3 = vsel %vm5331_vm5, %v22926_v21, %v15360_v54 }
 0x5dc   :  { %24504 = vst [vmem:[#allocation25_spill] sm:$0xff] %v23084_v0  ;;  %24505 = vst [vmem:[#allocation26_spill] sm:$0xff] %v23086_v4  ;;  %15515 = vmatpush1.msra.mxu1 %v15514_v44  ;;  %15608 = vmatpush1.msra.mxu0 %v23016_v1  ;;  %v11676_v59 = vadd.f32 %v11675_v56, %v11587_v19  ;;  %v15370_v4 = vsel %vm5331_vm5, %v15360_v54, %v15362_v40  ;;  %v24512_v54 = vand.u32 4294901760, %v23021_v58 }
 0x5dd   :  { %15521 = vmatprep.subr.mxu1 %v15520_v16  ;;  %15611 = vmatprep.subr.mxu0 %v23021_v58  ;;  %v11753_v55 = vpop.f32.mrf.mxu1  ;;  %v11846_v63 = vpop.f32.mrf.mxu0 }
 0x5de   :  { %15527 = vmatpush1.msra.mxu1 %v15526_v51  ;;  %15614 = vmatpush1.msra.mxu0 %v23027_v62  ;;  %v11754_v41 = vadd.f32 %v11753_v55, %v11668_v14  ;;  %v23105_v51 = vand.u32 4294901760, %v15370_v4  ;;  %v15352_v14 = vpop.permute.xlu1 %15351  ;;  %v15350_v40 = vpop.permute.xlu0 %15349 }
 0x5df   :  { %15324 = vmatprep.mubr.f32.mxu1 %v24471_v49  ;;  %15464 = vmatprep.mubr.f32.mxu0 %v24471_v49  ;;  %v23096_v17 = vpop.f32.mrf.mxu1  ;;  %v23098_v56 = vpop.f32.mrf.mxu0  ;;  %v15365_v21 = vsel %vm5331_vm5, %v22960_v18, %v15350_v40 }
 0x5e0   :  { %24506 = vst [vmem:[#allocation32_spill] sm:$0xff] %v23096_v17  ;;  %24507 = vst [vmem:[#allocation34_spill] sm:$0xff] %v23098_v56  ;;  %15693 = vmatprep.subr.mxu1 %v22955_v9  ;;  %15782 = vmatprep.subr.mxu0 %v24508_v43  ;;  %v11847_v44 = vadd.f32 %v11846_v63, %v11754_v41  ;;  %v23118_v41 = vsub.f32 %v15370_v4, %v23105_v51  ;;  %v23129_v4 = vand.u32 4294901760, %v15369_v3 }
 0x5e1   :  { %15326 = vmatmul.mubr.f32.gmra.mxu1 %v22738_v33  ;;  %15470 = vmatmul.mubr.f32.gmra.mxu0 %v23090_v32  ;;  %v15366_v43 = vsel %vm5331_vm5, %v15350_v40, %v15352_v14  ;;  %v24513_v14 = vand.u32 4294901760, %v23027_v62  ;;  %v23144_v40 = vand.u32 4294901760, %v15365_v21 }
 0x5e2   :  { %15560 = vmatprep.mubr.f32.mxu1 %v24471_v49  ;;  %15647 = vmatprep.mubr.f32.mxu0 %v24471_v49  ;;  %v24344_v62 = vand.u32 4294901760, %v23118_v41  ;;  %v16487_v17 = vpop.permute.xlu0 %16486  ;;  %v23200_v0 = vpop.permute.xlu1 %16490 }
 0x5e3   :  { %v11762_v19 = vpop.f32.mrf.mxu1  ;;  %v11853_v16 = vpop.f32.mrf.mxu0 }
 0x5e4   :  { %v11763_v55 = vadd.f32 %v11762_v19, %v11676_v59  ;;  %v24511_v59 = vand.u32 4294901760, %v23016_v1 }
 0x5e5   :  { %15562 = vmatmul.mubr.f32.vlgmr.msra.gmra.mxu1 %v22965_v34  ;;  %15650 = vmatmul.mubr.f32.vlgmr.msra.gmra.mxu0 %v23000_v24  ;;  %v23113_v33 = vpop.f32.mrf.mxu1  ;;  %v23115_v63 = vpop.f32.mrf.mxu0 }
 0x5e6   :  { %24509 = vst [vmem:[#allocation41_spill] sm:$0xff] %v23113_v33  ;;  %24510 = vst [vmem:[#allocation35_spill] sm:$0xff] %v23115_v63  ;;  %15695 = vmatpush1.msra.mxu1 %v22986_v50  ;;  %15786 = vmatpush1.msra.mxu0 %v24511_v59  ;;  %v11854_v19 = vadd.f32 %v11853_v16, %v11763_v55  ;;  %v23136_v16 = vand.u32 4294901760, %v15366_v43  ;;  %v23160_v59 = vsub.f32 %v15365_v21, %v23144_v40 }
 0x5e7   :  { %15697 = vmatprep.subr.mxu1 %v22995_v47  ;;  %15790 = vmatprep.subr.mxu0 %v24512_v54  ;;  %v11929_v63 = vpop.f32.mrf.mxu1  ;;  %v12061_v33 = vpop.f32.mrf.mxu0  ;;  %v16047_v54 = vsub.f32 %v23118_v41, %v24344_v62 }
 0x5e8   :  { %15699 = vmatpush1.msra.mxu1 %v23006_v27  ;;  %15794 = vmatpush1.msra.mxu0 %v24513_v14  ;;  %v23134_v1 = vadd.f32 %v11929_v63, %v11847_v44  ;;  %v23152_v44 = vsub.f32 %v15369_v3, %v23129_v4  ;;  %v23157_v55 = vsub.f32 %v15366_v43, %v23136_v16  ;;  %v24345_v62 = vand.u32 4294901760, %v23160_v59 }
 0x5e9   :  { %15567 = vmatprep.mubr.f32.mxu1 %v24471_v49  ;;  %15655 = vmatprep.mubr.f32.mxu0 %v24471_v49  ;;  %v23140_v18 = vpop.f32.mrf.mxu1  ;;  %v23142_v58 = vpop.f32.mrf.mxu0 }
 0x5ea   :  { %24514 = vst [vmem:[#allocation58_spill] sm:$0xff] %v23140_v18  ;;  %15871 = vmatprep.subr.mxu1 %v22955_v9  ;;  %15954 = vmatprep.subr.mxu0 %v23105_v51 }
 0x5eb   :  { %15569 = vmatmul.mubr.f32.gmra.mxu1 %v23013_v61  ;;  %15658 = vmatmul.mubr.f32.gmra.mxu0 %v23038_v38 }
 0x5ec   :  { %15732 = vmatprep.mubr.f32.mxu1 %v24471_v49  ;;  %15827 = vmatprep.mubr.f32.mxu0 %v24471_v49 }
 0x5ed   :  { %v11936_v63 = vpop.f32.mrf.mxu1  ;;  %v12072_v9 = vpop.f32.mrf.mxu0 }
 0x5ee   :  { %v23165_v14 = vadd.f32 %v11936_v63, %v11854_v19  ;;  %v24518_v19 = vand.u32 4294901760, %v23152_v44 }
 0x5ef   :  { %15736 = vmatmul.mubr.f32.vlgmr.msra.gmra.mxu1 %v23024_v37  ;;  %15829 = vmatmul.mubr.f32.vlgmr.msra.gmra.mxu0 %v22965_v34  ;;  %v23169_v3 = vpop.f32.mrf.mxu1  ;;  %v23171_v18 = vpop.f32.mrf.mxu0 }
 0x5f0   :  { %24515 = vst [vmem:[#allocation28_spill] sm:$0xff] %v23169_v3  ;;  %24516 = vst [vmem:[#allocation38_spill] sm:$0xff] %v23171_v18  ;;  %15873 = vmatpush1.msra.mxu1 %v22986_v50  ;;  %15956 = vmatpush1.msra.mxu0 %v23129_v4  ;;  %v16048_v3 = vand.u32 4294901760, %v16047_v54  ;;  %v16053_v56 = vsub.f32 %v23152_v44, %v24518_v19 }
 0x5f1   :  { %15875 = vmatprep.subr.mxu1 %v22995_v47  ;;  %15958 = vmatprep.subr.mxu0 %v23136_v16  ;;  %v12164_v21 = vpop.f32.mrf.mxu1  ;;  %v12252_v63 = vpop.f32.mrf.mxu0 }
 0x5f2   :  { %15877 = vmatpush1.msra.mxu1 %v23006_v27  ;;  %15960 = vmatpush1.msra.mxu0 %v23144_v40  ;;  %v12165_v43 = vadd.f32 %v12164_v21, %v12061_v33  ;;  %v24519_v33 = vand.u32 4294901760, %v23157_v55  ;;  %v16065_v21 = vsub.f32 %v23160_v59, %v24345_v62  ;;  %v16054_v19 = vand.u32 4294901760, %v16053_v56 }
 0x5f3   :  { %15741 = vmatprep.mubr.f32.mxu1 %v24471_v49  ;;  %15834 = vmatprep.mubr.f32.mxu0 %v24471_v49  ;;  %v23184_v50 = vpop.f32.mrf.mxu1  ;;  %v23186_v47 = vpop.f32.mrf.mxu0 }
 0x5f4   :  { %24517 = vst [vmem:[#allocation36_spill] sm:$0xff] %v23186_v47  ;;  %16049 = vmatprep.subr.mxu1 %v16048_v3  ;;  %16145 = vmatprep.subr.mxu0 %v23118_v41  ;;  %v12253_v27 = vadd.f32 %v12252_v63, %v12165_v43  ;;  %v16059_v54 = vsub.f32 %v23157_v55, %v24519_v33  ;;  %v16066_v62 = vand.u32 4294901760, %v16065_v21  ;;  %v19910_v21 = vld [vmem:[%s24334_s2 + $0x60] sm:$0xff] }
 0x5f5   :  { %15745 = vmatmul.mubr.f32.gmra.mxu1 %v23058_v26  ;;  %15836 = vmatmul.mubr.f32.gmra.mxu0 %v23013_v61 }
 0x5f6   :  { %15910 = vmatprep.mubr.f32.mxu1 %v24471_v49  ;;  %15993 = vmatprep.mubr.f32.mxu0 %v24471_v49  ;;  %v16060_v33 = vand.u32 4294901760, %v16059_v54 }
 0x5f7   :  { %v12171_v3 = vpop.f32.mrf.mxu1  ;;  %v12260_v43 = vpop.f32.mrf.mxu0 }
 0x5f8   :  { %v12172_v63 = vadd.f32 %v12171_v3, %v12072_v9  ;;  %v16489_v9 = vpop.permute.xlu0 %16488  ;;  %v16479_v3 = vpop.permute.xlu1 %16478 }
 0x5f9   :  { %15912 = vmatmul.mubr.f32.vlgmr.msra.gmra.mxu1 %v22965_v34  ;;  %15999 = vmatmul.mubr.f32.vlgmr.msra.gmra.mxu0 %v23070_v36  ;;  %v23206_v48 = vpop.f32.mrf.mxu1  ;;  %v23208_v12 = vpop.f32.mrf.mxu0  ;;  %v16501_v54 = vsel %vm6395_vm6, %v16489_v9, %v23200_v0 }
 0x5fa   :  { %24520 = vst [vmem:[#allocation43_spill] sm:$0xff] %v23206_v48  ;;  %24521 = vst [vmem:[#allocation40_spill] sm:$0xff] %v23208_v12  ;;  %16055 = vmatpush1.msra.mxu1 %v16054_v19  ;;  %16148 = vmatpush1.msra.mxu0 %v23152_v44  ;;  %v12261_v2 = vadd.f32 %v12260_v43, %v12172_v63  ;;  %v16513_v63 = vsel %vm9768_vm9, %v19910_v21, 0  ;;  %v24529_v12 = vand.u32 4294901760, %v23160_v59 }
 0x5fb   :  { %16061 = vmatprep.subr.mxu1 %v16060_v33  ;;  %16151 = vmatprep.subr.mxu0 %v23157_v55  ;;  %v12338_v45 = vpop.f32.mrf.mxu1  ;;  %v12431_v56 = vpop.f32.mrf.mxu0 }
 0x5fc   :  { %16067 = vmatpush1.msra.mxu1 %v16066_v62  ;;  %16154 = vmatpush1.msra.mxu0 %v23160_v59  ;;  %v12339_v36 = vadd.f32 %v12338_v45, %v12253_v27  ;;  %v24524_v62 = vand.u32 4294901760, %v23118_v41  ;;  %v23229_v27 = vand.u32 4294901760, %v16501_v54  ;;  %v23234_v7 = vpop.permute.xlu0 %16480  ;;  %v16477_v23 = vpop.permute.xlu1 %16476 }
 0x5fd   :  { %15917 = vmatprep.mubr.f32.mxu1 %v24471_v49  ;;  %16004 = vmatprep.mubr.f32.mxu0 %v24471_v49  ;;  %v23220_v43 = vpop.f32.mrf.mxu1  ;;  %v23222_v19 = vpop.f32.mrf.mxu0 }
 0x5fe   :  { %24522 = vst [vmem:[#allocation59_spill] sm:$0xff] %v23220_v43  ;;  %24523 = vst [vmem:[#allocation42_spill] sm:$0xff] %v23222_v19  ;;  %16233 = vmatprep.subr.mxu1 %v23105_v51  ;;  %16322 = vmatprep.subr.mxu0 %v24524_v62  ;;  %v12432_v45 = vadd.f32 %v12431_v56, %v12339_v36  ;;  %v16500_v56 = vsel %vm6395_vm6, %v16487_v17, %v16489_v9  ;;  %v19911_v36 = vld [vmem:[%s24334_s2 + $0x68] sm:$0xff] }
 0x5ff   :  { %15919 = vmatmul.mubr.f32.gmra.mxu1 %v23013_v61  ;;  %16010 = vmatmul.mubr.f32.gmra.mxu0 %v23090_v32  ;;  %v23239_v32 = vand.u32 4294901760, %v16513_v63  ;;  %v23249_v19 = vsub.f32 %v16501_v54, %v23229_v27  ;;  %v16496_v9 = vsel %vm6395_vm6, %v16477_v23, %v16479_v3  ;;  %v23260_v54 = vand.u32 4294901760, %v16500_v56 }
 0x600   :  { %16100 = vmatprep.mubr.f32.mxu1 %v24471_v49  ;;  %16187 = vmatprep.mubr.f32.mxu0 %v24471_v49 }
 0x601   :  { %v12347_v33 = vpop.f32.mrf.mxu1  ;;  %v12438_v46 = vpop.f32.mrf.mxu0  ;;  %v23271_v23 = vsub.f32 %v16513_v63, %v23239_v32  ;;  %v23290_v63 = vsub.f32 %v16500_v56, %v23260_v54 }
 0x602   :  { %v12348_v41 = vadd.f32 %v12347_v33, %v12261_v2  ;;  %v16497_v2 = vsel %vm6395_vm6, %v16479_v3, %v23234_v7  ;;  %v24528_v33 = vand.u32 4294901760, %v23157_v55 }
 0x603   :  { %16102 = vmatmul.mubr.f32.vlgmr.msra.gmra.mxu1 %v22965_v34  ;;  %16190 = vmatmul.mubr.f32.vlgmr.msra.gmra.mxu0 %v23000_v24  ;;  %v23244_v62 = vpop.f32.mrf.mxu1  ;;  %v23246_v21 = vpop.f32.mrf.mxu0  ;;  %v24527_v24 = vand.u32 4294901760, %v23152_v44  ;;  %v16516_v44 = vsel %vm9768_vm9, %v19911_v36, 0  ;;  %v23298_v36 = vand.u32 4294901760, %v23271_v23 }
 0x604   :  { %24525 = vst [vmem:[#allocation45_spill] sm:$0xff] %v23244_v62  ;;  %24526 = vst [vmem:[#allocation47_spill] sm:$0xff] %v23246_v21  ;;  %16235 = vmatpush1.msra.mxu1 %v23129_v4  ;;  %v12439_v17 = vadd.f32 %v12438_v46, %v12348_v41  ;;  %v23266_v46 = vand.u32 4294901760, %v16497_v2  ;;  %16107 = vmatprep.mubr.f32.mxu1 %v24471_v49  ;;  %v23277_v41 = vand.u32 4294901760, %v16496_v9 }
 0x605   :  { %16326 = vmatpush1.msra.mxu0 %v24527_v24  ;;  %16237 = vmatprep.subr.mxu1 %v23136_v16  ;;  %v12514_v21 = vpop.f32.mrf.mxu1  ;;  %v12601_v62 = vpop.f32.mrf.mxu0 }
 0x606   :  { %16330 = vmatprep.subr.mxu0 %v24528_v33  ;;  %16239 = vmatpush1.msra.mxu1 %v23144_v40  ;;  %v12515_v24 = vadd.f32 %v12514_v21, %v12432_v45  ;;  %v23287_v45 = vand.u32 4294901760, %v16516_v44  ;;  %v23301_v33 = vsub.f32 %v16496_v9, %v23277_v41 }
 0x607   :  { %16334 = vmatpush1.msra.mxu0 %v24529_v12  ;;  %16195 = vmatprep.mubr.f32.mxu0 %v24471_v49  ;;  %v23273_v55 = vpop.f32.mrf.mxu1  ;;  %v23275_v3 = vpop.f32.mrf.mxu0  ;;  %v24346_v12 = vand.u32 4294901760, %v23249_v19 }
 0x608   :  { %24530 = vst [vmem:[#allocation44_spill] sm:$0xff] %v23273_v55  ;;  %24531 = vst [vmem:[#allocation49_spill] sm:$0xff] %v23275_v3  ;;  %16411 = vmatprep.subr.mxu1 %v23105_v51  ;;  %16547 = vmatprep.subr.mxu0 %v23229_v27  ;;  %v23283_v59 = vadd.f32 %v12515_v24, %v22992_v11  ;;  %v23295_v51 = vsub.f32 %v16497_v2, %v23266_v46  ;;  %v24347_v55 = vand.u32 4294901760, %v23290_v63 }
 0x609   :  { %16109 = vmatmul.mubr.f32.gmra.mxu1 %v23013_v61  ;;  %16198 = vmatmul.mubr.f32.gmra.mxu0 %v23038_v38  ;;  %v16640_v38 = vsub.f32 %v23249_v19, %v24346_v12  ;;  %v23309_v2 = vsub.f32 %v16516_v44, %v23287_v45 }
 0x60a   :  { %16272 = vmatprep.mubr.f32.mxu1 %v24471_v49  ;;  %16367 = vmatprep.mubr.f32.mxu0 %v24471_v49  ;;  %v16646_v12 = vsub.f32 %v23290_v63, %v24347_v55 }
 0x60b   :  { %v12521_v11 = vpop.f32.mrf.mxu1  ;;  %v12612_v21 = vpop.f32.mrf.mxu0 }
 0x60c   :  { %v12522_v56 = vadd.f32 %v12521_v11, %v12439_v17 }
 0x60d   :  { %16276 = vmatmul.mubr.f32.vlgmr.msra.gmra.mxu1 %v23024_v37  ;;  %16369 = vmatmul.mubr.f32.vlgmr.msra.gmra.mxu0 %v22965_v34  ;;  %v23311_v24 = vpop.f32.mrf.mxu1  ;;  %v23313_v3 = vpop.f32.mrf.mxu0  ;;  %v16590_v37 = vsub.f32 %v23271_v23, %v23298_v36 }
 0x60e   :  { %24532 = vst [vmem:[#allocation46_spill] sm:$0xff] %v23311_v24  ;;  %24533 = vst [vmem:[#allocation51_spill] sm:$0xff] %v23313_v3  ;;  %16413 = vmatpush1.msra.mxu1 %v23129_v4  ;;  %16549 = vmatpush1.msra.mxu0 %v23260_v54  ;;  %v23319_v9 = vadd.f32 %v12522_v56, %v23032_v22  ;;  %v16641_v4 = vand.u32 4294901760, %v16640_v38  ;;  %v24536_v38 = vand.u32 4294901760, %v23295_v51  ;;  %v24537_v3 = vand.u32 4294901760, %v23301_v33 }
 0x60f   :  { %16415 = vmatprep.subr.mxu1 %v23136_v16  ;;  %16551 = vmatprep.subr.mxu0 %v23266_v46  ;;  %v12704_v44 = vpop.f32.mrf.mxu1  ;;  %v12792_v11 = vpop.f32.mrf.mxu0  ;;  %v23332_v16 = vand.u32 4294901760, %v23309_v2 }
 0x610   :  { %16417 = vmatpush1.msra.mxu1 %v23144_v40  ;;  %16553 = vmatpush1.msra.mxu0 %v23277_v41  ;;  %v12705_v22 = vadd.f32 %v12704_v44, %v12601_v62  ;;  %v23344_v62 = vand.u32 4294901760, %v16590_v37  ;;  %v16652_v44 = vsub.f32 %v23295_v51, %v24536_v38 }
 0x611   :  { %16281 = vmatprep.mubr.f32.mxu1 %v24471_v49  ;;  %16374 = vmatprep.mubr.f32.mxu0 %v24471_v49  ;;  %v23334_v56 = vpop.f32.mrf.mxu1  ;;  %v23336_v17 = vpop.f32.mrf.mxu0 }
 0x612   :  { %24534 = vst [vmem:[#allocation48_spill] sm:$0xff] %v23334_v56  ;;  %24535 = vst [vmem:[#allocation50_spill] sm:$0xff] %v23336_v17  ;;  %16642 = vmatprep.subr.mxu1 %v16641_v4  ;;  %16738 = vmatprep.subr.mxu0 %v23249_v19  ;;  %v12793_v40 = vadd.f32 %v12792_v11, %v12705_v22  ;;  %v16658_v17 = vsub.f32 %v23301_v33, %v24537_v3  ;;  %v16647_v22 = vand.u32 4294901760, %v16646_v12  ;;  %v16495_v3 = vpop.permute.xlu1 %16494 }
 0x613   :  { %16285 = vmatmul.mubr.f32.gmra.mxu1 %v23058_v26  ;;  %16376 = vmatmul.mubr.f32.gmra.mxu0 %v23013_v61  ;;  %v16601_v11 = vsub.f32 %v23309_v2, %v23332_v16  ;;  %v16653_v38 = vand.u32 4294901760, %v16652_v44 }
 0x614   :  { %16450 = vmatprep.mubr.f32.mxu1 %v24471_v49  ;;  %16586 = vmatprep.mubr.f32.mxu0 %v24471_v49  ;;  %v16659_v24 = vand.u32 4294901760, %v16658_v17 }
 0x615   :  { %v12711_v26 = vpop.f32.mrf.mxu1  ;;  %v12800_v4 = vpop.f32.mrf.mxu0  ;;  %v23364_v12 = vand.u32 4294901760, %v16601_v11  ;;  %v24542_v11 = vand.u32 4294901760, %v23249_v19 }
 0x616   :  { %v12712_v37 = vadd.f32 %v12711_v26, %v12612_v21  ;;  %v16493_v26 = vpop.permute.xlu0 %16492 }
 0x617   :  { %16452 = vmatmul.mubr.f32.vlgmr.msra.gmra.mxu1 %v22965_v34  ;;  %16592 = vmatmul.mubr.f32.vlgmr.msra.gmra.mxu0 %v23344_v62  ;;  %v23358_v55 = vpop.f32.mrf.mxu1  ;;  %v23360_v56 = vpop.f32.mrf.mxu0  ;;  %v16502_v19 = vsel %vm6395_vm6, %v23200_v0, %v16493_v26 }
 0x618   :  { %24538 = vst [vmem:[#allocation53_spill] sm:$0xff] %v23358_v55  ;;  %24539 = vst [vmem:[#allocation54_spill] sm:$0xff] %v23360_v56  ;;  %16648 = vmatpush1.msra.mxu1 %v16647_v22  ;;  %16741 = vmatpush1.msra.mxu0 %v23290_v63  ;;  %v12801_v60 = vadd.f32 %v12800_v4, %v12712_v37  ;;  %v16503_v56 = vsel %vm6395_vm6, %v16493_v26, %v16495_v3  ;;  %v24546_v26 = vand.u32 4294901760, %v23295_v51 }
 0x619   :  { %16654 = vmatprep.subr.mxu1 %v16653_v38  ;;  %16744 = vmatprep.subr.mxu0 %v23295_v51  ;;  %v12878_v21 = vpop.f32.mrf.mxu1  ;;  %v12971_v34 = vpop.f32.mrf.mxu0 }
 0x61a   :  { %16660 = vmatpush1.msra.mxu1 %v16659_v24  ;;  %16747 = vmatpush1.msra.mxu0 %v23301_v33  ;;  %v12879_v44 = vadd.f32 %v12878_v21, %v12793_v40  ;;  %v23379_v24 = vand.u32 4294901760, %v16503_v56  ;;  %v16485_v40 = vpop.permute.xlu1 %16484  ;;  %v16483_v3 = vpop.permute.xlu0 %16482 }
 0x61b   :  { %16457 = vmatprep.mubr.f32.mxu1 %v24471_v49  ;;  %16597 = vmatprep.mubr.f32.mxu0 %v24471_v49  ;;  %v23370_v17 = vpop.f32.mrf.mxu1  ;;  %v23372_v4 = vpop.f32.mrf.mxu0  ;;  %v16498_v0 = vsel %vm6395_vm6, %v23234_v7, %v16483_v3 }
 0x61c   :  { %24540 = vst [vmem:[#allocation52_spill] sm:$0xff] %v23370_v17  ;;  %24541 = vst [vmem:[#allocation55_spill] sm:$0xff] %v23372_v4  ;;  %16826 = vmatprep.subr.mxu1 %v23229_v27  ;;  %16915 = vmatprep.subr.mxu0 %v24542_v11  ;;  %v12972_v22 = vadd.f32 %v12971_v34, %v12879_v44  ;;  %v23392_v44 = vsub.f32 %v16503_v56, %v23379_v24  ;;  %v23403_v56 = vand.u32 4294901760, %v16502_v19 }
 0x61d   :  { %16459 = vmatmul.mubr.f32.gmra.mxu1 %v23013_v61  ;;  %16603 = vmatmul.mubr.f32.gmra.mxu0 %v23364_v12  ;;  %v16499_v11 = vsel %vm6395_vm6, %v16483_v3, %v16485_v40  ;;  %v24547_v40 = vand.u32 4294901760, %v23301_v33 }
 0x61e   :  { %16693 = vmatprep.mubr.f32.mxu1 %v24471_v49  ;;  %16780 = vmatprep.mubr.f32.mxu0 %v24471_v49  ;;  %v24348_v33 = vand.u32 4294901760, %v23392_v44  ;;  %v23427_v3 = vsub.f32 %v16502_v19, %v23403_v56  ;;  %v23476_v4 = vpop.permute.xlu1 %17623 }
 0x61f   :  { %v12887_v37 = vpop.f32.mrf.mxu1  ;;  %v12978_v38 = vpop.f32.mrf.mxu0 }
 0x620   :  { %v12888_v21 = vadd.f32 %v12887_v37, %v12801_v60  ;;  %v24545_v60 = vand.u32 4294901760, %v23290_v63 }
 0x621   :  { %16695 = vmatmul.mubr.f32.vlgmr.msra.gmra.mxu1 %v23239_v32  ;;  %16783 = vmatmul.mubr.f32.vlgmr.msra.gmra.mxu0 %v23271_v23  ;;  %v23387_v61 = vpop.f32.mrf.mxu1  ;;  %v23389_v34 = vpop.f32.mrf.mxu0 }
 0x622   :  { %24543 = vst [vmem:[#allocation33_spill] sm:$0xff] %v23387_v61  ;;  %24544 = vst [vmem:[#allocation27_spill] sm:$0xff] %v23389_v34  ;;  %16828 = vmatpush1.msra.mxu1 %v23260_v54  ;;  %16919 = vmatpush1.msra.mxu0 %v24545_v60  ;;  %v12979_v37 = vadd.f32 %v12978_v38, %v12888_v21  ;;  %v23408_v60 = vand.u32 4294901760, %v16499_v11  ;;  %v23416_v38 = vand.u32 4294901760, %v16498_v0 }
 0x623   :  { %16830 = vmatprep.subr.mxu1 %v23266_v46  ;;  %16923 = vmatprep.subr.mxu0 %v24546_v26  ;;  %v13054_v34 = vpop.f32.mrf.mxu1  ;;  %v13194_v61 = vpop.f32.mrf.mxu0 }
 0x624   :  { %16832 = vmatpush1.msra.mxu1 %v23277_v41  ;;  %16927 = vmatpush1.msra.mxu0 %v24547_v40  ;;  %v13055_v63 = vadd.f32 %v13054_v34, %v12972_v22  ;;  %v23435_v26 = vsub.f32 %v16498_v0, %v23416_v38 }
 0x625   :  { %16700 = vmatprep.mubr.f32.mxu1 %v24471_v49  ;;  %16788 = vmatprep.mubr.f32.mxu0 %v24471_v49  ;;  %v23412_v7 = vpop.f32.mrf.mxu1  ;;  %v23414_v51 = vpop.f32.mrf.mxu0 }
 0x626   :  { %24548 = vst [vmem:[#allocation57_spill] sm:$0xff] %v23412_v7  ;;  %17004 = vmatprep.subr.mxu1 %v23229_v27  ;;  %17087 = vmatprep.subr.mxu0 %v23379_v24  ;;  %v23422_v22 = vadd.f32 %v13055_v63, %v23134_v1  ;;  %v23432_v27 = vsub.f32 %v16499_v11, %v23408_v60  ;;  %v17620_v7 = vpop.permute.xlu0 %17619 }
 0x627   :  { %16702 = vmatmul.mubr.f32.gmra.mxu1 %v23287_v45  ;;  %16791 = vmatmul.mubr.f32.gmra.mxu0 %v23309_v2  ;;  %v17180_v1 = vsub.f32 %v23392_v44, %v24348_v33 }
 0x628   :  { %16865 = vmatprep.mubr.f32.mxu1 %v24471_v49  ;;  %16960 = vmatprep.mubr.f32.mxu0 %v24471_v49 }
 0x629   :  { %v13061_v21 = vpop.f32.mrf.mxu1  ;;  %v13205_v34 = vpop.f32.mrf.mxu0 }
 0x62a   :  { %v13062_v40 = vadd.f32 %v13061_v21, %v12979_v37 }
 0x62b   :  { %16869 = vmatmul.mubr.f32.vlgmr.msra.gmra.mxu1 %v23298_v36  ;;  %16962 = vmatmul.mubr.f32.vlgmr.msra.gmra.mxu0 %v23239_v32  ;;  %v23442_v19 = vpop.f32.mrf.mxu1  ;;  %v23444_v63 = vpop.f32.mrf.mxu0 }
 0x62c   :  { %24549 = vst [vmem:[#allocation37_spill] sm:$0xff] %v23442_v19  ;;  %24550 = vst [vmem:[#allocation29_spill] sm:$0xff] %v23444_v63  ;;  %17006 = vmatpush1.msra.mxu1 %v23260_v54  ;;  %17089 = vmatpush1.msra.mxu0 %v23403_v56  ;;  %v23450_v0 = vadd.f32 %v13062_v40, %v23165_v14  ;;  %v24349_v19 = vand.u32 4294901760, %v23435_v26  ;;  %v17181_v54 = vand.u32 4294901760, %v17180_v1  ;;  %v24552_v40 = vand.u32 4294901760, %v23427_v3 }
 0x62d   :  { %17008 = vmatprep.subr.mxu1 %v23266_v46  ;;  %17091 = vmatprep.subr.mxu0 %v23408_v60  ;;  %v13297_v21 = vpop.f32.mrf.mxu1  ;;  %v13385_v33 = vpop.f32.mrf.mxu0 }
 0x62e   :  { %17010 = vmatpush1.msra.mxu1 %v23277_v41  ;;  %17093 = vmatpush1.msra.mxu0 %v23416_v38  ;;  %v13298_v11 = vadd.f32 %v13297_v21, %v13194_v61  ;;  %v17186_v37 = vsub.f32 %v23427_v3, %v24552_v40  ;;  %v24553_v61 = vand.u32 4294901760, %v23432_v27  ;;  %v17198_v21 = vsub.f32 %v23435_v26, %v24349_v19 }
 0x62f   :  { %16874 = vmatprep.mubr.f32.mxu1 %v24471_v49  ;;  %16967 = vmatprep.mubr.f32.mxu0 %v24471_v49  ;;  %v23460_v14 = vpop.f32.mrf.mxu1  ;;  %v23462_v46 = vpop.f32.mrf.mxu0 }
 0x630   :  { %24551 = vst [vmem:[#allocation60_spill] sm:$0xff] %v23462_v46  ;;  %17182 = vmatprep.subr.mxu1 %v17181_v54  ;;  %17278 = vmatprep.subr.mxu0 %v23392_v44  ;;  %v13386_v41 = vadd.f32 %v13385_v33, %v13298_v11  ;;  %v17192_v1 = vsub.f32 %v23432_v27, %v24553_v61  ;;  %v17187_v54 = vand.u32 4294901760, %v17186_v37  ;;  %v17199_v19 = vand.u32 4294901760, %v17198_v21  ;;  %v19912_v21 = vld [vmem:[%s24334_s2 + $0x70] sm:$0xff] }
 0x631   :  { %16878 = vmatmul.mubr.f32.gmra.mxu1 %v23332_v16  ;;  %16969 = vmatmul.mubr.f32.gmra.mxu0 %v23287_v45  ;;  %v24563_v46 = vand.u32 4294901760, %v23435_v26 }
 0x632   :  { %17043 = vmatprep.mubr.f32.mxu1 %v24471_v49  ;;  %17126 = vmatprep.mubr.f32.mxu0 %v24471_v49  ;;  %v17193_v61 = vand.u32 4294901760, %v17192_v1 }
 0x633   :  { %v13304_v33 = vpop.f32.mrf.mxu1  ;;  %v13393_v11 = vpop.f32.mrf.mxu0 }
 0x634   :  { %v13305_v40 = vadd.f32 %v13304_v33, %v13205_v34  ;;  %v17622_v34 = vpop.permute.xlu0 %17621  ;;  %v17612_v33 = vpop.permute.xlu1 %17611 }
 0x635   :  { %17045 = vmatmul.mubr.f32.vlgmr.msra.gmra.mxu1 %v23239_v32  ;;  %17132 = vmatmul.mubr.f32.vlgmr.msra.gmra.mxu0 %v23344_v62  ;;  %v23482_v17 = vpop.f32.mrf.mxu1  ;;  %v23484_v55 = vpop.f32.mrf.mxu0  ;;  %v17634_v1 = vsel %vm7459_vm7, %v17622_v34, %v23476_v4 }
 0x636   :  { %24554 = vst [vmem:[#allocation61_spill] sm:$0xff] %v23482_v17  ;;  %24555 = vst [vmem:[#allocation62_spill] sm:$0xff] %v23484_v55  ;;  %17188 = vmatpush1.msra.mxu1 %v17187_v54  ;;  %17281 = vmatpush1.msra.mxu0 %v23427_v3  ;;  %v13394_v63 = vadd.f32 %v13393_v11, %v13305_v40  ;;  %v17646_v40 = vsel %vm9768_vm9, %v19912_v21, 0 }
 0x637   :  { %17194 = vmatprep.subr.mxu1 %v17193_v61  ;;  %17284 = vmatprep.subr.mxu0 %v23432_v27  ;;  %v13471_v29 = vpop.f32.mrf.mxu1  ;;  %v13564_v37 = vpop.f32.mrf.mxu0 }
 0x638   :  { %17200 = vmatpush1.msra.mxu1 %v17199_v19  ;;  %17287 = vmatpush1.msra.mxu0 %v23435_v26  ;;  %v13472_v62 = vadd.f32 %v13471_v29, %v13386_v41  ;;  %v24558_v19 = vand.u32 4294901760, %v23392_v44  ;;  %v23505_v41 = vand.u32 4294901760, %v17634_v1  ;;  %v23510_v55 = vpop.permute.xlu0 %17613 }
 0x639   :  { %17050 = vmatprep.mubr.f32.mxu1 %v24471_v49  ;;  %17137 = vmatprep.mubr.f32.mxu0 %v24471_v49  ;;  %v23496_v11 = vpop.f32.mrf.mxu1  ;;  %v23498_v54 = vpop.f32.mrf.mxu0 }
 0x63a   :  { %24556 = vst [vmem:[#allocation63_spill] sm:$0xff] %v23496_v11  ;;  %24557 = vst [vmem:[#allocation64_spill] sm:$0xff] %v23498_v54  ;;  %17366 = vmatprep.subr.mxu1 %v23379_v24  ;;  %17455 = vmatprep.subr.mxu0 %v24558_v19  ;;  %v13565_v29 = vadd.f32 %v13564_v37, %v13472_v62  ;;  %v17610_v11 = vpop.permute.xlu1 %17609  ;;  %v17633_v37 = vsel %vm7459_vm7, %v17620_v7, %v17622_v34  ;;  %v19913_v62 = vld [vmem:[%s24334_s2 + $0x78] sm:$0xff] }
 0x63b   :  { %17052 = vmatmul.mubr.f32.gmra.mxu1 %v23287_v45  ;;  %17143 = vmatmul.mubr.f32.gmra.mxu0 %v23364_v12  ;;  %v23515_v12 = vand.u32 4294901760, %v17646_v40  ;;  %v23525_v17 = vsub.f32 %v17634_v1, %v23505_v41  ;;  %v17630_v7 = vsel %vm7459_vm7, %v17612_v33, %v23510_v55  ;;  %v17629_v34 = vsel %vm7459_vm7, %v17610_v11, %v17612_v33 }
 0x63c   :  { %17233 = vmatprep.mubr.f32.mxu1 %v24471_v49  ;;  %17320 = vmatprep.mubr.f32.mxu0 %v24471_v49  ;;  %v23536_v1 = vand.u32 4294901760, %v17633_v37 }
 0x63d   :  { %v13480_v61 = vpop.f32.mrf.mxu1  ;;  %v13571_v54 = vpop.f32.mrf.mxu0  ;;  %v24350_v26 = vand.u32 4294901760, %v23525_v17 }
 0x63e   :  { %v13481_v44 = vadd.f32 %v13480_v61, %v13394_v63  ;;  %v24562_v61 = vand.u32 4294901760, %v23432_v27  ;;  %v23547_v27 = vsub.f32 %v17646_v40, %v23515_v12  ;;  %v23566_v40 = vsub.f32 %v17633_v37, %v23536_v1 }
 0x63f   :  { %17235 = vmatmul.mubr.f32.vlgmr.msra.gmra.mxu1 %v23239_v32  ;;  %17323 = vmatmul.mubr.f32.vlgmr.msra.gmra.mxu0 %v23271_v23  ;;  %v23520_v19 = vpop.f32.mrf.mxu1  ;;  %v23522_v21 = vpop.f32.mrf.mxu0  ;;  %v24561_v23 = vand.u32 4294901760, %v23427_v3  ;;  %v17649_v3 = vsel %vm9768_vm9, %v19913_v62, 0 }
 0x640   :  { %24559 = vst [vmem:[#allocation65_spill] sm:$0xff] %v23520_v19  ;;  %24560 = vst [vmem:[#allocation66_spill] sm:$0xff] %v23522_v21  ;;  %17368 = vmatpush1.msra.mxu1 %v23403_v56  ;;  %v13572_v63 = vadd.f32 %v13571_v54, %v13481_v44  ;;  %v23542_v54 = vand.u32 4294901760, %v17630_v7  ;;  %17240 = vmatprep.mubr.f32.mxu1 %v24471_v49  ;;  %v23553_v44 = vand.u32 4294901760, %v17629_v34  ;;  %v23574_v62 = vand.u32 4294901760, %v23547_v27 }
 0x641   :  { %17459 = vmatpush1.msra.mxu0 %v24561_v23  ;;  %17370 = vmatprep.subr.mxu1 %v23408_v60  ;;  %v13647_v21 = vpop.f32.mrf.mxu1  ;;  %v13734_v19 = vpop.f32.mrf.mxu0 }
 0x642   :  { %17463 = vmatprep.subr.mxu0 %v24562_v61  ;;  %17372 = vmatpush1.msra.mxu1 %v23416_v38  ;;  %v13648_v23 = vadd.f32 %v13647_v21, %v13565_v29  ;;  %v23563_v29 = vand.u32 4294901760, %v17649_v3  ;;  %v23577_v61 = vsub.f32 %v17629_v34, %v23553_v44 }
 0x643   :  { %17467 = vmatpush1.msra.mxu0 %v24563_v46  ;;  %17328 = vmatprep.mubr.f32.mxu0 %v24471_v49  ;;  %v23549_v33 = vpop.f32.mrf.mxu1  ;;  %v23551_v11 = vpop.f32.mrf.mxu0 }
 0x644   :  { %24564 = vst [vmem:[#allocation67_spill] sm:$0xff] %v23549_v33  ;;  %24565 = vst [vmem:[#allocation68_spill] sm:$0xff] %v23551_v11  ;;  %17544 = vmatprep.subr.mxu1 %v23379_v24  ;;  %17680 = vmatprep.subr.mxu0 %v23505_v41  ;;  %v23559_v46 = vadd.f32 %v13648_v23, %v23283_v59  ;;  %v23571_v24 = vsub.f32 %v17630_v7, %v23542_v54  ;;  %v24351_v33 = vand.u32 4294901760, %v23566_v40 }
 0x645   :  { %17242 = vmatmul.mubr.f32.gmra.mxu1 %v23287_v45  ;;  %17331 = vmatmul.mubr.f32.gmra.mxu0 %v23309_v2  ;;  %v17773_v2 = vsub.f32 %v23525_v17, %v24350_v26  ;;  %v23585_v7 = vsub.f32 %v17649_v3, %v23563_v29 }
 0x646   :  { %17405 = vmatprep.mubr.f32.mxu1 %v24471_v49  ;;  %17500 = vmatprep.mubr.f32.mxu0 %v24471_v49  ;;  %v17779_v26 = vsub.f32 %v23566_v40, %v24351_v33 }
 0x647   :  { %v13654_v59 = vpop.f32.mrf.mxu1  ;;  %v13745_v21 = vpop.f32.mrf.mxu0 }
 0x648   :  { %v13655_v37 = vadd.f32 %v13654_v59, %v13572_v63 }
 0x649   :  { %17409 = vmatmul.mubr.f32.vlgmr.msra.gmra.mxu1 %v23298_v36  ;;  %17502 = vmatmul.mubr.f32.vlgmr.msra.gmra.mxu0 %v23239_v32  ;;  %v23587_v23 = vpop.f32.mrf.mxu1  ;;  %v23589_v11 = vpop.f32.mrf.mxu0  ;;  %v17723_v36 = vsub.f32 %v23547_v27, %v23574_v62 }
 0x64a   :  { %24566 = vst [vmem:[#allocation69_spill] sm:$0xff] %v23587_v23  ;;  %24567 = vst [vmem:[#allocation70_spill] sm:$0xff] %v23589_v11  ;;  %17546 = vmatpush1.msra.mxu1 %v23403_v56  ;;  %17682 = vmatpush1.msra.mxu0 %v23536_v1  ;;  %v23595_v34 = vadd.f32 %v13655_v37, %v23319_v9  ;;  %v17774_v56 = vand.u32 4294901760, %v17773_v2  ;;  %v24570_v2 = vand.u32 4294901760, %v23571_v24  ;;  %v24571_v11 = vand.u32 4294901760, %v23577_v61 }
 0x64b   :  { %17548 = vmatprep.subr.mxu1 %v23408_v60  ;;  %17684 = vmatprep.subr.mxu0 %v23542_v54  ;;  %v13837_v3 = vpop.f32.mrf.mxu1  ;;  %v13925_v59 = vpop.f32.mrf.mxu0  ;;  %v23608_v60 = vand.u32 4294901760, %v23585_v7 }
 0x64c   :  { %17550 = vmatpush1.msra.mxu1 %v23416_v38  ;;  %17686 = vmatpush1.msra.mxu0 %v23553_v44  ;;  %v13838_v9 = vadd.f32 %v13837_v3, %v13734_v19  ;;  %v23620_v19 = vand.u32 4294901760, %v17723_v36  ;;  %v17785_v3 = vsub.f32 %v23571_v24, %v24570_v2 }
 0x64d   :  { %17414 = vmatprep.mubr.f32.mxu1 %v24471_v49  ;;  %17507 = vmatprep.mubr.f32.mxu0 %v24471_v49  ;;  %v23610_v37 = vpop.f32.mrf.mxu1  ;;  %v23612_v63 = vpop.f32.mrf.mxu0 }
 0x64e   :  { %24568 = vst [vmem:[#allocation71_spill] sm:$0xff] %v23610_v37  ;;  %24569 = vst [vmem:[#allocation72_spill] sm:$0xff] %v23612_v63  ;;  %17775 = vmatprep.subr.mxu1 %v17774_v56  ;;  %17871 = vmatprep.subr.mxu0 %v23525_v17  ;;  %v13926_v38 = vadd.f32 %v13925_v59, %v13838_v9  ;;  %v17791_v63 = vsub.f32 %v23577_v61, %v24571_v11  ;;  %v17780_v9 = vand.u32 4294901760, %v17779_v26  ;;  %v17628_v11 = vpop.permute.xlu1 %17627 }
 0x64f   :  { %17418 = vmatmul.mubr.f32.gmra.mxu1 %v23332_v16  ;;  %17509 = vmatmul.mubr.f32.gmra.mxu0 %v23287_v45  ;;  %v17734_v59 = vsub.f32 %v23585_v7, %v23608_v60  ;;  %v17786_v2 = vand.u32 4294901760, %v17785_v3 }
 0x650   :  { %17583 = vmatprep.mubr.f32.mxu1 %v24471_v49  ;;  %17719 = vmatprep.mubr.f32.mxu0 %v24471_v49  ;;  %v17792_v23 = vand.u32 4294901760, %v17791_v63 }
 0x651   :  { %v13844_v16 = vpop.f32.mrf.mxu1  ;;  %v13933_v56 = vpop.f32.mrf.mxu0  ;;  %v23640_v26 = vand.u32 4294901760, %v17734_v59  ;;  %v24576_v59 = vand.u32 4294901760, %v23525_v17 }
 0x652   :  { %v13845_v36 = vadd.f32 %v13844_v16, %v13745_v21  ;;  %v17626_v16 = vpop.permute.xlu0 %17625 }
 0x653   :  { %17585 = vmatmul.mubr.f32.vlgmr.msra.gmra.mxu1 %v23239_v32  ;;  %17725 = vmatmul.mubr.f32.vlgmr.msra.gmra.mxu0 %v23620_v19  ;;  %v23634_v33 = vpop.f32.mrf.mxu1  ;;  %v23636_v37 = vpop.f32.mrf.mxu0  ;;  %v17635_v17 = vsel %vm7459_vm7, %v23476_v4, %v17626_v16 }
 0x654   :  { %24572 = vst [vmem:[#allocation73_spill] sm:$0xff] %v23634_v33  ;;  %24573 = vst [vmem:[#allocation74_spill] sm:$0xff] %v23636_v37  ;;  %17781 = vmatpush1.msra.mxu1 %v17780_v9  ;;  %17874 = vmatpush1.msra.mxu0 %v23566_v40  ;;  %v13934_v43 = vadd.f32 %v13933_v56, %v13845_v36  ;;  %v17636_v37 = vsel %vm7459_vm7, %v17626_v16, %v17628_v11  ;;  %v24580_v16 = vand.u32 4294901760, %v23571_v24 }
 0x655   :  { %17787 = vmatprep.subr.mxu1 %v17786_v2  ;;  %17877 = vmatprep.subr.mxu0 %v23571_v24  ;;  %v14011_v21 = vpop.f32.mrf.mxu1  ;;  %v14104_v32 = vpop.f32.mrf.mxu0 }
 0x656   :  { %17793 = vmatpush1.msra.mxu1 %v17792_v23  ;;  %17880 = vmatpush1.msra.mxu0 %v23577_v61  ;;  %v14012_v3 = vadd.f32 %v14011_v21, %v13926_v38  ;;  %v23655_v23 = vand.u32 4294901760, %v17636_v37  ;;  %v17618_v38 = vpop.permute.xlu1 %17617  ;;  %v17616_v11 = vpop.permute.xlu0 %17615 }
 0x657   :  { %17590 = vmatprep.mubr.f32.mxu1 %v24471_v49  ;;  %17730 = vmatprep.mubr.f32.mxu0 %v24471_v49  ;;  %v23646_v63 = vpop.f32.mrf.mxu1  ;;  %v23648_v56 = vpop.f32.mrf.mxu0  ;;  %v17631_v4 = vsel %vm7459_vm7, %v23510_v55, %v17616_v11 }
 0x658   :  { %24574 = vst [vmem:[#allocation75_spill] sm:$0xff] %v23646_v63  ;;  %24575 = vst [vmem:[#allocation76_spill] sm:$0xff] %v23648_v56  ;;  %17959 = vmatprep.subr.mxu1 %v23505_v41  ;;  %18048 = vmatprep.subr.mxu0 %v24576_v59  ;;  %v14105_v9 = vadd.f32 %v14104_v32, %v14012_v3  ;;  %v23668_v3 = vsub.f32 %v17636_v37, %v23655_v23  ;;  %v23679_v37 = vand.u32 4294901760, %v17635_v17 }
 0x659   :  { %17592 = vmatmul.mubr.f32.gmra.mxu1 %v23287_v45  ;;  %17736 = vmatmul.mubr.f32.gmra.mxu0 %v23640_v26  ;;  %v17632_v59 = vsel %vm7459_vm7, %v17616_v11, %v17618_v38  ;;  %v24581_v38 = vand.u32 4294901760, %v23577_v61 }
 0x65a   :  { %17826 = vmatprep.mubr.f32.mxu1 %v24471_v49  ;;  %17913 = vmatprep.mubr.f32.mxu0 %v24471_v49  ;;  %v24352_v61 = vand.u32 4294901760, %v23668_v3  ;;  %v23703_v11 = vsub.f32 %v17635_v17, %v23679_v37  ;;  %v23748_v56 = vpop.permute.xlu1 %18756 }
 0x65b   :  { %v14020_v36 = vpop.f32.mrf.mxu1  ;;  %v14111_v2 = vpop.f32.mrf.mxu0 }
 0x65c   :  { %v14021_v21 = vadd.f32 %v14020_v36, %v13934_v43  ;;  %v24579_v43 = vand.u32 4294901760, %v23566_v40 }
 0x65d   :  { %17828 = vmatmul.mubr.f32.vlgmr.msra.gmra.mxu1 %v23515_v12  ;;  %17916 = vmatmul.mubr.f32.vlgmr.msra.gmra.mxu0 %v23547_v27  ;;  %v23663_v45 = vpop.f32.mrf.mxu1  ;;  %v23665_v32 = vpop.f32.mrf.mxu0 }
 0x65e   :  { %24577 = vst [vmem:[#allocation77_spill] sm:$0xff] %v23663_v45  ;;  %24578 = vst [vmem:[#allocation78_spill] sm:$0xff] %v23665_v32  ;;  %17961 = vmatpush1.msra.mxu1 %v23536_v1  ;;  %18052 = vmatpush1.msra.mxu0 %v24579_v43  ;;  %v14112_v36 = vadd.f32 %v14111_v2, %v14021_v21  ;;  %v23684_v43 = vand.u32 4294901760, %v17632_v59  ;;  %v23692_v2 = vand.u32 4294901760, %v17631_v4 }
 0x65f   :  { %17963 = vmatprep.subr.mxu1 %v23542_v54  ;;  %18056 = vmatprep.subr.mxu0 %v24580_v16  ;;  %v14187_v32 = vpop.f32.mrf.mxu1  ;;  %v14327_v45 = vpop.f32.mrf.mxu0 }
 0x660   :  { %17965 = vmatpush1.msra.mxu1 %v23553_v44  ;;  %18060 = vmatpush1.msra.mxu0 %v24581_v38  ;;  %v14188_v40 = vadd.f32 %v14187_v32, %v14105_v9  ;;  %v23711_v16 = vsub.f32 %v17631_v4, %v23692_v2 }
 0x661   :  { %17833 = vmatprep.mubr.f32.mxu1 %v24471_v49  ;;  %17921 = vmatprep.mubr.f32.mxu0 %v24471_v49  ;;  %v23688_v55 = vpop.f32.mrf.mxu1  ;;  %v23690_v24 = vpop.f32.mrf.mxu0 }
 0x662   :  { %24582 = vst [vmem:[#allocation79_spill] sm:$0xff] %v23688_v55  ;;  %18137 = vmatprep.subr.mxu1 %v23505_v41  ;;  %18220 = vmatprep.subr.mxu0 %v23655_v23  ;;  %v23698_v9 = vadd.f32 %v14188_v40, %v23422_v22  ;;  %v23708_v41 = vsub.f32 %v17632_v59, %v23684_v43  ;;  %v24584_v55 = vand.u32 4294901760, %v23703_v11 }
 0x663   :  { %17835 = vmatmul.mubr.f32.gmra.mxu1 %v23563_v29  ;;  %17924 = vmatmul.mubr.f32.gmra.mxu0 %v23585_v7  ;;  %v18313_v22 = vsub.f32 %v23668_v3, %v24352_v61 }
 0x664   :  { %17998 = vmatprep.mubr.f32.mxu1 %v24471_v49  ;;  %18093 = vmatprep.mubr.f32.mxu0 %v24471_v49 }
 0x665   :  { %v14194_v21 = vpop.f32.mrf.mxu1  ;;  %v14338_v32 = vpop.f32.mrf.mxu0 }
 0x666   :  { %v14195_v38 = vadd.f32 %v14194_v21, %v14112_v36  ;;  %v18319_v36 = vsub.f32 %v23703_v11, %v24584_v55 }
 0x667   :  { %18002 = vmatmul.mubr.f32.vlgmr.msra.gmra.mxu1 %v23574_v62  ;;  %18095 = vmatmul.mubr.f32.vlgmr.msra.gmra.mxu0 %v23515_v12  ;;  %v23718_v17 = vpop.f32.mrf.mxu1  ;;  %v23720_v40 = vpop.f32.mrf.mxu0 }
 0x668   :  { %24583 = vst [vmem:[#allocation80_spill] sm:$0xff] %v23718_v17  ;;  %18139 = vmatpush1.msra.mxu1 %v23536_v1  ;;  %18222 = vmatpush1.msra.mxu0 %v23679_v37  ;;  %v23726_v4 = vadd.f32 %v14195_v38, %v23450_v0  ;;  %v18314_v1 = vand.u32 4294901760, %v18313_v22  ;;  %v18753_v38 = vpop.permute.xlu0 %18752  ;;  %v24586_v22 = vand.u32 4294901760, %v23711_v16 }
 0x669   :  { %18141 = vmatprep.subr.mxu1 %v23542_v54  ;;  %18224 = vmatprep.subr.mxu0 %v23684_v43  ;;  %v14430_v21 = vpop.f32.mrf.mxu1  ;;  %v14518_v61 = vpop.f32.mrf.mxu0 }
 0x66a   :  { %18143 = vmatpush1.msra.mxu1 %v23553_v44  ;;  %18226 = vmatpush1.msra.mxu0 %v23692_v2  ;;  %v14431_v59 = vadd.f32 %v14430_v21, %v14327_v45  ;;  %v24585_v44 = vand.u32 4294901760, %v23708_v41  ;;  %v18331_v21 = vsub.f32 %v23711_v16, %v24586_v22 }
 0x66b   :  { %18007 = vmatprep.mubr.f32.mxu1 %v24471_v49  ;;  %18100 = vmatprep.mubr.f32.mxu0 %v24471_v49  ;;  %v14432_v0 = vpop.f32.mrf.mxu1  ;;  %v14520_v54 = vpop.f32.mrf.mxu0 }
 0x66c   :  { %18315 = vmatprep.subr.mxu1 %v18314_v1  ;;  %18411 = vmatprep.subr.mxu0 %v23668_v3  ;;  %v14519_v17 = vadd.f32 %v14518_v61, %v14431_v59  ;;  %v18325_v45 = vsub.f32 %v23708_v41, %v24585_v44  ;;  %v18320_v59 = vand.u32 4294901760, %v18319_v36  ;;  %v18755_v48 = vpop.permute.xlu0 %18754  ;;  %v18332_v22 = vand.u32 4294901760, %v18331_v21  ;;  %v18745_v36 = vpop.permute.xlu1 %18744 }
 0x66d   :  { %18011 = vmatmul.mubr.f32.gmra.mxu1 %v23608_v60  ;;  %18102 = vmatmul.mubr.f32.gmra.mxu0 %v23563_v29 }
 0x66e   :  { %18176 = vmatprep.mubr.f32.mxu1 %v24471_v49  ;;  %18259 = vmatprep.mubr.f32.mxu0 %v24471_v49  ;;  %v18326_v63 = vand.u32 4294901760, %v18325_v45 }
 0x66f   :  { %v14437_v55 = vpop.f32.mrf.mxu1  ;;  %v14526_v61 = vpop.f32.mrf.mxu0 }
 0x670   :  { %v14438_v1 = vadd.f32 %v14437_v55, %v14338_v32  ;;  %v18767_v32 = vsel %vm8523_vm8, %v18755_v48, %v23748_v56 }
 0x671   :  { %18178 = vmatmul.mubr.f32.vlgmr.msra.gmra.mxu1 %v23515_v12  ;;  %18265 = vmatmul.mubr.f32.vlgmr.msra.gmra.mxu0 %v23620_v19  ;;  %v14439_v44 = vpop.f32.mrf.mxu1  ;;  %v14528_v33 = vpop.f32.mrf.mxu0  ;;  %v14433_v19 = vadd.f32 %v14432_v0, %v23690_v24 }
 0x672   :  { %18321 = vmatpush1.msra.mxu1 %v18320_v59  ;;  %18414 = vmatpush1.msra.mxu0 %v23703_v11  ;;  %v14527_v18 = vadd.f32 %v14526_v61, %v14438_v1  ;;  %v24587_v61 = vand.u32 4294901760, %v23668_v3  ;;  %v23768_v1 = vand.u32 4294901760, %v18767_v32  ;;  %v23776_v3 = vpop.permute.xlu0 %18746 }
 0x673   :  { %18327 = vmatprep.subr.mxu1 %v18326_v63  ;;  %18417 = vmatprep.subr.mxu0 %v23708_v41  ;;  %v14604_v8 = vpop.f32.mrf.mxu1  ;;  %v14697_v42 = vpop.f32.mrf.mxu0  ;;  %v19914_v63 = vld [vmem:[%s24334_s2 + $0x80] sm:$0xff]  ;;  %v14521_v24 = vadd.f32 %v14520_v54, %v14433_v19  ;;  %v24589_v19 = vand.u32 4294901760, %v23708_v41 }
 0x674   :  { %18333 = vmatpush1.msra.mxu1 %v18332_v22  ;;  %18420 = vmatpush1.msra.mxu0 %v23711_v16  ;;  %v14605_v45 = vadd.f32 %v14604_v8, %v14519_v17  ;;  %v18779_v8 = vsel %vm9768_vm9, %v19914_v63, 0  ;;  %v18766_v22 = vsel %vm8523_vm8, %v18753_v38, %v18755_v48  ;;  %v19915_v48 = vld [vmem:[%s24334_s2 + $0x88] sm:$0xff] }
 0x675   :  { %18183 = vmatprep.mubr.f32.mxu1 %v24471_v49  ;;  %18270 = vmatprep.mubr.f32.mxu0 %v24471_v49  ;;  %v14606_v21 = vpop.f32.mrf.mxu1  ;;  %v14699_v55 = vpop.f32.mrf.mxu0  ;;  %v23784_v63 = vand.u32 4294901760, %v18779_v8 }
 0x676   :  { %18499 = vmatprep.subr.mxu1 %v23655_v23  ;;  %18588 = vmatprep.subr.mxu0 %v24587_v61  ;;  %v14698_v59 = vadd.f32 %v14697_v42, %v14605_v45  ;;  %v18743_v42 = vpop.permute.xlu1 %18742  ;;  %v14440_v45 = vadd.f32 %v14439_v44, %v23720_v40  ;;  %v14607_v61 = vadd.f32 %v14606_v21, %v14521_v24 }
 0x677   :  { %18185 = vmatmul.mubr.f32.gmra.mxu1 %v23563_v29  ;;  %18276 = vmatmul.mubr.f32.gmra.mxu0 %v23640_v26  ;;  %v23780_v26 = vsub.f32 %v18767_v32, %v23768_v1  ;;  %v18763_v40 = vsel %vm8523_vm8, %v18745_v36, %v23776_v3  ;;  %v23794_v32 = vand.u32 4294901760, %v18766_v22 }
 0x678   :  { %18366 = vmatprep.mubr.f32.mxu1 %v24471_v49  ;;  %18453 = vmatprep.mubr.f32.mxu0 %v24471_v49  ;;  %v23804_v35 = vand.u32 4294901760, %v18763_v40 }
 0x679   :  { %v14613_v17 = vpop.f32.mrf.mxu1  ;;  %v14704_v0 = vpop.f32.mrf.mxu0  ;;  %v24356_v41 = vand.u32 4294901760, %v23780_v26 }
 0x67a   :  { %v14614_v47 = vadd.f32 %v14613_v17, %v14527_v18  ;;  %v24588_v18 = vand.u32 4294901760, %v23703_v11  ;;  %v24590_v17 = vand.u32 4294901760, %v23711_v16  ;;  %v18782_v11 = vsel %vm9768_vm9, %v19915_v48, 0 }
 0x67b   :  { %18368 = vmatmul.mubr.f32.vlgmr.msra.gmra.mxu1 %v23515_v12  ;;  %18456 = vmatmul.mubr.f32.vlgmr.msra.gmra.mxu0 %v23547_v27  ;;  %v14615_v54 = vpop.f32.mrf.mxu1  ;;  %v14706_v38 = vpop.f32.mrf.mxu0  ;;  %v18762_v27 = vsel %vm8523_vm8, %v18743_v42, %v18745_v36  ;;  %v23810_v36 = vsub.f32 %v18779_v8, %v23784_v63  ;;  %v23823_v8 = vand.u32 4294901760, %v18782_v11 }
 0x67c   :  { %18501 = vmatpush1.msra.mxu1 %v23679_v37  ;;  %18592 = vmatpush1.msra.mxu0 %v24588_v18  ;;  %v14705_v44 = vadd.f32 %v14704_v0, %v14614_v47  ;;  %v14529_v18 = vadd.f32 %v14528_v33, %v14440_v45  ;;  %v14700_v47 = vadd.f32 %v14699_v55, %v14607_v61  ;;  %v23812_v16 = vand.u32 4294901760, %v18762_v27 }
 0x67d   :  { %18503 = vmatprep.subr.mxu1 %v23684_v43  ;;  %18596 = vmatprep.subr.mxu0 %v24589_v19  ;;  %v14780_v21 = vpop.f32.mrf.mxu1  ;;  %v14867_v24 = vpop.f32.mrf.mxu0  ;;  %v23826_v45 = vsub.f32 %v18766_v22, %v23794_v32 }
 0x67e   :  { %18505 = vmatpush1.msra.mxu1 %v23692_v2  ;;  %18600 = vmatpush1.msra.mxu0 %v24590_v17  ;;  %v14781_v0 = vadd.f32 %v14780_v21, %v14698_v59  ;;  %v14616_v33 = vadd.f32 %v14615_v54, %v14529_v18  ;;  %v23837_v54 = vsub.f32 %v18762_v27, %v23812_v16 }
 0x67f   :  { %18373 = vmatprep.mubr.f32.mxu1 %v24471_v49  ;;  %18461 = vmatprep.mubr.f32.mxu0 %v24471_v49  ;;  %v14782_v42 = vpop.f32.mrf.mxu1  ;;  %v14869_v19 = vpop.f32.mrf.mxu0 }
 0x680   :  { %18677 = vmatprep.subr.mxu1 %v23655_v23  ;;  %18813 = vmatprep.subr.mxu0 %v23768_v1  ;;  %v23817_v55 = vadd.f32 %v14781_v0, %v23559_v46  ;;  %v23819_v59 = vadd.f32 %v14782_v42, %v14700_v47  ;;  %v23831_v23 = vsub.f32 %v18763_v40, %v23804_v35  ;;  %v23834_v46 = vand.u32 4294901760, %v23810_v36 }
 0x681   :  { %18375 = vmatmul.mubr.f32.gmra.mxu1 %v23563_v29  ;;  %18464 = vmatmul.mubr.f32.gmra.mxu0 %v23585_v7  ;;  %v18906_v7 = vsub.f32 %v23780_v26, %v24356_v41  ;;  %v14707_v22 = vadd.f32 %v14706_v38, %v14616_v33  ;;  %v23845_v40 = vsub.f32 %v18782_v11, %v23823_v8  ;;  %v24355_v47 = vand.u32 4294901760, %v23826_v45 }
 0x682   :  { %18538 = vmatprep.mubr.f32.mxu1 %v24471_v49  ;;  %18633 = vmatprep.mubr.f32.mxu0 %v24471_v49 }
 0x683   :  { %v14787_v61 = vpop.f32.mrf.mxu1  ;;  %v14878_v48 = vpop.f32.mrf.mxu0 }
 0x684   :  { %v14788_v21 = vadd.f32 %v14787_v61, %v14705_v44  ;;  %v24353_v44 = vand.u32 4294901760, %v23831_v23 }
 0x685   :  { %18542 = vmatmul.mubr.f32.vlgmr.msra.gmra.mxu1 %v23574_v62  ;;  %18635 = vmatmul.mubr.f32.vlgmr.msra.gmra.mxu0 %v23515_v12  ;;  %v14789_v17 = vpop.f32.mrf.mxu1  ;;  %v14880_v18 = vpop.f32.mrf.mxu0  ;;  %v18856_v62 = vsub.f32 %v23810_v36, %v23834_v46 }
 0x686   :  { %18679 = vmatpush1.msra.mxu1 %v23679_v37  ;;  %18815 = vmatpush1.msra.mxu0 %v23794_v32  ;;  %v23851_v27 = vadd.f32 %v14788_v21, %v23595_v34  ;;  %v23853_v38 = vadd.f32 %v14789_v17, %v14707_v22  ;;  %v24354_v37 = vand.u32 4294901760, %v23837_v54  ;;  %v18907_v34 = vand.u32 4294901760, %v18906_v7 }
 0x687   :  { %18681 = vmatprep.subr.mxu1 %v23684_v43  ;;  %18817 = vmatprep.subr.mxu0 %v23804_v35  ;;  %v14970_v11 = vpop.f32.mrf.mxu1  ;;  %v15058_v0 = vpop.f32.mrf.mxu0  ;;  %v23866_v43 = vand.u32 4294901760, %v23845_v40  ;;  %v18912_v22 = vsub.f32 %v23826_v45, %v24355_v47  ;;  %v18918_v7 = vsub.f32 %v23831_v23, %v24353_v44 }
 0x688   :  { %24591 = vst [vmem:[#allocation81_spill] sm:$0xff] %v23851_v27  ;;  %18683 = vmatpush1.msra.mxu1 %v23692_v2  ;;  %18819 = vmatpush1.msra.mxu0 %v23812_v16  ;;  %v14971_v42 = vadd.f32 %v14970_v11, %v14867_v24  ;;  %v23874_v24 = vand.u32 4294901760, %v18856_v62  ;;  %v18924_v17 = vsub.f32 %v23837_v54, %v24354_v37  ;;  %v18761_v62 = vpop.permute.xlu1 %18760  ;;  %v18759_v47 = vpop.permute.xlu0 %18758 }
 0x689   :  { %18547 = vmatprep.mubr.f32.mxu1 %v24471_v49  ;;  %18640 = vmatprep.mubr.f32.mxu0 %v24471_v49  ;;  %v14972_v33 = vpop.f32.mrf.mxu1  ;;  %v15060_v61 = vpop.f32.mrf.mxu0 }
 0x68a   :  { %18908 = vmatprep.subr.mxu1 %v18907_v34  ;;  %19004 = vmatprep.subr.mxu0 %v23780_v26  ;;  %v14973_v2 = vadd.f32 %v14972_v33, %v14869_v19  ;;  %v15059_v21 = vadd.f32 %v15058_v0, %v14971_v42  ;;  %v18913_v34 = vand.u32 4294901760, %v18912_v22  ;;  %v18919_v33 = vand.u32 4294901760, %v18918_v7 }
 0x68b   :  { %18551 = vmatmul.mubr.f32.gmra.mxu1 %v23608_v60  ;;  %18642 = vmatmul.mubr.f32.gmra.mxu0 %v23563_v29  ;;  %v18867_v60 = vsub.f32 %v23845_v40, %v23866_v43 }
 0x68c   :  { %18716 = vmatprep.mubr.f32.mxu1 %v24471_v49  ;;  %18852 = vmatprep.mubr.f32.mxu0 %v24471_v49  ;;  %v15061_v19 = vadd.f32 %v15060_v61, %v14973_v2  ;;  %v18925_v61 = vand.u32 4294901760, %v18924_v17  ;;  %v24592_v17 = vand.u32 4294901760, %v23780_v26  ;;  %v18768_v26 = vsel %vm8523_vm8, %v23748_v56, %v18759_v47 }
 0x68d   :  { %v14977_v11 = vpop.f32.mrf.mxu1  ;;  %v15066_v0 = vpop.f32.mrf.mxu0  ;;  %v23890_v27 = vand.u32 4294901760, %v18867_v60  ;;  %v24593_v56 = vand.u32 4294901760, %v23826_v45 }
 0x68e   :  { %v14978_v42 = vadd.f32 %v14977_v11, %v14878_v48 }
 0x68f   :  { %18718 = vmatmul.mubr.f32.vlgmr.msra.gmra.mxu1 %v23515_v12  ;;  %18858 = vmatmul.mubr.f32.vlgmr.msra.gmra.mxu0 %v23874_v24  ;;  %v14979_v44 = vpop.f32.mrf.mxu1  ;;  %v15068_v37 = vpop.f32.mrf.mxu0  ;;  %v18769_v12 = vsel %vm8523_vm8, %v18759_v47, %v18761_v62 }
 0x690   :  { %18914 = vmatpush1.msra.mxu1 %v18913_v34  ;;  %19007 = vmatpush1.msra.mxu0 %v23826_v45  ;;  %v14980_v2 = vadd.f32 %v14979_v44, %v14880_v18  ;;  %v15067_v41 = vadd.f32 %v15066_v0, %v14978_v42  ;;  %v23899_v34 = vand.u32 4294901760, %v18769_v12 }
 0x691   :  { %18920 = vmatprep.subr.mxu1 %v18919_v33  ;;  %19010 = vmatprep.subr.mxu0 %v23831_v23  ;;  %v15144_v48 = vpop.f32.mrf.mxu1  ;;  %v15237_v22 = vpop.f32.mrf.mxu0 }
 0x692   :  { %18926 = vmatpush1.msra.mxu1 %v18925_v61  ;;  %19013 = vmatpush1.msra.mxu0 %v23837_v54  ;;  %v15069_v7 = vadd.f32 %v15068_v37, %v14980_v2  ;;  %v15145_v11 = vadd.f32 %v15144_v48, %v15059_v21  ;;  %v18749_v37 = vpop.permute.xlu0 %18748  ;;  %v18751_v21 = vpop.permute.xlu1 %18750  ;;  %v23912_v2 = vsub.f32 %v18769_v12, %v23899_v34 }
 0x693   :  { %18723 = vmatprep.mubr.f32.mxu1 %v24471_v49  ;;  %18863 = vmatprep.mubr.f32.mxu0 %v24471_v49  ;;  %v15146_v18 = vpop.f32.mrf.mxu1  ;;  %v15239_v44 = vpop.f32.mrf.mxu0 }
 0x694   :  { %19092 = vmatprep.subr.mxu1 %v23768_v1  ;;  %19181 = vmatprep.subr.mxu0 %v24592_v17  ;;  %v15147_v60 = vadd.f32 %v15146_v18, %v15061_v19  ;;  %v15238_v0 = vadd.f32 %v15237_v22, %v15145_v11  ;;  %v9956_v19 = vadd.f32 %v22631_v52, %v22598_v53 }
 0x695   :  { %18725 = vmatmul.mubr.f32.gmra.mxu1 %v23563_v29  ;;  %18869 = vmatmul.mubr.f32.gmra.mxu0 %v23890_v27  ;;  %v18764_v29 = vsel %vm8523_vm8, %v23776_v3, %v18749_v37  ;;  %v18765_v11 = vsel %vm8523_vm8, %v18749_v37, %v18751_v21  ;;  %v24594_v3 = vand.u32 4294901760, %v23831_v23  ;;  %v9963_v37 = vadd.f32 %v22656_v30, %v22615_v39 }
 0x696   :  { %18959 = vmatprep.mubr.f32.mxu1 %v24471_v49  ;;  %19046 = vmatprep.mubr.f32.mxu0 %v24471_v49  ;;  %v15240_v62 = vadd.f32 %v15239_v44, %v15147_v60  ;;  %v10044_v18 = vadd.f32 %v22636_v20, %v9956_v19  ;;  %v24595_v44 = vand.u32 4294901760, %v23837_v54  ;;  %v23931_v60 = vand.u32 4294901760, %v18765_v11 }
 0x697   :  { %v15153_v42 = vpop.f32.mrf.mxu1  ;;  %v15244_v33 = vpop.f32.mrf.mxu0  ;;  %v19445_v54 = vand.u32 4294901760, %v23912_v2 }
 0x698   :  { %v15154_v61 = vadd.f32 %v15153_v42, %v15067_v41  ;;  %v23920_v41 = vand.u32 4294901760, %v18768_v26  ;;  %v10130_v21 = vadd.f32 %v22665_v28, %v10044_v18  ;;  %v23954_v30 = vsub.f32 %v18765_v11, %v23931_v60 }
 0x699   :  { %18961 = vmatmul.mubr.f32.vlgmr.msra.gmra.mxu1 %v23784_v63  ;;  %19049 = vmatmul.mubr.f32.vlgmr.msra.gmra.mxu0 %v23810_v36  ;;  %v15155_v48 = vpop.f32.mrf.mxu1  ;;  %v15246_v22 = vpop.f32.mrf.mxu0  ;;  %v10052_v28 = vadd.f32 %v22658_v6, %v9963_v37  ;;  %v24597_v37 = vld [vmem:[#allocation36_spill] sm:$0xff] }
 0x69a   :  { %19094 = vmatpush1.msra.mxu1 %v23794_v32  ;;  %19185 = vmatpush1.msra.mxu0 %v24593_v56  ;;  %v15156_v53 = vadd.f32 %v15155_v48, %v15069_v7  ;;  %v15245_v52 = vadd.f32 %v15244_v33, %v15154_v61  ;;  %v23929_v7 = vand.u32 4294901760, %v18764_v29  ;;  %v23947_v39 = vsub.f32 %v18768_v26, %v23920_v41 }
 0x69b   :  { %19096 = vmatprep.subr.mxu1 %v23804_v35  ;;  %19189 = vmatprep.subr.mxu0 %v24594_v3  ;;  %v15320_v47 = vpop.f32.mrf.mxu1  ;;  %v15460_v12 = vpop.f32.mrf.mxu0  ;;  %v10223_v33 = vadd.f32 %v22667_v10, %v10130_v21  ;;  %v19446_v26 = vsub.f32 %v23912_v2, %v19445_v54  ;;  %v10139_v48 = vadd.f32 %v22686_v5, %v10052_v28  ;;  %v19457_v5 = vand.u32 4294901760, %v23954_v30  ;;  %v24598_v28 = vld [vmem:[#allocation13_spill] sm:$0xff] }
 0x69c   :  { %19098 = vmatpush1.msra.mxu1 %v23812_v16  ;;  %19193 = vmatpush1.msra.mxu0 %v24595_v44  ;;  %v15247_v45 = vadd.f32 %v15246_v22, %v15156_v53  ;;  %v15321_v17 = vadd.f32 %v15320_v47, %v15238_v0  ;;  %v19451_v61 = vand.u32 4294901760, %v23947_v39  ;;  %v12167_v47 = vadd.f32 %v23184_v50, %v23142_v58  ;;  %v24596_v50 = vld [vmem:[#allocation3_spill] sm:$0xff] }
 0x69d   :  { %18966 = vmatprep.mubr.f32.mxu1 %v24471_v49  ;;  %19054 = vmatprep.mubr.f32.mxu0 %v24471_v49  ;;  %v15322_v23 = vpop.f32.mrf.mxu1  ;;  %v15462_v20 = vpop.f32.mrf.mxu0  ;;  %v10230_v3 = vadd.f32 %v22688_v13, %v10139_v48  ;;  %v19458_v13 = vsub.f32 %v23954_v30, %v19457_v5 }
 0x69e   :  { %19270 = vmatprep.subr.mxu1 %v23768_v1  ;;  %19353 = vmatprep.subr.mxu0 %v23899_v34  ;;  %v23942_v0 = vadd.f32 %v15321_v17, %v23698_v9  ;;  %v23944_v42 = vadd.f32 %v15322_v23, %v15240_v62  ;;  %v23958_v62 = vsub.f32 %v18764_v29, %v23929_v7 }
 0x69f   :  { %18968 = vmatmul.mubr.f32.gmra.mxu1 %v23823_v8  ;;  %19057 = vmatmul.mubr.f32.gmra.mxu0 %v23845_v40  ;;  %v10306_v29 = vadd.f32 %v22720_v25, %v10223_v33  ;;  %v12255_v23 = vadd.f32 %v24597_v37, %v12167_v47 }
 0x6a0   :  { %19131 = vmatprep.mubr.f32.mxu1 %v24471_v49  ;;  %19226 = vmatprep.mubr.f32.mxu0 %v24471_v49 }
 0x6a1   :  { %v15327_v9 = vpop.f32.mrf.mxu1  ;;  %v15471_v1 = vpop.f32.mrf.mxu0  ;;  %v10939_v25 = vadd.f32 %v22867_v15, %v10306_v29  ;;  %v24601_v29 = vld [vmem:[#allocation43_spill] sm:$0xff] }
 0x6a2   :  { %v15328_v19 = vadd.f32 %v15327_v9, %v15245_v52  ;;  %v19463_v52 = vand.u32 4294901760, %v23958_v62 }
 0x6a3   :  { %19135 = vmatmul.mubr.f32.vlgmr.msra.gmra.mxu1 %v23834_v46  ;;  %19228 = vmatmul.mubr.f32.vlgmr.msra.gmra.mxu0 %v23784_v63  ;;  %v15329_v6 = vpop.f32.mrf.mxu1  ;;  %v15473_v22 = vpop.f32.mrf.mxu0 }
 0x6a4   :  { %19272 = vmatpush1.msra.mxu1 %v23794_v32  ;;  %19355 = vmatpush1.msra.mxu0 %v23920_v41  ;;  %v23972_v10 = vadd.f32 %v15328_v19, %v23726_v4  ;;  %v23974_v11 = vadd.f32 %v15329_v6, %v15247_v45  ;;  %v19447_v4 = vand.u32 4294901760, %v19446_v26  ;;  %v10313_v45 = vadd.f32 %v22759_v31, %v10230_v3  ;;  %v24599_v19 = vld [vmem:[#allocation16_spill] sm:$0xff]  ;;  %v24600_v6 = vld [vmem:[#allocation38_spill] sm:$0xff] }
 0x6a5   :  { %19274 = vmatprep.subr.mxu1 %v23804_v35  ;;  %19357 = vmatprep.subr.mxu0 %v23931_v60  ;;  %v15563_v56 = vpop.f32.mrf.mxu1  ;;  %v15651_v53 = vpop.f32.mrf.mxu0  ;;  %v19452_v35 = vsub.f32 %v23947_v39, %v19451_v61  ;;  %v19464_v58 = vsub.f32 %v23958_v62, %v19463_v52 }
 0x6a6   :  { %19276 = vmatpush1.msra.mxu1 %v23812_v16  ;;  %19359 = vmatpush1.msra.mxu0 %v23929_v7  ;;  %v15564_v32 = vadd.f32 %v15563_v56, %v15460_v12  ;;  %v11042_v16 = vadd.f32 %v22910_v57, %v10939_v25  ;;  %v13300_v57 = vadd.f32 %v23460_v14, %v23414_v51  ;;  %v24602_v14 = vld [vmem:[#allocation59_spill] sm:$0xff] }
 0x6a7   :  { %19140 = vmatprep.mubr.f32.mxu1 %v24471_v49  ;;  %19233 = vmatprep.mubr.f32.mxu0 %v24471_v49  ;;  %v15565_v15 = vpop.f32.mrf.mxu1  ;;  %v15653_v18 = vpop.f32.mrf.mxu0  ;;  %v10950_v17 = vadd.f32 %v24596_v50, %v10313_v45  ;;  %v19453_v33 = vand.u32 4294901760, %v19452_v35  ;;  %v12174_v51 = vadd.f32 %v24601_v29, %v24600_v6  ;;  %v12341_v56 = vadd.f32 %v24602_v14, %v12255_v23  ;;  %v24607_v50 = vld [vmem:[#allocation63_spill] sm:$0xff]  ;;  %v24609_v23 = vld [vmem:[#allocation40_spill] sm:$0xff] }
 0x6a8   :  { %19448 = vmatprep.subr.mxu1 %v19447_v4  ;;  %19544 = vmatprep.subr.mxu0 %v23912_v2  ;;  %v15566_v12 = vadd.f32 %v15565_v15, %v15462_v20  ;;  %v15652_v44 = vadd.f32 %v15651_v53, %v15564_v32  ;;  %v11130_v9 = vadd.f32 %v24598_v28, %v11042_v16  ;;  %v19459_v53 = vand.u32 4294901760, %v19458_v13  ;;  %v24603_v32 = vld [vmem:[#allocation60_spill] sm:$0xff]  ;;  %v24604_v15 = vld [vmem:[#allocation21_spill] sm:$0xff] }
 0x6a9   :  { %19144 = vmatmul.mubr.f32.gmra.mxu1 %v23866_v43  ;;  %19235 = vmatmul.mubr.f32.gmra.mxu0 %v23823_v8  ;;  %v11049_v48 = vadd.f32 %v24599_v19, %v10950_v17  ;;  %v13388_v3 = vadd.f32 %v24603_v32, %v13300_v57  ;;  %v24605_v16 = vld [vmem:[#allocation29_spill] sm:$0xff] }
 0x6aa   :  { %19309 = vmatprep.mubr.f32.mxu1 %v24471_v49  ;;  %19392 = vmatprep.mubr.f32.mxu0 %v24471_v49  ;;  %v15654_v31 = vadd.f32 %v15653_v18, %v15566_v12  ;;  %v11216_v18 = vadd.f32 %v24604_v15, %v11130_v9  ;;  %v24606_v12 = vld [vmem:[#allocation61_spill] sm:$0xff]  ;;  %v24610_v9 = vld [vmem:[#allocation42_spill] sm:$0xff] }
 0x6ab   :  { %v15570_v20 = vpop.f32.mrf.mxu1  ;;  %v15659_v21 = vpop.f32.mrf.mxu0  ;;  %v13307_v45 = vadd.f32 %v24606_v12, %v24605_v16  ;;  %v13474_v17 = vadd.f32 %v24607_v50, %v13388_v3  ;;  %v24617_v32 = vld [vmem:[#allocation65_spill] sm:$0xff]  ;;  %v24618_v15 = vld [vmem:[#allocation6_spill] sm:$0xff]  ;;  %v24619_v16 = vld [vmem:[#allocation67_spill] sm:$0xff] }
 0x6ac   :  { %v15571_v26 = vadd.f32 %v15570_v20, %v15471_v1  ;;  %v19465_v1 = vand.u32 4294901760, %v19464_v58  ;;  %v24608_v58 = vld [vmem:[#allocation17_spill] sm:$0xff]  ;;  %v12263_v20 = vadd.f32 %v24609_v23, %v12174_v51  ;;  %v24613_v51 = vld [vmem:[#allocation62_spill] sm:$0xff]  ;;  %v24622_v50 = vld [vmem:[#allocation47_spill] sm:$0xff] }
 0x6ad   :  { %19311 = vmatmul.mubr.f32.vlgmr.msra.gmra.mxu1 %v23784_v63  ;;  %19398 = vmatmul.mubr.f32.vlgmr.msra.gmra.mxu0 %v23874_v24  ;;  %v15572_v25 = vpop.f32.mrf.mxu1  ;;  %v15661_v4 = vpop.f32.mrf.mxu0  ;;  %v13396_v14 = vadd.f32 %v24613_v51, %v13307_v45  ;;  %v24620_v45 = vld [vmem:[#allocation7_spill] sm:$0xff] }
 0x6ae   :  { %19454 = vmatpush1.msra.mxu1 %v19453_v33  ;;  %19547 = vmatpush1.msra.mxu0 %v23947_v39  ;;  %v15573_v35 = vadd.f32 %v15572_v25, %v15473_v22  ;;  %v15660_v47 = vadd.f32 %v15659_v21, %v15571_v26  ;;  %v11138_v22 = vadd.f32 %v24608_v58, %v11049_v48  ;;  %v24612_v48 = vld [vmem:[#allocation45_spill] sm:$0xff] }
 0x6af   :  { %19460 = vmatprep.subr.mxu1 %v19459_v53  ;;  %19550 = vmatprep.subr.mxu0 %v23954_v30  ;;  %v15737_v24 = vpop.f32.mrf.mxu1  ;;  %v15830_v13 = vpop.f32.mrf.mxu0  ;;  %v12434_v33 = vadd.f32 %v24610_v9, %v12341_v56  ;;  %v12350_v29 = vadd.f32 %v24612_v48, %v12263_v20  ;;  %v24614_v53 = vld [vmem:[#allocation44_spill] sm:$0xff]  ;;  %v13483_v3 = vadd.f32 %v24617_v32, %v13396_v14  ;;  %v24628_v14 = vld [vmem:[#allocation69_spill] sm:$0xff] }
 0x6b0   :  { %19466 = vmatpush1.msra.mxu1 %v19465_v1  ;;  %19553 = vmatpush1.msra.mxu0 %v23958_v62  ;;  %v15662_v57 = vadd.f32 %v15661_v4, %v15573_v35  ;;  %v15738_v37 = vadd.f32 %v15737_v24, %v15652_v44  ;;  %v24611_v44 = vld [vmem:[#allocation22_spill] sm:$0xff]  ;;  %v24615_v56 = vld [vmem:[#allocation64_spill] sm:$0xff] }
 0x6b1   :  { %19316 = vmatprep.mubr.f32.mxu1 %v24471_v49  ;;  %19403 = vmatprep.mubr.f32.mxu0 %v24471_v49  ;;  %v15739_v21 = vpop.f32.mrf.mxu1  ;;  %v15832_v28 = vpop.f32.mrf.mxu0  ;;  %v11309_v6 = vadd.f32 %v24611_v44, %v11216_v18  ;;  %v12517_v25 = vadd.f32 %v24614_v53, %v12434_v33  ;;  %v13567_v4 = vadd.f32 %v24615_v56, %v13474_v17  ;;  %v24621_v24 = vld [vmem:[#allocation18_spill] sm:$0xff]  ;;  %v24630_v56 = vld [vmem:[#allocation8_spill] sm:$0xff] }
 0x6b2   :  { %19632 = vmatprep.subr.mxu1 %v23899_v34  ;;  %19721 = vmatprep.subr.mxu0 %v19445_v54  ;;  %v15740_v26 = vadd.f32 %v15739_v21, %v15654_v31  ;;  %v15831_v19 = vadd.f32 %v15830_v13, %v15738_v37  ;;  %v24616_v54 = vld [vmem:[#allocation4_spill] sm:$0xff]  ;;  %v10496_v13 = vadd.f32 %v24621_v24, %v24620_v45  ;;  %v24625_v33 = vld [vmem:[#allocation66_spill] sm:$0xff] }
 0x6b3   :  { %19318 = vmatmul.mubr.f32.gmra.mxu1 %v23823_v8  ;;  %19409 = vmatmul.mubr.f32.gmra.mxu0 %v23890_v27  ;;  %v11225_v31 = vadd.f32 %v24616_v54, %v11138_v22  ;;  %v11392_v18 = vadd.f32 %v24618_v15, %v11309_v6  ;;  %v13650_v12 = vadd.f32 %v24619_v16, %v13567_v4  ;;  %v24631_v54 = vld [vmem:[#allocation11_spill] sm:$0xff]  ;;  %v24633_v15 = vld [vmem:[#allocation14_spill] sm:$0xff]  ;;  %v24635_v24 = vld [vmem:[#allocation12_spill] sm:$0xff] }
 0x6b4   :  { %19499 = vmatprep.mubr.f32.mxu1 %v24471_v49  ;;  %19586 = vmatprep.mubr.f32.mxu0 %v24471_v49  ;;  %v15833_v2 = vadd.f32 %v15832_v28, %v15740_v26  ;;  %v12441_v17 = vadd.f32 %v24622_v50, %v12350_v29  ;;  %v24624_v28 = vld [vmem:[#allocation46_spill] sm:$0xff]  ;;  %v13574_v26 = vadd.f32 %v24625_v33, %v13483_v3  ;;  %v24627_v29 = vld [vmem:[#allocation23_spill] sm:$0xff] }
 0x6b5   :  { %v15746_v1 = vpop.f32.mrf.mxu1  ;;  %v15837_v35 = vpop.f32.mrf.mxu0  ;;  %v13067_v22 = vadd.f32 %v12517_v25, %v11392_v18  ;;  %v24636_v50 = vld [vmem:[#allocation19_spill] sm:$0xff] }
 0x6b6   :  { %v15747_v27 = vadd.f32 %v15746_v1, %v15660_v47  ;;  %v24623_v47 = vld [vmem:[#allocation5_spill] sm:$0xff]  ;;  %v12524_v9 = vadd.f32 %v24624_v28, %v12441_v17  ;;  %v13657_v53 = vadd.f32 %v24628_v14, %v13574_v26  ;;  %v24640_v33 = vld [vmem:[#allocation15_spill] sm:$0xff]  ;;  %v24645_v14 = vld [vmem:[#allocation50_spill] sm:$0xff] }
 0x6b7   :  { %19501 = vmatmul.mubr.f32.vlgmr.msra.gmra.mxu1 %v23784_v63  ;;  %19589 = vmatmul.mubr.f32.vlgmr.msra.gmra.mxu0 %v23810_v36  ;;  %v15748_v37 = vpop.f32.mrf.mxu1  ;;  %v15839_v58 = vpop.f32.mrf.mxu0  ;;  %v11316_v21 = vadd.f32 %v24623_v47, %v11225_v31  ;;  %v14200_v6 = vadd.f32 %v13650_v12, %v13067_v22  ;;  %v24638_v47 = vld [vmem:[#allocation49_spill] sm:$0xff] }
 0x6b8   :  { %19634 = vmatpush1.msra.mxu1 %v23920_v41  ;;  %19725 = vmatpush1.msra.mxu0 %v19451_v61  ;;  %v15749_v23 = vadd.f32 %v15748_v37, %v15662_v57  ;;  %v15838_v20 = vadd.f32 %v15837_v35, %v15747_v27  ;;  %v24626_v57 = vld [vmem:[#allocation20_spill] sm:$0xff]  ;;  %v24634_v27 = vld [vmem:[#allocation81_spill] sm:$0xff] }
 0x6b9   :  { %19636 = vmatprep.subr.mxu1 %v23931_v60  ;;  %19729 = vmatprep.subr.mxu0 %v19457_v5  ;;  %v15913_v36 = vpop.f32.mrf.mxu1  ;;  %v16000_v44 = vpop.f32.mrf.mxu0  ;;  %v10584_v48 = vadd.f32 %v24626_v57, %v10496_v13  ;;  %v11399_v51 = vadd.f32 %v24627_v29, %v11316_v21  ;;  %v15333_v25 = vadd.f32 %v23819_v59, %v14200_v6  ;;  %v24639_v21 = vld [vmem:[#allocation48_spill] sm:$0xff]  ;;  %v24644_v57 = vld [vmem:[#allocation30_spill] sm:$0xff] }
 0x6ba   :  { %19638 = vmatpush1.msra.mxu1 %v23929_v7  ;;  %19733 = vmatpush1.msra.mxu0 %v19463_v52  ;;  %v15840_v39 = vadd.f32 %v15839_v58, %v15749_v23  ;;  %v15914_v61 = vadd.f32 %v15913_v36, %v15831_v19  ;;  %v24629_v19 = vld [vmem:[#allocation10_spill] sm:$0xff]  ;;  %v24637_v58 = vld [vmem:[#allocation24_spill] sm:$0xff]  ;;  %v24641_v36 = vld [vmem:[#allocation39_spill] sm:$0xff] }
 0x6bb   :  { %19506 = vmatprep.mubr.f32.mxu1 %v24471_v49  ;;  %19810 = vmatprep.subr.mxu1 %v23899_v34  ;;  %v15915_v30 = vpop.f32.mrf.mxu1  ;;  %v16002_v5 = vpop.f32.mrf.mxu0  ;;  %v10503_v4 = vadd.f32 %v24630_v56, %v24629_v19  ;;  %v10670_v31 = vadd.f32 %v24631_v54, %v10584_v48  ;;  %v13071_v34 = vadd.f32 %v12524_v9, %v11399_v51  ;;  %v24642_v6 = vld [vmem:[#allocation68_spill] sm:$0xff]  ;;  %v24648_v56 = vld [vmem:[#allocation51_spill] sm:$0xff] }
 0x6bc   :  { %19508 = vmatmul.mubr.f32.gmra.mxu1 %v23823_v8  ;;  %19594 = vmatprep.mubr.f32.mxu0 %v24471_v49  ;;  %v24070_v62 = vadd.f32 %v15914_v61, %v23817_v55  ;;  %v15916_v52 = vadd.f32 %v15915_v30, %v15833_v2  ;;  %v24632_v2 = vld [vmem:[#allocation9_spill] sm:$0xff] }
 0x6bd   :  { %19597 = vmatmul.mubr.f32.gmra.mxu0 %v23845_v40  ;;  %19671 = vmatprep.mubr.f32.mxu1 %v24471_v49  ;;  %v14204_v1 = vadd.f32 %v13657_v53, %v13071_v34  ;;  %v10592_v35 = vadd.f32 %v24632_v2, %v10503_v4  ;;  %v10763_v18 = vadd.f32 %v24633_v15, %v10670_v31  ;;  %v24649_v4 = vld [vmem:[#allocation53_spill] sm:$0xff] }
 0x6be   :  { %19766 = vmatprep.mubr.f32.mxu0 %v24471_v49  ;;  %v24078_v59 = vadd.f32 %v15916_v52, %v15333_v25  ;;  %v24647_v52 = vld [vmem:[#allocation56_spill] sm:$0xff]  ;;  %v12714_v54 = vadd.f32 %v24649_v4, %v24648_v56  ;;  %v24669_v56 = vld [vmem:[#allocation27_spill] sm:$0xff] }
 0x6bf   :  { %v15920_v32 = vpop.f32.mrf.mxu1  ;;  %v16011_v3 = vpop.f32.mrf.mxu0  ;;  %v15337_v12 = vadd.f32 %v23853_v38, %v14204_v1  ;;  %v10679_v13 = vadd.f32 %v24635_v24, %v10592_v35  ;;  %v10846_v17 = vadd.f32 %v24636_v50, %v10763_v18  ;;  %v24651_v1 = vld [vmem:[#allocation72_spill] sm:$0xff]  ;;  %v24652_v35 = vld [vmem:[#allocation25_spill] sm:$0xff] }
 0x6c0   :  { %19675 = vmatmul.mubr.f32.vlgmr.msra.gmra.mxu1 %v23834_v46  ;;  %v15921_v55 = vadd.f32 %v15920_v32, %v15838_v20 }
 0x6c1   :  { %19812 = vmatpush1.msra.mxu1 %v23920_v41  ;;  %19768 = vmatmul.mubr.f32.vlgmr.msra.gmra.mxu0 %v23784_v63  ;;  %v15922_v40 = vpop.f32.mrf.mxu1  ;;  %v16013_v16 = vpop.f32.mrf.mxu0  ;;  %v11479_v22 = vadd.f32 %v24637_v58, %v10846_v17  ;;  %v10770_v26 = vadd.f32 %v24640_v33, %v10679_v13  ;;  %v24656_v13 = vld [vmem:[#allocation75_spill] sm:$0xff]  ;;  %v24661_v33 = vld [vmem:[#allocation33_spill] sm:$0xff] }
 0x6c2   :  { %19814 = vmatprep.subr.mxu1 %v23931_v60  ;;  %19680 = vmatprep.mubr.f32.mxu1 %v24471_v49  ;;  %v24089_v45 = vadd.f32 %v15921_v55, %v24634_v27  ;;  %v15923_v46 = vadd.f32 %v15922_v40, %v15840_v39  ;;  %v24643_v39 = vld [vmem:[#allocation71_spill] sm:$0xff]  ;;  %v24654_v27 = vld [vmem:[#allocation70_spill] sm:$0xff] }
 0x6c3   :  { %19816 = vmatpush1.msra.mxu1 %v23929_v7  ;;  %19773 = vmatprep.mubr.f32.mxu0 %v24471_v49  ;;  %v16103_v41 = vpop.f32.mrf.mxu1  ;;  %v16191_v37 = vpop.f32.mrf.mxu0  ;;  %v12707_v7 = vadd.f32 %v24639_v21, %v24638_v47  ;;  %v10853_v48 = vadd.f32 %v24644_v57, %v10770_v26  ;;  %v24659_v47 = vld [vmem:[#allocation26_spill] sm:$0xff] }
 0x6c4   :  { %19684 = vmatmul.mubr.f32.gmra.mxu1 %v23866_v43  ;;  %v24096_v38 = vadd.f32 %v15923_v46, %v15337_v12  ;;  %v16104_v60 = vadd.f32 %v16103_v41, %v16000_v44  ;;  %v11582_v43 = vadd.f32 %v24641_v36, %v11479_v22  ;;  %v13840_v44 = vadd.f32 %v24643_v39, %v24642_v6  ;;  %v24655_v46 = vld [vmem:[#allocation73_spill] sm:$0xff]  ;;  %v24663_v6 = vld [vmem:[#allocation74_spill] sm:$0xff] }
 0x6c5   :  { %19775 = vmatmul.mubr.f32.gmra.mxu0 %v23823_v8  ;;  %19849 = vmatprep.mubr.f32.mxu1 %v24471_v49  ;;  %v16105_v23 = vpop.f32.mrf.mxu1  ;;  %v16193_v20 = vpop.f32.mrf.mxu0  ;;  %v12795_v53 = vadd.f32 %v24645_v14, %v12707_v7  ;;  %v13847_v24 = vadd.f32 %v24655_v46, %v24654_v27  ;;  %v24660_v7 = vld [vmem:[#allocation34_spill] sm:$0xff]  ;;  %v24662_v36 = vld [vmem:[#allocation57_spill] sm:$0xff] }
 0x6c6   :  { %v16106_v28 = vadd.f32 %v16105_v23, %v16002_v5  ;;  %v16192_v9 = vadd.f32 %v16191_v37, %v16104_v60  ;;  %v24646_v5 = vld [vmem:[#allocation31_spill] sm:$0xff]  ;;  %v11670_v19 = vadd.f32 %v24647_v52, %v11582_v43  ;;  %v13928_v55 = vadd.f32 %v24651_v1, %v13840_v44  ;;  %v24657_v37 = vld [vmem:[#allocation54_spill] sm:$0xff]  ;;  %v24664_v44 = vld [vmem:[#allocation76_spill] sm:$0xff] }
 0x6c7   :  { %v11490_v25 = vadd.f32 %v24646_v5, %v10853_v48  ;;  %v12803_v60 = vadd.f32 %v24657_v37, %v12714_v54  ;;  %v13936_v39 = vadd.f32 %v24663_v6, %v13847_v24  ;;  %v24665_v48 = vld [vmem:[#allocation41_spill] sm:$0xff]  ;;  %v24670_v1 = vld [vmem:[#allocation35_spill] sm:$0xff]  ;;  %v24673_v24 = vld [vmem:[#allocation28_spill] sm:$0xff] }
 0x6c8   :  { %19851 = vmatmul.mubr.f32.vlgmr.msra.gmra.mxu1 %v23784_v63  ;;  %v16194_v61 = vadd.f32 %v16193_v20, %v16106_v28  ;;  %v24650_v63 = vld [vmem:[#allocation52_spill] sm:$0xff]  ;;  %v14014_v50 = vadd.f32 %v24656_v13, %v13928_v55 }
 0x6c9   :  { %19856 = vmatprep.mubr.f32.mxu1 %v24471_v49  ;;  %v16110_v29 = vpop.f32.mrf.mxu1  ;;  %v16199_v51 = vpop.f32.mrf.mxu0  ;;  %v12881_v32 = vadd.f32 %v24650_v63, %v12795_v53  ;;  %v11589_v15 = vadd.f32 %v24652_v35, %v11490_v25  ;;  %v12890_v26 = vadd.f32 %v24661_v33, %v12803_v60  ;;  %v24666_v53 = vld [vmem:[#allocation58_spill] sm:$0xff]  ;;  %v24668_v25 = vld [vmem:[#allocation79_spill] sm:$0xff] }
 0x6ca   :  { %v16111_v30 = vadd.f32 %v16110_v29, %v16011_v3  ;;  %v24653_v3 = vld [vmem:[#allocation32_spill] sm:$0xff] }
 0x6cb   :  { %v16112_v31 = vpop.f32.mrf.mxu1  ;;  %v16201_v34 = vpop.f32.mrf.mxu0  ;;  %v11756_v18 = vadd.f32 %v24653_v3, %v11670_v19  ;;  %v11678_v21 = vadd.f32 %v24659_v47, %v11589_v15  ;;  %v12981_v4 = vadd.f32 %v24669_v56, %v12890_v26 }
 0x6cc   :  { %19858 = vmatmul.mubr.f32.gmra.mxu1 %v23823_v8  ;;  %v16113_v49 = vadd.f32 %v16112_v31, %v16013_v16  ;;  %v16200_v2 = vadd.f32 %v16199_v51, %v16111_v30  ;;  %v24658_v8 = vld [vmem:[#allocation55_spill] sm:$0xff]  ;;  %v24667_v30 = vld [vmem:[#allocation77_spill] sm:$0xff] }
 0x6cd   :  { %v16277_v40 = vpop.f32.mrf.mxu1  ;;  %v16370_v12 = vpop.f32.mrf.mxu0  ;;  %v12974_v16 = vadd.f32 %v24658_v8, %v12881_v32  ;;  %v11849_v28 = vadd.f32 %v24660_v7, %v11756_v18  ;;  %v11765_v29 = vadd.f32 %v24665_v48, %v11678_v21  ;;  %v14023_v5 = vadd.f32 %v24667_v30, %v13936_v39  ;;  %v24672_v18 = vld [vmem:[#allocation78_spill] sm:$0xff] }
 0x6ce   :  { %v16202_v17 = vadd.f32 %v16201_v34, %v16113_v49  ;;  %v16278_v41 = vadd.f32 %v16277_v40, %v16192_v9  ;;  %v14107_v9 = vadd.f32 %v24664_v44, %v14014_v50  ;;  %v24671_v49 = vld [vmem:[#allocation37_spill] sm:$0xff] }
 0x6cf   :  { %v16279_v58 = vpop.f32.mrf.mxu1  ;;  %v16372_v22 = vpop.f32.mrf.mxu0  ;;  %v13057_v43 = vadd.f32 %v24662_v36, %v12974_v16  ;;  %v11856_v55 = vadd.f32 %v24670_v1, %v11765_v29  ;;  %v13064_v35 = vadd.f32 %v24671_v49, %v12981_v4  ;;  %v14114_v40 = vadd.f32 %v24672_v18, %v14023_v5 }
 0x6d0   :  { %v16280_v23 = vadd.f32 %v16279_v58, %v16194_v61  ;;  %v16371_v20 = vadd.f32 %v16370_v12, %v16278_v41  ;;  %v11932_v61 = vadd.f32 %v24666_v53, %v11849_v28  ;;  %v14190_v52 = vadd.f32 %v24668_v25, %v14107_v9  ;;  %v24674_v41 = vld [vmem:[#allocation80_spill] sm:$0xff] }
 0x6d1   :  { %v14197_v37 = vadd.f32 %v24674_v41, %v14114_v40 }
 0x6d2   :  { %v16373_v57 = vadd.f32 %v16372_v22, %v16280_v23  ;;  %v13069_v34 = vadd.f32 %v13057_v43, %v11932_v61 }
 0x6d3   :  { %v16286_v51 = vpop.f32.mrf.mxu1  ;;  %v16377_v14 = vpop.f32.mrf.mxu0 }
 0x6d4   :  { %v16287_v19 = vadd.f32 %v16286_v51, %v16200_v2  ;;  %v14202_v12 = vadd.f32 %v14190_v52, %v13069_v34  ;;  %v11939_v2 = vadd.f32 %v24673_v24, %v11856_v55 }
 0x6d5   :  { %v16288_v54 = vpop.f32.mrf.mxu1  ;;  %v16379_v31 = vpop.f32.mrf.mxu0 }
 0x6d6   :  { %v16289_v63 = vadd.f32 %v16288_v54, %v16202_v17  ;;  %v16378_v32 = vadd.f32 %v16377_v14, %v16287_v19  ;;  %v15335_v17 = vadd.f32 %v23944_v42, %v14202_v12  ;;  %v13073_v22 = vadd.f32 %v13064_v35, %v11939_v2 }
 0x6d7   :  { %v16453_v15 = vpop.f32.mrf.mxu1  ;;  %v16593_v3 = vpop.f32.mrf.mxu0 }
 0x6d8   :  { %v16380_v27 = vadd.f32 %v16379_v31, %v16289_v63  ;;  %v16454_v46 = vadd.f32 %v16453_v15, %v16371_v20  ;;  %v14206_v47 = vadd.f32 %v14197_v37, %v13073_v22 }
 0x6d9   :  { %v16455_v13 = vpop.f32.mrf.mxu1  ;;  %v16595_v50 = vpop.f32.mrf.mxu0 }
 0x6da   :  { %v24143_v60 = vadd.f32 %v16454_v46, %v23942_v0  ;;  %v16456_v58 = vadd.f32 %v16455_v13, %v16373_v57  ;;  %v15339_v28 = vadd.f32 %v23974_v11, %v14206_v47 }
 0x6dc   :  { %v24145_v8 = vadd.f32 %v16456_v58, %v15335_v17 }
 0x6dd   :  { %v16460_v16 = vpop.f32.mrf.mxu1  ;;  %v16604_v23 = vpop.f32.mrf.mxu0 }
 0x6de   :  { %v16461_v21 = vadd.f32 %v16460_v16, %v16378_v32 }
 0x6df   :  { %v16462_v20 = vpop.f32.mrf.mxu1  ;;  %v16606_v7 = vpop.f32.mrf.mxu0 }
 0x6e0   :  { %v24149_v33 = vadd.f32 %v16461_v21, %v23972_v10  ;;  %v16463_v26 = vadd.f32 %v16462_v20, %v16380_v27 }
 0x6e1   :  { %v16696_v42 = vpop.f32.mrf.mxu1  ;;  %v16784_v36 = vpop.f32.mrf.mxu0 }
 0x6e2   :  { %v24151_v0 = vadd.f32 %v16463_v26, %v15339_v28  ;;  %v16697_v43 = vadd.f32 %v16696_v42, %v16593_v3 }
 0x6e3   :  { %v16698_v6 = vpop.f32.mrf.mxu1  ;;  %v16786_v39 = vpop.f32.mrf.mxu0 }
 0x6e4   :  { %v16699_v44 = vadd.f32 %v16698_v6, %v16595_v50  ;;  %v16785_v9 = vadd.f32 %v16784_v36, %v16697_v43 }
 0x6e6   :  { %v16787_v57 = vadd.f32 %v16786_v39, %v16699_v44 }
 0x6e7   :  { %v16703_v48 = vpop.f32.mrf.mxu1  ;;  %v16792_v29 = vpop.f32.mrf.mxu0 }
 0x6e8   :  { %v16704_v51 = vadd.f32 %v16703_v48, %v16604_v23 }
 0x6e9   :  { %v16705_v14 = vpop.f32.mrf.mxu1  ;;  %v16794_v53 = vpop.f32.mrf.mxu0 }
 0x6ea   :  { %v16706_v11 = vadd.f32 %v16705_v14, %v16606_v7  ;;  %v16793_v61 = vadd.f32 %v16792_v29, %v16704_v51 }
 0x6eb   :  { %v16870_v10 = vpop.f32.mrf.mxu1  ;;  %v16963_v30 = vpop.f32.mrf.mxu0 }
 0x6ec   :  { %v16795_v5 = vadd.f32 %v16794_v53, %v16706_v11  ;;  %v16871_v25 = vadd.f32 %v16870_v10, %v16785_v9 }
 0x6ed   :  { %v16872_v52 = vpop.f32.mrf.mxu1  ;;  %v16965_v19 = vpop.f32.mrf.mxu0 }
 0x6ee   :  { %v16873_v56 = vadd.f32 %v16872_v52, %v16787_v57  ;;  %v16964_v4 = vadd.f32 %v16963_v30, %v16871_v25 }
 0x6f0   :  { %v16966_v54 = vadd.f32 %v16965_v19, %v16873_v56 }
 0x6f1   :  { %v16879_v31 = vpop.f32.mrf.mxu1  ;;  %v16970_v34 = vpop.f32.mrf.mxu0 }
 0x6f2   :  { %v16880_v63 = vadd.f32 %v16879_v31, %v16793_v61 }
 0x6f3   :  { %v16881_v32 = vpop.f32.mrf.mxu1  ;;  %v16972_v1 = vpop.f32.mrf.mxu0 }
 0x6f4   :  { %v16882_v55 = vadd.f32 %v16881_v32, %v16795_v5  ;;  %v16971_v49 = vadd.f32 %v16970_v34, %v16880_v63 }
 0x6f5   :  { %v17046_v35 = vpop.f32.mrf.mxu1  ;;  %v17133_v15 = vpop.f32.mrf.mxu0 }
 0x6f6   :  { %v16973_v3 = vadd.f32 %v16972_v1, %v16882_v55  ;;  %v17047_v18 = vadd.f32 %v17046_v35, %v16964_v4 }
 0x6f7   :  { %v17048_v40 = vpop.f32.mrf.mxu1  ;;  %v17135_v12 = vpop.f32.mrf.mxu0 }
 0x6f8   :  { %v24154_v27 = vadd.f32 %v17047_v18, %v24070_v62  ;;  %v17049_v46 = vadd.f32 %v17048_v40, %v16966_v54 }
 0x6fa   :  { %v24157_v24 = vadd.f32 %v17049_v46, %v24078_v59 }
 0x6fb   :  { %v17053_v2 = vpop.f32.mrf.mxu1  ;;  %v17144_v13 = vpop.f32.mrf.mxu0 }
 0x6fc   :  { %v17054_v50 = vadd.f32 %v17053_v2, %v16971_v49 }
 0x6fd   :  { %v17055_v41 = vpop.f32.mrf.mxu1  ;;  %v17146_v37 = vpop.f32.mrf.mxu0 }
 0x6fe   :  { %v24160_v17 = vadd.f32 %v17054_v50, %v24089_v45  ;;  %v17056_v58 = vadd.f32 %v17055_v41, %v16973_v3 }
 0x6ff   :  { %v17236_v22 = vpop.f32.mrf.mxu1  ;;  %v17324_v16 = vpop.f32.mrf.mxu0 }
 0x700   :  { %v24163_v23 = vadd.f32 %v17056_v58, %v24096_v38  ;;  %v17237_v62 = vadd.f32 %v17236_v22, %v17133_v15 }
 0x701   :  { %v17238_v47 = vpop.f32.mrf.mxu1  ;;  %v17326_v21 = vpop.f32.mrf.mxu0 }
 0x702   :  { %v17239_v20 = vadd.f32 %v17238_v47, %v17135_v12  ;;  %v17325_v59 = vadd.f32 %v17324_v16, %v17237_v62 }
 0x704   :  { %v17327_v7 = vadd.f32 %v17326_v21, %v17239_v20 }
 0x705   :  { %v17243_v28 = vpop.f32.mrf.mxu1  ;;  %v17332_v26 = vpop.f32.mrf.mxu0 }
 0x706   :  { %v17244_v42 = vadd.f32 %v17243_v28, %v17144_v13 }
 0x707   :  { %v17245_v36 = vpop.f32.mrf.mxu1  ;;  %v17334_v43 = vpop.f32.mrf.mxu0 }
 0x708   :  { %v17246_v6 = vadd.f32 %v17245_v36, %v17146_v37  ;;  %v17333_v45 = vadd.f32 %v17332_v26, %v17244_v42 }
 0x709   :  { %v17410_v39 = vpop.f32.mrf.mxu1  ;;  %v17503_v44 = vpop.f32.mrf.mxu0 }
 0x70a   :  { %v17335_v9 = vadd.f32 %v17334_v43, %v17246_v6  ;;  %v17411_v57 = vadd.f32 %v17410_v39, %v17325_v59 }
 0x70b   :  { %v17412_v48 = vpop.f32.mrf.mxu1  ;;  %v17505_v38 = vpop.f32.mrf.mxu0 }
 0x70c   :  { %v17413_v29 = vadd.f32 %v17412_v48, %v17327_v7  ;;  %v17504_v51 = vadd.f32 %v17503_v44, %v17411_v57 }
 0x70e   :  { %v17506_v14 = vadd.f32 %v17505_v38, %v17413_v29 }
 0x70f   :  { %v17419_v53 = vpop.f32.mrf.mxu1  ;;  %v17510_v11 = vpop.f32.mrf.mxu0 }
 0x710   :  { %v17420_v61 = vadd.f32 %v17419_v53, %v17333_v45 }
 0x711   :  { %v17421_v10 = vpop.f32.mrf.mxu1  ;;  %v17512_v30 = vpop.f32.mrf.mxu0 }
 0x712   :  { %v17422_v5 = vadd.f32 %v17421_v10, %v17335_v9  ;;  %v17511_v25 = vadd.f32 %v17510_v11, %v17420_v61 }
 0x713   :  { %v17586_v52 = vpop.f32.mrf.mxu1  ;;  %v24165_v19 = vpop.f32.mrf.mxu0 }
 0x714   :  { %v17513_v56 = vadd.f32 %v17512_v30, %v17422_v5  ;;  %v17587_v4 = vadd.f32 %v17586_v52, %v17504_v51 }
 0x715   :  { %v17588_v54 = vpop.f32.mrf.mxu1  ;;  %v24167_v31 = vpop.f32.mrf.mxu0 }
 0x716   :  { %v24170_v34 = vadd.f32 %v17587_v4, %v24143_v60  ;;  %v17589_v63 = vadd.f32 %v17588_v54, %v17506_v14 }
 0x718   :  { %24675 = vst [vmem:[#allocation3_spill] sm:$0xff] %v24170_v34  ;;  %v24173_v32 = vadd.f32 %v17589_v63, %v24145_v8 }
 0x719   :  { %v17593_v1 = vpop.f32.mrf.mxu1  ;;  %v24175_v55 = vpop.f32.mrf.mxu0 }
 0x71a   :  { %24676 = vst [vmem:[#allocation36_spill] sm:$0xff] %v24173_v32  ;;  %v17594_v49 = vadd.f32 %v17593_v1, %v17511_v25 }
 0x71b   :  { %v17595_v35 = vpop.f32.mrf.mxu1  ;;  %v24177_v15 = vpop.f32.mrf.mxu0 }
 0x71c   :  { %v24180_v3 = vadd.f32 %v17594_v49, %v24149_v33  ;;  %v17596_v18 = vadd.f32 %v17595_v35, %v17513_v56 }
 0x71d   :  { %v17829_v40 = vpop.f32.mrf.mxu1  ;;  %v17917_v12 = vpop.f32.mrf.mxu0 }
 0x71e   :  { %24677 = vst [vmem:[#allocation13_spill] sm:$0xff] %v24180_v3  ;;  %v24183_v60 = vadd.f32 %v17596_v18, %v24151_v0 }
 0x71f   :  { %v17831_v46 = vpop.f32.mrf.mxu1  ;;  %v17919_v2 = vpop.f32.mrf.mxu0 }
 0x720   :  { %24678 = vst [vmem:[#allocation16_spill] sm:$0xff] %v24183_v60  ;;  %v17830_v60 = vadd.f32 %v17829_v40, %v24165_v19  ;;  %v17832_v3 = vadd.f32 %v17831_v46, %v24167_v31 }
 0x723   :  { %v17836_v8 = vpop.f32.mrf.mxu1  ;;  %v24185_v13 = vpop.f32.mrf.mxu0 }
 0x725   :  { %v17838_v50 = vpop.f32.mrf.mxu1  ;;  %v24187_v41 = vpop.f32.mrf.mxu0 }
 0x727   :  { %v18003_v37 = vpop.f32.mrf.mxu1  ;;  %v24189_v58 = vpop.f32.mrf.mxu0 }
 0x729   :  { %v18005_v22 = vpop.f32.mrf.mxu1  ;;  %v24191_v33 = vpop.f32.mrf.mxu0 }
 0x72d   :  { %v24193_v16 = vpop.f32.mrf.mxu1  ;;  %v24195_v62 = vpop.f32.mrf.mxu0 }
 0x72f   :  { %v24197_v0 = vpop.f32.mrf.mxu1  ;;  %v24199_v47 = vpop.f32.mrf.mxu0 }
 0x731   :  { %v24201_v21 = vpop.f32.mrf.mxu1  ;;  %v24203_v20 = vpop.f32.mrf.mxu0 }
 0x733   :  { %v24205_v59 = vpop.f32.mrf.mxu1  ;;  %v24207_v7 = vpop.f32.mrf.mxu0 }
 0x737   :  { %v24209_v28 = vpop.f32.mrf.mxu1  ;;  %v24211_v26 = vpop.f32.mrf.mxu0 }
 0x739   :  { %v24213_v42 = vpop.f32.mrf.mxu1  ;;  %v24215_v36 = vpop.f32.mrf.mxu0 }
 0x73b   :  { %v24217_v43 = vpop.f32.mrf.mxu1  ;;  %v24219_v6 = vpop.f32.mrf.mxu0 }
 0x73d   :  { %v24221_v45 = vpop.f32.mrf.mxu1  ;;  %v24223_v39 = vpop.f32.mrf.mxu0 }
 0x741   :  { %v24225_v44 = vpop.f32.mrf.mxu1  ;;  %v24227_v9 = vpop.f32.mrf.mxu0 }
 0x742   :  { %24679 = vst [vmem:[#allocation38_spill] sm:$0xff] %v24227_v9 }
 0x743   :  { %v24229_v57 = vpop.f32.mrf.mxu1  ;;  %v24231_v48 = vpop.f32.mrf.mxu0 }
 0x744   :  { %24680 = vst [vmem:[#allocation43_spill] sm:$0xff] %v24231_v48  ;;  %v17839_v48 = vadd.f32 %v17838_v50, %v24177_v15 }
 0x745   :  { %v24233_v38 = vpop.f32.mrf.mxu1  ;;  %v24235_v29 = vpop.f32.mrf.mxu0 }
 0x746   :  { %24681 = vst [vmem:[#allocation59_spill] sm:$0xff] %v24235_v29 }
 0x747   :  { %v24237_v51 = vpop.f32.mrf.mxu1  ;;  %v24239_v14 = vpop.f32.mrf.mxu0 }
 0x748   :  { %24682 = vst [vmem:[#allocation60_spill] sm:$0xff] %v24237_v51  ;;  %24683 = vst [vmem:[#allocation21_spill] sm:$0xff] %v24239_v14 }
 0x74b   :  { %v24241_v53 = vpop.f32.mrf.mxu1  ;;  %v24243_v11 = vpop.f32.mrf.mxu0 }
 0x74c   :  { %24684 = vst [vmem:[#allocation29_spill] sm:$0xff] %v24241_v53  ;;  %24685 = vst [vmem:[#allocation61_spill] sm:$0xff] %v24243_v11 }
 0x74d   :  { %v24245_v61 = vpop.f32.mrf.mxu1  ;;  %v24247_v10 = vpop.f32.mrf.mxu0 }
 0x74e   :  { %24686 = vst [vmem:[#allocation63_spill] sm:$0xff] %v24245_v61  ;;  %24687 = vst [vmem:[#allocation17_spill] sm:$0xff] %v24247_v10  ;;  %v17918_v10 = vadd.f32 %v17917_v12, %v17830_v60  ;;  %v17920_v61 = vadd.f32 %v17919_v2, %v17832_v3 }
 0x74f   :  { %v24249_v30 = vpop.f32.mrf.mxu1  ;;  %v18859_v5 = vpop.f32.mrf.mxu0 }
 0x750   :  { %24688 = vst [vmem:[#allocation40_spill] sm:$0xff] %v24249_v30  ;;  %v18004_v14 = vadd.f32 %v18003_v37, %v17918_v10  ;;  %v18006_v9 = vadd.f32 %v18005_v22, %v17920_v61 }
 0x751   :  { %v24251_v25 = vpop.f32.mrf.mxu1  ;;  %v18861_v52 = vpop.f32.mrf.mxu0 }
 0x752   :  { %24689 = vst [vmem:[#allocation42_spill] sm:$0xff] %v24251_v25  ;;  %v18097_v12 = vadd.f32 %v24189_v58, %v18004_v14  ;;  %v18099_v2 = vadd.f32 %v24191_v33, %v18006_v9 }
 0x755   :  { %v24253_v56 = vpop.f32.mrf.mxu1  ;;  %v18870_v4 = vpop.f32.mrf.mxu0 }
 0x756   :  { %24690 = vst [vmem:[#allocation22_spill] sm:$0xff] %v24253_v56  ;;  %v17837_v56 = vadd.f32 %v17836_v8, %v24175_v55  ;;  %v17928_v55 = vadd.f32 %v24187_v41, %v17839_v48  ;;  %v18180_v8 = vadd.f32 %v24201_v21, %v18097_v12 }
 0x757   :  { %v24255_v54 = vpop.f32.mrf.mxu1  ;;  %v18872_v63 = vpop.f32.mrf.mxu0 }
 0x758   :  { %24691 = vst [vmem:[#allocation45_spill] sm:$0xff] %v24255_v54  ;;  %v17926_v31 = vadd.f32 %v24185_v13, %v17837_v56  ;;  %v18015_v61 = vadd.f32 %v24197_v0, %v17928_v55  ;;  %v18182_v13 = vadd.f32 %v24205_v59, %v18099_v2 }
 0x759   :  { %v18962_v1 = vpop.f32.mrf.mxu1  ;;  %v19050_v49 = vpop.f32.mrf.mxu0 }
 0x75a   :  { %v18963_v30 = vadd.f32 %v18962_v1, %v18859_v5  ;;  %v18013_v3 = vadd.f32 %v24193_v16, %v17926_v31  ;;  %v18731_v16 = vadd.f32 %v18180_v8, %v24154_v27  ;;  %v18732_v0 = vadd.f32 %v18182_v13, %v24157_v24 }
 0x75b   :  { %v18964_v35 = vpop.f32.mrf.mxu1  ;;  %v19052_v18 = vpop.f32.mrf.mxu0 }
 0x75c   :  { %v18965_v29 = vadd.f32 %v18964_v35, %v18861_v52  ;;  %v19051_v40 = vadd.f32 %v19050_v49, %v18963_v30  ;;  %v18104_v41 = vadd.f32 %v24195_v62, %v18013_v3  ;;  %v18379_v3 = vadd.f32 %v24229_v57, %v24215_v36 }
 0x75e   :  { %v19053_v46 = vadd.f32 %v19052_v18, %v18965_v29  ;;  %v18187_v52 = vadd.f32 %v24209_v28, %v18104_v41 }
 0x75f   :  { %v18969_v32 = vpop.f32.mrf.mxu1  ;;  %v19058_v34 = vpop.f32.mrf.mxu0 }
 0x760   :  { %v18970_v60 = vadd.f32 %v18969_v32, %v18870_v4 }
 0x761   :  { %v18971_v11 = vpop.f32.mrf.mxu1  ;;  %v19060_v25 = vpop.f32.mrf.mxu0 }
 0x762   :  { %v18972_v37 = vadd.f32 %v18971_v11, %v18872_v63  ;;  %v19059_v29 = vadd.f32 %v19058_v34, %v18970_v60  ;;  %v18372_v60 = vadd.f32 %v24221_v45, %v24207_v7 }
 0x763   :  { %v19136_v54 = vpop.f32.mrf.mxu1  ;;  %v19229_v53 = vpop.f32.mrf.mxu0 }
 0x764   :  { %v19137_v5 = vadd.f32 %v19136_v54, %v19051_v40  ;;  %v19061_v9 = vadd.f32 %v19060_v25, %v18972_v37  ;;  %v18370_v40 = vadd.f32 %v24217_v43, %v24203_v20  ;;  %v18377_v20 = vadd.f32 %v24225_v44, %v24211_v26  ;;  %v24694_v44 = vld [vmem:[#allocation43_spill] sm:$0xff] }
 0x765   :  { %v19138_v51 = vpop.f32.mrf.mxu1  ;;  %v19231_v19 = vpop.f32.mrf.mxu0  ;;  %v18460_v55 = vadd.f32 %v24223_v39, %v18372_v60 }
 0x766   :  { %v19139_v22 = vadd.f32 %v19138_v51, %v19053_v46  ;;  %v19230_v14 = vadd.f32 %v19229_v53, %v19137_v5  ;;  %v18106_v51 = vadd.f32 %v24199_v47, %v18015_v61  ;;  %v18735_v47 = vadd.f32 %v18187_v52, %v24160_v17 }
 0x768   :  { %v19232_v10 = vadd.f32 %v19231_v19, %v19139_v22  ;;  %v18189_v62 = vadd.f32 %v24213_v42, %v18106_v51 }
 0x769   :  { %v19145_v15 = vpop.f32.mrf.mxu1  ;;  %v19236_v50 = vpop.f32.mrf.mxu0 }
 0x76a   :  { %v19146_v21 = vadd.f32 %v19145_v15, %v19059_v29  ;;  %v18736_v42 = vadd.f32 %v18189_v62, %v24163_v23  ;;  %v18458_v23 = vadd.f32 %v24219_v6, %v18370_v40  ;;  %v24692_v15 = vld [vmem:[#allocation60_spill] sm:$0xff]  ;;  %v24693_v6 = vld [vmem:[#allocation38_spill] sm:$0xff] }
 0x76b   :  { %v19147_v58 = vpop.f32.mrf.mxu1  ;;  %v19238_v32 = vpop.f32.mrf.mxu0  ;;  %v18466_v22 = vadd.f32 %v24693_v6, %v18377_v20 }
 0x76c   :  { %v19148_v34 = vadd.f32 %v19147_v58, %v19061_v9  ;;  %v19237_v27 = vadd.f32 %v19236_v50, %v19146_v21  ;;  %v18544_v2 = vadd.f32 %v24233_v38, %v18458_v23  ;;  %v18546_v50 = vadd.f32 %v24692_v15, %v18460_v55  ;;  %v24698_v9 = vld [vmem:[#allocation63_spill] sm:$0xff] }
 0x76d   :  { %v19312_v48 = vpop.f32.mrf.mxu1  ;;  %v19399_v33 = vpop.f32.mrf.mxu0  ;;  %v18468_v58 = vadd.f32 %v24694_v44, %v18379_v3 }
 0x76e   :  { %v19313_v30 = vadd.f32 %v19312_v48, %v19230_v14  ;;  %v19239_v24 = vadd.f32 %v19238_v32, %v19148_v34  ;;  %v24695_v32 = vld [vmem:[#allocation59_spill] sm:$0xff]  ;;  %v24696_v14 = vld [vmem:[#allocation29_spill] sm:$0xff] }
 0x76f   :  { %v19314_v11 = vpop.f32.mrf.mxu1  ;;  %v19401_v59 = vpop.f32.mrf.mxu0  ;;  %v18637_v39 = vadd.f32 %v24695_v32, %v18544_v2  ;;  %v18553_v36 = vadd.f32 %v24696_v14, %v18466_v22  ;;  %v24697_v48 = vld [vmem:[#allocation21_spill] sm:$0xff]  ;;  %v18555_v21 = vadd.f32 %v24698_v9, %v18468_v58 }
 0x770   :  { %v19864_v53 = vadd.f32 %v19313_v30, %v18731_v16  ;;  %v19315_v56 = vadd.f32 %v19314_v11, %v19232_v10  ;;  %v24699_v10 = vld [vmem:[#allocation40_spill] sm:$0xff] }
 0x771   :  { %v18720_v30 = vadd.f32 %v24699_v10, %v18637_v39 }
 0x772   :  { %19872 = vst [vmem:[%s24335_s6] sm:$0xff] %v19864_v53  ;;  %v19865_v25 = vadd.f32 %v19315_v56, %v18732_v0  ;;  %v24701_v56 = vld [vmem:[#allocation61_spill] sm:$0xff] }
 0x773   :  { %v19319_v4 = vpop.f32.mrf.mxu1  ;;  %v19410_v54 = vpop.f32.mrf.mxu0  ;;  %v18644_v62 = vadd.f32 %v24701_v56, %v18553_v36 }
 0x774   :  { %19873 = vst [vmem:[%s24335_s6 + $0x8] sm:$0xff] %v19865_v25  ;;  %v19320_v28 = vadd.f32 %v19319_v4, %v19237_v27 }
 0x775   :  { %v19321_v63 = vpop.f32.mrf.mxu1  ;;  %v19412_v1 = vpop.f32.mrf.mxu0 }
 0x776   :  { %v19868_v49 = vadd.f32 %v19320_v28, %v18735_v47  ;;  %v19322_v35 = vadd.f32 %v19321_v63, %v19239_v24  ;;  %v24703_v24 = vld [vmem:[#allocation3_spill] sm:$0xff] }
 0x777   :  { %v19502_v18 = vpop.f32.mrf.mxu1  ;;  %v19590_v19 = vpop.f32.mrf.mxu0  ;;  %v18733_v28 = vadd.f32 %v18720_v30, %v24703_v24 }
 0x778   :  { %19876 = vst [vmem:[%s24335_s6 + $0x20] sm:$0xff] %v19868_v49  ;;  %v19869_v17 = vadd.f32 %v19322_v35, %v18736_v42  ;;  %v19503_v43 = vadd.f32 %v19502_v18, %v19399_v33  ;;  %v18639_v33 = vadd.f32 %v24697_v48, %v18546_v50 }
 0x779   :  { %v19504_v31 = vpop.f32.mrf.mxu1  ;;  %v19592_v12 = vpop.f32.mrf.mxu0 }
 0x77a   :  { %19877 = vst [vmem:[%s24335_s6 + $0x28] sm:$0xff] %v19869_v17  ;;  %v19505_v45 = vadd.f32 %v19504_v31, %v19401_v59  ;;  %v19591_v61 = vadd.f32 %v19590_v19, %v19503_v43  ;;  %v24700_v59 = vld [vmem:[#allocation42_spill] sm:$0xff]  ;;  %v24705_v19 = vld [vmem:[#allocation36_spill] sm:$0xff] }
 0x77b   :  { %v18722_v52 = vadd.f32 %v24700_v59, %v18639_v33 }
 0x77c   :  { %v19509_v46 = vpop.f32.mrf.mxu1  ;;  %v19593_v57 = vadd.f32 %v19592_v12, %v19505_v45  ;;  %v24706_v12 = vld [vmem:[#allocation45_spill] sm:$0xff] }
 0x77d   :  { %v19598_v5 = vpop.f32.mrf.mxu0  ;;  %v19510_v13 = vadd.f32 %v19509_v46, %v19410_v54  ;;  %v24702_v54 = vld [vmem:[#allocation17_spill] sm:$0xff]  ;;  %v18734_v40 = vadd.f32 %v18722_v52, %v24705_v19 }
 0x77e   :  { %v19511_v7 = vpop.f32.mrf.mxu1  ;;  %v18646_v47 = vadd.f32 %v24702_v54, %v18555_v21 }
 0x77f   :  { %v19600_v8 = vpop.f32.mrf.mxu0  ;;  %v19512_v38 = vadd.f32 %v19511_v7, %v19412_v1  ;;  %v19599_v0 = vadd.f32 %v19598_v5, %v19510_v13  ;;  %v24704_v1 = vld [vmem:[#allocation22_spill] sm:$0xff]  ;;  %v24707_v5 = vld [vmem:[#allocation13_spill] sm:$0xff] }
 0x780   :  { %v19676_v37 = vpop.f32.mrf.mxu1  ;;  %v18727_v42 = vadd.f32 %v24704_v1, %v18644_v62  ;;  %v18729_v60 = vadd.f32 %v24706_v12, %v18646_v47 }
 0x781   :  { %v19769_v26 = vpop.f32.mrf.mxu0  ;;  %v19677_v41 = vadd.f32 %v19676_v37, %v19591_v61  ;;  %v19601_v27 = vadd.f32 %v19600_v8, %v19512_v38  ;;  %v24708_v8 = vld [vmem:[#allocation16_spill] sm:$0xff] }
 0x782   :  { %v19678_v29 = vpop.f32.mrf.mxu1  ;;  %v18737_v55 = vadd.f32 %v18727_v42, %v24707_v5  ;;  %v18738_v15 = vadd.f32 %v18729_v60, %v24708_v8 }
 0x783   :  { %v19771_v16 = vpop.f32.mrf.mxu0  ;;  %v19679_v11 = vadd.f32 %v19678_v29, %v19593_v57  ;;  %v19770_v25 = vadd.f32 %v19769_v26, %v19677_v41 }
 0x784   :  { %v19685_v51 = vpop.f32.mrf.mxu1 }
 0x785   :  { %v19776_v53 = vpop.f32.mrf.mxu0  ;;  %v19686_v4 = vadd.f32 %v19685_v51, %v19599_v0  ;;  %v19772_v49 = vadd.f32 %v19771_v16, %v19679_v11 }
 0x786   :  { %v19687_v34 = vpop.f32.mrf.mxu1 }
 0x787   :  { %v19688_v35 = vadd.f32 %v19687_v34, %v19601_v27  ;;  %v19778_v17 = vpop.f32.mrf.mxu0  ;;  %v19777_v23 = vadd.f32 %v19776_v53, %v19686_v4 }
 0x788   :  { %v19852_v63 = vpop.f32.mrf.mxu1 }
 0x789   :  { %v19853_v18 = vadd.f32 %v19852_v63, %v19770_v25  ;;  %v19779_v3 = vadd.f32 %v19778_v17, %v19688_v35 }
 0x78a   :  { %v19854_v31 = vpop.f32.mrf.mxu1 }
 0x78b   :  { %v19866_v46 = vadd.f32 %v19853_v18, %v18733_v28  ;;  %v19855_v20 = vadd.f32 %v19854_v31, %v19772_v49 }
 0x78c   :  { %v19859_v43 = vpop.f32.mrf.mxu1 }
 0x78d   :  { %19874 = vst [vmem:[%s24335_s6 + $0x10] sm:$0xff] %v19866_v46  ;;  %v19867_v2 = vadd.f32 %v19855_v20, %v18734_v40  ;;  %v19860_v7 = vadd.f32 %v19859_v43, %v19777_v23 }
 0x78e   :  { %v19861_v45 = vpop.f32.mrf.mxu1 }
 0x78f   :  { %19875 = vst [vmem:[%s24335_s6 + $0x18] sm:$0xff] %v19867_v2  ;;  %v19870_v50 = vadd.f32 %v19860_v7, %v18737_v55  ;;  %v19862_v37 = vadd.f32 %v19861_v45, %v19779_v3 }
 0x791   :  { %19878 = vst [vmem:[%s24335_s6 + $0x30] sm:$0xff] %v19870_v50  ;;  %v19871_v6 = vadd.f32 %v19862_v37, %v18738_v15 }
 0x793   :  { %19879 = vst [vmem:[%s24335_s6 + $0x38] sm:$0xff] %v19871_v6 }

</bundles_post_ra>
